<compile_context>
chip_gen: v7x
topology: tpu7x:2x2x1
jax: 0.10.0
libtpu: 0.0.40
codegen_flags: <defaults>
</compile_context>

<pallas_src>
import jax
import jax.numpy as jnp
from jax.experimental import pallas as pl
from jax.experimental.pallas import tpu as pltpu


def _default_act_dtype():
    """bf16 activations on v6e/v7x (bf16 EUP); f32 elsewhere (v5e has none)."""
    try:
        dev = jax.devices()[0]
        if dev.platform == "tpu":
            kind = dev.device_kind.lower()
            if "v6" in kind or "v7" in kind:
                return jnp.bfloat16
    except Exception:
        pass
    return jnp.float32


def _default_num_cores():
    """TensorCores sharing the 'parallel' grid axis (v7x / megacore chips)."""
    try:
        dev = jax.devices()[0]
        if dev.platform == "tpu":
            kind = dev.device_kind.lower()
            if "v7" in kind or "v5p" in kind or "v4" in kind:
                return 2
    except Exception:
        pass
    return 1


def _choose_row_tile(n_rows, row_tile, num_cores):
    """Largest tile <= row_tile whose block count splits evenly over the TCs."""
    tn = min(row_tile, n_rows)
    num_blocks = pl.cdiv(n_rows, tn)
    if num_blocks > 1 and num_cores > 1 and num_blocks % num_cores != 0:
        num_blocks = pl.cdiv(num_blocks, num_cores) * num_cores
        tn = pl.cdiv(n_rows, num_blocks)
        tn = ((tn + 7) // 8) * 8          # keep the (8, 128) sublane rule
        tn = min(tn, n_rows)
    return tn


def _make_gated_attn_kernel(hidden_dim, c_is_one, act_dtype):
    def kernel(x_ref, wab_ref, bab_ref, wc_ref, bc_ref, out_ref):
        # In-kernel cast of the f32 row tile to the matmul dtype (bf16):
        # VPU work overlapped with the MXU, no separate XLA convert pass.
        x = x_ref[...].astype(wab_ref.dtype)

        # Fused gate matmul: (tn, L) @ (L, 2D) -> (tn, 2D); bf16 MXU inputs,
        # f32 accumulation. One matmul feeds both tanh and sigmoid branches.
        h = jnp.dot(x, wab_ref[...], preferred_element_type=jnp.float32)
        h = h + bab_ref[...]                          # (1, 2D) f32 bias

        # EUP activations (bf16 on v6e/v7x, f32 on v5e and older).
        a = jnp.tanh(h[:, :hidden_dim].astype(act_dtype))
        b = jax.nn.sigmoid(h[:, hidden_dim:].astype(act_dtype))
        gated = (a * b).astype(jnp.float32)           # (tn, D) f32

        if c_is_one:
            # n_classes == 1: VPU multiply + lane reduction. A (tn, D) @ (D, 1)
            # matmul would waste 255/256 MXU columns; VPU/XLU slots are idle
            # while the fused matmul owns the MXU, so this is ~free.
            A = jnp.sum(gated * wc_ref[...], axis=-1, keepdims=True) + bc_ref[...]
        else:
            # General n_classes path: bf16 MXU operands, f32 accumulation.
            A = jnp.dot(gated.astype(wc_ref.dtype), wc_ref[...],
                        preferred_element_type=jnp.float32) + bc_ref[...]

        out_ref[...] = A.astype(out_ref.dtype)

    return kernel


def prepare_attn_params(wa, ba, wb, bb, wc, bc, *, matmul_dtype=jnp.bfloat16):
    """One-time parameter fusion (do this at load time, not per forward call).

    wa, wb: (L, D)  pre-transposed nn.Linear weights (i.e. W^T)
    ba, bb: (1, D); wc: (D, C); bc: (1, C)
    """
    L, D = wa.shape
    C = wc.shape[1]
    wab = jnp.concatenate([wa, wb], axis=1).astype(matmul_dtype)      # (L, 2D)
    bab = jnp.concatenate([ba.reshape(1, D), bb.reshape(1, D)],
                          axis=1).astype(jnp.float32)                 # (1, 2D)
    if C == 1:
        wc_p = wc.reshape(1, D).astype(jnp.float32)   # broadcast row, VPU path
    else:
        wc_p = wc.astype(matmul_dtype)                # bf16 MXU operand
    bc_p = bc.reshape(1, C).astype(jnp.float32)
    return wab, bab, wc_p, bc_p


def attn_net_gated_forward(x, wab, bab, wc, bc, *, row_tile=512,
                           act_dtype=None, num_cores=None):
    """Gated attention forward pass.

    x:   (N, L) float32
    wab: (L, 2D) fused gate weight (bf16); bab: (1, 2D) fused bias (f32)
    wc:  (1, D) f32 if n_classes == 1 else (D, C) bf16; bc: (1, C) f32
    Returns (A, x) with A of shape (N, C) float32 and x passed through.
    """
    N, L = x.shape
    D = wab.shape[1] // 2
    C = bc.shape[1]
    c_is_one = (C == 1)

    if act_dtype is None:
        act_dtype = _default_act_dtype()
    if num_cores is None:
        num_cores = _default_num_cores()

    tn = _choose_row_tile(N, row_tile, num_cores)
    grid = (pl.cdiv(N, tn),)

    wc_block = (1, D) if c_is_one else (D, C)

    # Raise the scoped-VMEM limit only when the double-buffered f32 x tile is
    # large enough to brush v5e's 16 MiB default (not at row_tile=512).
    vmem_limit = None
    if 2 * tn * L * x.dtype.itemsize > 12 * 1024 * 1024:
        vmem_limit = 64 * 1024 * 1024

    kernel = _make_gated_attn_kernel(D, c_is_one, act_dtype)

    # Weight/bias BlockSpecs use constant index_maps -> DMA'd once, resident.
    # (pipeline_mode=pl.Buffered(1) would shave their second buffer; skipped
    # here as a tiny, version-sensitive win.)
    A = pl.pallas_call(
        kernel,
        out_shape=jax.ShapeDtypeStruct((N, C), jnp.float32),
        grid_spec=pltpu.PrefetchScalarGridSpec(
            num_scalar_prefetch=0,
            grid=grid,
            in_specs=[
                pl.BlockSpec((tn, L), lambda i: (i, 0)),      # x row tile (pipelined)
                pl.BlockSpec((L, 2 * D), lambda i: (0, 0)),   # fused Wa|Wb (resident)
                pl.BlockSpec((1, 2 * D), lambda i: (0, 0)),   # fused ba|bb
                pl.BlockSpec(wc_block, lambda i: (0, 0)),     # Wc
                pl.BlockSpec((1, C), lambda i: (0, 0)),       # bc
            ],
            out_specs=pl.BlockSpec((tn, C), lambda i: (i, 0)),
        ),
        compiler_params=pltpu.CompilerParams(
            dimension_semantics=("parallel",),
            vmem_limit_bytes=vmem_limit),
    )(x, wab, bab, wc, bc)

    return A, x


def _reference(x, wa, ba, wb, bb, wc, bc, matmul_dtype, act_dtype):
    """Pure-JAX reference mirroring the kernel's numerics (bf16 MXU inputs,
    f32 accumulation, act_dtype activations, f32 projection)."""
    xd = x.astype(matmul_dtype)
    ha = jnp.dot(xd, wa.astype(matmul_dtype),
                 preferred_element_type=jnp.float32) + ba
    hb = jnp.dot(xd, wb.astype(matmul_dtype),
                 preferred_element_type=jnp.float32) + bb
    a = jnp.tanh(ha.astype(act_dtype))
    b = jax.nn.sigmoid(hb.astype(act_dtype))
    gated = (a * b).astype(jnp.float32)
    return jnp.dot(gated, wc, precision=jax.lax.Precision.HIGHEST) + bc


if __name__ == "__main__":
    # Module defaults: L=1024, D=256, n_classes=1.  N deliberately NOT a
    # multiple of the row tile so the masked tail block is exercised.
    N, L, D, C = 600, 1024, 256, 1

    key = jax.random.PRNGKey(0)
    kx, kwa, kba, kwb, kbb, kwc, kbc = jax.random.split(key, 7)

    x  = jax.random.normal(kx,  (N, L), dtype=jnp.float32)
    # "Linear" params stored as (in, out) = W^T of the PyTorch layout.
    wa = jax.random.normal(kwa, (L, D), dtype=jnp.float32) * 0.02
    ba = jax.random.normal(kba, (1, D), dtype=jnp.float32) * 0.02
    wb = jax.random.normal(kwb, (L, D), dtype=jnp.float32) * 0.02
    bb = jax.random.normal(kbb, (1, D), dtype=jnp.float32) * 0.02
    wc = jax.random.normal(kwc, (D, C), dtype=jnp.float32) * 0.02
    bc = jax.random.normal(kbc, (1, C), dtype=jnp.float32) * 0.02

    # Parameter fusion done once, outside the per-call path.
    wab, bab, wc_p, bc_p = prepare_attn_params(wa, ba, wb, bb, wc, bc)

    fwd = jax.jit(attn_net_gated_forward)
    A, x_out = fwd(x, wab, bab, wc_p, bc_p)
    jax.block_until_ready(A)
    jax.block_until_ready(x_out)

    act_dtype = _default_act_dtype()
    A_ref = _reference(x, wa, ba, wb, bb, wc, bc, jnp.bfloat16, act_dtype)

    assert A.shape == (N, C)
    assert x_out.shape == (N, L)
    max_err = float(jnp.max(jnp.abs(A - A_ref)))
    assert jnp.allclose(A, A_ref, atol=5e-3, rtol=5e-3), max_err
    assert jnp.array_equal(x_out, x)

    print("KERNEL_OK")
</pallas_src>

<mosaic_0001>
module attributes {stable_mosaic.version = 11 : i64} {
  func.func @kernel(%arg0: i32, %arg1: memref<512x1024xf32, #tpu.memory_space<vmem>>, %arg2: memref<1024x512xbf16, #tpu.memory_space<vmem>>, %arg3: memref<1x512xf32, #tpu.memory_space<vmem>>, %arg4: memref<1x256xf32, #tpu.memory_space<vmem>>, %arg5: memref<1x1xf32, #tpu.memory_space<vmem>>, %arg6: memref<512x1xf32, #tpu.memory_space<vmem>>) attributes {dimension_semantics = [#tpu.dimension_semantics<parallel>], iteration_bounds = array<i64: 2>, scalar_prefetch = 0 : i64, scratch_operands = 0 : i64, tpu.core_type = #tpu.core_type<tc>, window_params = [{transform_indices = @transform_0, window_bounds = array<i64: 512, 1024>}, {pipeline_mode = #tpu.pipeline_mode<synchronous>, transform_indices = @transform_1, window_bounds = array<i64: 1024, 512>}, {pipeline_mode = #tpu.pipeline_mode<synchronous>, transform_indices = @transform_2, window_bounds = array<i64: 1, 512>}, {pipeline_mode = #tpu.pipeline_mode<synchronous>, transform_indices = @transform_3, window_bounds = array<i64: 1, 256>}, {pipeline_mode = #tpu.pipeline_mode<synchronous>, transform_indices = @transform_4, window_bounds = array<i64: 1, 1>}, {transform_indices = @transform_5, window_bounds = array<i64: 512, 1>}]} {
    %c0 = arith.constant 0 : index
    %c0_0 = arith.constant 0 : index
    %0 = vector.load %arg1[%c0, %c0_0] : memref<512x1024xf32, #tpu.memory_space<vmem>>, vector<512x1024xf32>
    %1 = arith.truncf %0 : vector<512x1024xf32> to vector<512x1024xbf16>
    %c0_1 = arith.constant 0 : index
    %c0_2 = arith.constant 0 : index
    %2 = vector.load %arg2[%c0_1, %c0_2] : memref<1024x512xbf16, #tpu.memory_space<vmem>>, vector<1024x512xbf16>
    %cst = arith.constant dense<0.000000e+00> : vector<512x512xf32>
    %3 = tpu.matmul %1, %2, %cst {dimension_numbers = #tpu.dot_dimension_numbers<[1], [0], [0], [1], [0, 0, 1, 1], [], []>} : vector<512x1024xbf16>, vector<1024x512xbf16>, vector<512x512xf32> -> vector<512x512xf32>
    %c0_3 = arith.constant 0 : index
    %c0_4 = arith.constant 0 : index
    %4 = vector.load %arg3[%c0_3, %c0_4] : memref<1x512xf32, #tpu.memory_space<vmem>>, vector<1x512xf32>
    %5 = vector.broadcast %4 : vector<1x512xf32> to vector<512x512xf32>
    %6 = arith.addf %3, %5 : vector<512x512xf32>
    %7 = vector.extract_strided_slice %6 {offsets = [0, 0], sizes = [512, 256], strides = [1, 1]} : vector<512x512xf32> to vector<512x256xf32>
    %8 = math.tanh %7 : vector<512x256xf32>
    %9 = vector.extract_strided_slice %6 {offsets = [0, 256], sizes = [512, 256], strides = [1, 1]} : vector<512x512xf32> to vector<512x256xf32>
    %10 = arith.negf %9 : vector<512x256xf32>
    %11 = math.exp %10 : vector<512x256xf32>
    %cst_5 = arith.constant 1.000000e+00 : f32
    %12 = vector.broadcast %cst_5 : f32 to vector<512x256xf32>
    %13 = arith.addf %12, %11 : vector<512x256xf32>
    %14 = arith.divf %12, %13 : vector<512x256xf32>
    %15 = arith.mulf %8, %14 : vector<512x256xf32>
    %c0_6 = arith.constant 0 : index
    %c0_7 = arith.constant 0 : index
    %16 = vector.load %arg4[%c0_6, %c0_7] : memref<1x256xf32, #tpu.memory_space<vmem>>, vector<1x256xf32>
    %17 = vector.broadcast %16 : vector<1x256xf32> to vector<512x256xf32>
    %18 = arith.mulf %15, %17 : vector<512x256xf32>
    %cst_8 = arith.constant dense<0.000000e+00> : vector<512xf32>
    %19 = vector.multi_reduction <add>, %18, %cst_8 [1] : vector<512x256xf32> to vector<512xf32>
    %20 = vector.shape_cast %19 : vector<512xf32> to vector<512x1xf32>
    %c0_9 = arith.constant 0 : index
    %c0_10 = arith.constant 0 : index
    %21 = vector.load %arg5[%c0_9, %c0_10] : memref<1x1xf32, #tpu.memory_space<vmem>>, vector<1x1xf32>
    %22 = vector.broadcast %21 : vector<1x1xf32> to vector<512x1xf32>
    %23 = arith.addf %20, %22 : vector<512x1xf32>
    %c0_11 = arith.constant 0 : index
    %c0_12 = arith.constant 0 : index
    %24 = vector.load %arg6[%c0_11, %c0_12] : memref<512x1xf32, #tpu.memory_space<vmem>>, vector<512x1xf32>
    tpu.vector_store %arg6[%c0_11, %c0_12], %23 {strides = array<i32>} : memref<512x1xf32, #tpu.memory_space<vmem>>, vector<512x1xf32>,
    return
  }
  func.func @transform_0(%arg0: i32) -> (i32, i32) {
    %c0_i32 = arith.constant 0 : i32
    %c0_i32_0 = arith.constant 0 : i32
    return %arg0, %c0_i32 : i32, i32
  }
  func.func @transform_1(%arg0: i32) -> (i32, i32) {
    %c0_i32 = arith.constant 0 : i32
    %c0_i32_0 = arith.constant 0 : i32
    %c0_i32_1 = arith.constant 0 : i32
    return %c0_i32, %c0_i32_0 : i32, i32
  }
  func.func @transform_2(%arg0: i32) -> (i32, i32) {
    %c0_i32 = arith.constant 0 : i32
    %c0_i32_0 = arith.constant 0 : i32
    %c0_i32_1 = arith.constant 0 : i32
    return %c0_i32, %c0_i32_0 : i32, i32
  }
  func.func @transform_3(%arg0: i32) -> (i32, i32) {
    %c0_i32 = arith.constant 0 : i32
    %c0_i32_0 = arith.constant 0 : i32
    %c0_i32_1 = arith.constant 0 : i32
    return %c0_i32, %c0_i32_0 : i32, i32
  }
  func.func @transform_4(%arg0: i32) -> (i32, i32) {
    %c0_i32 = arith.constant 0 : i32
    %c0_i32_0 = arith.constant 0 : i32
    %c0_i32_1 = arith.constant 0 : i32
    return %c0_i32, %c0_i32_0 : i32, i32
  }
  func.func @transform_5(%arg0: i32) -> (i32, i32) {
    %c0_i32 = arith.constant 0 : i32
    %c0_i32_0 = arith.constant 0 : i32
    return %arg0, %c0_i32 : i32, i32
  }
}

</mosaic_0001>

<bundles_post_ra>
// kernel: attn_net_gated_forward.1
= control target key start
LH: loop header
LB: loop body
LE: loop exit
PB: predicated region body
PF: predicated region fallthrough
CT: control target
= control target key end

     0   :  { %s12692_s0 = inlined_call_operand.hbm [shape: f32[600,1024], index: 0, kind: input, shape index: {}]   ;;  %s12693_s1 = inlined_call_operand.hbm [shape: bf16[1024,512], index: 1, kind: input, shape index: {}]   ;;  %s12694_s2 = inlined_call_operand.hbm [shape: f32[1,512], index: 2, kind: input, shape index: {}]   ;;  %s12695_s3 = inlined_call_operand.hbm [shape: f32[1,256], index: 3, kind: input, shape index: {}]   ;;  %s12696_s4 = inlined_call_operand.<no memory space> [shape: f32[1,1], index: 4, kind: input, shape index: {}]   ;;  %s12697_s5 = inlined_call_operand.vmem [shape: f32[600,1], index: 5, kind: output, shape index: {}]  }
   0x1   :  { %v10_v0 = vstv %s12696_s4 }
   0x2   :  { %11 = vst [vmem:[#allocation2] sm:$0x1] %v10_v0 }
   0x3   :  { %12 = vsyncpa [#allocation4], 0 }
   0x4   :  { %14 = vsyncpa [#allocation4 + $0x1], 0 }
   0x5   :  { %15 = vsyncpa [#allocation6], 0 }
   0x6   :  { %16 = vsyncpa [#allocation9], 0  ;;  %s10449_s20 = smov 0   ;;  %s10451_s21 = smov 0  }
   0x7   :  { %s10453_s22 = smov 0   ;;  %s10455_s23 = smov 0  }
   0x8 LB: > { %s10468_s4 = sadd.s32 4294967295, %s10374_s23   ;;  %s10471_s24 = sadd.s32 1, %s10374_s23   ;;  %s10374_s23 = sphi %s10455_s23, %s12863_s23   ;;  %s10370_s22 = sphi %s10453_s22, %s12862_s22   ;;  %s10366_s21 = sphi %s10451_s21, %s12861_s21   ;;  %s10362_s20 = sphi %s10449_s20, %s12860_s20  }
   0x9   : > { %s26_s25 = ssub.s32 %s10374_s23, %s10471_s24  ;;  %s29_s26 = sadd.s32 1, %s10370_s22 }
   0xa   : > { %p27_p0 = scmp.eq.s32.totalorder %s26_s25, 0  ;;  %p36_p1 = scmp.ne.s32.totalorder %s10370_s22, %s10366_s21 }
   0xb   : > { %p37_p2 = scmp.eq.s32.totalorder %s10374_s23, 0  ;;  %p42_p3 = scmp.ne.s32.totalorder %s10366_s21, %s10362_s20 }
   0xc   : > { %s10481_s27 = scalar_select %p27_p0, %s10370_s22, %s29_s26  }
   0xd   : > { %p10483_p4 = por %p37_p2, %p36_p1  ;;  %p12698_p5 = scmp.eq.s32.totalorder %s10468_s4, 0 }
   0xe   : > { %p150_p6 = scmp.eq.s32.totalorder %s10468_s4, 1  ;;  %p7450_p7 = scmp.ge.s32.totalorder %s10374_s23, 1 }
   0xf   : > { %s12701_s28 = scalar_select %p10483_p4, 1, 0 }
  0x10   : > { %p10492_p8 = por %p12698_p5, %p42_p3  ;;  %p163_p9 = scmp.lt.s32.totalorder %s10374_s23, 3 }
  0x11   : > { %p10497_p10 = por %p150_p6, %p36_p1  ;;  %s10408_s7 = smov [#allocation5]  }
  0x12   : > { %s12702_s29 = scalar_select %p10492_p8, 1, 0 }
  0x13   : > { %s12703_s30 = scalar_select %p10497_p10, 1, 0 }
  0x14   : > { %p10501_p11 = pnand %p7450_p7, %p163_p9  ;;  %s175_s8 = sshll.u32 %s10408_s7, 4  ;;  %s10507_s8 = int_to_ptr.vmem [resolvable:$true] %s175_s8 }
  0x15   : > { %s10409_s10 = smov [#allocation7]   ;;  %s10410_s12 = smov [#allocation8]  }
  0x16   : > { %s12704_s6 = scalar_select %p10501_p11, 1, 0 }
  0x17   : > { %p8915_p12 = pneg %p10501_p11  ;;  %s189_s11 = sshll.u32 %s10409_s10, 4  ;;  %s10515_s11 = int_to_ptr.vmem [resolvable:$true] %s189_s11 }
  0x18   : > { %s10517_s13 = sshll.u32 %s10410_s12, 4  ;;  %s10188_s16 = scalar_lea.hbm %s12693_s1, 32768  ;;  %s201_s13 = int_to_ptr.vmem [resolvable:$true] %s10517_s13 }
  0x19   : > { %p10511_p13 = pnand %p8915_p12, %p12698_p5  ;;  %p10189_p0 = scmp.ne.s32.totalorder %s12693_s1, %s10188_s16 }
  0x1a   : > { %p10195_p6 = scmp.lt.u32.totalorder %s10188_s16, %s12693_s1 }
  0x1b   : > { %p10527_p1 = pneg %p10511_p13 }
  0x1d   : > { %p10191_p2 = pnand %p10527_p1, %p10189_p0 }
  0x1f   : > { %p10192_p3 = pneg %p10191_p2 }
  0x21   : > { %p10197_p7 = pnand %p10195_p6, %p10192_p3 }
  0x23   : > { %10200 = shalt.err (!%p10197_p7)
}
  0x24   : > { %s10201_s26 = scalar_lea.vmem %s10507_s8, 32768  ;;  %p10209_p10 = scmp.lt.s32.totalorder %s10507_s8, %s10507_s8 }
  0x25   : > { %p10202_p9 = scmp.ne.s32.totalorder %s10507_s8, %s10201_s26  ;;  %p10210_p8 = scmp.lt.s32.totalorder %s10201_s26, %s10201_s26 }
  0x27   : > { %p10204_p12 = pnand %p10202_p9, %p10527_p1  ;;  %p10211_p0 = por %p10210_p8, %p10209_p10 }
  0x29   : > { %p10205_p5 = pneg %p10204_p12 }
  0x2b   : > { %p10212_p2 = pnand %p10211_p0, %p10205_p5 }
  0x2d   : > { %10215 = shalt.err (!%p10212_p2)
}
  0x2e   : > { %s10411_s7 = smov 256   ;;  %s10412_s10 = smov 16  }
  0x2f   : > { %8918 = dma.hbm_to_vmem [thread:$0]  (!%p10511_p13), %s12693_s1, 32768, %s10507_s8, [#allocation6], %s10411_s7, %s10411_s7, %s10412_s10  }
  0x30   : > { %s10216_s17 = scalar_lea.hbm %s12694_s2, 64 }
  0x31   : > { %p10217_p8 = scmp.ne.s32.totalorder %s12694_s2, %s10216_s17  ;;  %p10223_p3 = scmp.lt.u32.totalorder %s10216_s17, %s12694_s2 }
  0x33   : > { %p10219_p5 = pnand %p10217_p8, %p10527_p1 }
  0x35   : > { %p10220_p10 = pneg %p10219_p5 }
  0x37   : > { %p10225_p6 = pnand %p10223_p3, %p10220_p10 }
  0x39   : > { %10228 = shalt.err (!%p10225_p6)
}
  0x3a   : > { %s10229_s8 = scalar_lea.vmem %s10515_s11, 64  ;;  %p10237_p0 = scmp.lt.s32.totalorder %s10515_s11, %s10515_s11 }
  0x3b   : > { %p10230_p7 = scmp.ne.s32.totalorder %s10515_s11, %s10229_s8  ;;  %p10238_p2 = scmp.lt.s32.totalorder %s10229_s8, %s10229_s8 }
  0x3d   : > { %p10232_p9 = pnand %p10230_p7, %p10527_p1  ;;  %p10239_p8 = por %p10238_p2, %p10237_p0 }
  0x3f   : > { %p10233_p12 = pneg %p10232_p9 }
  0x41   : > { %p10240_p5 = pnand %p10239_p8, %p10233_p12 }
  0x43   : > { %10243 = shalt.err (!%p10240_p5)
}
  0x44   : > { %8921 = dma.hbm_to_vmem [thread:$0]  (!%p10511_p13), %s12694_s2, 64, %s10515_s11, [#allocation6]  }
  0x45   : > { %s10244_s15 = scalar_lea.hbm %s12695_s3, 32 }
  0x46   : > { %p10245_p10 = scmp.ne.s32.totalorder %s12695_s3, %s10244_s15  ;;  %p10251_p7 = scmp.lt.u32.totalorder %s10244_s15, %s12695_s3 }
  0x48   : > { %p10247_p3 = pnand %p10245_p10, %p10527_p1 }
  0x4a   : > { %p10248_p6 = pneg %p10247_p3 }
  0x4c   : > { %p10253_p9 = pnand %p10251_p7, %p10248_p6 }
  0x4e   : > { %10256 = shalt.err (!%p10253_p9)
}
  0x4f   : > { %s10257_s25 = scalar_lea.vmem %s201_s13, 32  ;;  %p10265_p8 = scmp.lt.s32.totalorder %s201_s13, %s201_s13 }
  0x50   : > { %p10258_p12 = scmp.ne.s32.totalorder %s201_s13, %s10257_s25  ;;  %p10266_p5 = scmp.lt.s32.totalorder %s10257_s25, %s10257_s25 }
  0x52   : > { %p10260_p0 = pnand %p10258_p12, %p10527_p1  ;;  %p10267_p11 = por %p10266_p5, %p10265_p8 }
  0x54   : > { %p10261_p2 = pneg %p10260_p0 }
  0x56   : > { %p10268_p4 = pnand %p10267_p11, %p10261_p2 }
  0x58   : > { %10271 = shalt.err (!%p10268_p4)
}
  0x59   : > { %8924 = dma.hbm_to_vmem [thread:$0]  (!%p10511_p13), %s12695_s3, 32, %s201_s13, [#allocation9]  }
  0x5a   : > { %p7454_p10 = scmp.ge.s32.totalorder %s10374_s23, 2 }
  0x5b   : > { %p12707_p3 = scmp.ne.s32.totalorder (!%p7454_p10), %s12701_s28, 0 }
  0x5c   : > { %210 = sbr.rel (%p7454_p10) target bundleno = 134 (0x86), region = 32 }
  0x63   : > { %213 = sbr.rel (!%p12707_p3) target bundleno = 134 (0x86), region = 36  ;;  %s214_s19 = sand.u32 (%p12707_p3), 1, %s10370_s22  }
  0x64   : > { %s7456_s8 = sshll.u32 (%p12707_p3), %s10374_s23, 6  ;;  %s7455_s7 = sshll.u32 (%p12707_p3), %s214_s19, 12 }
  0x65   : > { %s220_s10 = ssub.s32 (%p12707_p3), 75, %s7456_s8  ;;  %s10598_s14 = scalar_lea.sflag (%p12707_p3), [#allocation4], %s214_s19 }
  0x66   : > { %p221_p11 = scmp.lt.s32.totalorder (%p12707_p3), %s220_s10, 64  ;;  %s218_s13 = scalar_lea.vmem (%p12707_p3), [#allocation3], %s7455_s7 }
  0x6a   : > { %s12865_s10 = smov (!%p221_p11, %s220_s10), 64 }
  0x6b   : > { %s10595_s12 = sshll.u32 %s12865_s10, 10 }
  0x6c   : > { %s226_s9 = ssub.s32 65536, %s10595_s12 }
  0x6d   : > { %227 = vsyncadd %s10598_s14, %s226_s9  ;;  %p7459_p4 = scmp.ne.s32.totalorder %s10595_s12, 0  ;;  %s7874_s28 = sshll.u32 %s10374_s23, 16 }
  0x6e   : > { %s10606_s17 = scalar_lea.hbm %s12692_s0, %s7874_s28  ;;  %s233_s18 = sshll.u32 %s218_s13, 4  ;;  %s10608_s18 = int_to_ptr.vmem [resolvable:$true] %s233_s18 }
  0x6f   : > { %s10272_s20 = scalar_lea.hbm %s10606_s17, %s10595_s12  ;;  %s10276_s23 = scalar_lea.hbm %s12692_s0, 76800 }
  0x70   : > { %p10273_p13 = scmp.ne.s32.totalorder %s10606_s17, %s10272_s20  ;;  %p10277_p7 = scmp.lt.u32.totalorder %s10606_s17, %s12692_s0 }
  0x71   : > { %p10278_p9 = scmp.lt.u32.totalorder %s10276_s23, %s10272_s20  ;;  %p10280_p0 = scmp.lt.u32.totalorder %s10272_s20, %s10606_s17 }
  0x72   : > { %p10274_p1 = pnand %p10273_p13, %p7459_p4 }
  0x73   : > { %p10279_p12 = por %p10278_p9, %p10277_p7 }
  0x74   : > { %p10275_p6 = pneg %p10274_p1 }
  0x75   : > { %p10281_p2 = por %p10280_p0, %p10279_p12 }
  0x77   : > { %p10282_p8 = pnand %p10281_p2, %p10275_p6 }
  0x79   : > { %10285 = shalt.err (!%p10282_p8)
}
  0x7a   : > { %s10286_s8 = scalar_lea.vmem %s10608_s18, %s10595_s12  ;;  %s10413_s7 = smov [#allocation3]  }
  0x7b   : > { %p10287_p5 = scmp.ne.s32.totalorder %s10608_s18, %s10286_s8  ;;  %s10290_s10 = sshll.u32 %s10413_s7, 4  ;;  %s10291_s10 = int_to_ptr.vmem [resolvable:$false] %s10290_s10 }
  0x7c   : > { %s10292_s9 = scalar_lea.vmem %s10291_s10, 131072  ;;  %p10293_p11 = scmp.lt.s32.totalorder %s10608_s18, %s10291_s10 }
  0x7d   : > { %p10288_p10 = pnand %p10287_p5, %p7459_p4  ;;  %p10294_p13 = scmp.lt.s32.totalorder %s10292_s9, %s10286_s8 }
  0x7f   : > { %p10289_p3 = pneg %p10288_p10  ;;  %p10295_p1 = por %p10294_p13, %p10293_p11 }
  0x81   : > { %p10296_p7 = pnand %p10295_p1, %p10289_p3 }
  0x83   : > { %10299 = shalt.err (!%p10296_p7)
}
  0x84   : > { %s10414_s13 = smov 1024   ;;  %s10415_s28 = smov 64  }
  0x85   : > { %239 = dma.hbm_to_vmem [thread:$0]  (%p7459_p4), %s10606_s17, %s10595_s12, %s10608_s18, %s10598_s14, %s10414_s13, %s10414_s13, %s10415_s28  }
  0x86 PF: > { %p12708_p6 = scmp.ne.s32.totalorder %s12704_s6, 0 }
  0x88   : > { %245 = sbr.rel (%p12708_p6) target bundleno = 1835 (0x72b), region = 40 }
  0x8f   : > { %s10638_s15 = sand.u32 1, %s10366_s21   ;;  %p12709_p9 = scmp.ne.s32.totalorder %s12702_s29, 0 }
  0x90   : > { %s7465_s16 = sshll.u32 %s10638_s15, 12  ;;  %s248_s20 = scalar_lea.sflag [#allocation4], %s10638_s15 }
  0x91   : > { %s10642_s25 = scalar_lea.vmem [#allocation3], %s7465_s16 }
  0x92   : > { %10349 = dma.done.wait (%p12709_p9), %s248_s20, 65536  }
  0x93   : > { %10351 = vsyncadd (%p12709_p9), %s248_s20, 4294901760  ;;  %p12710_p4 = scmp.eq.s32.totalorder %s10468_s4, 0 }
  0x95   : > { %10353 = dma.done.wait (%p12710_p4), [#allocation6], 32832   ;;  %p12711_p12 = pmov %p12710_p4 }
  0x96   : > { %p12712_p0 = pmov %p12710_p4 }
  0x97   : > { %10355 = vsyncadd (%p12711_p12), [#allocation6], 4294934464 }
  0x98   : > { %10357 = dma.done.wait (%p12712_p0), [#allocation9], 32   ;;  %p12713_p2 = pmov %p12712_p0 }
  0x99   : > { %v9034_v1 = vld [vmem:[#allocation5 + $0x4] ss:$16 sps:$4 sm:$0xff]   ;;  %v9036_v2 = vld [vmem:[#allocation5 + $0xc] ss:$16 sps:$4 sm:$0xff]   ;;  %v9038_v3 = vld [vmem:[#allocation5] ss:$16 sps:$4 sm:$0xff]  }
  0x9a   : > { %10359 = vsyncadd (%p12713_p2), [#allocation9], 4294967264  ;;  %2626 = vmatprep.subr.bf16.mxu0 %v9034_v1  ;;  %v9039_v4 = vld [vmem:[#allocation5 + $0x8] ss:$16 sps:$4 sm:$0xff]   ;;  %4038 = vmatprep.subr.bf16.mxu1 %v9036_v2  ;;  %v9040_v5 = vld [vmem:[#allocation5 + $0x24] ss:$16 sps:$4 sm:$0xff]  }
  0x9b   : > { %2627 = vmatpush1.bf16.msra.mxu0 %v9038_v3  ;;  %4039 = vmatpush1.bf16.msra.mxu1 %v9039_v4  ;;  %v9042_v6 = vld [vmem:[#allocation5 + $0x2c] ss:$16 sps:$4 sm:$0xff]   ;;  %v9044_v7 = vld [vmem:[#allocation5 + $0x20] ss:$16 sps:$4 sm:$0xff]   ;;  %v9045_v8 = vld [vmem:[#allocation5 + $0x28] ss:$16 sps:$4 sm:$0xff]  }
  0x9c   : > { %2628 = vmatprep.subr.bf16.mxu0 %v9040_v5  ;;  %4040 = vmatprep.subr.bf16.mxu1 %v9042_v6  ;;  %v9046_v9 = vld [vmem:[#allocation5 + $0x44] ss:$16 sps:$4 sm:$0xff]   ;;  %v9048_v10 = vld [vmem:[#allocation5 + $0x4c] ss:$16 sps:$4 sm:$0xff]   ;;  %v9050_v11 = vld [vmem:[#allocation5 + $0x40] ss:$16 sps:$4 sm:$0xff]  }
  0x9d   : > { %v9051_v12 = vld [vmem:[#allocation5 + $0x48] ss:$16 sps:$4 sm:$0xff]   ;;  %v9052_v13 = vld [vmem:[#allocation5 + $0x64] ss:$16 sps:$4 sm:$0xff]   ;;  %v9054_v14 = vld [vmem:[#allocation5 + $0x6c] ss:$16 sps:$4 sm:$0xff]  }
  0x9e   : > { %v9056_v15 = vld [vmem:[#allocation5 + $0x60] ss:$16 sps:$4 sm:$0xff]   ;;  %v9057_v16 = vld [vmem:[#allocation5 + $0x68] ss:$16 sps:$4 sm:$0xff]   ;;  %v9058_v17 = vld [vmem:[#allocation5 + $0x84] ss:$16 sps:$4 sm:$0xff]  }
  0x9f   : > { %2629 = vmatpush1.bf16.msra.mxu0 %v9044_v7  ;;  %4041 = vmatpush1.bf16.msra.mxu1 %v9045_v8  ;;  %v9060_v18 = vld [vmem:[#allocation5 + $0x8c] ss:$16 sps:$4 sm:$0xff]   ;;  %v9062_v19 = vld [vmem:[#allocation5 + $0x80] ss:$16 sps:$4 sm:$0xff]   ;;  %v9063_v20 = vld [vmem:[#allocation5 + $0x88] ss:$16 sps:$4 sm:$0xff]  }
  0xa0   : > { %2630 = vmatprep.subr.bf16.mxu0 %v9046_v9  ;;  %4042 = vmatprep.subr.bf16.mxu1 %v9048_v10  ;;  %v9064_v21 = vld [vmem:[#allocation5 + $0xa4] ss:$16 sps:$4 sm:$0xff]   ;;  %v9066_v22 = vld [vmem:[#allocation5 + $0xac] ss:$16 sps:$4 sm:$0xff]   ;;  %v9068_v23 = vld [vmem:[#allocation5 + $0xa0] ss:$16 sps:$4 sm:$0xff]  }
  0xa1   : > { %v9069_v24 = vld [vmem:[#allocation5 + $0xa8] ss:$16 sps:$4 sm:$0xff]   ;;  %v9070_v25 = vld [vmem:[#allocation5 + $0xc4] ss:$16 sps:$4 sm:$0xff]   ;;  %v9072_v26 = vld [vmem:[#allocation5 + $0xcc] ss:$16 sps:$4 sm:$0xff]  }
  0xa2   : > { %v9074_v27 = vld [vmem:[#allocation5 + $0xc0] ss:$16 sps:$4 sm:$0xff]   ;;  %v9075_v28 = vld [vmem:[#allocation5 + $0xc8] ss:$16 sps:$4 sm:$0xff]   ;;  %v9076_v29 = vld [vmem:[#allocation5 + $0xe4] ss:$16 sps:$4 sm:$0xff]  }
  0xa3   : > { %2631 = vmatpush1.bf16.msra.mxu0 %v9050_v11  ;;  %4043 = vmatpush1.bf16.msra.mxu1 %v9051_v12  ;;  %v9078_v30 = vld [vmem:[#allocation5 + $0xec] ss:$16 sps:$4 sm:$0xff]   ;;  %v9080_v31 = vld [vmem:[#allocation5 + $0xe0] ss:$16 sps:$4 sm:$0xff]   ;;  %v9081_v32 = vld [vmem:[#allocation5 + $0xe8] ss:$16 sps:$4 sm:$0xff]  }
  0xa4   : > { %2632 = vmatprep.subr.bf16.mxu0 %v9052_v13  ;;  %4044 = vmatprep.subr.bf16.mxu1 %v9054_v14  ;;  %v9082_v33 = vld [vmem:[#allocation5 + $0x104] ss:$16 sps:$4 sm:$0xff]   ;;  %v9084_v34 = vld [vmem:[#allocation5 + $0x10c] ss:$16 sps:$4 sm:$0xff]   ;;  %v9086_v35 = vld [vmem:[#allocation5 + $0x100] ss:$16 sps:$4 sm:$0xff]  }
  0xa5   : > { %v9087_v36 = vld [vmem:[#allocation5 + $0x108] ss:$16 sps:$4 sm:$0xff]   ;;  %v9088_v37 = vld [vmem:[#allocation5 + $0x124] ss:$16 sps:$4 sm:$0xff]   ;;  %v9090_v38 = vld [vmem:[#allocation5 + $0x12c] ss:$16 sps:$4 sm:$0xff]  }
  0xa6   : > { %v9092_v39 = vld [vmem:[#allocation5 + $0x120] ss:$16 sps:$4 sm:$0xff]   ;;  %v9093_v40 = vld [vmem:[#allocation5 + $0x128] ss:$16 sps:$4 sm:$0xff]   ;;  %v9094_v41 = vld [vmem:[#allocation5 + $0x144] ss:$16 sps:$4 sm:$0xff]  }
  0xa7   : > { %2633 = vmatpush1.bf16.msra.mxu0 %v9056_v15  ;;  %4045 = vmatpush1.bf16.msra.mxu1 %v9057_v16  ;;  %v9096_v42 = vld [vmem:[#allocation5 + $0x14c] ss:$16 sps:$4 sm:$0xff]   ;;  %v9098_v43 = vld [vmem:[#allocation5 + $0x140] ss:$16 sps:$4 sm:$0xff]   ;;  %v9099_v44 = vld [vmem:[#allocation5 + $0x148] ss:$16 sps:$4 sm:$0xff]  }
  0xa8   : > { %2634 = vmatprep.subr.bf16.mxu0 %v9058_v17  ;;  %4046 = vmatprep.subr.bf16.mxu1 %v9060_v18  ;;  %v9100_v45 = vld [vmem:[#allocation5 + $0x164] ss:$16 sps:$4 sm:$0xff]   ;;  %v9102_v46 = vld [vmem:[#allocation5 + $0x16c] ss:$16 sps:$4 sm:$0xff]   ;;  %v9104_v48 = vld [vmem:[#allocation5 + $0x160] ss:$16 sps:$4 sm:$0xff]  }
  0xa9   : > { %v301_v47 = vld [vmem:[%s10642_s25 + $0x8] sm:$0xff]  ;;  %v9106_v52 = vld [vmem:[#allocation5 + $0x184] ss:$16 sps:$4 sm:$0xff]   ;;  %v9110_v54 = vld [vmem:[#allocation5 + $0x180] ss:$16 sps:$4 sm:$0xff]   ;;  %s7469_s29 = sshll.u32 %s10638_s15, 9 }
  0xaa   : > { %v309_v49 = vld [vmem:[%s10642_s25 + $0x48] sm:$0xff]  ;;  %v9112_v56 = vld [vmem:[#allocation5 + $0x1a4] ss:$16 sps:$4 sm:$0xff]   ;;  %v9116_v58 = vld [vmem:[#allocation5 + $0x1a0] ss:$16 sps:$4 sm:$0xff]   ;;  %vm6877_vm0 = vcmask 7168  }
  0xab   : > { %2635 = vmatpush1.bf16.msra.mxu0 %v9062_v19  ;;  %4047 = vmatpush1.bf16.msra.mxu1 %v9063_v20  ;;  %v9105_v50 = vld [vmem:[#allocation5 + $0x168] ss:$16 sps:$4 sm:$0xff]   ;;  %v813_v51 = vpack.c.bf16 %v309_v49, %v301_v47  ;;  %v9108_v53 = vld [vmem:[#allocation5 + $0x18c] ss:$16 sps:$4 sm:$0xff]   ;;  %v9118_v60 = vld [vmem:[#allocation5 + $0x1c4] ss:$16 sps:$4 sm:$0xff]  }
  0xac   : > { %2636 = vmatprep.subr.bf16.mxu0 %v9064_v21  ;;  %4048 = vmatprep.subr.bf16.mxu1 %v9066_v22  ;;  %v9111_v55 = vld [vmem:[#allocation5 + $0x188] ss:$16 sps:$4 sm:$0xff]   ;;  %v9114_v57 = vld [vmem:[#allocation5 + $0x1ac] ss:$16 sps:$4 sm:$0xff]   ;;  %v9122_v62 = vld [vmem:[#allocation5 + $0x1c0] ss:$16 sps:$4 sm:$0xff]  }
  0xad   : > { %2658 = vmatprep.mubr.bf16.mxu0 %v813_v51  ;;  %4070 = vmatprep.mubr.bf16.mxu1 %v813_v51  ;;  %v9117_v59 = vld [vmem:[#allocation5 + $0x1a8] ss:$16 sps:$4 sm:$0xff]   ;;  %v9120_v61 = vld [vmem:[#allocation5 + $0x1cc] ss:$16 sps:$4 sm:$0xff]   ;;  %v9124_v0 = vld [vmem:[#allocation5 + $0x1e4] ss:$16 sps:$4 sm:$0xff]  }
  0xae   : > { %v9123_v63 = vld [vmem:[#allocation5 + $0x1c8] ss:$16 sps:$4 sm:$0xff]   ;;  %v9126_v1 = vld [vmem:[#allocation5 + $0x1ec] ss:$16 sps:$4 sm:$0xff]   ;;  %v9128_v2 = vld [vmem:[#allocation5 + $0x1e0] ss:$16 sps:$4 sm:$0xff]  }
  0xaf   : > { %2637 = vmatpush1.bf16.msra.mxu0 %v9068_v23  ;;  %4049 = vmatpush1.bf16.msra.mxu1 %v9069_v24  ;;  %v9129_v3 = vld [vmem:[#allocation5 + $0x1e8] ss:$16 sps:$4 sm:$0xff]   ;;  %v300_v4 = vld [vmem:[%s10642_s25] sm:$0xff]  ;;  %v9132_v6 = vld [vmem:[#allocation5 + $0x20c] ss:$16 sps:$4 sm:$0xff]   ;;  %s11800_s6 = scalar_lea.vmem [#allocation10], %s7469_s29  }
  0xb0   : > { %2638 = vmatprep.subr.bf16.mxu0 %v9070_v25  ;;  %4050 = vmatprep.subr.bf16.mxu1 %v9072_v26  ;;  %v308_v5 = vld [vmem:[%s10642_s25 + $0x40] sm:$0xff]  ;;  %v317_v7 = vld [vmem:[%s10642_s25 + $0x88] sm:$0xff]  ;;  %p12854_p8 = scmp.ne.s32.totalorder %s12703_s30, 0 }
  0xb1   : > { %v325_v8 = vld [vmem:[%s10642_s25 + $0xc8] sm:$0xff]  ;;  %v9135_v9 = vld [vmem:[#allocation5 + $0x204] ss:$16 sps:$4 sm:$0xff]   ;;  %v812_v10 = vpack.c.bf16 %v308_v5, %v300_v4  ;;  %v9133_v13 = vld [vmem:[#allocation5 + $0x200] ss:$16 sps:$4 sm:$0xff]   ;;  %s7856_s12 = sshll.u32 (%p12854_p8), %s10468_s4, 6 }
  0xb2   : > { %v9130_v11 = vld [vmem:[#allocation5 + $0x208] ss:$16 sps:$4 sm:$0xff]   ;;  %v821_v12 = vpack.c.bf16 %v325_v8, %v317_v7  ;;  %v9138_v14 = vld [vmem:[#allocation5 + $0x22c] ss:$16 sps:$4 sm:$0xff]   ;;  %v9141_v15 = vld [vmem:[#allocation5 + $0x224] ss:$16 sps:$4 sm:$0xff]  }
  0xb3   : > { %2639 = vmatpush1.bf16.msra.mxu0 %v9074_v27  ;;  %4051 = vmatpush1.bf16.msra.mxu1 %v9075_v28  ;;  %v316_v16 = vld [vmem:[%s10642_s25 + $0x80] sm:$0xff]  ;;  %v333_v18 = vld [vmem:[%s10642_s25 + $0x108] sm:$0xff]  ;;  %s7875_s14 = sshll.u32 (%p12854_p8), %s10468_s4, 9  ;;  %s6950_s17 = ssub.s32 (%p12854_p8), 75, %s7856_s12 }
  0xb4   : > { %2640 = vmatprep.subr.bf16.mxu0 %v9076_v29  ;;  %4052 = vmatprep.subr.bf16.mxu1 %v9078_v30  ;;  %v324_v17 = vld [vmem:[%s10642_s25 + $0xc0] sm:$0xff]  ;;  %v341_v19 = vld [vmem:[%s10642_s25 + $0x148] sm:$0xff]  ;;  %s12490_s23 = scalar_lea.vmem (%p12854_p8), %s12697_s5, %s7875_s14   ;;  %p6951_p5 = scmp.lt.s32.totalorder (%p12854_p8), %s6950_s17, 64 }
  0xb5   : > { %v9136_v20 = vld [vmem:[#allocation5 + $0x228] ss:$16 sps:$4 sm:$0xff]   ;;  %v9139_v21 = vld [vmem:[#allocation5 + $0x220] ss:$16 sps:$4 sm:$0xff]   ;;  %v9144_v22 = vld [vmem:[#allocation5 + $0x24c] ss:$16 sps:$4 sm:$0xff]   ;;  %v820_v24 = vpack.c.bf16 %v324_v17, %v316_v16  ;;  %v829_v25 = vpack.c.bf16 %v341_v19, %v333_v18 }
  0xb6   : > { %v9147_v23 = vld [vmem:[#allocation5 + $0x244] ss:$16 sps:$4 sm:$0xff]   ;;  %v9142_v26 = vld [vmem:[#allocation5 + $0x248] ss:$16 sps:$4 sm:$0xff]   ;;  %v9145_v27 = vld [vmem:[#allocation5 + $0x240] ss:$16 sps:$4 sm:$0xff]  }
  0xb7   : > { %2641 = vmatpush1.bf16.msra.mxu0 %v9080_v31  ;;  %4053 = vmatpush1.bf16.msra.mxu1 %v9081_v32  ;;  %v9150_v28 = vld [vmem:[#allocation5 + $0x26c] ss:$16 sps:$4 sm:$0xff]   ;;  %v9153_v29 = vld [vmem:[#allocation5 + $0x264] ss:$16 sps:$4 sm:$0xff]   ;;  %v9163_v49 = vld [vmem:[#allocation5 + $0x2a0] ss:$16 sps:$4 sm:$0xff]  }
  0xb8   : > { %2642 = vmatprep.subr.bf16.mxu0 %v9082_v33  ;;  %4054 = vmatprep.subr.bf16.mxu1 %v9084_v34  ;;  %v332_v30 = vld [vmem:[%s10642_s25 + $0x100] sm:$0xff]  ;;  %v349_v32 = vld [vmem:[%s10642_s25 + $0x188] sm:$0xff] }
  0xb9   : > { %v340_v31 = vld [vmem:[%s10642_s25 + $0x140] sm:$0xff]  ;;  %v357_v33 = vld [vmem:[%s10642_s25 + $0x1c8] sm:$0xff] }
  0xba   : > { %v9148_v34 = vld [vmem:[#allocation5 + $0x268] ss:$16 sps:$4 sm:$0xff]   ;;  %v9171_v51 = vld [vmem:[#allocation5 + $0x2c4] ss:$16 sps:$4 sm:$0xff]   ;;  %v9181_v5 = vld [vmem:[#allocation5 + $0x300] ss:$16 sps:$4 sm:$0xff]  }
  0xbb   : > { %2643 = vmatpush1.bf16.msra.mxu0 %v9086_v35  ;;  %4055 = vmatpush1.bf16.msra.mxu1 %v9087_v36  ;;  %v9151_v35 = vld [vmem:[#allocation5 + $0x260] ss:$16 sps:$4 sm:$0xff]   ;;  %v9156_v36 = vld [vmem:[#allocation5 + $0x28c] ss:$16 sps:$4 sm:$0xff]   ;;  %v9178_v4 = vld [vmem:[#allocation5 + $0x308] ss:$16 sps:$4 sm:$0xff]  }
  0xbc   : > { %2644 = vmatprep.subr.bf16.mxu0 %v9088_v37  ;;  %4056 = vmatprep.subr.bf16.mxu1 %v9090_v38  ;;  %v9159_v37 = vld [vmem:[#allocation5 + $0x284] ss:$16 sps:$4 sm:$0xff]   ;;  %v828_v38 = vpack.c.bf16 %v340_v31, %v332_v30  ;;  %v373_v47 = vld [vmem:[%s10642_s25 + $0x248] sm:$0xff] }
  0xbd   : > { %v9189_v7 = vld [vmem:[#allocation5 + $0x324] ss:$16 sps:$4 sm:$0xff]   ;;  %v9190_v16 = vld [vmem:[#allocation5 + $0x348] ss:$16 sps:$4 sm:$0xff]  }
  0xbe   : > { %v380_v8 = vld [vmem:[%s10642_s25 + $0x280] sm:$0xff]  ;;  %v429_v30 = vld [vmem:[%s10642_s25 + $0x408] sm:$0xff] }
  0xbf   : > { %2645 = vmatpush1.bf16.msra.mxu0 %v9092_v39  ;;  %4057 = vmatpush1.bf16.msra.mxu1 %v9093_v40  ;;  %v837_v39 = vpack.c.bf16 %v357_v33, %v349_v32  ;;  %v9154_v40 = vld [vmem:[#allocation5 + $0x288] ss:$16 sps:$4 sm:$0xff]   ;;  %v396_v18 = vld [vmem:[%s10642_s25 + $0x300] sm:$0xff] }
  0xc0   : > { %2646 = vmatprep.subr.bf16.mxu0 %v9094_v41  ;;  %4058 = vmatprep.subr.bf16.mxu1 %v9096_v42  ;;  %v9157_v41 = vld [vmem:[#allocation5 + $0x280] ss:$16 sps:$4 sm:$0xff]   ;;  %v9162_v42 = vld [vmem:[#allocation5 + $0x2ac] ss:$16 sps:$4 sm:$0xff]  }
  0xc1   : > { %v404_v19 = vld [vmem:[%s10642_s25 + $0x340] sm:$0xff]  ;;  %v437_v31 = vld [vmem:[%s10642_s25 + $0x448] sm:$0xff] }
  0xc2   : > { %v877_v33 = vpack.c.bf16 %v437_v31, %v429_v30  ;;  %v557_v30 = vld [vmem:[%s10642_s25 + $0x808] sm:$0xff] }
  0xc3   : > { %2647 = vmatpush1.bf16.msra.mxu0 %v9098_v43  ;;  %4059 = vmatpush1.bf16.msra.mxu1 %v9099_v44  ;;  %v9165_v43 = vld [vmem:[#allocation5 + $0x2a4] ss:$16 sps:$4 sm:$0xff]   ;;  %v565_v31 = vld [vmem:[%s10642_s25 + $0x848] sm:$0xff] }
  0xc4   : > { %2648 = vmatprep.subr.bf16.mxu0 %v9100_v45  ;;  %4060 = vmatprep.subr.bf16.mxu1 %v9102_v46  ;;  %v348_v44 = vld [vmem:[%s10642_s25 + $0x180] sm:$0xff]  ;;  %v365_v46 = vld [vmem:[%s10642_s25 + $0x208] sm:$0xff] }
  0xc5   : > { %v356_v45 = vld [vmem:[%s10642_s25 + $0x1c0] sm:$0xff] }
  0xc7   : > { %2649 = vmatpush1.bf16.msra.mxu0 %v9104_v48  ;;  %4061 = vmatpush1.bf16.msra.mxu1 %v9105_v50  ;;  %v9160_v48 = vld [vmem:[#allocation5 + $0x2a8] ss:$16 sps:$4 sm:$0xff]   ;;  %v9168_v50 = vld [vmem:[#allocation5 + $0x2cc] ss:$16 sps:$4 sm:$0xff]  }
  0xc8   : > { %2650 = vmatprep.subr.bf16.mxu0 %v9106_v52  ;;  %4062 = vmatprep.subr.bf16.mxu1 %v9108_v53  ;;  %v836_v52 = vpack.c.bf16 %v356_v45, %v348_v44  ;;  %v845_v53 = vpack.c.bf16 %v373_v47, %v365_v46  ;;  %v9204_v44 = vld [vmem:[#allocation5 + $0x38c] ss:$16 sps:$4 sm:$0xff]   ;;  %v452_v45 = vld [vmem:[%s10642_s25 + $0x4c0] sm:$0xff] }
  0xc9   : > { %v461_v46 = vld [vmem:[%s10642_s25 + $0x508] sm:$0xff] }
  0xca   : > { %v469_v47 = vld [vmem:[%s10642_s25 + $0x548] sm:$0xff] }
  0xcb   : > { %2651 = vmatpush1.bf16.msra.mxu0 %v9110_v54  ;;  %4063 = vmatpush1.bf16.msra.mxu1 %v9111_v55  ;;  %v9166_v54 = vld [vmem:[#allocation5 + $0x2c8] ss:$16 sps:$4 sm:$0xff]   ;;  %v9169_v55 = vld [vmem:[#allocation5 + $0x2c0] ss:$16 sps:$4 sm:$0xff]  }
  0xcc   : > { %2652 = vmatprep.subr.bf16.mxu0 %v9112_v56  ;;  %4064 = vmatprep.subr.bf16.mxu1 %v9114_v57  ;;  %v9174_v56 = vld [vmem:[#allocation5 + $0x2ec] ss:$16 sps:$4 sm:$0xff]   ;;  %v9177_v57 = vld [vmem:[#allocation5 + $0x2e4] ss:$16 sps:$4 sm:$0xff]  }
  0xcf   : > { %2653 = vmatpush1.bf16.msra.mxu0 %v9116_v58  ;;  %4065 = vmatpush1.bf16.msra.mxu1 %v9117_v59  ;;  %v364_v58 = vld [vmem:[%s10642_s25 + $0x200] sm:$0xff] }
  0xd0   : > { %2654 = vmatprep.subr.bf16.mxu0 %v9118_v60  ;;  %4066 = vmatprep.subr.bf16.mxu1 %v9120_v61  ;;  %v372_v59 = vld [vmem:[%s10642_s25 + $0x240] sm:$0xff]  ;;  %v381_v60 = vld [vmem:[%s10642_s25 + $0x288] sm:$0xff] }
  0xd1   : > { %v389_v61 = vld [vmem:[%s10642_s25 + $0x2c8] sm:$0xff] }
  0xd3   : > { %2655 = vmatpush1.bf16.msra.mxu0 %v9122_v62  ;;  %4067 = vmatpush1.bf16.msra.mxu1 %v9123_v63  ;;  %v9172_v62 = vld [vmem:[#allocation5 + $0x2e8] ss:$16 sps:$4 sm:$0xff]   ;;  %v9175_v63 = vld [vmem:[#allocation5 + $0x2e0] ss:$16 sps:$4 sm:$0xff]  }
  0xd4   : > { %2656 = vmatprep.subr.bf16.mxu0 %v9124_v0  ;;  %4068 = vmatprep.subr.bf16.mxu1 %v9126_v1  ;;  %v9180_v0 = vld [vmem:[#allocation5 + $0x30c] ss:$16 sps:$4 sm:$0xff]   ;;  %v9183_v1 = vld [vmem:[#allocation5 + $0x304] ss:$16 sps:$4 sm:$0xff]  }
  0xd7   : > { %2657 = vmatpush1.bf16.msra.mxu0 %v9128_v2  ;;  %4069 = vmatpush1.bf16.msra.mxu1 %v9129_v3  ;;  %v844_v2 = vpack.c.bf16 %v372_v59, %v364_v58  ;;  %v853_v3 = vpack.c.bf16 %v389_v61, %v381_v60  ;;  %v476_v58 = vld [vmem:[%s10642_s25 + $0x580] sm:$0xff]  ;;  %v9208_v59 = vld [vmem:[#allocation5 + $0x3a8] ss:$16 sps:$4 sm:$0xff]   ;;  %v9210_v60 = vld [vmem:[#allocation5 + $0x3ac] ss:$16 sps:$4 sm:$0xff]  }
  0xd8   : > { %4391 = vmatprep.subr.bf16.mxu1 %v9132_v6  ;;  %2979 = vmatprep.subr.bf16.mxu0 %v9135_v9  ;;  %v9186_v6 = vld [vmem:[#allocation5 + $0x32c] ss:$16 sps:$4 sm:$0xff]   ;;  %v388_v9 = vld [vmem:[%s10642_s25 + $0x2c0] sm:$0xff] }
  0xd9   : > { %v484_v61 = vld [vmem:[%s10642_s25 + $0x5c0] sm:$0xff] }
  0xda   : > { %2659 = vmatmul.mubr.bf16.vlgmr.msra.gmra.mrb[0].mxu0 %v812_v10  ;;  %4071 = vmatmul.mubr.bf16.vlgmr.msra.gmra.mrb[0].mxu1 %v812_v10  ;;  %v397_v10 = vld [vmem:[%s10642_s25 + $0x308] sm:$0xff] }
  0xdb   : > { %4392 = vmatpush1.bf16.msra.mxu1 %v9130_v11  ;;  %2668 = vmatprep.mubr.bf16.mxu0 %v821_v12  ;;  %v405_v11 = vld [vmem:[%s10642_s25 + $0x348] sm:$0xff] }
  0xdc   : > { %4080 = vmatprep.mubr.bf16.mxu1 %v821_v12  ;;  %2980 = vmatpush1.bf16.msra.mxu0 %v9133_v13  ;;  %v9184_v12 = vld [vmem:[#allocation5 + $0x328] ss:$16 sps:$4 sm:$0xff]   ;;  %v9187_v13 = vld [vmem:[#allocation5 + $0x320] ss:$16 sps:$4 sm:$0xff]   ;;  %v861_v17 = vpack.c.bf16 %v405_v11, %v397_v10 }
  0xdd   : > { %4393 = vmatprep.subr.bf16.mxu1 %v9138_v14  ;;  %2981 = vmatprep.subr.bf16.mxu0 %v9141_v15  ;;  %v9192_v14 = vld [vmem:[#allocation5 + $0x34c] ss:$16 sps:$4 sm:$0xff]   ;;  %v852_v15 = vpack.c.bf16 %v388_v9, %v380_v8  ;;  %v508_v10 = vld [vmem:[%s10642_s25 + $0x680] sm:$0xff]  ;;  %v9214_v11 = vld [vmem:[#allocation5 + $0x3c8] ss:$16 sps:$4 sm:$0xff]  }
  0xdf   : > { %4394 = vmatpush1.bf16.msra.mxu1 %v9136_v20  ;;  %v413_v20 = vld [vmem:[%s10642_s25 + $0x388] sm:$0xff] }
  0xe0   : > { %2982 = vmatpush1.bf16.msra.mxu0 %v9139_v21  ;;  %4395 = vmatprep.subr.bf16.mxu1 %v9144_v22  ;;  %v9193_v21 = vld [vmem:[#allocation5 + $0x340] ss:$16 sps:$4 sm:$0xff]   ;;  %v9195_v22 = vld [vmem:[#allocation5 + $0x344] ss:$16 sps:$4 sm:$0xff]  }
  0xe1   : > { %2983 = vmatprep.subr.bf16.mxu0 %v9147_v23  ;;  %v421_v23 = vld [vmem:[%s10642_s25 + $0x3c8] sm:$0xff] }
  0xe2   : > { %2669 = vmatmul.mubr.bf16.gmra.mrb[4].mxu0 %v820_v24  ;;  %4081 = vmatmul.mubr.bf16.gmra.mrb[4].mxu1 %v820_v24  ;;  %v860_v24 = vpack.c.bf16 %v404_v19, %v396_v18  ;;  %v524_v18 = vld [vmem:[%s10642_s25 + $0x700] sm:$0xff] }
  0xe3   : > { %2678 = vmatprep.mubr.bf16.mxu0 %v829_v25  ;;  %4090 = vmatprep.mubr.bf16.mxu1 %v829_v25  ;;  %v869_v25 = vpack.c.bf16 %v421_v23, %v413_v20  ;;  %v532_v19 = vld [vmem:[%s10642_s25 + $0x740] sm:$0xff]  ;;  %v549_v23 = vld [vmem:[%s10642_s25 + $0x7c8] sm:$0xff] }
  0xe4   : > { %4396 = vmatpush1.bf16.msra.mxu1 %v9142_v26  ;;  %2984 = vmatpush1.bf16.msra.mxu0 %v9145_v27  ;;  %v412_v26 = vld [vmem:[%s10642_s25 + $0x380] sm:$0xff]  ;;  %v9196_v27 = vld [vmem:[#allocation5 + $0x368] ss:$16 sps:$4 sm:$0xff]  }
  0xe5   : > { %4397 = vmatprep.subr.bf16.mxu1 %v9150_v28  ;;  %2985 = vmatprep.subr.bf16.mxu0 %v9153_v29  ;;  %v9198_v28 = vld [vmem:[#allocation5 + $0x36c] ss:$16 sps:$4 sm:$0xff]   ;;  %v420_v29 = vld [vmem:[%s10642_s25 + $0x3c0] sm:$0xff] }
  0xe6   : > { %v868_v32 = vpack.c.bf16 %v420_v29, %v412_v26  ;;  %v9217_v20 = vld [vmem:[#allocation5 + $0x3c0] ss:$16 sps:$4 sm:$0xff]   ;;  %v9220_v26 = vld [vmem:[#allocation5 + $0x3e8] ss:$16 sps:$4 sm:$0xff]  }
  0xe7   : > { %v548_v29 = vld [vmem:[%s10642_s25 + $0x7c0] sm:$0xff] }
  0xe8   : > { %4398 = vmatpush1.bf16.msra.mxu1 %v9148_v34  ;;  %2986 = vmatpush1.bf16.msra.mxu0 %v9151_v35  ;;  %v428_v34 = vld [vmem:[%s10642_s25 + $0x400] sm:$0xff] }
  0xe9   : > { %4399 = vmatprep.subr.bf16.mxu1 %v9156_v36  ;;  %2987 = vmatprep.subr.bf16.mxu0 %v9159_v37  ;;  %v436_v35 = vld [vmem:[%s10642_s25 + $0x440] sm:$0xff]  ;;  %v445_v36 = vld [vmem:[%s10642_s25 + $0x488] sm:$0xff] }
  0xea   : > { %2679 = vmatmul.mubr.bf16.gmra.mrb[8].mxu0 %v828_v38  ;;  %4091 = vmatmul.mubr.bf16.gmra.mrb[8].mxu1 %v828_v38  ;;  %v9199_v37 = vld [vmem:[#allocation5 + $0x360] ss:$16 sps:$4 sm:$0xff]   ;;  %v9201_v38 = vld [vmem:[#allocation5 + $0x364] ss:$16 sps:$4 sm:$0xff]  }
  0xeb   : > { %2688 = vmatprep.mubr.bf16.mxu0 %v837_v39  ;;  %4100 = vmatprep.mubr.bf16.mxu1 %v837_v39  ;;  %v453_v39 = vld [vmem:[%s10642_s25 + $0x4c8] sm:$0xff] }
  0xec   : > { %4400 = vmatpush1.bf16.msra.mxu1 %v9154_v40  ;;  %2988 = vmatpush1.bf16.msra.mxu0 %v9157_v41  ;;  %v876_v40 = vpack.c.bf16 %v436_v35, %v428_v34  ;;  %v885_v41 = vpack.c.bf16 %v453_v39, %v445_v36  ;;  %v9223_v34 = vld [vmem:[#allocation5 + $0x3e0] ss:$16 sps:$4 sm:$0xff]   ;;  %v9225_v35 = vld [vmem:[#allocation5 + $0x3e4] ss:$16 sps:$4 sm:$0xff]   ;;  %v581_v39 = vld [vmem:[%s10642_s25 + $0x8c8] sm:$0xff] }
  0xed   : > { %4401 = vmatprep.subr.bf16.mxu1 %v9162_v42  ;;  %2989 = vmatprep.subr.bf16.mxu0 %v9165_v43  ;;  %v444_v42 = vld [vmem:[%s10642_s25 + $0x480] sm:$0xff]  ;;  %v9202_v43 = vld [vmem:[#allocation5 + $0x388] ss:$16 sps:$4 sm:$0xff]  }
  0xee   : > { %v556_v36 = vld [vmem:[%s10642_s25 + $0x800] sm:$0xff] }
  0xf0   : > { %4402 = vmatpush1.bf16.msra.mxu1 %v9160_v48  ;;  %2990 = vmatpush1.bf16.msra.mxu0 %v9163_v49  ;;  %v884_v48 = vpack.c.bf16 %v452_v45, %v444_v42  ;;  %v893_v49 = vpack.c.bf16 %v469_v47, %v461_v46  ;;  %v9228_v42 = vld [vmem:[#allocation5 + $0x40c] ss:$16 sps:$4 sm:$0xff]  }
  0xf1   : > { %4403 = vmatprep.subr.bf16.mxu1 %v9168_v50  ;;  %2991 = vmatprep.subr.bf16.mxu0 %v9171_v51  ;;  %v460_v50 = vld [vmem:[%s10642_s25 + $0x500] sm:$0xff]  ;;  %v589_v45 = vld [vmem:[%s10642_s25 + $0x908] sm:$0xff] }
  0xf2   : > { %2689 = vmatmul.mubr.bf16.gmra.mrb[12].mxu0 %v836_v52  ;;  %4101 = vmatmul.mubr.bf16.gmra.mrb[12].mxu1 %v836_v52  ;;  %v468_v51 = vld [vmem:[%s10642_s25 + $0x540] sm:$0xff]  ;;  %v477_v52 = vld [vmem:[%s10642_s25 + $0x588] sm:$0xff] }
  0xf3   : > { %2698 = vmatprep.mubr.bf16.mxu0 %v845_v53  ;;  %4110 = vmatprep.mubr.bf16.mxu1 %v845_v53  ;;  %v9205_v53 = vld [vmem:[#allocation5 + $0x380] ss:$16 sps:$4 sm:$0xff]   ;;  %v597_v46 = vld [vmem:[%s10642_s25 + $0x948] sm:$0xff] }
  0xf4   : > { %4404 = vmatpush1.bf16.msra.mxu1 %v9166_v54  ;;  %2992 = vmatpush1.bf16.msra.mxu0 %v9169_v55  ;;  %v9207_v54 = vld [vmem:[#allocation5 + $0x384] ss:$16 sps:$4 sm:$0xff]   ;;  %v485_v55 = vld [vmem:[%s10642_s25 + $0x5c8] sm:$0xff] }
  0xf5   : > { %4405 = vmatprep.subr.bf16.mxu1 %v9174_v56  ;;  %2993 = vmatprep.subr.bf16.mxu0 %v9177_v57  ;;  %v892_v56 = vpack.c.bf16 %v468_v51, %v460_v50  ;;  %v901_v57 = vpack.c.bf16 %v485_v55, %v477_v52  ;;  %v596_v50 = vld [vmem:[%s10642_s25 + $0x940] sm:$0xff]  ;;  %v605_v52 = vld [vmem:[%s10642_s25 + $0x988] sm:$0xff] }
  0xf6   : > { %v9231_v51 = vld [vmem:[#allocation5 + $0x404] ss:$16 sps:$4 sm:$0xff]  }
  0xf8   : > { %4406 = vmatpush1.bf16.msra.mxu1 %v9172_v62  ;;  %2994 = vmatpush1.bf16.msra.mxu0 %v9175_v63  ;;  %v493_v62 = vld [vmem:[%s10642_s25 + $0x608] sm:$0xff] }
  0xf9   : > { %4407 = vmatprep.subr.bf16.mxu1 %v9180_v0  ;;  %2995 = vmatprep.subr.bf16.mxu0 %v9183_v1  ;;  %v501_v63 = vld [vmem:[%s10642_s25 + $0x648] sm:$0xff]  ;;  %v900_v0 = vpack.c.bf16 %v484_v61, %v476_v58 }
  0xfa   : > { %2699 = vmatmul.mubr.bf16.gmra.mrb[16].mxu0 %v844_v2  ;;  %4111 = vmatmul.mubr.bf16.gmra.mrb[16].mxu1 %v844_v2  ;;  %v909_v1 = vpack.c.bf16 %v501_v63, %v493_v62  ;;  %v492_v2 = vld [vmem:[%s10642_s25 + $0x600] sm:$0xff]  ;;  %v621_v58 = vld [vmem:[%s10642_s25 + $0xa08] sm:$0xff] }
  0xfb   : > { %2708 = vmatprep.mubr.bf16.mxu0 %v853_v3  ;;  %4120 = vmatprep.mubr.bf16.mxu1 %v853_v3  ;;  %v500_v3 = vld [vmem:[%s10642_s25 + $0x640] sm:$0xff] }
  0xfc   : > { %4408 = vmatpush1.bf16.msra.mxu1 %v9178_v4  ;;  %2996 = vmatpush1.bf16.msra.mxu0 %v9181_v5  ;;  %v509_v4 = vld [vmem:[%s10642_s25 + $0x688] sm:$0xff]  ;;  %v9211_v5 = vld [vmem:[#allocation5 + $0x3a0] ss:$16 sps:$4 sm:$0xff]   ;;  %v908_v8 = vpack.c.bf16 %v500_v3, %v492_v2 }
  0xfd   : > { %4409 = vmatprep.subr.bf16.mxu1 %v9186_v6  ;;  %2997 = vmatprep.subr.bf16.mxu0 %v9189_v7  ;;  %v9213_v6 = vld [vmem:[#allocation5 + $0x3a4] ss:$16 sps:$4 sm:$0xff]   ;;  %v517_v7 = vld [vmem:[%s10642_s25 + $0x6c8] sm:$0xff] }
  0xfe   : > { %v917_v9 = vpack.c.bf16 %v517_v7, %v509_v4  ;;  %v620_v62 = vld [vmem:[%s10642_s25 + $0xa00] sm:$0xff]  ;;  %v661_v7 = vld [vmem:[%s10642_s25 + $0xb48] sm:$0xff] }
  0xff   : > { %v628_v63 = vld [vmem:[%s10642_s25 + $0xa40] sm:$0xff] }
 0x100   : > { %4410 = vmatpush1.bf16.msra.mxu1 %v9184_v12  ;;  %2998 = vmatpush1.bf16.msra.mxu0 %v9187_v13  ;;  %v9216_v12 = vld [vmem:[#allocation5 + $0x3cc] ss:$16 sps:$4 sm:$0xff]   ;;  %v516_v13 = vld [vmem:[%s10642_s25 + $0x6c0] sm:$0xff]  ;;  %v972_v2 = vpack.c.bf16 %v628_v63, %v620_v62 }
 0x101   : > { %4411 = vmatprep.subr.bf16.mxu1 %v9192_v14  ;;  %2999 = vmatprep.subr.bf16.mxu0 %v9195_v22  ;;  %v525_v14 = vld [vmem:[%s10642_s25 + $0x708] sm:$0xff]  ;;  %v636_v4 = vld [vmem:[%s10642_s25 + $0xa80] sm:$0xff] }
 0x102   : > { %2709 = vmatmul.mubr.bf16.gmra.mrb[20].mxu0 %v852_v15  ;;  %4121 = vmatmul.mubr.bf16.gmra.mrb[20].mxu1 %v852_v15  ;;  %v533_v15 = vld [vmem:[%s10642_s25 + $0x748] sm:$0xff] }
 0x103   : > { %2718 = vmatprep.mubr.bf16.mxu0 %v861_v17  ;;  %4130 = vmatprep.mubr.bf16.mxu1 %v861_v17  ;;  %v925_v17 = vpack.c.bf16 %v533_v15, %v525_v14  ;;  %v541_v22 = vld [vmem:[%s10642_s25 + $0x788] sm:$0xff] }
 0x104   : > { %4412 = vmatpush1.bf16.msra.mxu1 %v9190_v16  ;;  %3000 = vmatpush1.bf16.msra.mxu0 %v9193_v21  ;;  %v916_v16 = vpack.c.bf16 %v516_v13, %v508_v10  ;;  %v9219_v21 = vld [vmem:[#allocation5 + $0x3c4] ss:$16 sps:$4 sm:$0xff]   ;;  %v677_v13 = vld [vmem:[%s10642_s25 + $0xbc8] sm:$0xff] }
 0x105   : > { %4413 = vmatprep.subr.bf16.mxu1 %v9198_v28  ;;  %3001 = vmatprep.subr.bf16.mxu0 %v9201_v38  ;;  %v540_v28 = vld [vmem:[%s10642_s25 + $0x780] sm:$0xff]  ;;  %v573_v38 = vld [vmem:[%s10642_s25 + $0x888] sm:$0xff] }
 0x106   : > { %v652_v10 = vld [vmem:[%s10642_s25 + $0xb00] sm:$0xff] }
 0x108   : > { %4414 = vmatpush1.bf16.msra.mxu1 %v9196_v27  ;;  %3002 = vmatpush1.bf16.msra.mxu0 %v9199_v37  ;;  %v9222_v27 = vld [vmem:[#allocation5 + $0x3ec] ss:$16 sps:$4 sm:$0xff]   ;;  %v564_v37 = vld [vmem:[%s10642_s25 + $0x840] sm:$0xff] }
 0x109   : > { %4415 = vmatprep.subr.bf16.mxu1 %v9204_v44  ;;  %3003 = vmatprep.subr.bf16.mxu0 %v9207_v54  ;;  %v580_v44 = vld [vmem:[%s10642_s25 + $0x8c0] sm:$0xff] }
 0x10a   : > { %2719 = vmatmul.mubr.bf16.gmra.mrb[24].mxu0 %v860_v24  ;;  %4131 = vmatmul.mubr.bf16.gmra.mrb[24].mxu1 %v860_v24  ;;  %v924_v24 = vpack.c.bf16 %v532_v19, %v524_v18  ;;  %v685_v18 = vld [vmem:[%s10642_s25 + $0xc08] sm:$0xff] }
 0x10b   : > { %2728 = vmatprep.mubr.bf16.mxu0 %v869_v25  ;;  %4140 = vmatprep.mubr.bf16.mxu1 %v869_v25  ;;  %v933_v25 = vpack.c.bf16 %v549_v23, %v541_v22  ;;  %v693_v19 = vld [vmem:[%s10642_s25 + $0xc48] sm:$0xff]  ;;  %v684_v22 = vld [vmem:[%s10642_s25 + $0xc00] sm:$0xff] }
 0x10c   : > { %4416 = vmatpush1.bf16.msra.mxu1 %v9202_v43  ;;  %3004 = vmatpush1.bf16.msra.mxu0 %v9205_v53  ;;  %v572_v43 = vld [vmem:[%s10642_s25 + $0x880] sm:$0xff]  ;;  %v613_v53 = vld [vmem:[%s10642_s25 + $0x9c8] sm:$0xff] }
 0x10d   : > { %4417 = vmatprep.subr.bf16.mxu1 %v9210_v60  ;;  %3005 = vmatprep.subr.bf16.mxu0 %v9213_v6  ;;  %v948_v47 = vpack.c.bf16 %v580_v44, %v572_v43  ;;  %v965_v55 = vpack.c.bf16 %v613_v53, %v605_v52  ;;  %v653_v6 = vld [vmem:[%s10642_s25 + $0xb08] sm:$0xff]  ;;  %v692_v23 = vld [vmem:[%s10642_s25 + $0xc40] sm:$0xff] }
 0x10e   : > { %v757_v43 = vld [vmem:[%s10642_s25 + $0xe48] sm:$0xff]  ;;  %v764_v52 = vld [vmem:[%s10642_s25 + $0xe80] sm:$0xff] }
 0x10f   : > { %v772_v53 = vld [vmem:[%s10642_s25 + $0xec0] sm:$0xff] }
 0x110   : > { %4418 = vmatpush1.bf16.msra.mxu1 %v9208_v59  ;;  %3006 = vmatpush1.bf16.msra.mxu0 %v9211_v5  ;;  %v629_v59 = vld [vmem:[%s10642_s25 + $0xa48] sm:$0xff]  ;;  %v644_v5 = vld [vmem:[%s10642_s25 + $0xac0] sm:$0xff] }
 0x111   : > { %4419 = vmatprep.subr.bf16.mxu1 %v9216_v12  ;;  %3007 = vmatprep.subr.bf16.mxu0 %v9219_v21  ;;  %v973_v61 = vpack.c.bf16 %v629_v59, %v621_v58  ;;  %v669_v12 = vld [vmem:[%s10642_s25 + $0xb88] sm:$0xff]  ;;  %v1005_v21 = vpack.c.bf16 %v693_v19, %v685_v18  ;;  %v780_v58 = vld [vmem:[%s10642_s25 + $0xf00] sm:$0xff]  ;;  %v335_v18 = vld [vmem:[%s10642_s25 + $0x118] sm:$0xff] }
 0x112   : > { %2729 = vmatmul.mubr.bf16.gmra.mrb[28].mxu0 %v868_v32  ;;  %4141 = vmatmul.mubr.bf16.gmra.mrb[28].mxu1 %v868_v32  ;;  %v932_v32 = vpack.c.bf16 %v548_v29, %v540_v28  ;;  %v997_v15 = vpack.c.bf16 %v677_v13, %v669_v12  ;;  %v700_v28 = vld [vmem:[%s10642_s25 + $0xc80] sm:$0xff]  ;;  %v9232_v19 = vld [vmem:[#allocation5 + $0x428] ss:$16 sps:$4 sm:$0xff]  }
 0x113   : > { %2738 = vmatprep.mubr.bf16.mxu0 %v877_v33  ;;  %4150 = vmatprep.mubr.bf16.mxu1 %v877_v33  ;;  %v941_v33 = vpack.c.bf16 %v565_v31, %v557_v30  ;;  %v708_v29 = vld [vmem:[%s10642_s25 + $0xcc0] sm:$0xff]  ;;  %v717_v30 = vld [vmem:[%s10642_s25 + $0xd08] sm:$0xff] }
 0x114   : > { %4420 = vmatpush1.bf16.msra.mxu1 %v9214_v11  ;;  %3008 = vmatpush1.bf16.msra.mxu0 %v9217_v20  ;;  %v660_v11 = vld [vmem:[%s10642_s25 + $0xb40] sm:$0xff]  ;;  %v725_v31 = vld [vmem:[%s10642_s25 + $0xd48] sm:$0xff] }
 0x115   : > { %4421 = vmatprep.subr.bf16.mxu1 %v9222_v27  ;;  %3009 = vmatprep.subr.bf16.mxu0 %v9225_v35  ;;  %v988_v14 = vpack.c.bf16 %v660_v11, %v652_v10  ;;  %v724_v35 = vld [vmem:[%s10642_s25 + $0xd40] sm:$0xff]  ;;  %v9226_v11 = vld [vmem:[#allocation5 + $0x408] ss:$16 sps:$4 sm:$0xff]  }
 0x116   : > { %v788_v59 = vld [vmem:[%s10642_s25 + $0xf40] sm:$0xff] }
 0x117   : > { %v1052_v62 = vpack.c.bf16 %v788_v59, %v780_v58  ;;  %v9229_v13 = vld [vmem:[#allocation5 + $0x400] ss:$16 sps:$4 sm:$0xff]  }
 0x118   : > { %4422 = vmatpush1.bf16.msra.mxu1 %v9220_v26  ;;  %3010 = vmatpush1.bf16.msra.mxu0 %v9223_v34  ;;  %v1004_v26 = vpack.c.bf16 %v692_v23, %v684_v22  ;;  %v716_v34 = vld [vmem:[%s10642_s25 + $0xd00] sm:$0xff]  ;;  %v9240_v22 = vld [vmem:[#allocation5 + $0x44c] ss:$16 sps:$4 sm:$0xff]   ;;  %v366_v58 = vld [vmem:[%s10642_s25 + $0x210] sm:$0xff] }
 0x119   : > { %4744 = vmatprep.subr.bf16.mxu1 %v9228_v42  ;;  %3332 = vmatprep.subr.bf16.mxu0 %v9231_v51  ;;  %v749_v42 = vld [vmem:[%s10642_s25 + $0xe08] sm:$0xff]  ;;  %v9243_v23 = vld [vmem:[#allocation5 + $0x444] ss:$16 sps:$4 sm:$0xff]  }
 0x11a   : > { %2739 = vmatmul.mubr.bf16.gmra.mrb[32].mxu0 %v876_v40  ;;  %4151 = vmatmul.mubr.bf16.gmra.mrb[32].mxu1 %v876_v40  ;;  %v940_v40 = vpack.c.bf16 %v564_v37, %v556_v36  ;;  %v733_v36 = vld [vmem:[%s10642_s25 + $0xd88] sm:$0xff]  ;;  %v374_v59 = vld [vmem:[%s10642_s25 + $0x250] sm:$0xff] }
 0x11b   : > { %2748 = vmatprep.mubr.bf16.mxu0 %v885_v41  ;;  %4160 = vmatprep.mubr.bf16.mxu1 %v885_v41  ;;  %v949_v41 = vpack.c.bf16 %v581_v39, %v573_v38  ;;  %v741_v37 = vld [vmem:[%s10642_s25 + $0xdc8] sm:$0xff]  ;;  %v1020_v38 = vpack.c.bf16 %v724_v35, %v716_v34  ;;  %v9247_v35 = vld [vmem:[#allocation5 + $0x460] ss:$16 sps:$4 sm:$0xff]  }
 0x11c   : > { %v1029_v39 = vpack.c.bf16 %v741_v37, %v733_v36  ;;  %v9244_v34 = vld [vmem:[#allocation5 + $0x468] ss:$16 sps:$4 sm:$0xff]   ;;  %v9252_v36 = vld [vmem:[#allocation5 + $0x48c] ss:$16 sps:$4 sm:$0xff]   ;;  %v9255_v37 = vld [vmem:[#allocation5 + $0x484] ss:$16 sps:$4 sm:$0xff]  }
 0x122   : > { %2749 = vmatmul.mubr.bf16.gmra.mrb[36].mxu0 %v884_v48  ;;  %4161 = vmatmul.mubr.bf16.gmra.mrb[36].mxu1 %v884_v48  ;;  %v957_v48 = vpack.c.bf16 %v597_v46, %v589_v45  ;;  %v1037_v45 = vpack.c.bf16 %v757_v43, %v749_v42  ;;  %v748_v46 = vld [vmem:[%s10642_s25 + $0xe00] sm:$0xff]  ;;  %v9258_v42 = vld [vmem:[#allocation5 + $0x4ac] ss:$16 sps:$4 sm:$0xff]  }
 0x123   : > { %2758 = vmatprep.mubr.bf16.mxu0 %v893_v49  ;;  %4170 = vmatprep.mubr.bf16.mxu1 %v893_v49  ;;  %v588_v49 = vld [vmem:[%s10642_s25 + $0x900] sm:$0xff] }
 0x124   : > { %v956_v54 = vpack.c.bf16 %v596_v50, %v588_v49  ;;  %v773_v49 = vld [vmem:[%s10642_s25 + $0xec8] sm:$0xff]  ;;  %v9261_v43 = vld [vmem:[#allocation5 + $0x4a4] ss:$16 sps:$4 sm:$0xff]  }
 0x12a   : > { %2759 = vmatmul.mubr.bf16.gmra.mrb[40].mxu0 %v892_v56  ;;  %4171 = vmatmul.mubr.bf16.gmra.mrb[40].mxu1 %v892_v56  ;;  %v604_v56 = vld [vmem:[%s10642_s25 + $0x980] sm:$0xff] }
 0x12b   : > { %2768 = vmatprep.mubr.bf16.mxu0 %v901_v57  ;;  %4180 = vmatprep.mubr.bf16.mxu1 %v901_v57  ;;  %v612_v57 = vld [vmem:[%s10642_s25 + $0x9c0] sm:$0xff] }
 0x12c   : > { %v964_v60 = vpack.c.bf16 %v612_v57, %v604_v56  ;;  %v1044_v56 = vpack.c.bf16 %v772_v53, %v764_v52 }
 0x132   : > { %2769 = vmatmul.mubr.bf16.gmra.mrb[44].mxu0 %v900_v0  ;;  %4181 = vmatmul.mubr.bf16.gmra.mrb[44].mxu1 %v900_v0  ;;  %v637_v0 = vld [vmem:[%s10642_s25 + $0xa88] sm:$0xff] }
 0x133   : > { %2778 = vmatprep.mubr.bf16.mxu0 %v909_v1  ;;  %4190 = vmatprep.mubr.bf16.mxu1 %v909_v1  ;;  %v645_v1 = vld [vmem:[%s10642_s25 + $0xac8] sm:$0xff] }
 0x134   : > { %v981_v3 = vpack.c.bf16 %v645_v1, %v637_v0  ;;  %v796_v0 = vld [vmem:[%s10642_s25 + $0xf80] sm:$0xff] }
 0x135   : > { %v804_v1 = vld [vmem:[%s10642_s25 + $0xfc0] sm:$0xff] }
 0x13a   : > { %2779 = vmatmul.mubr.bf16.gmra.mrb[48].mxu0 %v908_v8  ;;  %4191 = vmatmul.mubr.bf16.gmra.mrb[48].mxu1 %v908_v8  ;;  %v980_v8 = vpack.c.bf16 %v644_v5, %v636_v4  ;;  %v1060_v4 = vpack.c.bf16 %v804_v1, %v796_v0  ;;  %v9276_v0 = vld [vmem:[#allocation5 + $0x50c] ss:$16 sps:$4 sm:$0xff]   ;;  %v9279_v1 = vld [vmem:[#allocation5 + $0x504] ss:$16 sps:$4 sm:$0xff]  }
 0x13b   : > { %2788 = vmatprep.mubr.bf16.mxu0 %v917_v9  ;;  %4200 = vmatprep.mubr.bf16.mxu1 %v917_v9  ;;  %v989_v9 = vpack.c.bf16 %v661_v7, %v653_v6  ;;  %v302_v6 = vld [vmem:[%s10642_s25 + $0x10] sm:$0xff] }
 0x13c   : > { %v310_v7 = vld [vmem:[%s10642_s25 + $0x50] sm:$0xff] }
 0x13d   : > { %v814_v10 = vpack.c.bf16 %v310_v7, %v302_v6  ;;  %v9282_v6 = vld [vmem:[#allocation5 + $0x52c] ss:$16 sps:$4 sm:$0xff]   ;;  %v9285_v7 = vld [vmem:[#allocation5 + $0x524] ss:$16 sps:$4 sm:$0xff]  }
 0x142   : > { %2789 = vmatmul.mubr.bf16.gmra.mrb[52].mxu0 %v916_v16  ;;  %4201 = vmatmul.mubr.bf16.gmra.mrb[52].mxu1 %v916_v16  ;;  %v668_v16 = vld [vmem:[%s10642_s25 + $0xb80] sm:$0xff] }
 0x143   : > { %2798 = vmatprep.mubr.bf16.mxu0 %v925_v17  ;;  %4210 = vmatprep.mubr.bf16.mxu1 %v925_v17  ;;  %v676_v17 = vld [vmem:[%s10642_s25 + $0xbc0] sm:$0xff] }
 0x144   : > { %v996_v20 = vpack.c.bf16 %v676_v17, %v668_v16  ;;  %v318_v16 = vld [vmem:[%s10642_s25 + $0x90] sm:$0xff] }
 0x145   : > { %v326_v17 = vld [vmem:[%s10642_s25 + $0xd0] sm:$0xff] }
 0x14a   : > { %2799 = vmatmul.mubr.bf16.gmra.mrb[56].mxu0 %v924_v24  ;;  %4211 = vmatmul.mubr.bf16.gmra.mrb[56].mxu1 %v924_v24  ;;  %v701_v24 = vld [vmem:[%s10642_s25 + $0xc88] sm:$0xff] }
 0x14b   : > { %2808 = vmatprep.mubr.bf16.mxu0 %v933_v25  ;;  %4220 = vmatprep.mubr.bf16.mxu1 %v933_v25  ;;  %v709_v25 = vld [vmem:[%s10642_s25 + $0xcc8] sm:$0xff] }
 0x14c   : > { %v1013_v27 = vpack.c.bf16 %v709_v25, %v701_v24  ;;  %v822_v24 = vpack.c.bf16 %v326_v17, %v318_v16  ;;  %v9286_v17 = vld [vmem:[#allocation5 + $0x548] ss:$16 sps:$4 sm:$0xff]  }
 0x152   : > { %2809 = vmatmul.mubr.bf16.gmra.mrb[60].mxu0 %v932_v32  ;;  %4221 = vmatmul.mubr.bf16.gmra.mrb[60].mxu1 %v932_v32  ;;  %v1012_v32 = vpack.c.bf16 %v708_v29, %v700_v28  ;;  %v9246_v28 = vld [vmem:[#allocation5 + $0x46c] ss:$16 sps:$4 sm:$0xff]   ;;  %v9249_v29 = vld [vmem:[#allocation5 + $0x464] ss:$16 sps:$4 sm:$0xff]  }
 0x153   : > { %2818 = vmatprep.mubr.bf16.mxu0 %v941_v33  ;;  %4230 = vmatprep.mubr.bf16.mxu1 %v941_v33  ;;  %v1021_v33 = vpack.c.bf16 %v725_v31, %v717_v30  ;;  %v334_v30 = vld [vmem:[%s10642_s25 + $0x110] sm:$0xff] }
 0x154   : > { %v342_v31 = vld [vmem:[%s10642_s25 + $0x150] sm:$0xff] }
 0x15a   : > { %2819 = vmatmul.mubr.bf16.gmra.mrb[64].mxu0 %v940_v40  ;;  %4231 = vmatmul.mubr.bf16.gmra.mrb[64].mxu1 %v940_v40  ;;  %v732_v40 = vld [vmem:[%s10642_s25 + $0xd80] sm:$0xff] }
 0x15b   : > { %2828 = vmatprep.mubr.bf16.mxu0 %v949_v41  ;;  %4240 = vmatprep.mubr.bf16.mxu1 %v949_v41  ;;  %v740_v41 = vld [vmem:[%s10642_s25 + $0xdc0] sm:$0xff] }
 0x15c   : > { %v1028_v44 = vpack.c.bf16 %v740_v41, %v732_v40  ;;  %v9250_v40 = vld [vmem:[#allocation5 + $0x488] ss:$16 sps:$4 sm:$0xff]   ;;  %v9253_v41 = vld [vmem:[#allocation5 + $0x480] ss:$16 sps:$4 sm:$0xff]  }
 0x162   : > { %2829 = vmatmul.mubr.bf16.gmra.mrb[68].mxu0 %v948_v47  ;;  %4241 = vmatmul.mubr.bf16.gmra.mrb[68].mxu1 %v948_v47  ;;  %v756_v47 = vld [vmem:[%s10642_s25 + $0xe40] sm:$0xff] }
 0x163   : > { %2838 = vmatprep.mubr.bf16.mxu0 %v957_v48  ;;  %4250 = vmatprep.mubr.bf16.mxu1 %v957_v48  ;;  %v765_v48 = vld [vmem:[%s10642_s25 + $0xe88] sm:$0xff]  ;;  %v1036_v50 = vpack.c.bf16 %v756_v47, %v748_v46  ;;  %v367_v46 = vld [vmem:[%s10642_s25 + $0x218] sm:$0xff] }
 0x164   : > { %v1045_v51 = vpack.c.bf16 %v773_v49, %v765_v48  ;;  %v375_v47 = vld [vmem:[%s10642_s25 + $0x258] sm:$0xff]  ;;  %v9259_v49 = vld [vmem:[#allocation5 + $0x4a0] ss:$16 sps:$4 sm:$0xff]  }
 0x165   : > { %v9256_v48 = vld [vmem:[#allocation5 + $0x4a8] ss:$16 sps:$4 sm:$0xff]   ;;  %v847_v53 = vpack.c.bf16 %v375_v47, %v367_v46 }
 0x166   : > { %v463_v46 = vld [vmem:[%s10642_s25 + $0x518] sm:$0xff] }
 0x167   : > { %v471_v47 = vld [vmem:[%s10642_s25 + $0x558] sm:$0xff] }
 0x16a   : > { %2839 = vmatmul.mubr.bf16.gmra.mrb[72].mxu0 %v956_v54  ;;  %4251 = vmatmul.mubr.bf16.gmra.mrb[72].mxu1 %v956_v54  ;;  %v781_v54 = vld [vmem:[%s10642_s25 + $0xf08] sm:$0xff] }
 0x16b   : > { %2848 = vmatprep.mubr.bf16.mxu0 %v965_v55  ;;  %4260 = vmatprep.mubr.bf16.mxu1 %v965_v55  ;;  %v789_v55 = vld [vmem:[%s10642_s25 + $0xf48] sm:$0xff] }
 0x16c   : > { %v1053_v57 = vpack.c.bf16 %v789_v55, %v781_v54  ;;  %v9262_v54 = vld [vmem:[#allocation5 + $0x4c8] ss:$16 sps:$4 sm:$0xff]   ;;  %v9265_v55 = vld [vmem:[#allocation5 + $0x4c0] ss:$16 sps:$4 sm:$0xff]  }
 0x172   : > { %2849 = vmatmul.mubr.bf16.gmra.mrb[76].mxu0 %v964_v60  ;;  %4261 = vmatmul.mubr.bf16.gmra.mrb[76].mxu1 %v964_v60  ;;  %v797_v60 = vld [vmem:[%s10642_s25 + $0xf88] sm:$0xff] }
 0x173   : > { %2858 = vmatprep.mubr.bf16.mxu0 %v973_v61  ;;  %4270 = vmatprep.mubr.bf16.mxu1 %v973_v61  ;;  %v805_v61 = vld [vmem:[%s10642_s25 + $0xfc8] sm:$0xff] }
 0x174   : > { %v1061_v63 = vpack.c.bf16 %v805_v61, %v797_v60  ;;  %v383_v60 = vld [vmem:[%s10642_s25 + $0x298] sm:$0xff] }
 0x175   : > { %v391_v61 = vld [vmem:[%s10642_s25 + $0x2d8] sm:$0xff] }
 0x17a   : > { %2859 = vmatmul.mubr.bf16.gmra.mrb[80].mxu0 %v972_v2  ;;  %4271 = vmatmul.mubr.bf16.gmra.mrb[80].mxu1 %v972_v2  ;;  %v303_v2 = vld [vmem:[%s10642_s25 + $0x18] sm:$0xff] }
 0x17b   : > { %2868 = vmatprep.mubr.bf16.mxu0 %v981_v3  ;;  %4280 = vmatprep.mubr.bf16.mxu1 %v981_v3  ;;  %v311_v3 = vld [vmem:[%s10642_s25 + $0x58] sm:$0xff] }
 0x17c   : > { %v815_v5 = vpack.c.bf16 %v311_v3, %v303_v2  ;;  %v846_v2 = vpack.c.bf16 %v374_v59, %v366_v58  ;;  %v855_v3 = vpack.c.bf16 %v391_v61, %v383_v60  ;;  %v9304_v58 = vld [vmem:[#allocation5 + $0x5a8] ss:$16 sps:$4 sm:$0xff]   ;;  %v9306_v59 = vld [vmem:[#allocation5 + $0x5ac] ss:$16 sps:$4 sm:$0xff]   ;;  %v478_v60 = vld [vmem:[%s10642_s25 + $0x590] sm:$0xff] }
 0x17d   : > { %v486_v61 = vld [vmem:[%s10642_s25 + $0x5d0] sm:$0xff] }
 0x182   : > { %2869 = vmatmul.mubr.bf16.gmra.mrb[84].mxu0 %v980_v8  ;;  %4281 = vmatmul.mubr.bf16.gmra.mrb[84].mxu1 %v980_v8  ;;  %v319_v8 = vld [vmem:[%s10642_s25 + $0x98] sm:$0xff] }
 0x183   : > { %2878 = vmatprep.mubr.bf16.mxu0 %v989_v9  ;;  %4290 = vmatprep.mubr.bf16.mxu1 %v989_v9  ;;  %v327_v9 = vld [vmem:[%s10642_s25 + $0xd8] sm:$0xff] }
 0x184   : > { %v823_v12 = vpack.c.bf16 %v327_v9, %v319_v8  ;;  %v382_v8 = vld [vmem:[%s10642_s25 + $0x290] sm:$0xff] }
 0x185   : > { %v390_v9 = vld [vmem:[%s10642_s25 + $0x2d0] sm:$0xff] }
 0x18a   : > { %2879 = vmatmul.mubr.bf16.gmra.mrb[88].mxu0 %v988_v14  ;;  %4291 = vmatmul.mubr.bf16.gmra.mrb[88].mxu1 %v988_v14  ;;  %v9234_v14 = vld [vmem:[#allocation5 + $0x42c] ss:$16 sps:$4 sm:$0xff]  }
 0x18b   : > { %2888 = vmatprep.mubr.bf16.mxu0 %v997_v15  ;;  %4300 = vmatprep.mubr.bf16.mxu1 %v997_v15  ;;  %v9237_v15 = vld [vmem:[#allocation5 + $0x424] ss:$16 sps:$4 sm:$0xff]  }
 0x192   : > { %2889 = vmatmul.mubr.bf16.gmra.mrb[92].mxu0 %v996_v20  ;;  %4301 = vmatmul.mubr.bf16.gmra.mrb[92].mxu1 %v996_v20  ;;  %v343_v20 = vld [vmem:[%s10642_s25 + $0x158] sm:$0xff] }
 0x193   : > { %2898 = vmatprep.mubr.bf16.mxu0 %v1005_v21  ;;  %4310 = vmatprep.mubr.bf16.mxu1 %v1005_v21  ;;  %v9235_v21 = vld [vmem:[#allocation5 + $0x420] ss:$16 sps:$4 sm:$0xff]   ;;  %v831_v25 = vpack.c.bf16 %v343_v20, %v335_v18 }
 0x194   : > { %v398_v18 = vld [vmem:[%s10642_s25 + $0x310] sm:$0xff] }
 0x195   : > { %v9289_v20 = vld [vmem:[#allocation5 + $0x540] ss:$16 sps:$4 sm:$0xff]  }
 0x19a   : > { %2899 = vmatmul.mubr.bf16.gmra.mrb[96].mxu0 %v1004_v26  ;;  %4311 = vmatmul.mubr.bf16.gmra.mrb[96].mxu1 %v1004_v26  ;;  %v9238_v26 = vld [vmem:[#allocation5 + $0x448] ss:$16 sps:$4 sm:$0xff]  }
 0x19b   : > { %2908 = vmatprep.mubr.bf16.mxu0 %v1013_v27  ;;  %4320 = vmatprep.mubr.bf16.mxu1 %v1013_v27  ;;  %v9241_v27 = vld [vmem:[#allocation5 + $0x440] ss:$16 sps:$4 sm:$0xff]  }
 0x1a2   : > { %2909 = vmatmul.mubr.bf16.gmra.mrb[100].mxu0 %v1012_v32  ;;  %4321 = vmatmul.mubr.bf16.gmra.mrb[100].mxu1 %v1012_v32  ;;  %v351_v32 = vld [vmem:[%s10642_s25 + $0x198] sm:$0xff] }
 0x1a3   : > { %2918 = vmatprep.mubr.bf16.mxu0 %v1021_v33  ;;  %4330 = vmatprep.mubr.bf16.mxu1 %v1021_v33  ;;  %v359_v33 = vld [vmem:[%s10642_s25 + $0x1d8] sm:$0xff] }
 0x1aa   : > { %2919 = vmatmul.mubr.bf16.gmra.mrb[104].mxu0 %v1020_v38  ;;  %4331 = vmatmul.mubr.bf16.gmra.mrb[104].mxu1 %v1020_v38  ;;  %v830_v38 = vpack.c.bf16 %v342_v31, %v334_v30  ;;  %v431_v30 = vld [vmem:[%s10642_s25 + $0x418] sm:$0xff] }
 0x1ab   : > { %2928 = vmatprep.mubr.bf16.mxu0 %v1029_v39  ;;  %4340 = vmatprep.mubr.bf16.mxu1 %v1029_v39  ;;  %v839_v39 = vpack.c.bf16 %v359_v33, %v351_v32  ;;  %v439_v31 = vld [vmem:[%s10642_s25 + $0x458] sm:$0xff] }
 0x1ac   : > { %v879_v33 = vpack.c.bf16 %v439_v31, %v431_v30  ;;  %v559_v30 = vld [vmem:[%s10642_s25 + $0x818] sm:$0xff] }
 0x1ad   : > { %v567_v31 = vld [vmem:[%s10642_s25 + $0x858] sm:$0xff] }
 0x1b2   : > { %2929 = vmatmul.mubr.bf16.gmra.mrb[108].mxu0 %v1028_v44  ;;  %4341 = vmatmul.mubr.bf16.gmra.mrb[108].mxu1 %v1028_v44  ;;  %v350_v44 = vld [vmem:[%s10642_s25 + $0x190] sm:$0xff] }
 0x1b3   : > { %2938 = vmatprep.mubr.bf16.mxu0 %v1037_v45  ;;  %4350 = vmatprep.mubr.bf16.mxu1 %v1037_v45  ;;  %v358_v45 = vld [vmem:[%s10642_s25 + $0x1d0] sm:$0xff] }
 0x1b4   : > { %v838_v52 = vpack.c.bf16 %v358_v45, %v350_v44  ;;  %v446_v44 = vld [vmem:[%s10642_s25 + $0x490] sm:$0xff] }
 0x1b5   : > { %v454_v45 = vld [vmem:[%s10642_s25 + $0x4d0] sm:$0xff] }
 0x1ba   : > { %2939 = vmatmul.mubr.bf16.gmra.mrb[112].mxu0 %v1036_v50  ;;  %4351 = vmatmul.mubr.bf16.gmra.mrb[112].mxu1 %v1036_v50  ;;  %v9264_v50 = vld [vmem:[#allocation5 + $0x4cc] ss:$16 sps:$4 sm:$0xff]  }
 0x1bb   : > { %2948 = vmatprep.mubr.bf16.mxu0 %v1045_v51  ;;  %4360 = vmatprep.mubr.bf16.mxu1 %v1045_v51  ;;  %v9267_v51 = vld [vmem:[#allocation5 + $0x4c4] ss:$16 sps:$4 sm:$0xff]  }
 0x1c2   : > { %2949 = vmatmul.mubr.bf16.gmra.mrb[116].mxu0 %v1044_v56  ;;  %4361 = vmatmul.mubr.bf16.gmra.mrb[116].mxu1 %v1044_v56  ;;  %v9270_v56 = vld [vmem:[#allocation5 + $0x4ec] ss:$16 sps:$4 sm:$0xff]  }
 0x1c3   : > { %2958 = vmatprep.mubr.bf16.mxu0 %v1053_v57  ;;  %4370 = vmatprep.mubr.bf16.mxu1 %v1053_v57  ;;  %v9273_v57 = vld [vmem:[#allocation5 + $0x4e4] ss:$16 sps:$4 sm:$0xff]  }
 0x1ca   : > { %2959 = vmatmul.mubr.bf16.gmra.mrb[120].mxu0 %v1052_v62  ;;  %4371 = vmatmul.mubr.bf16.gmra.mrb[120].mxu1 %v1052_v62  ;;  %v9268_v62 = vld [vmem:[#allocation5 + $0x4e8] ss:$16 sps:$4 sm:$0xff]  }
 0x1cb   : > { %2968 = vmatprep.mubr.bf16.mxu0 %v1061_v63  ;;  %4380 = vmatprep.mubr.bf16.mxu1 %v1061_v63  ;;  %v9271_v63 = vld [vmem:[#allocation5 + $0x4e0] ss:$16 sps:$4 sm:$0xff]  }
 0x1d2   : > { %2969 = vmatmul.mubr.bf16.gmra.mrb[124].mxu0 %v1060_v4  ;;  %4381 = vmatmul.mubr.bf16.gmra.mrb[124].mxu1 %v1060_v4  ;;  %v9274_v4 = vld [vmem:[#allocation5 + $0x508] ss:$16 sps:$4 sm:$0xff]  }
 0x1d3   : > { %3011 = vmatprep.mubr.bf16.mxu0 %v815_v5  ;;  %4423 = vmatprep.mubr.bf16.mxu1 %v815_v5  ;;  %v9277_v5 = vld [vmem:[#allocation5 + $0x500] ss:$16 sps:$4 sm:$0xff]  }
 0x1da   : > { %3012 = vmatmul.mubr.bf16.vlgmr.msra.gmra.mrb[0].mxu0 %v814_v10  ;;  %4424 = vmatmul.mubr.bf16.vlgmr.msra.gmra.mrb[0].mxu1 %v814_v10  ;;  %v399_v10 = vld [vmem:[%s10642_s25 + $0x318] sm:$0xff] }
 0x1db   : > { %4745 = vmatpush1.bf16.msra.mxu1 %v9226_v11  ;;  %3021 = vmatprep.mubr.bf16.mxu0 %v823_v12  ;;  %v407_v11 = vld [vmem:[%s10642_s25 + $0x358] sm:$0xff] }
 0x1dc   : > { %4433 = vmatprep.mubr.bf16.mxu1 %v823_v12  ;;  %3333 = vmatpush1.bf16.msra.mxu0 %v9229_v13  ;;  %v9280_v12 = vld [vmem:[#allocation5 + $0x528] ss:$16 sps:$4 sm:$0xff]   ;;  %v9283_v13 = vld [vmem:[#allocation5 + $0x520] ss:$16 sps:$4 sm:$0xff]   ;;  %v863_v16 = vpack.c.bf16 %v407_v11, %v399_v10  ;;  %v9312_v11 = vld [vmem:[#allocation5 + $0x5cc] ss:$16 sps:$4 sm:$0xff]  }
 0x1dd   : > { %4746 = vmatprep.subr.bf16.mxu1 %v9234_v14  ;;  %3334 = vmatprep.subr.bf16.mxu0 %v9237_v15  ;;  %v9288_v14 = vld [vmem:[#allocation5 + $0x54c] ss:$16 sps:$4 sm:$0xff]   ;;  %v854_v15 = vpack.c.bf16 %v390_v9, %v382_v8  ;;  %v9310_v10 = vld [vmem:[#allocation5 + $0x5c8] ss:$16 sps:$4 sm:$0xff]  }
 0x1df   : > { %4747 = vmatpush1.bf16.msra.mxu1 %v9232_v19  ;;  %v406_v19 = vld [vmem:[%s10642_s25 + $0x350] sm:$0xff] }
 0x1e0   : > { %3335 = vmatpush1.bf16.msra.mxu0 %v9235_v21  ;;  %4748 = vmatprep.subr.bf16.mxu1 %v9240_v22  ;;  %v9291_v21 = vld [vmem:[#allocation5 + $0x544] ss:$16 sps:$4 sm:$0xff]   ;;  %v415_v22 = vld [vmem:[%s10642_s25 + $0x398] sm:$0xff] }
 0x1e1   : > { %3336 = vmatprep.subr.bf16.mxu0 %v9243_v23  ;;  %v423_v23 = vld [vmem:[%s10642_s25 + $0x3d8] sm:$0xff] }
 0x1e2   : > { %3022 = vmatmul.mubr.bf16.gmra.mrb[4].mxu0 %v822_v24  ;;  %4434 = vmatmul.mubr.bf16.gmra.mrb[4].mxu1 %v822_v24  ;;  %v862_v24 = vpack.c.bf16 %v406_v19, %v398_v18  ;;  %v526_v18 = vld [vmem:[%s10642_s25 + $0x710] sm:$0xff] }
 0x1e3   : > { %3031 = vmatprep.mubr.bf16.mxu0 %v831_v25  ;;  %4443 = vmatprep.mubr.bf16.mxu1 %v831_v25  ;;  %v871_v25 = vpack.c.bf16 %v423_v23, %v415_v22  ;;  %v534_v19 = vld [vmem:[%s10642_s25 + $0x750] sm:$0xff]  ;;  %v543_v22 = vld [vmem:[%s10642_s25 + $0x798] sm:$0xff] }
 0x1e4   : > { %4749 = vmatpush1.bf16.msra.mxu1 %v9238_v26  ;;  %3337 = vmatpush1.bf16.msra.mxu0 %v9241_v27  ;;  %v9292_v26 = vld [vmem:[#allocation5 + $0x568] ss:$16 sps:$4 sm:$0xff]   ;;  %v9294_v27 = vld [vmem:[#allocation5 + $0x56c] ss:$16 sps:$4 sm:$0xff]  }
 0x1e5   : > { %4750 = vmatprep.subr.bf16.mxu1 %v9246_v28  ;;  %3338 = vmatprep.subr.bf16.mxu0 %v9249_v29  ;;  %v414_v28 = vld [vmem:[%s10642_s25 + $0x390] sm:$0xff]  ;;  %v551_v23 = vld [vmem:[%s10642_s25 + $0x7d8] sm:$0xff] }
 0x1e6   : > { %v422_v29 = vld [vmem:[%s10642_s25 + $0x3d0] sm:$0xff] }
 0x1e7   : > { %v870_v32 = vpack.c.bf16 %v422_v29, %v414_v28  ;;  %v542_v28 = vld [vmem:[%s10642_s25 + $0x790] sm:$0xff] }
 0x1e8   : > { %4751 = vmatpush1.bf16.msra.mxu1 %v9244_v34  ;;  %3339 = vmatpush1.bf16.msra.mxu0 %v9247_v35  ;;  %v430_v34 = vld [vmem:[%s10642_s25 + $0x410] sm:$0xff] }
 0x1e9   : > { %4752 = vmatprep.subr.bf16.mxu1 %v9252_v36  ;;  %3340 = vmatprep.subr.bf16.mxu0 %v9255_v37  ;;  %v438_v35 = vld [vmem:[%s10642_s25 + $0x450] sm:$0xff] }
 0x1ea   : > { %3032 = vmatmul.mubr.bf16.gmra.mrb[8].mxu0 %v830_v38  ;;  %4444 = vmatmul.mubr.bf16.gmra.mrb[8].mxu1 %v830_v38  ;;  %v9295_v36 = vld [vmem:[#allocation5 + $0x560] ss:$16 sps:$4 sm:$0xff]   ;;  %v9297_v37 = vld [vmem:[#allocation5 + $0x564] ss:$16 sps:$4 sm:$0xff]   ;;  %v447_v38 = vld [vmem:[%s10642_s25 + $0x498] sm:$0xff] }
 0x1eb   : > { %3041 = vmatprep.mubr.bf16.mxu0 %v839_v39  ;;  %4453 = vmatprep.mubr.bf16.mxu1 %v839_v39  ;;  %v455_v39 = vld [vmem:[%s10642_s25 + $0x4d8] sm:$0xff]  ;;  %v550_v29 = vld [vmem:[%s10642_s25 + $0x7d0] sm:$0xff] }
 0x1ec   : > { %4753 = vmatpush1.bf16.msra.mxu1 %v9250_v40  ;;  %3341 = vmatpush1.bf16.msra.mxu0 %v9253_v41  ;;  %v878_v40 = vpack.c.bf16 %v438_v35, %v430_v34  ;;  %v887_v41 = vpack.c.bf16 %v455_v39, %v447_v38  ;;  %v9319_v34 = vld [vmem:[#allocation5 + $0x5e0] ss:$16 sps:$4 sm:$0xff]   ;;  %v9321_v35 = vld [vmem:[#allocation5 + $0x5e4] ss:$16 sps:$4 sm:$0xff]   ;;  %v575_v38 = vld [vmem:[%s10642_s25 + $0x898] sm:$0xff] }
 0x1ed   : > { %4754 = vmatprep.subr.bf16.mxu1 %v9258_v42  ;;  %3342 = vmatprep.subr.bf16.mxu0 %v9261_v43  ;;  %v9298_v42 = vld [vmem:[#allocation5 + $0x588] ss:$16 sps:$4 sm:$0xff]   ;;  %v9300_v43 = vld [vmem:[#allocation5 + $0x58c] ss:$16 sps:$4 sm:$0xff]  }
 0x1ee   : > { %v583_v39 = vld [vmem:[%s10642_s25 + $0x8d8] sm:$0xff] }
 0x1f0   : > { %4755 = vmatpush1.bf16.msra.mxu1 %v9256_v48  ;;  %3343 = vmatpush1.bf16.msra.mxu0 %v9259_v49  ;;  %v886_v48 = vpack.c.bf16 %v454_v45, %v446_v44  ;;  %v895_v49 = vpack.c.bf16 %v471_v47, %v463_v46  ;;  %v582_v44 = vld [vmem:[%s10642_s25 + $0x8d0] sm:$0xff]  ;;  %v591_v45 = vld [vmem:[%s10642_s25 + $0x918] sm:$0xff] }
 0x1f1   : > { %4756 = vmatprep.subr.bf16.mxu1 %v9264_v50  ;;  %3344 = vmatprep.subr.bf16.mxu0 %v9267_v51  ;;  %v462_v50 = vld [vmem:[%s10642_s25 + $0x510] sm:$0xff]  ;;  %v599_v46 = vld [vmem:[%s10642_s25 + $0x958] sm:$0xff] }
 0x1f2   : > { %3042 = vmatmul.mubr.bf16.gmra.mrb[12].mxu0 %v838_v52  ;;  %4454 = vmatmul.mubr.bf16.gmra.mrb[12].mxu1 %v838_v52  ;;  %v470_v51 = vld [vmem:[%s10642_s25 + $0x550] sm:$0xff] }
 0x1f3   : > { %3051 = vmatprep.mubr.bf16.mxu0 %v847_v53  ;;  %4463 = vmatprep.mubr.bf16.mxu1 %v847_v53  ;;  %v9301_v52 = vld [vmem:[#allocation5 + $0x580] ss:$16 sps:$4 sm:$0xff]   ;;  %v9303_v53 = vld [vmem:[#allocation5 + $0x584] ss:$16 sps:$4 sm:$0xff]  }
 0x1f4   : > { %4757 = vmatpush1.bf16.msra.mxu1 %v9262_v54  ;;  %3345 = vmatpush1.bf16.msra.mxu0 %v9265_v55  ;;  %v479_v54 = vld [vmem:[%s10642_s25 + $0x598] sm:$0xff] }
 0x1f5   : > { %4758 = vmatprep.subr.bf16.mxu1 %v9270_v56  ;;  %3346 = vmatprep.subr.bf16.mxu0 %v9273_v57  ;;  %v487_v55 = vld [vmem:[%s10642_s25 + $0x5d8] sm:$0xff]  ;;  %v894_v56 = vpack.c.bf16 %v470_v51, %v462_v50  ;;  %v598_v50 = vld [vmem:[%s10642_s25 + $0x950] sm:$0xff] }
 0x1f6   : > { %v903_v57 = vpack.c.bf16 %v487_v55, %v479_v54  ;;  %v9327_v51 = vld [vmem:[#allocation5 + $0x604] ss:$16 sps:$4 sm:$0xff]  }
 0x1f8   : > { %4759 = vmatpush1.bf16.msra.mxu1 %v9268_v62  ;;  %3347 = vmatpush1.bf16.msra.mxu0 %v9271_v63  ;;  %v495_v62 = vld [vmem:[%s10642_s25 + $0x618] sm:$0xff] }
 0x1f9   : > { %4760 = vmatprep.subr.bf16.mxu1 %v9276_v0  ;;  %3348 = vmatprep.subr.bf16.mxu0 %v9279_v1  ;;  %v503_v63 = vld [vmem:[%s10642_s25 + $0x658] sm:$0xff]  ;;  %v902_v0 = vpack.c.bf16 %v486_v61, %v478_v60 }
 0x1fa   : > { %3052 = vmatmul.mubr.bf16.gmra.mrb[16].mxu0 %v846_v2  ;;  %4464 = vmatmul.mubr.bf16.gmra.mrb[16].mxu1 %v846_v2  ;;  %v911_v1 = vpack.c.bf16 %v503_v63, %v495_v62  ;;  %v494_v2 = vld [vmem:[%s10642_s25 + $0x610] sm:$0xff] }
 0x1fb   : > { %3061 = vmatprep.mubr.bf16.mxu0 %v855_v3  ;;  %4473 = vmatprep.mubr.bf16.mxu1 %v855_v3  ;;  %v502_v3 = vld [vmem:[%s10642_s25 + $0x650] sm:$0xff] }
 0x1fc   : > { %4761 = vmatpush1.bf16.msra.mxu1 %v9274_v4  ;;  %3349 = vmatpush1.bf16.msra.mxu0 %v9277_v5  ;;  %v9307_v4 = vld [vmem:[#allocation5 + $0x5a0] ss:$16 sps:$4 sm:$0xff]   ;;  %v9309_v5 = vld [vmem:[#allocation5 + $0x5a4] ss:$16 sps:$4 sm:$0xff]   ;;  %v910_v8 = vpack.c.bf16 %v502_v3, %v494_v2 }
 0x1fd   : > { %4762 = vmatprep.subr.bf16.mxu1 %v9282_v6  ;;  %3350 = vmatprep.subr.bf16.mxu0 %v9285_v7  ;;  %v511_v6 = vld [vmem:[%s10642_s25 + $0x698] sm:$0xff]  ;;  %v622_v62 = vld [vmem:[%s10642_s25 + $0xa10] sm:$0xff] }
 0x1fe   : > { %v519_v7 = vld [vmem:[%s10642_s25 + $0x6d8] sm:$0xff]  ;;  %v630_v63 = vld [vmem:[%s10642_s25 + $0xa50] sm:$0xff] }
 0x1ff   : > { %v919_v9 = vpack.c.bf16 %v519_v7, %v511_v6  ;;  %v974_v2 = vpack.c.bf16 %v630_v63, %v622_v62  ;;  %v655_v6 = vld [vmem:[%s10642_s25 + $0xb18] sm:$0xff] }
 0x200   : > { %4763 = vmatpush1.bf16.msra.mxu1 %v9280_v12  ;;  %3351 = vmatpush1.bf16.msra.mxu0 %v9283_v13  ;;  %v510_v12 = vld [vmem:[%s10642_s25 + $0x690] sm:$0xff]  ;;  %v663_v7 = vld [vmem:[%s10642_s25 + $0xb58] sm:$0xff] }
 0x201   : > { %4764 = vmatprep.subr.bf16.mxu1 %v9288_v14  ;;  %3352 = vmatprep.subr.bf16.mxu0 %v9291_v21  ;;  %v518_v13 = vld [vmem:[%s10642_s25 + $0x6d0] sm:$0xff]  ;;  %v527_v14 = vld [vmem:[%s10642_s25 + $0x718] sm:$0xff] }
 0x202   : > { %3062 = vmatmul.mubr.bf16.gmra.mrb[20].mxu0 %v854_v15  ;;  %4474 = vmatmul.mubr.bf16.gmra.mrb[20].mxu1 %v854_v15  ;;  %v535_v15 = vld [vmem:[%s10642_s25 + $0x758] sm:$0xff]  ;;  %v9315_v21 = vld [vmem:[#allocation5 + $0x5c4] ss:$16 sps:$4 sm:$0xff]  }
 0x203   : > { %3071 = vmatprep.mubr.bf16.mxu0 %v863_v16  ;;  %4483 = vmatprep.mubr.bf16.mxu1 %v863_v16  ;;  %v918_v16 = vpack.c.bf16 %v518_v13, %v510_v12  ;;  %v671_v12 = vld [vmem:[%s10642_s25 + $0xb98] sm:$0xff] }
 0x204   : > { %4765 = vmatpush1.bf16.msra.mxu1 %v9286_v17  ;;  %3353 = vmatpush1.bf16.msra.mxu0 %v9289_v20  ;;  %v927_v17 = vpack.c.bf16 %v535_v15, %v527_v14  ;;  %v9313_v20 = vld [vmem:[#allocation5 + $0x5c0] ss:$16 sps:$4 sm:$0xff]   ;;  %v679_v13 = vld [vmem:[%s10642_s25 + $0xbd8] sm:$0xff] }
 0x205   : > { %4766 = vmatprep.subr.bf16.mxu1 %v9294_v27  ;;  %3354 = vmatprep.subr.bf16.mxu0 %v9297_v37  ;;  %v9318_v27 = vld [vmem:[#allocation5 + $0x5ec] ss:$16 sps:$4 sm:$0xff]   ;;  %v566_v37 = vld [vmem:[%s10642_s25 + $0x850] sm:$0xff]  ;;  %v999_v15 = vpack.c.bf16 %v679_v13, %v671_v12 }
 0x206   : > { %v9325_v13 = vld [vmem:[#allocation5 + $0x600] ss:$16 sps:$4 sm:$0xff]  }
 0x208   : > { %4767 = vmatpush1.bf16.msra.mxu1 %v9292_v26  ;;  %3355 = vmatpush1.bf16.msra.mxu0 %v9295_v36  ;;  %v9316_v26 = vld [vmem:[#allocation5 + $0x5e8] ss:$16 sps:$4 sm:$0xff]   ;;  %v558_v36 = vld [vmem:[%s10642_s25 + $0x810] sm:$0xff] }
 0x209   : > { %4768 = vmatprep.subr.bf16.mxu1 %v9300_v43  ;;  %3356 = vmatprep.subr.bf16.mxu0 %v9303_v53  ;;  %v574_v43 = vld [vmem:[%s10642_s25 + $0x890] sm:$0xff]  ;;  %v615_v53 = vld [vmem:[%s10642_s25 + $0x9d8] sm:$0xff] }
 0x20a   : > { %3072 = vmatmul.mubr.bf16.gmra.mrb[24].mxu0 %v862_v24  ;;  %4484 = vmatmul.mubr.bf16.gmra.mrb[24].mxu1 %v862_v24  ;;  %v926_v24 = vpack.c.bf16 %v534_v19, %v526_v18  ;;  %v950_v47 = vpack.c.bf16 %v582_v44, %v574_v43  ;;  %v687_v18 = vld [vmem:[%s10642_s25 + $0xc18] sm:$0xff] }
 0x20b   : > { %3081 = vmatprep.mubr.bf16.mxu0 %v871_v25  ;;  %4493 = vmatprep.mubr.bf16.mxu1 %v871_v25  ;;  %v935_v25 = vpack.c.bf16 %v551_v23, %v543_v22  ;;  %v695_v19 = vld [vmem:[%s10642_s25 + $0xc58] sm:$0xff]  ;;  %v686_v22 = vld [vmem:[%s10642_s25 + $0xc10] sm:$0xff] }
 0x20c   : > { %4769 = vmatpush1.bf16.msra.mxu1 %v9298_v42  ;;  %3357 = vmatpush1.bf16.msra.mxu0 %v9301_v52  ;;  %v9324_v42 = vld [vmem:[#allocation5 + $0x60c] ss:$16 sps:$4 sm:$0xff]   ;;  %v694_v23 = vld [vmem:[%s10642_s25 + $0xc50] sm:$0xff] }
 0x20d   : > { %4770 = vmatprep.subr.bf16.mxu1 %v9306_v59  ;;  %3358 = vmatprep.subr.bf16.mxu0 %v9309_v5  ;;  %v607_v52 = vld [vmem:[%s10642_s25 + $0x998] sm:$0xff]  ;;  %v646_v5 = vld [vmem:[%s10642_s25 + $0xad0] sm:$0xff] }
 0x20e   : > { %v967_v55 = vpack.c.bf16 %v615_v53, %v607_v52  ;;  %v631_v59 = vld [vmem:[%s10642_s25 + $0xa58] sm:$0xff]  ;;  %v766_v52 = vld [vmem:[%s10642_s25 + $0xe90] sm:$0xff] }
 0x20f   : > { %v759_v43 = vld [vmem:[%s10642_s25 + $0xe58] sm:$0xff]  ;;  %v774_v53 = vld [vmem:[%s10642_s25 + $0xed0] sm:$0xff] }
 0x210   : > { %4771 = vmatpush1.bf16.msra.mxu1 %v9304_v58  ;;  %3359 = vmatpush1.bf16.msra.mxu0 %v9307_v4  ;;  %v623_v58 = vld [vmem:[%s10642_s25 + $0xa18] sm:$0xff]  ;;  %v638_v4 = vld [vmem:[%s10642_s25 + $0xa90] sm:$0xff] }
 0x211   : > { %4772 = vmatprep.subr.bf16.mxu1 %v9312_v11  ;;  %3360 = vmatprep.subr.bf16.mxu0 %v9315_v21  ;;  %v975_v61 = vpack.c.bf16 %v631_v59, %v623_v58  ;;  %v662_v11 = vld [vmem:[%s10642_s25 + $0xb50] sm:$0xff]  ;;  %v1007_v21 = vpack.c.bf16 %v695_v19, %v687_v18  ;;  %v337_v18 = vld [vmem:[%s10642_s25 + $0x128] sm:$0xff] }
 0x212   : > { %3082 = vmatmul.mubr.bf16.gmra.mrb[28].mxu0 %v870_v32  ;;  %4494 = vmatmul.mubr.bf16.gmra.mrb[28].mxu1 %v870_v32  ;;  %v934_v32 = vpack.c.bf16 %v550_v29, %v542_v28  ;;  %v702_v28 = vld [vmem:[%s10642_s25 + $0xc90] sm:$0xff]  ;;  %v9328_v19 = vld [vmem:[#allocation5 + $0x628] ss:$16 sps:$4 sm:$0xff]  }
 0x213   : > { %3091 = vmatprep.mubr.bf16.mxu0 %v879_v33  ;;  %4503 = vmatprep.mubr.bf16.mxu1 %v879_v33  ;;  %v943_v33 = vpack.c.bf16 %v567_v31, %v559_v30  ;;  %v710_v29 = vld [vmem:[%s10642_s25 + $0xcd0] sm:$0xff]  ;;  %v719_v30 = vld [vmem:[%s10642_s25 + $0xd18] sm:$0xff] }
 0x214   : > { %4773 = vmatpush1.bf16.msra.mxu1 %v9310_v10  ;;  %3361 = vmatpush1.bf16.msra.mxu0 %v9313_v20  ;;  %v654_v10 = vld [vmem:[%s10642_s25 + $0xb10] sm:$0xff]  ;;  %v727_v31 = vld [vmem:[%s10642_s25 + $0xd58] sm:$0xff] }
 0x215   : > { %4774 = vmatprep.subr.bf16.mxu1 %v9318_v27  ;;  %3362 = vmatprep.subr.bf16.mxu0 %v9321_v35  ;;  %v990_v14 = vpack.c.bf16 %v662_v11, %v654_v10  ;;  %v726_v35 = vld [vmem:[%s10642_s25 + $0xd50] sm:$0xff]  ;;  %v9322_v11 = vld [vmem:[#allocation5 + $0x608] ss:$16 sps:$4 sm:$0xff]  }
 0x216   : > { %v782_v58 = vld [vmem:[%s10642_s25 + $0xf10] sm:$0xff] }
 0x217   : > { %v790_v59 = vld [vmem:[%s10642_s25 + $0xf50] sm:$0xff] }
 0x218   : > { %4775 = vmatpush1.bf16.msra.mxu1 %v9316_v26  ;;  %3363 = vmatpush1.bf16.msra.mxu0 %v9319_v34  ;;  %v1006_v26 = vpack.c.bf16 %v694_v23, %v686_v22  ;;  %v718_v34 = vld [vmem:[%s10642_s25 + $0xd10] sm:$0xff]  ;;  %v1054_v62 = vpack.c.bf16 %v790_v59, %v782_v58  ;;  %v9336_v22 = vld [vmem:[#allocation5 + $0x64c] ss:$16 sps:$4 sm:$0xff]   ;;  %v368_v58 = vld [vmem:[%s10642_s25 + $0x220] sm:$0xff] }
 0x219   : > { %5097 = vmatprep.subr.bf16.mxu1 %v9324_v42  ;;  %3685 = vmatprep.subr.bf16.mxu0 %v9327_v51  ;;  %v751_v42 = vld [vmem:[%s10642_s25 + $0xe18] sm:$0xff]  ;;  %v9339_v23 = vld [vmem:[#allocation5 + $0x644] ss:$16 sps:$4 sm:$0xff]  }
 0x21a   : > { %3092 = vmatmul.mubr.bf16.gmra.mrb[32].mxu0 %v878_v40  ;;  %4504 = vmatmul.mubr.bf16.gmra.mrb[32].mxu1 %v878_v40  ;;  %v942_v40 = vpack.c.bf16 %v566_v37, %v558_v36  ;;  %v735_v36 = vld [vmem:[%s10642_s25 + $0xd98] sm:$0xff]  ;;  %v376_v59 = vld [vmem:[%s10642_s25 + $0x260] sm:$0xff] }
 0x21b   : > { %3101 = vmatprep.mubr.bf16.mxu0 %v887_v41  ;;  %4513 = vmatprep.mubr.bf16.mxu1 %v887_v41  ;;  %v951_v41 = vpack.c.bf16 %v583_v39, %v575_v38  ;;  %v743_v37 = vld [vmem:[%s10642_s25 + $0xdd8] sm:$0xff]  ;;  %v1022_v38 = vpack.c.bf16 %v726_v35, %v718_v34  ;;  %v9343_v35 = vld [vmem:[#allocation5 + $0x660] ss:$16 sps:$4 sm:$0xff]  }
 0x21c   : > { %v1031_v39 = vpack.c.bf16 %v743_v37, %v735_v36  ;;  %v9340_v34 = vld [vmem:[#allocation5 + $0x668] ss:$16 sps:$4 sm:$0xff]   ;;  %v9348_v36 = vld [vmem:[#allocation5 + $0x68c] ss:$16 sps:$4 sm:$0xff]   ;;  %v9351_v37 = vld [vmem:[#allocation5 + $0x684] ss:$16 sps:$4 sm:$0xff]  }
 0x222   : > { %3102 = vmatmul.mubr.bf16.gmra.mrb[36].mxu0 %v886_v48  ;;  %4514 = vmatmul.mubr.bf16.gmra.mrb[36].mxu1 %v886_v48  ;;  %v959_v48 = vpack.c.bf16 %v599_v46, %v591_v45  ;;  %v1039_v45 = vpack.c.bf16 %v759_v43, %v751_v42  ;;  %v750_v46 = vld [vmem:[%s10642_s25 + $0xe10] sm:$0xff]  ;;  %v9354_v42 = vld [vmem:[#allocation5 + $0x6ac] ss:$16 sps:$4 sm:$0xff]  }
 0x223   : > { %3111 = vmatprep.mubr.bf16.mxu0 %v895_v49  ;;  %4523 = vmatprep.mubr.bf16.mxu1 %v895_v49  ;;  %v590_v49 = vld [vmem:[%s10642_s25 + $0x910] sm:$0xff] }
 0x224   : > { %v958_v54 = vpack.c.bf16 %v598_v50, %v590_v49  ;;  %v775_v49 = vld [vmem:[%s10642_s25 + $0xed8] sm:$0xff]  ;;  %v9357_v43 = vld [vmem:[#allocation5 + $0x6a4] ss:$16 sps:$4 sm:$0xff]  }
 0x22a   : > { %3112 = vmatmul.mubr.bf16.gmra.mrb[40].mxu0 %v894_v56  ;;  %4524 = vmatmul.mubr.bf16.gmra.mrb[40].mxu1 %v894_v56  ;;  %v606_v56 = vld [vmem:[%s10642_s25 + $0x990] sm:$0xff] }
 0x22b   : > { %3121 = vmatprep.mubr.bf16.mxu0 %v903_v57  ;;  %4533 = vmatprep.mubr.bf16.mxu1 %v903_v57  ;;  %v614_v57 = vld [vmem:[%s10642_s25 + $0x9d0] sm:$0xff] }
 0x22c   : > { %v966_v60 = vpack.c.bf16 %v614_v57, %v606_v56  ;;  %v1046_v56 = vpack.c.bf16 %v774_v53, %v766_v52 }
 0x232   : > { %3122 = vmatmul.mubr.bf16.gmra.mrb[44].mxu0 %v902_v0  ;;  %4534 = vmatmul.mubr.bf16.gmra.mrb[44].mxu1 %v902_v0  ;;  %v639_v0 = vld [vmem:[%s10642_s25 + $0xa98] sm:$0xff] }
 0x233   : > { %3131 = vmatprep.mubr.bf16.mxu0 %v911_v1  ;;  %4543 = vmatprep.mubr.bf16.mxu1 %v911_v1  ;;  %v647_v1 = vld [vmem:[%s10642_s25 + $0xad8] sm:$0xff] }
 0x234   : > { %v983_v3 = vpack.c.bf16 %v647_v1, %v639_v0  ;;  %v798_v0 = vld [vmem:[%s10642_s25 + $0xf90] sm:$0xff] }
 0x235   : > { %v806_v1 = vld [vmem:[%s10642_s25 + $0xfd0] sm:$0xff] }
 0x23a   : > { %3132 = vmatmul.mubr.bf16.gmra.mrb[48].mxu0 %v910_v8  ;;  %4544 = vmatmul.mubr.bf16.gmra.mrb[48].mxu1 %v910_v8  ;;  %v982_v8 = vpack.c.bf16 %v646_v5, %v638_v4  ;;  %v1062_v4 = vpack.c.bf16 %v806_v1, %v798_v0  ;;  %v9372_v0 = vld [vmem:[#allocation5 + $0x70c] ss:$16 sps:$4 sm:$0xff]   ;;  %v9375_v1 = vld [vmem:[#allocation5 + $0x704] ss:$16 sps:$4 sm:$0xff]  }
 0x23b   : > { %3141 = vmatprep.mubr.bf16.mxu0 %v919_v9  ;;  %4553 = vmatprep.mubr.bf16.mxu1 %v919_v9  ;;  %v991_v9 = vpack.c.bf16 %v663_v7, %v655_v6  ;;  %v304_v6 = vld [vmem:[%s10642_s25 + $0x20] sm:$0xff] }
 0x23c   : > { %v312_v7 = vld [vmem:[%s10642_s25 + $0x60] sm:$0xff] }
 0x23d   : > { %v816_v10 = vpack.c.bf16 %v312_v7, %v304_v6  ;;  %v9378_v6 = vld [vmem:[#allocation5 + $0x72c] ss:$16 sps:$4 sm:$0xff]   ;;  %v9381_v7 = vld [vmem:[#allocation5 + $0x724] ss:$16 sps:$4 sm:$0xff]  }
 0x242   : > { %3142 = vmatmul.mubr.bf16.gmra.mrb[52].mxu0 %v918_v16  ;;  %4554 = vmatmul.mubr.bf16.gmra.mrb[52].mxu1 %v918_v16  ;;  %v670_v16 = vld [vmem:[%s10642_s25 + $0xb90] sm:$0xff] }
 0x243   : > { %3151 = vmatprep.mubr.bf16.mxu0 %v927_v17  ;;  %4563 = vmatprep.mubr.bf16.mxu1 %v927_v17  ;;  %v678_v17 = vld [vmem:[%s10642_s25 + $0xbd0] sm:$0xff] }
 0x244   : > { %v998_v20 = vpack.c.bf16 %v678_v17, %v670_v16  ;;  %v320_v16 = vld [vmem:[%s10642_s25 + $0xa0] sm:$0xff] }
 0x245   : > { %v328_v17 = vld [vmem:[%s10642_s25 + $0xe0] sm:$0xff] }
 0x24a   : > { %3152 = vmatmul.mubr.bf16.gmra.mrb[56].mxu0 %v926_v24  ;;  %4564 = vmatmul.mubr.bf16.gmra.mrb[56].mxu1 %v926_v24  ;;  %v703_v24 = vld [vmem:[%s10642_s25 + $0xc98] sm:$0xff] }
 0x24b   : > { %3161 = vmatprep.mubr.bf16.mxu0 %v935_v25  ;;  %4573 = vmatprep.mubr.bf16.mxu1 %v935_v25  ;;  %v711_v25 = vld [vmem:[%s10642_s25 + $0xcd8] sm:$0xff] }
 0x24c   : > { %v1015_v27 = vpack.c.bf16 %v711_v25, %v703_v24  ;;  %v824_v24 = vpack.c.bf16 %v328_v17, %v320_v16  ;;  %v9382_v17 = vld [vmem:[#allocation5 + $0x748] ss:$16 sps:$4 sm:$0xff]  }
 0x252   : > { %3162 = vmatmul.mubr.bf16.gmra.mrb[60].mxu0 %v934_v32  ;;  %4574 = vmatmul.mubr.bf16.gmra.mrb[60].mxu1 %v934_v32  ;;  %v1014_v32 = vpack.c.bf16 %v710_v29, %v702_v28  ;;  %v9342_v28 = vld [vmem:[#allocation5 + $0x66c] ss:$16 sps:$4 sm:$0xff]   ;;  %v9345_v29 = vld [vmem:[#allocation5 + $0x664] ss:$16 sps:$4 sm:$0xff]  }
 0x253   : > { %3171 = vmatprep.mubr.bf16.mxu0 %v943_v33  ;;  %4583 = vmatprep.mubr.bf16.mxu1 %v943_v33  ;;  %v1023_v33 = vpack.c.bf16 %v727_v31, %v719_v30  ;;  %v336_v30 = vld [vmem:[%s10642_s25 + $0x120] sm:$0xff] }
 0x254   : > { %v344_v31 = vld [vmem:[%s10642_s25 + $0x160] sm:$0xff] }
 0x25a   : > { %3172 = vmatmul.mubr.bf16.gmra.mrb[64].mxu0 %v942_v40  ;;  %4584 = vmatmul.mubr.bf16.gmra.mrb[64].mxu1 %v942_v40  ;;  %v734_v40 = vld [vmem:[%s10642_s25 + $0xd90] sm:$0xff] }
 0x25b   : > { %3181 = vmatprep.mubr.bf16.mxu0 %v951_v41  ;;  %4593 = vmatprep.mubr.bf16.mxu1 %v951_v41  ;;  %v742_v41 = vld [vmem:[%s10642_s25 + $0xdd0] sm:$0xff] }
 0x25c   : > { %v1030_v44 = vpack.c.bf16 %v742_v41, %v734_v40  ;;  %v9346_v40 = vld [vmem:[#allocation5 + $0x688] ss:$16 sps:$4 sm:$0xff]   ;;  %v9349_v41 = vld [vmem:[#allocation5 + $0x680] ss:$16 sps:$4 sm:$0xff]  }
 0x262   : > { %3182 = vmatmul.mubr.bf16.gmra.mrb[68].mxu0 %v950_v47  ;;  %4594 = vmatmul.mubr.bf16.gmra.mrb[68].mxu1 %v950_v47  ;;  %v758_v47 = vld [vmem:[%s10642_s25 + $0xe50] sm:$0xff] }
 0x263   : > { %3191 = vmatprep.mubr.bf16.mxu0 %v959_v48  ;;  %4603 = vmatprep.mubr.bf16.mxu1 %v959_v48  ;;  %v767_v48 = vld [vmem:[%s10642_s25 + $0xe98] sm:$0xff]  ;;  %v1038_v50 = vpack.c.bf16 %v758_v47, %v750_v46  ;;  %v369_v46 = vld [vmem:[%s10642_s25 + $0x228] sm:$0xff] }
 0x264   : > { %v1047_v51 = vpack.c.bf16 %v775_v49, %v767_v48  ;;  %v377_v47 = vld [vmem:[%s10642_s25 + $0x268] sm:$0xff]  ;;  %v9355_v49 = vld [vmem:[#allocation5 + $0x6a0] ss:$16 sps:$4 sm:$0xff]  }
 0x265   : > { %v9352_v48 = vld [vmem:[#allocation5 + $0x6a8] ss:$16 sps:$4 sm:$0xff]   ;;  %v849_v53 = vpack.c.bf16 %v377_v47, %v369_v46 }
 0x266   : > { %v465_v46 = vld [vmem:[%s10642_s25 + $0x528] sm:$0xff] }
 0x267   : > { %v473_v47 = vld [vmem:[%s10642_s25 + $0x568] sm:$0xff] }
 0x26a   : > { %3192 = vmatmul.mubr.bf16.gmra.mrb[72].mxu0 %v958_v54  ;;  %4604 = vmatmul.mubr.bf16.gmra.mrb[72].mxu1 %v958_v54  ;;  %v783_v54 = vld [vmem:[%s10642_s25 + $0xf18] sm:$0xff] }
 0x26b   : > { %3201 = vmatprep.mubr.bf16.mxu0 %v967_v55  ;;  %4613 = vmatprep.mubr.bf16.mxu1 %v967_v55  ;;  %v791_v55 = vld [vmem:[%s10642_s25 + $0xf58] sm:$0xff] }
 0x26c   : > { %v1055_v57 = vpack.c.bf16 %v791_v55, %v783_v54  ;;  %v9358_v54 = vld [vmem:[#allocation5 + $0x6c8] ss:$16 sps:$4 sm:$0xff]   ;;  %v9361_v55 = vld [vmem:[#allocation5 + $0x6c0] ss:$16 sps:$4 sm:$0xff]  }
 0x272   : > { %3202 = vmatmul.mubr.bf16.gmra.mrb[76].mxu0 %v966_v60  ;;  %4614 = vmatmul.mubr.bf16.gmra.mrb[76].mxu1 %v966_v60  ;;  %v799_v60 = vld [vmem:[%s10642_s25 + $0xf98] sm:$0xff] }
 0x273   : > { %3211 = vmatprep.mubr.bf16.mxu0 %v975_v61  ;;  %4623 = vmatprep.mubr.bf16.mxu1 %v975_v61  ;;  %v807_v61 = vld [vmem:[%s10642_s25 + $0xfd8] sm:$0xff] }
 0x274   : > { %v1063_v63 = vpack.c.bf16 %v807_v61, %v799_v60  ;;  %v385_v60 = vld [vmem:[%s10642_s25 + $0x2a8] sm:$0xff] }
 0x275   : > { %v393_v61 = vld [vmem:[%s10642_s25 + $0x2e8] sm:$0xff] }
 0x27a   : > { %3212 = vmatmul.mubr.bf16.gmra.mrb[80].mxu0 %v974_v2  ;;  %4624 = vmatmul.mubr.bf16.gmra.mrb[80].mxu1 %v974_v2  ;;  %v305_v2 = vld [vmem:[%s10642_s25 + $0x28] sm:$0xff] }
 0x27b   : > { %3221 = vmatprep.mubr.bf16.mxu0 %v983_v3  ;;  %4633 = vmatprep.mubr.bf16.mxu1 %v983_v3  ;;  %v313_v3 = vld [vmem:[%s10642_s25 + $0x68] sm:$0xff] }
 0x27c   : > { %v817_v5 = vpack.c.bf16 %v313_v3, %v305_v2  ;;  %v848_v2 = vpack.c.bf16 %v376_v59, %v368_v58  ;;  %v857_v3 = vpack.c.bf16 %v393_v61, %v385_v60  ;;  %v9400_v58 = vld [vmem:[#allocation5 + $0x7a8] ss:$16 sps:$4 sm:$0xff]   ;;  %v9402_v59 = vld [vmem:[#allocation5 + $0x7ac] ss:$16 sps:$4 sm:$0xff]   ;;  %v480_v60 = vld [vmem:[%s10642_s25 + $0x5a0] sm:$0xff] }
 0x27d   : > { %v488_v61 = vld [vmem:[%s10642_s25 + $0x5e0] sm:$0xff] }
 0x282   : > { %3222 = vmatmul.mubr.bf16.gmra.mrb[84].mxu0 %v982_v8  ;;  %4634 = vmatmul.mubr.bf16.gmra.mrb[84].mxu1 %v982_v8  ;;  %v321_v8 = vld [vmem:[%s10642_s25 + $0xa8] sm:$0xff] }
 0x283   : > { %3231 = vmatprep.mubr.bf16.mxu0 %v991_v9  ;;  %4643 = vmatprep.mubr.bf16.mxu1 %v991_v9  ;;  %v329_v9 = vld [vmem:[%s10642_s25 + $0xe8] sm:$0xff] }
 0x284   : > { %v825_v12 = vpack.c.bf16 %v329_v9, %v321_v8  ;;  %v384_v8 = vld [vmem:[%s10642_s25 + $0x2a0] sm:$0xff] }
 0x285   : > { %v392_v9 = vld [vmem:[%s10642_s25 + $0x2e0] sm:$0xff] }
 0x28a   : > { %3232 = vmatmul.mubr.bf16.gmra.mrb[88].mxu0 %v990_v14  ;;  %4644 = vmatmul.mubr.bf16.gmra.mrb[88].mxu1 %v990_v14  ;;  %v9330_v14 = vld [vmem:[#allocation5 + $0x62c] ss:$16 sps:$4 sm:$0xff]  }
 0x28b   : > { %3241 = vmatprep.mubr.bf16.mxu0 %v999_v15  ;;  %4653 = vmatprep.mubr.bf16.mxu1 %v999_v15  ;;  %v9333_v15 = vld [vmem:[#allocation5 + $0x624] ss:$16 sps:$4 sm:$0xff]  }
 0x292   : > { %3242 = vmatmul.mubr.bf16.gmra.mrb[92].mxu0 %v998_v20  ;;  %4654 = vmatmul.mubr.bf16.gmra.mrb[92].mxu1 %v998_v20  ;;  %v345_v20 = vld [vmem:[%s10642_s25 + $0x168] sm:$0xff] }
 0x293   : > { %3251 = vmatprep.mubr.bf16.mxu0 %v1007_v21  ;;  %4663 = vmatprep.mubr.bf16.mxu1 %v1007_v21  ;;  %v9331_v21 = vld [vmem:[#allocation5 + $0x620] ss:$16 sps:$4 sm:$0xff]   ;;  %v833_v25 = vpack.c.bf16 %v345_v20, %v337_v18 }
 0x294   : > { %v400_v18 = vld [vmem:[%s10642_s25 + $0x320] sm:$0xff] }
 0x295   : > { %v9385_v20 = vld [vmem:[#allocation5 + $0x740] ss:$16 sps:$4 sm:$0xff]  }
 0x29a   : > { %3252 = vmatmul.mubr.bf16.gmra.mrb[96].mxu0 %v1006_v26  ;;  %4664 = vmatmul.mubr.bf16.gmra.mrb[96].mxu1 %v1006_v26  ;;  %v9334_v26 = vld [vmem:[#allocation5 + $0x648] ss:$16 sps:$4 sm:$0xff]  }
 0x29b   : > { %3261 = vmatprep.mubr.bf16.mxu0 %v1015_v27  ;;  %4673 = vmatprep.mubr.bf16.mxu1 %v1015_v27  ;;  %v9337_v27 = vld [vmem:[#allocation5 + $0x640] ss:$16 sps:$4 sm:$0xff]  }
 0x2a2   : > { %3262 = vmatmul.mubr.bf16.gmra.mrb[100].mxu0 %v1014_v32  ;;  %4674 = vmatmul.mubr.bf16.gmra.mrb[100].mxu1 %v1014_v32  ;;  %v353_v32 = vld [vmem:[%s10642_s25 + $0x1a8] sm:$0xff] }
 0x2a3   : > { %3271 = vmatprep.mubr.bf16.mxu0 %v1023_v33  ;;  %4683 = vmatprep.mubr.bf16.mxu1 %v1023_v33  ;;  %v361_v33 = vld [vmem:[%s10642_s25 + $0x1e8] sm:$0xff] }
 0x2aa   : > { %3272 = vmatmul.mubr.bf16.gmra.mrb[104].mxu0 %v1022_v38  ;;  %4684 = vmatmul.mubr.bf16.gmra.mrb[104].mxu1 %v1022_v38  ;;  %v832_v38 = vpack.c.bf16 %v344_v31, %v336_v30  ;;  %v433_v30 = vld [vmem:[%s10642_s25 + $0x428] sm:$0xff] }
 0x2ab   : > { %3281 = vmatprep.mubr.bf16.mxu0 %v1031_v39  ;;  %4693 = vmatprep.mubr.bf16.mxu1 %v1031_v39  ;;  %v841_v39 = vpack.c.bf16 %v361_v33, %v353_v32  ;;  %v441_v31 = vld [vmem:[%s10642_s25 + $0x468] sm:$0xff] }
 0x2ac   : > { %v881_v33 = vpack.c.bf16 %v441_v31, %v433_v30  ;;  %v561_v30 = vld [vmem:[%s10642_s25 + $0x828] sm:$0xff] }
 0x2ad   : > { %v569_v31 = vld [vmem:[%s10642_s25 + $0x868] sm:$0xff] }
 0x2b2   : > { %3282 = vmatmul.mubr.bf16.gmra.mrb[108].mxu0 %v1030_v44  ;;  %4694 = vmatmul.mubr.bf16.gmra.mrb[108].mxu1 %v1030_v44  ;;  %v352_v44 = vld [vmem:[%s10642_s25 + $0x1a0] sm:$0xff] }
 0x2b3   : > { %3291 = vmatprep.mubr.bf16.mxu0 %v1039_v45  ;;  %4703 = vmatprep.mubr.bf16.mxu1 %v1039_v45  ;;  %v360_v45 = vld [vmem:[%s10642_s25 + $0x1e0] sm:$0xff] }
 0x2b4   : > { %v840_v52 = vpack.c.bf16 %v360_v45, %v352_v44  ;;  %v448_v44 = vld [vmem:[%s10642_s25 + $0x4a0] sm:$0xff] }
 0x2b5   : > { %v456_v45 = vld [vmem:[%s10642_s25 + $0x4e0] sm:$0xff] }
 0x2ba   : > { %3292 = vmatmul.mubr.bf16.gmra.mrb[112].mxu0 %v1038_v50  ;;  %4704 = vmatmul.mubr.bf16.gmra.mrb[112].mxu1 %v1038_v50  ;;  %v9360_v50 = vld [vmem:[#allocation5 + $0x6cc] ss:$16 sps:$4 sm:$0xff]  }
 0x2bb   : > { %3301 = vmatprep.mubr.bf16.mxu0 %v1047_v51  ;;  %4713 = vmatprep.mubr.bf16.mxu1 %v1047_v51  ;;  %v9363_v51 = vld [vmem:[#allocation5 + $0x6c4] ss:$16 sps:$4 sm:$0xff]  }
 0x2c2   : > { %3302 = vmatmul.mubr.bf16.gmra.mrb[116].mxu0 %v1046_v56  ;;  %4714 = vmatmul.mubr.bf16.gmra.mrb[116].mxu1 %v1046_v56  ;;  %v9366_v56 = vld [vmem:[#allocation5 + $0x6ec] ss:$16 sps:$4 sm:$0xff]  }
 0x2c3   : > { %3311 = vmatprep.mubr.bf16.mxu0 %v1055_v57  ;;  %4723 = vmatprep.mubr.bf16.mxu1 %v1055_v57  ;;  %v9369_v57 = vld [vmem:[#allocation5 + $0x6e4] ss:$16 sps:$4 sm:$0xff]  }
 0x2ca   : > { %3312 = vmatmul.mubr.bf16.gmra.mrb[120].mxu0 %v1054_v62  ;;  %4724 = vmatmul.mubr.bf16.gmra.mrb[120].mxu1 %v1054_v62  ;;  %v9364_v62 = vld [vmem:[#allocation5 + $0x6e8] ss:$16 sps:$4 sm:$0xff]  }
 0x2cb   : > { %3321 = vmatprep.mubr.bf16.mxu0 %v1063_v63  ;;  %4733 = vmatprep.mubr.bf16.mxu1 %v1063_v63  ;;  %v9367_v63 = vld [vmem:[#allocation5 + $0x6e0] ss:$16 sps:$4 sm:$0xff]  }
 0x2d2   : > { %3322 = vmatmul.mubr.bf16.gmra.mrb[124].mxu0 %v1062_v4  ;;  %4734 = vmatmul.mubr.bf16.gmra.mrb[124].mxu1 %v1062_v4  ;;  %v9370_v4 = vld [vmem:[#allocation5 + $0x708] ss:$16 sps:$4 sm:$0xff]  }
 0x2d3   : > { %3364 = vmatprep.mubr.bf16.mxu0 %v817_v5  ;;  %4776 = vmatprep.mubr.bf16.mxu1 %v817_v5  ;;  %v9373_v5 = vld [vmem:[#allocation5 + $0x700] ss:$16 sps:$4 sm:$0xff]  }
 0x2da   : > { %3365 = vmatmul.mubr.bf16.vlgmr.msra.gmra.mrb[0].mxu0 %v816_v10  ;;  %4777 = vmatmul.mubr.bf16.vlgmr.msra.gmra.mrb[0].mxu1 %v816_v10  ;;  %v401_v10 = vld [vmem:[%s10642_s25 + $0x328] sm:$0xff] }
 0x2db   : > { %5098 = vmatpush1.bf16.msra.mxu1 %v9322_v11  ;;  %3374 = vmatprep.mubr.bf16.mxu0 %v825_v12  ;;  %v409_v11 = vld [vmem:[%s10642_s25 + $0x368] sm:$0xff] }
 0x2dc   : > { %4786 = vmatprep.mubr.bf16.mxu1 %v825_v12  ;;  %3686 = vmatpush1.bf16.msra.mxu0 %v9325_v13  ;;  %v9376_v12 = vld [vmem:[#allocation5 + $0x728] ss:$16 sps:$4 sm:$0xff]   ;;  %v9379_v13 = vld [vmem:[#allocation5 + $0x720] ss:$16 sps:$4 sm:$0xff]   ;;  %v865_v16 = vpack.c.bf16 %v409_v11, %v401_v10  ;;  %v9408_v11 = vld [vmem:[#allocation5 + $0x7cc] ss:$16 sps:$4 sm:$0xff]  }
 0x2dd   : > { %5099 = vmatprep.subr.bf16.mxu1 %v9330_v14  ;;  %3687 = vmatprep.subr.bf16.mxu0 %v9333_v15  ;;  %v9384_v14 = vld [vmem:[#allocation5 + $0x74c] ss:$16 sps:$4 sm:$0xff]   ;;  %v856_v15 = vpack.c.bf16 %v392_v9, %v384_v8  ;;  %v9406_v10 = vld [vmem:[#allocation5 + $0x7c8] ss:$16 sps:$4 sm:$0xff]  }
 0x2df   : > { %5100 = vmatpush1.bf16.msra.mxu1 %v9328_v19  ;;  %v408_v19 = vld [vmem:[%s10642_s25 + $0x360] sm:$0xff] }
 0x2e0   : > { %3688 = vmatpush1.bf16.msra.mxu0 %v9331_v21  ;;  %5101 = vmatprep.subr.bf16.mxu1 %v9336_v22  ;;  %v9387_v21 = vld [vmem:[#allocation5 + $0x744] ss:$16 sps:$4 sm:$0xff]   ;;  %v417_v22 = vld [vmem:[%s10642_s25 + $0x3a8] sm:$0xff] }
 0x2e1   : > { %3689 = vmatprep.subr.bf16.mxu0 %v9339_v23  ;;  %v425_v23 = vld [vmem:[%s10642_s25 + $0x3e8] sm:$0xff] }
 0x2e2   : > { %3375 = vmatmul.mubr.bf16.gmra.mrb[4].mxu0 %v824_v24  ;;  %4787 = vmatmul.mubr.bf16.gmra.mrb[4].mxu1 %v824_v24  ;;  %v864_v24 = vpack.c.bf16 %v408_v19, %v400_v18  ;;  %v528_v18 = vld [vmem:[%s10642_s25 + $0x720] sm:$0xff] }
 0x2e3   : > { %3384 = vmatprep.mubr.bf16.mxu0 %v833_v25  ;;  %4796 = vmatprep.mubr.bf16.mxu1 %v833_v25  ;;  %v873_v25 = vpack.c.bf16 %v425_v23, %v417_v22  ;;  %v536_v19 = vld [vmem:[%s10642_s25 + $0x760] sm:$0xff]  ;;  %v545_v22 = vld [vmem:[%s10642_s25 + $0x7a8] sm:$0xff] }
 0x2e4   : > { %5102 = vmatpush1.bf16.msra.mxu1 %v9334_v26  ;;  %3690 = vmatpush1.bf16.msra.mxu0 %v9337_v27  ;;  %v9388_v26 = vld [vmem:[#allocation5 + $0x768] ss:$16 sps:$4 sm:$0xff]   ;;  %v9390_v27 = vld [vmem:[#allocation5 + $0x76c] ss:$16 sps:$4 sm:$0xff]  }
 0x2e5   : > { %5103 = vmatprep.subr.bf16.mxu1 %v9342_v28  ;;  %3691 = vmatprep.subr.bf16.mxu0 %v9345_v29  ;;  %v416_v28 = vld [vmem:[%s10642_s25 + $0x3a0] sm:$0xff]  ;;  %v553_v23 = vld [vmem:[%s10642_s25 + $0x7e8] sm:$0xff] }
 0x2e6   : > { %v424_v29 = vld [vmem:[%s10642_s25 + $0x3e0] sm:$0xff] }
 0x2e7   : > { %v872_v32 = vpack.c.bf16 %v424_v29, %v416_v28  ;;  %v544_v28 = vld [vmem:[%s10642_s25 + $0x7a0] sm:$0xff] }
 0x2e8   : > { %5104 = vmatpush1.bf16.msra.mxu1 %v9340_v34  ;;  %3692 = vmatpush1.bf16.msra.mxu0 %v9343_v35  ;;  %v432_v34 = vld [vmem:[%s10642_s25 + $0x420] sm:$0xff] }
 0x2e9   : > { %5105 = vmatprep.subr.bf16.mxu1 %v9348_v36  ;;  %3693 = vmatprep.subr.bf16.mxu0 %v9351_v37  ;;  %v440_v35 = vld [vmem:[%s10642_s25 + $0x460] sm:$0xff] }
 0x2ea   : > { %3385 = vmatmul.mubr.bf16.gmra.mrb[8].mxu0 %v832_v38  ;;  %4797 = vmatmul.mubr.bf16.gmra.mrb[8].mxu1 %v832_v38  ;;  %v9391_v36 = vld [vmem:[#allocation5 + $0x760] ss:$16 sps:$4 sm:$0xff]   ;;  %v9393_v37 = vld [vmem:[#allocation5 + $0x764] ss:$16 sps:$4 sm:$0xff]   ;;  %v449_v38 = vld [vmem:[%s10642_s25 + $0x4a8] sm:$0xff] }
 0x2eb   : > { %3394 = vmatprep.mubr.bf16.mxu0 %v841_v39  ;;  %4806 = vmatprep.mubr.bf16.mxu1 %v841_v39  ;;  %v457_v39 = vld [vmem:[%s10642_s25 + $0x4e8] sm:$0xff]  ;;  %v552_v29 = vld [vmem:[%s10642_s25 + $0x7e0] sm:$0xff] }
 0x2ec   : > { %5106 = vmatpush1.bf16.msra.mxu1 %v9346_v40  ;;  %3694 = vmatpush1.bf16.msra.mxu0 %v9349_v41  ;;  %v880_v40 = vpack.c.bf16 %v440_v35, %v432_v34  ;;  %v889_v41 = vpack.c.bf16 %v457_v39, %v449_v38  ;;  %v9415_v34 = vld [vmem:[#allocation5 + $0x7e0] ss:$16 sps:$4 sm:$0xff]   ;;  %v9417_v35 = vld [vmem:[#allocation5 + $0x7e4] ss:$16 sps:$4 sm:$0xff]   ;;  %v577_v38 = vld [vmem:[%s10642_s25 + $0x8a8] sm:$0xff] }
 0x2ed   : > { %5107 = vmatprep.subr.bf16.mxu1 %v9354_v42  ;;  %3695 = vmatprep.subr.bf16.mxu0 %v9357_v43  ;;  %v9394_v42 = vld [vmem:[#allocation5 + $0x788] ss:$16 sps:$4 sm:$0xff]   ;;  %v9396_v43 = vld [vmem:[#allocation5 + $0x78c] ss:$16 sps:$4 sm:$0xff]  }
 0x2ee   : > { %v585_v39 = vld [vmem:[%s10642_s25 + $0x8e8] sm:$0xff] }
 0x2f0   : > { %5108 = vmatpush1.bf16.msra.mxu1 %v9352_v48  ;;  %3696 = vmatpush1.bf16.msra.mxu0 %v9355_v49  ;;  %v888_v48 = vpack.c.bf16 %v456_v45, %v448_v44  ;;  %v897_v49 = vpack.c.bf16 %v473_v47, %v465_v46  ;;  %v593_v44 = vld [vmem:[%s10642_s25 + $0x928] sm:$0xff] }
 0x2f1   : > { %5109 = vmatprep.subr.bf16.mxu1 %v9360_v50  ;;  %3697 = vmatprep.subr.bf16.mxu0 %v9363_v51  ;;  %v464_v50 = vld [vmem:[%s10642_s25 + $0x520] sm:$0xff]  ;;  %v601_v45 = vld [vmem:[%s10642_s25 + $0x968] sm:$0xff] }
 0x2f2   : > { %3395 = vmatmul.mubr.bf16.gmra.mrb[12].mxu0 %v840_v52  ;;  %4807 = vmatmul.mubr.bf16.gmra.mrb[12].mxu1 %v840_v52  ;;  %v472_v51 = vld [vmem:[%s10642_s25 + $0x560] sm:$0xff]  ;;  %v961_v47 = vpack.c.bf16 %v601_v45, %v593_v44 }
 0x2f3   : > { %3404 = vmatprep.mubr.bf16.mxu0 %v849_v53  ;;  %4816 = vmatprep.mubr.bf16.mxu1 %v849_v53  ;;  %v9397_v52 = vld [vmem:[#allocation5 + $0x780] ss:$16 sps:$4 sm:$0xff]   ;;  %v9399_v53 = vld [vmem:[#allocation5 + $0x784] ss:$16 sps:$4 sm:$0xff]  }
 0x2f4   : > { %5110 = vmatpush1.bf16.msra.mxu1 %v9358_v54  ;;  %3698 = vmatpush1.bf16.msra.mxu0 %v9361_v55  ;;  %v481_v54 = vld [vmem:[%s10642_s25 + $0x5a8] sm:$0xff]  ;;  %v752_v44 = vld [vmem:[%s10642_s25 + $0xe20] sm:$0xff] }
 0x2f5   : > { %5111 = vmatprep.subr.bf16.mxu1 %v9366_v56  ;;  %3699 = vmatprep.subr.bf16.mxu0 %v9369_v57  ;;  %v489_v55 = vld [vmem:[%s10642_s25 + $0x5e8] sm:$0xff]  ;;  %v896_v56 = vpack.c.bf16 %v472_v51, %v464_v50  ;;  %v760_v45 = vld [vmem:[%s10642_s25 + $0xe60] sm:$0xff] }
 0x2f6   : > { %v905_v57 = vpack.c.bf16 %v489_v55, %v481_v54  ;;  %v609_v50 = vld [vmem:[%s10642_s25 + $0x9a8] sm:$0xff]  ;;  %v608_v54 = vld [vmem:[%s10642_s25 + $0x9a0] sm:$0xff] }
 0x2f7   : > { %v617_v51 = vld [vmem:[%s10642_s25 + $0x9e8] sm:$0xff]  ;;  %v616_v55 = vld [vmem:[%s10642_s25 + $0x9e0] sm:$0xff] }
 0x2f8   : > { %5112 = vmatpush1.bf16.msra.mxu1 %v9364_v62  ;;  %3700 = vmatpush1.bf16.msra.mxu0 %v9367_v63  ;;  %v497_v62 = vld [vmem:[%s10642_s25 + $0x628] sm:$0xff] }
 0x2f9   : > { %5113 = vmatprep.subr.bf16.mxu1 %v9372_v0  ;;  %3701 = vmatprep.subr.bf16.mxu0 %v9375_v1  ;;  %v505_v63 = vld [vmem:[%s10642_s25 + $0x668] sm:$0xff]  ;;  %v904_v0 = vpack.c.bf16 %v488_v61, %v480_v60  ;;  %v624_v60 = vld [vmem:[%s10642_s25 + $0xa20] sm:$0xff] }
 0x2fa   : > { %3405 = vmatmul.mubr.bf16.gmra.mrb[16].mxu0 %v848_v2  ;;  %4817 = vmatmul.mubr.bf16.gmra.mrb[16].mxu1 %v848_v2  ;;  %v913_v1 = vpack.c.bf16 %v505_v63, %v497_v62  ;;  %v496_v2 = vld [vmem:[%s10642_s25 + $0x620] sm:$0xff]  ;;  %v641_v62 = vld [vmem:[%s10642_s25 + $0xaa8] sm:$0xff] }
 0x2fb   : > { %3414 = vmatprep.mubr.bf16.mxu0 %v857_v3  ;;  %4826 = vmatprep.mubr.bf16.mxu1 %v857_v3  ;;  %v504_v3 = vld [vmem:[%s10642_s25 + $0x660] sm:$0xff]  ;;  %v649_v63 = vld [vmem:[%s10642_s25 + $0xae8] sm:$0xff] }
 0x2fc   : > { %5114 = vmatpush1.bf16.msra.mxu1 %v9370_v4  ;;  %3702 = vmatpush1.bf16.msra.mxu0 %v9373_v5  ;;  %v9403_v4 = vld [vmem:[#allocation5 + $0x7a0] ss:$16 sps:$4 sm:$0xff]   ;;  %v9405_v5 = vld [vmem:[#allocation5 + $0x7a4] ss:$16 sps:$4 sm:$0xff]   ;;  %v912_v8 = vpack.c.bf16 %v504_v3, %v496_v2 }
 0x2fd   : > { %5115 = vmatprep.subr.bf16.mxu1 %v9378_v6  ;;  %3703 = vmatprep.subr.bf16.mxu0 %v9381_v7  ;;  %v513_v6 = vld [vmem:[%s10642_s25 + $0x6a8] sm:$0xff]  ;;  %v632_v61 = vld [vmem:[%s10642_s25 + $0xa60] sm:$0xff] }
 0x2fe   : > { %v521_v7 = vld [vmem:[%s10642_s25 + $0x6e8] sm:$0xff]  ;;  %v640_v2 = vld [vmem:[%s10642_s25 + $0xaa0] sm:$0xff] }
 0x2ff   : > { %v921_v9 = vpack.c.bf16 %v521_v7, %v513_v6  ;;  %v648_v3 = vld [vmem:[%s10642_s25 + $0xae0] sm:$0xff] }
 0x300   : > { %5116 = vmatpush1.bf16.msra.mxu1 %v9376_v12  ;;  %3704 = vmatpush1.bf16.msra.mxu0 %v9379_v13  ;;  %v512_v12 = vld [vmem:[%s10642_s25 + $0x6a0] sm:$0xff]  ;;  %v984_v6 = vpack.c.bf16 %v648_v3, %v640_v2 }
 0x301   : > { %5117 = vmatprep.subr.bf16.mxu1 %v9384_v14  ;;  %3705 = vmatprep.subr.bf16.mxu0 %v9387_v21  ;;  %v520_v13 = vld [vmem:[%s10642_s25 + $0x6e0] sm:$0xff]  ;;  %v529_v14 = vld [vmem:[%s10642_s25 + $0x728] sm:$0xff] }
 0x302   : > { %3415 = vmatmul.mubr.bf16.gmra.mrb[20].mxu0 %v856_v15  ;;  %4827 = vmatmul.mubr.bf16.gmra.mrb[20].mxu1 %v856_v15  ;;  %v537_v15 = vld [vmem:[%s10642_s25 + $0x768] sm:$0xff]  ;;  %v9411_v21 = vld [vmem:[#allocation5 + $0x7c4] ss:$16 sps:$4 sm:$0xff]  }
 0x303   : > { %3424 = vmatprep.mubr.bf16.mxu0 %v865_v16  ;;  %4836 = vmatprep.mubr.bf16.mxu1 %v865_v16  ;;  %v920_v16 = vpack.c.bf16 %v520_v13, %v512_v12 }
 0x304   : > { %5118 = vmatpush1.bf16.msra.mxu1 %v9382_v17  ;;  %3706 = vmatpush1.bf16.msra.mxu0 %v9385_v20  ;;  %v929_v17 = vpack.c.bf16 %v537_v15, %v529_v14  ;;  %v9409_v20 = vld [vmem:[#allocation5 + $0x7c0] ss:$16 sps:$4 sm:$0xff]  }
 0x305   : > { %5119 = vmatprep.subr.bf16.mxu1 %v9390_v27  ;;  %3707 = vmatprep.subr.bf16.mxu0 %v9393_v37  ;;  %v9414_v27 = vld [vmem:[#allocation5 + $0x7ec] ss:$16 sps:$4 sm:$0xff]   ;;  %v568_v37 = vld [vmem:[%s10642_s25 + $0x860] sm:$0xff] }
 0x306   : > { %v672_v14 = vld [vmem:[%s10642_s25 + $0xba0] sm:$0xff] }
 0x307   : > { %v680_v15 = vld [vmem:[%s10642_s25 + $0xbe0] sm:$0xff] }
 0x308   : > { %5120 = vmatpush1.bf16.msra.mxu1 %v9388_v26  ;;  %3708 = vmatpush1.bf16.msra.mxu0 %v9391_v36  ;;  %v9412_v26 = vld [vmem:[#allocation5 + $0x7e8] ss:$16 sps:$4 sm:$0xff]   ;;  %v560_v36 = vld [vmem:[%s10642_s25 + $0x820] sm:$0xff] }
 0x309   : > { %5121 = vmatprep.subr.bf16.mxu1 %v9396_v43  ;;  %3709 = vmatprep.subr.bf16.mxu0 %v9399_v53  ;;  %v584_v43 = vld [vmem:[%s10642_s25 + $0x8e0] sm:$0xff]  ;;  %v969_v53 = vpack.c.bf16 %v617_v51, %v609_v50 }
 0x30a   : > { %3425 = vmatmul.mubr.bf16.gmra.mrb[24].mxu0 %v864_v24  ;;  %4837 = vmatmul.mubr.bf16.gmra.mrb[24].mxu1 %v864_v24  ;;  %v928_v24 = vpack.c.bf16 %v536_v19, %v528_v18  ;;  %v1000_v18 = vpack.c.bf16 %v680_v15, %v672_v14  ;;  %v768_v50 = vld [vmem:[%s10642_s25 + $0xea0] sm:$0xff] }
 0x30b   : > { %3434 = vmatprep.mubr.bf16.mxu0 %v873_v25  ;;  %4846 = vmatprep.mubr.bf16.mxu1 %v873_v25  ;;  %v937_v25 = vpack.c.bf16 %v553_v23, %v545_v22  ;;  %v705_v22 = vld [vmem:[%s10642_s25 + $0xca8] sm:$0xff]  ;;  %v776_v51 = vld [vmem:[%s10642_s25 + $0xee0] sm:$0xff] }
 0x30c   : > { %5122 = vmatpush1.bf16.msra.mxu1 %v9394_v42  ;;  %3710 = vmatpush1.bf16.msra.mxu0 %v9397_v52  ;;  %v576_v42 = vld [vmem:[%s10642_s25 + $0x8a0] sm:$0xff]  ;;  %v713_v23 = vld [vmem:[%s10642_s25 + $0xce8] sm:$0xff] }
 0x30d   : > { %5123 = vmatprep.subr.bf16.mxu1 %v9402_v59  ;;  %3711 = vmatprep.subr.bf16.mxu0 %v9405_v5  ;;  %v952_v46 = vpack.c.bf16 %v584_v43, %v576_v42  ;;  %v665_v5 = vld [vmem:[%s10642_s25 + $0xb68] sm:$0xff] }
 0x310   : > { %5124 = vmatpush1.bf16.msra.mxu1 %v9400_v58  ;;  %3712 = vmatpush1.bf16.msra.mxu0 %v9403_v4  ;;  %v968_v58 = vpack.c.bf16 %v616_v55, %v608_v54  ;;  %v657_v4 = vld [vmem:[%s10642_s25 + $0xb28] sm:$0xff]  ;;  %v1048_v54 = vpack.c.bf16 %v776_v51, %v768_v50 }
 0x311   : > { %5125 = vmatprep.subr.bf16.mxu1 %v9408_v11  ;;  %3713 = vmatprep.subr.bf16.mxu0 %v9411_v21  ;;  %v993_v7 = vpack.c.bf16 %v665_v5, %v657_v4  ;;  %v681_v11 = vld [vmem:[%s10642_s25 + $0xbe8] sm:$0xff]  ;;  %v696_v21 = vld [vmem:[%s10642_s25 + $0xc60] sm:$0xff]  ;;  %v306_v4 = vld [vmem:[%s10642_s25 + $0x30] sm:$0xff] }
 0x312   : > { %3435 = vmatmul.mubr.bf16.gmra.mrb[28].mxu0 %v872_v32  ;;  %4847 = vmatmul.mubr.bf16.gmra.mrb[28].mxu1 %v872_v32  ;;  %v936_v32 = vpack.c.bf16 %v552_v29, %v544_v28  ;;  %v721_v28 = vld [vmem:[%s10642_s25 + $0xd28] sm:$0xff]  ;;  %v314_v5 = vld [vmem:[%s10642_s25 + $0x70] sm:$0xff] }
 0x313   : > { %3444 = vmatprep.mubr.bf16.mxu0 %v881_v33  ;;  %4856 = vmatprep.mubr.bf16.mxu1 %v881_v33  ;;  %v945_v33 = vpack.c.bf16 %v569_v31, %v561_v30  ;;  %v729_v29 = vld [vmem:[%s10642_s25 + $0xd68] sm:$0xff] }
 0x314   : > { %5126 = vmatpush1.bf16.msra.mxu1 %v9406_v10  ;;  %3714 = vmatpush1.bf16.msra.mxu0 %v9409_v20  ;;  %v673_v10 = vld [vmem:[%s10642_s25 + $0xba8] sm:$0xff]  ;;  %v688_v20 = vld [vmem:[%s10642_s25 + $0xc20] sm:$0xff]  ;;  %v1025_v31 = vpack.c.bf16 %v729_v29, %v721_v28  ;;  %v370_v28 = vld [vmem:[%s10642_s25 + $0x230] sm:$0xff] }
 0x315   : > { %5127 = vmatprep.subr.bf16.mxu1 %v9414_v27  ;;  %3715 = vmatprep.subr.bf16.mxu0 %v9417_v35  ;;  %v1001_v13 = vpack.c.bf16 %v681_v11, %v673_v10  ;;  %v712_v27 = vld [vmem:[%s10642_s25 + $0xce0] sm:$0xff]  ;;  %v745_v35 = vld [vmem:[%s10642_s25 + $0xde8] sm:$0xff]  ;;  %v322_v10 = vld [vmem:[%s10642_s25 + $0xb0] sm:$0xff] }
 0x316   : > { %v330_v11 = vld [vmem:[%s10642_s25 + $0xf0] sm:$0xff] }
 0x317   : > { %v826_v14 = vpack.c.bf16 %v330_v11, %v322_v10  ;;  %v378_v29 = vld [vmem:[%s10642_s25 + $0x270] sm:$0xff] }
 0x318   : > { %5128 = vmatpush1.bf16.msra.mxu1 %v9412_v26  ;;  %3716 = vmatpush1.bf16.msra.mxu0 %v9415_v34  ;;  %v704_v26 = vld [vmem:[%s10642_s25 + $0xca0] sm:$0xff]  ;;  %v737_v34 = vld [vmem:[%s10642_s25 + $0xda8] sm:$0xff] }
 0x319   : > { %v1016_v30 = vpack.c.bf16 %v712_v27, %v704_v26 }
 0x31a   : > { %3445 = vmatmul.mubr.bf16.gmra.mrb[32].mxu0 %v880_v40  ;;  %4857 = vmatmul.mubr.bf16.gmra.mrb[32].mxu1 %v880_v40  ;;  %v944_v40 = vpack.c.bf16 %v568_v37, %v560_v36  ;;  %v1033_v37 = vpack.c.bf16 %v745_v35, %v737_v34  ;;  %v386_v34 = vld [vmem:[%s10642_s25 + $0x2b0] sm:$0xff] }
 0x31b   : > { %3454 = vmatprep.mubr.bf16.mxu0 %v889_v41  ;;  %4866 = vmatprep.mubr.bf16.mxu1 %v889_v41  ;;  %v953_v41 = vpack.c.bf16 %v585_v39, %v577_v38  ;;  %v736_v38 = vld [vmem:[%s10642_s25 + $0xda0] sm:$0xff]  ;;  %v394_v35 = vld [vmem:[%s10642_s25 + $0x2f0] sm:$0xff] }
 0x31c   : > { %v744_v39 = vld [vmem:[%s10642_s25 + $0xde0] sm:$0xff] }
 0x31d   : > { %v1032_v42 = vpack.c.bf16 %v744_v39, %v736_v38  ;;  %v858_v38 = vpack.c.bf16 %v394_v35, %v386_v34 }
 0x322   : > { %3455 = vmatmul.mubr.bf16.gmra.mrb[36].mxu0 %v888_v48  ;;  %4867 = vmatmul.mubr.bf16.gmra.mrb[36].mxu1 %v888_v48  ;;  %v592_v48 = vld [vmem:[%s10642_s25 + $0x920] sm:$0xff] }
 0x323   : > { %3464 = vmatprep.mubr.bf16.mxu0 %v897_v49  ;;  %4876 = vmatprep.mubr.bf16.mxu1 %v897_v49  ;;  %v600_v49 = vld [vmem:[%s10642_s25 + $0x960] sm:$0xff] }
 0x324   : > { %v960_v52 = vpack.c.bf16 %v600_v49, %v592_v48  ;;  %v1040_v48 = vpack.c.bf16 %v760_v45, %v752_v44 }
 0x32a   : > { %3465 = vmatmul.mubr.bf16.gmra.mrb[40].mxu0 %v896_v56  ;;  %4877 = vmatmul.mubr.bf16.gmra.mrb[40].mxu1 %v896_v56  ;;  %v625_v56 = vld [vmem:[%s10642_s25 + $0xa28] sm:$0xff] }
 0x32b   : > { %3474 = vmatprep.mubr.bf16.mxu0 %v905_v57  ;;  %4886 = vmatprep.mubr.bf16.mxu1 %v905_v57  ;;  %v633_v57 = vld [vmem:[%s10642_s25 + $0xa68] sm:$0xff] }
 0x32c   : > { %v977_v59 = vpack.c.bf16 %v633_v57, %v625_v56  ;;  %v784_v56 = vld [vmem:[%s10642_s25 + $0xf20] sm:$0xff] }
 0x32d   : > { %v792_v57 = vld [vmem:[%s10642_s25 + $0xf60] sm:$0xff] }
 0x332   : > { %3475 = vmatmul.mubr.bf16.gmra.mrb[44].mxu0 %v904_v0  ;;  %4887 = vmatmul.mubr.bf16.gmra.mrb[44].mxu1 %v904_v0  ;;  %v976_v0 = vpack.c.bf16 %v632_v61, %v624_v60  ;;  %v1056_v60 = vpack.c.bf16 %v792_v57, %v784_v56 }
 0x333   : > { %3484 = vmatprep.mubr.bf16.mxu0 %v913_v1  ;;  %4896 = vmatprep.mubr.bf16.mxu1 %v913_v1  ;;  %v985_v1 = vpack.c.bf16 %v649_v63, %v641_v62  ;;  %v800_v62 = vld [vmem:[%s10642_s25 + $0xfa0] sm:$0xff] }
 0x334   : > { %v808_v63 = vld [vmem:[%s10642_s25 + $0xfe0] sm:$0xff] }
 0x335   : > { %v1064_v2 = vpack.c.bf16 %v808_v63, %v800_v62 }
 0x33a   : > { %3485 = vmatmul.mubr.bf16.gmra.mrb[48].mxu0 %v912_v8  ;;  %4897 = vmatmul.mubr.bf16.gmra.mrb[48].mxu1 %v912_v8  ;;  %v656_v8 = vld [vmem:[%s10642_s25 + $0xb20] sm:$0xff] }
 0x33b   : > { %3494 = vmatprep.mubr.bf16.mxu0 %v921_v9  ;;  %4906 = vmatprep.mubr.bf16.mxu1 %v921_v9  ;;  %v664_v9 = vld [vmem:[%s10642_s25 + $0xb60] sm:$0xff] }
 0x33c   : > { %v992_v12 = vpack.c.bf16 %v664_v9, %v656_v8  ;;  %v818_v8 = vpack.c.bf16 %v314_v5, %v306_v4 }
 0x342   : > { %3495 = vmatmul.mubr.bf16.gmra.mrb[52].mxu0 %v920_v16  ;;  %4907 = vmatmul.mubr.bf16.gmra.mrb[52].mxu1 %v920_v16  ;;  %v689_v16 = vld [vmem:[%s10642_s25 + $0xc28] sm:$0xff] }
 0x343   : > { %3504 = vmatprep.mubr.bf16.mxu0 %v929_v17  ;;  %4916 = vmatprep.mubr.bf16.mxu1 %v929_v17  ;;  %v697_v17 = vld [vmem:[%s10642_s25 + $0xc68] sm:$0xff] }
 0x344   : > { %v1009_v19 = vpack.c.bf16 %v697_v17, %v689_v16  ;;  %v338_v16 = vld [vmem:[%s10642_s25 + $0x130] sm:$0xff] }
 0x345   : > { %v346_v17 = vld [vmem:[%s10642_s25 + $0x170] sm:$0xff] }
 0x34a   : > { %3505 = vmatmul.mubr.bf16.gmra.mrb[56].mxu0 %v928_v24  ;;  %4917 = vmatmul.mubr.bf16.gmra.mrb[56].mxu1 %v928_v24  ;;  %v1008_v24 = vpack.c.bf16 %v696_v21, %v688_v20  ;;  %v834_v20 = vpack.c.bf16 %v346_v17, %v338_v16 }
 0x34b   : > { %3514 = vmatprep.mubr.bf16.mxu0 %v937_v25  ;;  %4926 = vmatprep.mubr.bf16.mxu1 %v937_v25  ;;  %v1017_v25 = vpack.c.bf16 %v713_v23, %v705_v22  ;;  %v354_v22 = vld [vmem:[%s10642_s25 + $0x1b0] sm:$0xff] }
 0x34c   : > { %v362_v23 = vld [vmem:[%s10642_s25 + $0x1f0] sm:$0xff] }
 0x34d   : > { %v842_v26 = vpack.c.bf16 %v362_v23, %v354_v22 }
 0x352   : > { %3515 = vmatmul.mubr.bf16.gmra.mrb[60].mxu0 %v936_v32  ;;  %4927 = vmatmul.mubr.bf16.gmra.mrb[60].mxu1 %v936_v32  ;;  %v720_v32 = vld [vmem:[%s10642_s25 + $0xd20] sm:$0xff] }
 0x353   : > { %3524 = vmatprep.mubr.bf16.mxu0 %v945_v33  ;;  %4936 = vmatprep.mubr.bf16.mxu1 %v945_v33  ;;  %v728_v33 = vld [vmem:[%s10642_s25 + $0xd60] sm:$0xff] }
 0x354   : > { %v1024_v36 = vpack.c.bf16 %v728_v33, %v720_v32  ;;  %v850_v32 = vpack.c.bf16 %v378_v29, %v370_v28 }
 0x35a   : > { %3525 = vmatmul.mubr.bf16.gmra.mrb[64].mxu0 %v944_v40  ;;  %4937 = vmatmul.mubr.bf16.gmra.mrb[64].mxu1 %v944_v40  ;;  %v753_v40 = vld [vmem:[%s10642_s25 + $0xe28] sm:$0xff] }
 0x35b   : > { %3534 = vmatprep.mubr.bf16.mxu0 %v953_v41  ;;  %4946 = vmatprep.mubr.bf16.mxu1 %v953_v41  ;;  %v761_v41 = vld [vmem:[%s10642_s25 + $0xe68] sm:$0xff] }
 0x35c   : > { %v1041_v43 = vpack.c.bf16 %v761_v41, %v753_v40  ;;  %v402_v40 = vld [vmem:[%s10642_s25 + $0x330] sm:$0xff] }
 0x35d   : > { %v410_v41 = vld [vmem:[%s10642_s25 + $0x370] sm:$0xff] }
 0x35e   : > { %v866_v44 = vpack.c.bf16 %v410_v41, %v402_v40 }
 0x362   : > { %3535 = vmatmul.mubr.bf16.gmra.mrb[68].mxu0 %v952_v46  ;;  %4947 = vmatmul.mubr.bf16.gmra.mrb[68].mxu1 %v952_v46  ;;  %v769_v46 = vld [vmem:[%s10642_s25 + $0xea8] sm:$0xff] }
 0x363   : > { %3544 = vmatprep.mubr.bf16.mxu0 %v961_v47  ;;  %4956 = vmatprep.mubr.bf16.mxu1 %v961_v47  ;;  %v777_v47 = vld [vmem:[%s10642_s25 + $0xee8] sm:$0xff] }
 0x364   : > { %v1049_v49 = vpack.c.bf16 %v777_v47, %v769_v46  ;;  %v418_v46 = vld [vmem:[%s10642_s25 + $0x3b0] sm:$0xff] }
 0x365   : > { %v426_v47 = vld [vmem:[%s10642_s25 + $0x3f0] sm:$0xff] }
 0x366   : > { %v874_v50 = vpack.c.bf16 %v426_v47, %v418_v46 }
 0x36a   : > { %3545 = vmatmul.mubr.bf16.gmra.mrb[72].mxu0 %v960_v52  ;;  %4957 = vmatmul.mubr.bf16.gmra.mrb[72].mxu1 %v960_v52  ;;  %v785_v52 = vld [vmem:[%s10642_s25 + $0xf28] sm:$0xff] }
 0x36b   : > { %3554 = vmatprep.mubr.bf16.mxu0 %v969_v53  ;;  %4966 = vmatprep.mubr.bf16.mxu1 %v969_v53  ;;  %v793_v53 = vld [vmem:[%s10642_s25 + $0xf68] sm:$0xff] }
 0x36c   : > { %v1057_v55 = vpack.c.bf16 %v793_v53, %v785_v52  ;;  %v434_v52 = vld [vmem:[%s10642_s25 + $0x430] sm:$0xff] }
 0x36d   : > { %v442_v53 = vld [vmem:[%s10642_s25 + $0x470] sm:$0xff] }
 0x36e   : > { %v882_v56 = vpack.c.bf16 %v442_v53, %v434_v52 }
 0x372   : > { %3555 = vmatmul.mubr.bf16.gmra.mrb[76].mxu0 %v968_v58  ;;  %4967 = vmatmul.mubr.bf16.gmra.mrb[76].mxu1 %v968_v58  ;;  %v801_v58 = vld [vmem:[%s10642_s25 + $0xfa8] sm:$0xff] }
 0x373   : > { %3564 = vmatprep.mubr.bf16.mxu0 %v977_v59  ;;  %4976 = vmatprep.mubr.bf16.mxu1 %v977_v59  ;;  %v809_v59 = vld [vmem:[%s10642_s25 + $0xfe8] sm:$0xff] }
 0x374   : > { %v1065_v61 = vpack.c.bf16 %v809_v59, %v801_v58  ;;  %v450_v58 = vld [vmem:[%s10642_s25 + $0x4b0] sm:$0xff] }
 0x375   : > { %v458_v59 = vld [vmem:[%s10642_s25 + $0x4f0] sm:$0xff] }
 0x376   : > { %v890_v62 = vpack.c.bf16 %v458_v59, %v450_v58 }
 0x37a   : > { %3565 = vmatmul.mubr.bf16.gmra.mrb[80].mxu0 %v976_v0  ;;  %4977 = vmatmul.mubr.bf16.gmra.mrb[80].mxu1 %v976_v0  ;;  %v307_v0 = vld [vmem:[%s10642_s25 + $0x38] sm:$0xff] }
 0x37b   : > { %3574 = vmatprep.mubr.bf16.mxu0 %v985_v1  ;;  %4986 = vmatprep.mubr.bf16.mxu1 %v985_v1  ;;  %v315_v1 = vld [vmem:[%s10642_s25 + $0x78] sm:$0xff] }
 0x37c   : > { %v819_v3 = vpack.c.bf16 %v315_v1, %v307_v0  ;;  %v466_v0 = vld [vmem:[%s10642_s25 + $0x530] sm:$0xff] }
 0x37d   : > { %v474_v1 = vld [vmem:[%s10642_s25 + $0x570] sm:$0xff] }
 0x37e   : > { %v898_v4 = vpack.c.bf16 %v474_v1, %v466_v0 }
 0x382   : > { %3575 = vmatmul.mubr.bf16.gmra.mrb[84].mxu0 %v984_v6  ;;  %4987 = vmatmul.mubr.bf16.gmra.mrb[84].mxu1 %v984_v6  ;;  %v323_v6 = vld [vmem:[%s10642_s25 + $0xb8] sm:$0xff] }
 0x383   : > { %3584 = vmatprep.mubr.bf16.mxu0 %v993_v7  ;;  %4996 = vmatprep.mubr.bf16.mxu1 %v993_v7  ;;  %v331_v7 = vld [vmem:[%s10642_s25 + $0xf8] sm:$0xff] }
 0x384   : > { %v827_v9 = vpack.c.bf16 %v331_v7, %v323_v6  ;;  %v482_v6 = vld [vmem:[%s10642_s25 + $0x5b0] sm:$0xff] }
 0x385   : > { %v490_v7 = vld [vmem:[%s10642_s25 + $0x5f0] sm:$0xff] }
 0x386   : > { %v906_v10 = vpack.c.bf16 %v490_v7, %v482_v6 }
 0x38a   : > { %3585 = vmatmul.mubr.bf16.gmra.mrb[88].mxu0 %v992_v12  ;;  %4997 = vmatmul.mubr.bf16.gmra.mrb[88].mxu1 %v992_v12  ;;  %v339_v12 = vld [vmem:[%s10642_s25 + $0x138] sm:$0xff] }
 0x38b   : > { %3594 = vmatprep.mubr.bf16.mxu0 %v1001_v13  ;;  %5006 = vmatprep.mubr.bf16.mxu1 %v1001_v13  ;;  %v347_v13 = vld [vmem:[%s10642_s25 + $0x178] sm:$0xff] }
 0x38c   : > { %v835_v15 = vpack.c.bf16 %v347_v13, %v339_v12  ;;  %v498_v12 = vld [vmem:[%s10642_s25 + $0x630] sm:$0xff] }
 0x38d   : > { %v506_v13 = vld [vmem:[%s10642_s25 + $0x670] sm:$0xff] }
 0x38e   : > { %v914_v16 = vpack.c.bf16 %v506_v13, %v498_v12 }
 0x392   : > { %3595 = vmatmul.mubr.bf16.gmra.mrb[92].mxu0 %v1000_v18  ;;  %5007 = vmatmul.mubr.bf16.gmra.mrb[92].mxu1 %v1000_v18  ;;  %v355_v18 = vld [vmem:[%s10642_s25 + $0x1b8] sm:$0xff] }
 0x393   : > { %3604 = vmatprep.mubr.bf16.mxu0 %v1009_v19  ;;  %5016 = vmatprep.mubr.bf16.mxu1 %v1009_v19  ;;  %v363_v19 = vld [vmem:[%s10642_s25 + $0x1f8] sm:$0xff] }
 0x394   : > { %v843_v21 = vpack.c.bf16 %v363_v19, %v355_v18  ;;  %v514_v18 = vld [vmem:[%s10642_s25 + $0x6b0] sm:$0xff] }
 0x395   : > { %v522_v19 = vld [vmem:[%s10642_s25 + $0x6f0] sm:$0xff] }
 0x396   : > { %v922_v22 = vpack.c.bf16 %v522_v19, %v514_v18 }
 0x39a   : > { %3605 = vmatmul.mubr.bf16.gmra.mrb[96].mxu0 %v1008_v24  ;;  %5017 = vmatmul.mubr.bf16.gmra.mrb[96].mxu1 %v1008_v24  ;;  %v371_v24 = vld [vmem:[%s10642_s25 + $0x238] sm:$0xff] }
 0x39b   : > { %3614 = vmatprep.mubr.bf16.mxu0 %v1017_v25  ;;  %5026 = vmatprep.mubr.bf16.mxu1 %v1017_v25  ;;  %v379_v25 = vld [vmem:[%s10642_s25 + $0x278] sm:$0xff] }
 0x39c   : > { %v851_v27 = vpack.c.bf16 %v379_v25, %v371_v24  ;;  %v530_v24 = vld [vmem:[%s10642_s25 + $0x730] sm:$0xff] }
 0x39d   : > { %v538_v25 = vld [vmem:[%s10642_s25 + $0x770] sm:$0xff] }
 0x39e   : > { %v930_v28 = vpack.c.bf16 %v538_v25, %v530_v24 }
 0x3a2   : > { %3615 = vmatmul.mubr.bf16.gmra.mrb[100].mxu0 %v1016_v30  ;;  %5027 = vmatmul.mubr.bf16.gmra.mrb[100].mxu1 %v1016_v30  ;;  %v387_v30 = vld [vmem:[%s10642_s25 + $0x2b8] sm:$0xff] }
 0x3a3   : > { %3624 = vmatprep.mubr.bf16.mxu0 %v1025_v31  ;;  %5036 = vmatprep.mubr.bf16.mxu1 %v1025_v31  ;;  %v395_v31 = vld [vmem:[%s10642_s25 + $0x2f8] sm:$0xff] }
 0x3a4   : > { %v859_v33 = vpack.c.bf16 %v395_v31, %v387_v30  ;;  %v546_v30 = vld [vmem:[%s10642_s25 + $0x7b0] sm:$0xff] }
 0x3a5   : > { %v554_v31 = vld [vmem:[%s10642_s25 + $0x7f0] sm:$0xff] }
 0x3a6   : > { %v938_v34 = vpack.c.bf16 %v554_v31, %v546_v30  ;;  %v1326_v31 = vlaneseq }
 0x3aa   : > { %3625 = vmatmul.mubr.bf16.gmra.mrb[104].mxu0 %v1024_v36  ;;  %5037 = vmatmul.mubr.bf16.gmra.mrb[104].mxu1 %v1024_v36  ;;  %v403_v36 = vld [vmem:[%s10642_s25 + $0x338] sm:$0xff] }
 0x3ab   : > { %3634 = vmatprep.mubr.bf16.mxu0 %v1033_v37  ;;  %5046 = vmatprep.mubr.bf16.mxu1 %v1033_v37  ;;  %v411_v37 = vld [vmem:[%s10642_s25 + $0x378] sm:$0xff] }
 0x3ac   : > { %v867_v39 = vpack.c.bf16 %v411_v37, %v403_v36  ;;  %v562_v36 = vld [vmem:[%s10642_s25 + $0x830] sm:$0xff] }
 0x3ad   : > { %v570_v37 = vld [vmem:[%s10642_s25 + $0x870] sm:$0xff] }
 0x3ae   : > { %v946_v40 = vpack.c.bf16 %v570_v37, %v562_v36  ;;  %v739_v36 = vld [vmem:[%s10642_s25 + $0xdb8] sm:$0xff] }
 0x3af   : > { %v747_v37 = vld [vmem:[%s10642_s25 + $0xdf8] sm:$0xff] }
 0x3b2   : > { %3635 = vmatmul.mubr.bf16.gmra.mrb[108].mxu0 %v1032_v42  ;;  %5047 = vmatmul.mubr.bf16.gmra.mrb[108].mxu1 %v1032_v42  ;;  %v419_v42 = vld [vmem:[%s10642_s25 + $0x3b8] sm:$0xff] }
 0x3b3   : > { %3644 = vmatprep.mubr.bf16.mxu0 %v1041_v43  ;;  %5056 = vmatprep.mubr.bf16.mxu1 %v1041_v43  ;;  %v427_v43 = vld [vmem:[%s10642_s25 + $0x3f8] sm:$0xff] }
 0x3b4   : > { %v875_v45 = vpack.c.bf16 %v427_v43, %v419_v42  ;;  %v578_v42 = vld [vmem:[%s10642_s25 + $0x8b0] sm:$0xff] }
 0x3b5   : > { %v586_v43 = vld [vmem:[%s10642_s25 + $0x8f0] sm:$0xff] }
 0x3b6   : > { %v954_v46 = vpack.c.bf16 %v586_v43, %v578_v42  ;;  %v1035_v42 = vpack.c.bf16 %v747_v37, %v739_v36  ;;  %v787_v37 = vld [vmem:[%s10642_s25 + $0xf38] sm:$0xff] }
 0x3ba   : > { %3645 = vmatmul.mubr.bf16.gmra.mrb[112].mxu0 %v1040_v48  ;;  %5057 = vmatmul.mubr.bf16.gmra.mrb[112].mxu1 %v1040_v48  ;;  %v435_v48 = vld [vmem:[%s10642_s25 + $0x438] sm:$0xff] }
 0x3bb   : > { %3654 = vmatprep.mubr.bf16.mxu0 %v1049_v49  ;;  %5066 = vmatprep.mubr.bf16.mxu1 %v1049_v49  ;;  %v443_v49 = vld [vmem:[%s10642_s25 + $0x478] sm:$0xff] }
 0x3bc   : > { %v883_v51 = vpack.c.bf16 %v443_v49, %v435_v48  ;;  %v594_v48 = vld [vmem:[%s10642_s25 + $0x930] sm:$0xff] }
 0x3bd   : > { %v602_v49 = vld [vmem:[%s10642_s25 + $0x970] sm:$0xff] }
 0x3be   : > { %v962_v52 = vpack.c.bf16 %v602_v49, %v594_v48  ;;  %v755_v49 = vld [vmem:[%s10642_s25 + $0xe38] sm:$0xff] }
 0x3c2   : > { %3655 = vmatmul.mubr.bf16.gmra.mrb[116].mxu0 %v1048_v54  ;;  %5067 = vmatmul.mubr.bf16.gmra.mrb[116].mxu1 %v1048_v54  ;;  %v451_v54 = vld [vmem:[%s10642_s25 + $0x4b8] sm:$0xff] }
 0x3c3   : > { %3664 = vmatprep.mubr.bf16.mxu0 %v1057_v55  ;;  %5076 = vmatprep.mubr.bf16.mxu1 %v1057_v55  ;;  %v459_v55 = vld [vmem:[%s10642_s25 + $0x4f8] sm:$0xff] }
 0x3c4   : > { %v891_v57 = vpack.c.bf16 %v459_v55, %v451_v54  ;;  %v610_v54 = vld [vmem:[%s10642_s25 + $0x9b0] sm:$0xff] }
 0x3c5   : > { %v618_v55 = vld [vmem:[%s10642_s25 + $0x9f0] sm:$0xff] }
 0x3c6   : > { %v970_v58 = vpack.c.bf16 %v618_v55, %v610_v54 }
 0x3ca   : > { %3665 = vmatmul.mubr.bf16.gmra.mrb[120].mxu0 %v1056_v60  ;;  %5077 = vmatmul.mubr.bf16.gmra.mrb[120].mxu1 %v1056_v60  ;;  %v467_v60 = vld [vmem:[%s10642_s25 + $0x538] sm:$0xff] }
 0x3cb   : > { %3674 = vmatprep.mubr.bf16.mxu0 %v1065_v61  ;;  %5086 = vmatprep.mubr.bf16.mxu1 %v1065_v61  ;;  %v475_v61 = vld [vmem:[%s10642_s25 + $0x578] sm:$0xff] }
 0x3cc   : > { %v899_v63 = vpack.c.bf16 %v475_v61, %v467_v60  ;;  %v626_v60 = vld [vmem:[%s10642_s25 + $0xa30] sm:$0xff] }
 0x3cd   : > { %v634_v61 = vld [vmem:[%s10642_s25 + $0xa70] sm:$0xff] }
 0x3ce   : > { %v978_v0 = vpack.c.bf16 %v634_v61, %v626_v60 }
 0x3d2   : > { %3675 = vmatmul.mubr.bf16.gmra.mrb[124].mxu0 %v1064_v2  ;;  %5087 = vmatmul.mubr.bf16.gmra.mrb[124].mxu1 %v1064_v2  ;;  %v483_v2 = vld [vmem:[%s10642_s25 + $0x5b8] sm:$0xff] }
 0x3d3   : > { %3717 = vmatprep.mubr.bf16.mxu0 %v819_v3  ;;  %5129 = vmatprep.mubr.bf16.mxu1 %v819_v3  ;;  %v491_v3 = vld [vmem:[%s10642_s25 + $0x5f8] sm:$0xff] }
 0x3d4   : > { %v907_v5 = vpack.c.bf16 %v491_v3, %v483_v2  ;;  %v642_v2 = vld [vmem:[%s10642_s25 + $0xab0] sm:$0xff] }
 0x3d5   : > { %v650_v3 = vld [vmem:[%s10642_s25 + $0xaf0] sm:$0xff] }
 0x3d6   : > { %v986_v6 = vpack.c.bf16 %v650_v3, %v642_v2 }
 0x3da   : > { %3718 = vmatmul.mubr.bf16.vlgmr.msra.gmra.mrb[0].mxu0 %v818_v8  ;;  %5130 = vmatmul.mubr.bf16.vlgmr.msra.gmra.mrb[0].mxu1 %v818_v8  ;;  %v499_v8 = vld [vmem:[%s10642_s25 + $0x638] sm:$0xff] }
 0x3db   : > { %3727 = vmatprep.mubr.bf16.mxu0 %v827_v9  ;;  %5139 = vmatprep.mubr.bf16.mxu1 %v827_v9  ;;  %v507_v9 = vld [vmem:[%s10642_s25 + $0x678] sm:$0xff] }
 0x3dc   : > { %v915_v11 = vpack.c.bf16 %v507_v9, %v499_v8  ;;  %v658_v8 = vld [vmem:[%s10642_s25 + $0xb30] sm:$0xff] }
 0x3dd   : > { %v666_v9 = vld [vmem:[%s10642_s25 + $0xb70] sm:$0xff] }
 0x3de   : > { %v994_v12 = vpack.c.bf16 %v666_v9, %v658_v8  ;;  %v754_v8 = vld [vmem:[%s10642_s25 + $0xe30] sm:$0xff] }
 0x3df   : > { %v762_v9 = vld [vmem:[%s10642_s25 + $0xe70] sm:$0xff] }
 0x3e2   : > { %3728 = vmatmul.mubr.bf16.gmra.mrb[4].mxu0 %v826_v14  ;;  %5140 = vmatmul.mubr.bf16.gmra.mrb[4].mxu1 %v826_v14  ;;  %v515_v14 = vld [vmem:[%s10642_s25 + $0x6b8] sm:$0xff] }
 0x3e3   : > { %3737 = vmatprep.mubr.bf16.mxu0 %v835_v15  ;;  %5149 = vmatprep.mubr.bf16.mxu1 %v835_v15  ;;  %v523_v15 = vld [vmem:[%s10642_s25 + $0x6f8] sm:$0xff] }
 0x3e4   : > { %v923_v17 = vpack.c.bf16 %v523_v15, %v515_v14  ;;  %v674_v14 = vld [vmem:[%s10642_s25 + $0xbb0] sm:$0xff] }
 0x3e5   : > { %v682_v15 = vld [vmem:[%s10642_s25 + $0xbf0] sm:$0xff] }
 0x3e6   : > { %v1002_v18 = vpack.c.bf16 %v682_v15, %v674_v14 }
 0x3ea   : > { %3738 = vmatmul.mubr.bf16.gmra.mrb[8].mxu0 %v834_v20  ;;  %5150 = vmatmul.mubr.bf16.gmra.mrb[8].mxu1 %v834_v20  ;;  %v531_v20 = vld [vmem:[%s10642_s25 + $0x738] sm:$0xff] }
 0x3eb   : > { %3747 = vmatprep.mubr.bf16.mxu0 %v843_v21  ;;  %5159 = vmatprep.mubr.bf16.mxu1 %v843_v21  ;;  %v539_v21 = vld [vmem:[%s10642_s25 + $0x778] sm:$0xff] }
 0x3ec   : > { %v931_v23 = vpack.c.bf16 %v539_v21, %v531_v20  ;;  %v690_v20 = vld [vmem:[%s10642_s25 + $0xc30] sm:$0xff] }
 0x3ed   : > { %v698_v21 = vld [vmem:[%s10642_s25 + $0xc70] sm:$0xff] }
 0x3ee   : > { %v1010_v24 = vpack.c.bf16 %v698_v21, %v690_v20 }
 0x3f2   : > { %3748 = vmatmul.mubr.bf16.gmra.mrb[12].mxu0 %v842_v26  ;;  %5160 = vmatmul.mubr.bf16.gmra.mrb[12].mxu1 %v842_v26  ;;  %v547_v26 = vld [vmem:[%s10642_s25 + $0x7b8] sm:$0xff] }
 0x3f3   : > { %3757 = vmatprep.mubr.bf16.mxu0 %v851_v27  ;;  %5169 = vmatprep.mubr.bf16.mxu1 %v851_v27  ;;  %v555_v27 = vld [vmem:[%s10642_s25 + $0x7f8] sm:$0xff] }
 0x3f4   : > { %v939_v29 = vpack.c.bf16 %v555_v27, %v547_v26  ;;  %v706_v26 = vld [vmem:[%s10642_s25 + $0xcb0] sm:$0xff] }
 0x3f5   : > { %v714_v27 = vld [vmem:[%s10642_s25 + $0xcf0] sm:$0xff] }
 0x3f6   : > { %v1018_v30 = vpack.c.bf16 %v714_v27, %v706_v26 }
 0x3fa   : > { %3758 = vmatmul.mubr.bf16.gmra.mrb[16].mxu0 %v850_v32  ;;  %5170 = vmatmul.mubr.bf16.gmra.mrb[16].mxu1 %v850_v32  ;;  %v563_v32 = vld [vmem:[%s10642_s25 + $0x838] sm:$0xff] }
 0x3fb   : > { %3767 = vmatprep.mubr.bf16.mxu0 %v859_v33  ;;  %5179 = vmatprep.mubr.bf16.mxu1 %v859_v33  ;;  %v571_v33 = vld [vmem:[%s10642_s25 + $0x878] sm:$0xff] }
 0x3fc   : > { %v947_v35 = vpack.c.bf16 %v571_v33, %v563_v32  ;;  %v11146_v33 = vshrl.u32 %v1326_v31, 7 }
 0x3fe   : > { %v1328_v43 = vsub.s32 0, %v11146_v33  ;;  %v1332_v48 = vsub.s32 1, %v11146_v33 }
 0x402   : > { %3768 = vmatmul.mubr.bf16.gmra.mrb[20].mxu0 %v858_v38  ;;  %5180 = vmatmul.mubr.bf16.gmra.mrb[20].mxu1 %v858_v38  ;;  %v579_v38 = vld [vmem:[%s10642_s25 + $0x8b8] sm:$0xff] }
 0x403   : > { %3777 = vmatprep.mubr.bf16.mxu0 %v867_v39  ;;  %5189 = vmatprep.mubr.bf16.mxu1 %v867_v39  ;;  %v587_v39 = vld [vmem:[%s10642_s25 + $0x8f8] sm:$0xff] }
 0x404   : > { %v955_v41 = vpack.c.bf16 %v587_v39, %v579_v38  ;;  %v1336_v39 = vsub.s32 2, %v11146_v33 }
 0x40a   : > { %3778 = vmatmul.mubr.bf16.gmra.mrb[24].mxu0 %v866_v44  ;;  %5190 = vmatmul.mubr.bf16.gmra.mrb[24].mxu1 %v866_v44  ;;  %v595_v44 = vld [vmem:[%s10642_s25 + $0x938] sm:$0xff] }
 0x40b   : > { %3787 = vmatprep.mubr.bf16.mxu0 %v875_v45  ;;  %5199 = vmatprep.mubr.bf16.mxu1 %v875_v45  ;;  %v603_v45 = vld [vmem:[%s10642_s25 + $0x978] sm:$0xff] }
 0x40c   : > { %v963_v47 = vpack.c.bf16 %v603_v45, %v595_v44 }
 0x412   : > { %3788 = vmatmul.mubr.bf16.gmra.mrb[28].mxu0 %v874_v50  ;;  %5200 = vmatmul.mubr.bf16.gmra.mrb[28].mxu1 %v874_v50  ;;  %v611_v50 = vld [vmem:[%s10642_s25 + $0x9b8] sm:$0xff] }
 0x413   : > { %3797 = vmatprep.mubr.bf16.mxu0 %v883_v51  ;;  %5209 = vmatprep.mubr.bf16.mxu1 %v883_v51  ;;  %v619_v51 = vld [vmem:[%s10642_s25 + $0x9f8] sm:$0xff] }
 0x414   : > { %v971_v53 = vpack.c.bf16 %v619_v51, %v611_v50  ;;  %v763_v50 = vld [vmem:[%s10642_s25 + $0xe78] sm:$0xff] }
 0x415   : > { %v1043_v61 = vpack.c.bf16 %v763_v50, %v755_v49 }
 0x41a   : > { %3798 = vmatmul.mubr.bf16.gmra.mrb[32].mxu0 %v882_v56  ;;  %5210 = vmatmul.mubr.bf16.gmra.mrb[32].mxu1 %v882_v56  ;;  %v627_v56 = vld [vmem:[%s10642_s25 + $0xa38] sm:$0xff] }
 0x41b   : > { %3807 = vmatprep.mubr.bf16.mxu0 %v891_v57  ;;  %5219 = vmatprep.mubr.bf16.mxu1 %v891_v57  ;;  %v635_v57 = vld [vmem:[%s10642_s25 + $0xa78] sm:$0xff] }
 0x41c   : > { %v979_v59 = vpack.c.bf16 %v635_v57, %v627_v56 }
 0x422   : > { %3808 = vmatmul.mubr.bf16.gmra.mrb[36].mxu0 %v890_v62  ;;  %5220 = vmatmul.mubr.bf16.gmra.mrb[36].mxu1 %v890_v62  ;;  %v643_v62 = vld [vmem:[%s10642_s25 + $0xab8] sm:$0xff] }
 0x423   : > { %3817 = vmatprep.mubr.bf16.mxu0 %v899_v63  ;;  %5229 = vmatprep.mubr.bf16.mxu1 %v899_v63  ;;  %v651_v63 = vld [vmem:[%s10642_s25 + $0xaf8] sm:$0xff] }
 0x424   : > { %v987_v1 = vpack.c.bf16 %v651_v63, %v643_v62 }
 0x42a   : > { %3818 = vmatmul.mubr.bf16.gmra.mrb[40].mxu0 %v898_v4  ;;  %5230 = vmatmul.mubr.bf16.gmra.mrb[40].mxu1 %v898_v4  ;;  %v659_v4 = vld [vmem:[%s10642_s25 + $0xb38] sm:$0xff] }
 0x42b   : > { %3827 = vmatprep.mubr.bf16.mxu0 %v907_v5  ;;  %5239 = vmatprep.mubr.bf16.mxu1 %v907_v5  ;;  %v667_v5 = vld [vmem:[%s10642_s25 + $0xb78] sm:$0xff] }
 0x42c   : > { %v995_v7 = vpack.c.bf16 %v667_v5, %v659_v4 }
 0x432   : > { %3828 = vmatmul.mubr.bf16.gmra.mrb[44].mxu0 %v906_v10  ;;  %5240 = vmatmul.mubr.bf16.gmra.mrb[44].mxu1 %v906_v10  ;;  %v675_v10 = vld [vmem:[%s10642_s25 + $0xbb8] sm:$0xff] }
 0x433   : > { %3837 = vmatprep.mubr.bf16.mxu0 %v915_v11  ;;  %5249 = vmatprep.mubr.bf16.mxu1 %v915_v11  ;;  %v683_v11 = vld [vmem:[%s10642_s25 + $0xbf8] sm:$0xff] }
 0x434   : > { %v1003_v13 = vpack.c.bf16 %v683_v11, %v675_v10  ;;  %v771_v11 = vld [vmem:[%s10642_s25 + $0xeb8] sm:$0xff] }
 0x43a   : > { %3838 = vmatmul.mubr.bf16.gmra.mrb[48].mxu0 %v914_v16  ;;  %5250 = vmatmul.mubr.bf16.gmra.mrb[48].mxu1 %v914_v16  ;;  %v691_v16 = vld [vmem:[%s10642_s25 + $0xc38] sm:$0xff] }
 0x43b   : > { %3847 = vmatprep.mubr.bf16.mxu0 %v923_v17  ;;  %5259 = vmatprep.mubr.bf16.mxu1 %v923_v17  ;;  %v699_v17 = vld [vmem:[%s10642_s25 + $0xc78] sm:$0xff] }
 0x43c   : > { %v1011_v19 = vpack.c.bf16 %v699_v17, %v691_v16 }
 0x442   : > { %3848 = vmatmul.mubr.bf16.gmra.mrb[52].mxu0 %v922_v22  ;;  %5260 = vmatmul.mubr.bf16.gmra.mrb[52].mxu1 %v922_v22  ;;  %v707_v22 = vld [vmem:[%s10642_s25 + $0xcb8] sm:$0xff] }
 0x443   : > { %3857 = vmatprep.mubr.bf16.mxu0 %v931_v23  ;;  %5269 = vmatprep.mubr.bf16.mxu1 %v931_v23  ;;  %v715_v23 = vld [vmem:[%s10642_s25 + $0xcf8] sm:$0xff] }
 0x444   : > { %v1019_v25 = vpack.c.bf16 %v715_v23, %v707_v22 }
 0x44a   : > { %3858 = vmatmul.mubr.bf16.gmra.mrb[56].mxu0 %v930_v28  ;;  %5270 = vmatmul.mubr.bf16.gmra.mrb[56].mxu1 %v930_v28  ;;  %v723_v28 = vld [vmem:[%s10642_s25 + $0xd38] sm:$0xff] }
 0x44b   : > { %3867 = vmatprep.mubr.bf16.mxu0 %v939_v29  ;;  %5279 = vmatprep.mubr.bf16.mxu1 %v939_v29  ;;  %v731_v29 = vld [vmem:[%s10642_s25 + $0xd78] sm:$0xff] }
 0x44c   : > { %v1027_v32 = vpack.c.bf16 %v731_v29, %v723_v28 }
 0x452   : > { %3868 = vmatmul.mubr.bf16.gmra.mrb[60].mxu0 %v938_v34  ;;  %5280 = vmatmul.mubr.bf16.gmra.mrb[60].mxu1 %v938_v34  ;;  %v722_v34 = vld [vmem:[%s10642_s25 + $0xd30] sm:$0xff] }
 0x453   : > { %3877 = vmatprep.mubr.bf16.mxu0 %v947_v35  ;;  %5289 = vmatprep.mubr.bf16.mxu1 %v947_v35  ;;  %v730_v35 = vld [vmem:[%s10642_s25 + $0xd70] sm:$0xff] }
 0x454   : > { %v1026_v38 = vpack.c.bf16 %v730_v35, %v722_v34  ;;  %v770_v34 = vld [vmem:[%s10642_s25 + $0xeb0] sm:$0xff] }
 0x455   : > { %v778_v35 = vld [vmem:[%s10642_s25 + $0xef0] sm:$0xff] }
 0x45a   : > { %3878 = vmatmul.mubr.bf16.gmra.mrb[64].mxu0 %v946_v40  ;;  %5290 = vmatmul.mubr.bf16.gmra.mrb[64].mxu1 %v946_v40  ;;  %v1324_v40 = vld [vmem:[#allocation7] sm:$0xf] }
 0x45b   : > { %3887 = vmatprep.mubr.bf16.mxu0 %v955_v41  ;;  %5299 = vmatprep.mubr.bf16.mxu1 %v955_v41  ;;  %v1340_v41 = vsub.s32 3, %v11146_v33  ;;  %v11155_v44 = vrot.slane %v1324_v40, %v1336_v39  ;;  %v11172_v63 = vrot.slane %v1324_v40, %v1332_v48 }
 0x45d   : > { %v11157_v45 = vrot.slane %v1324_v40, %v1340_v41 }
 0x462   : > { %3888 = vmatmul.mubr.bf16.gmra.mrb[68].mxu0 %v954_v46  ;;  %5300 = vmatmul.mubr.bf16.gmra.mrb[68].mxu1 %v954_v46  ;;  %v738_v46 = vld [vmem:[%s10642_s25 + $0xdb0] sm:$0xff] }
 0x463   : > { %3897 = vmatprep.mubr.bf16.mxu0 %v963_v47  ;;  %5309 = vmatprep.mubr.bf16.mxu1 %v963_v47  ;;  %v746_v47 = vld [vmem:[%s10642_s25 + $0xdf0] sm:$0xff] }
 0x464   : > { %v1034_v57 = vpack.c.bf16 %v746_v47, %v738_v46 }
 0x46a   : > { %3898 = vmatmul.mubr.bf16.gmra.mrb[72].mxu0 %v962_v52  ;;  %5310 = vmatmul.mubr.bf16.gmra.mrb[72].mxu1 %v962_v52 }
 0x46b   : > { %3907 = vmatprep.mubr.bf16.mxu0 %v971_v53  ;;  %5319 = vmatprep.mubr.bf16.mxu1 %v971_v53  ;;  %v11166_v53 = vrot.slane %v1324_v40, %v1328_v43 }
 0x472   : > { %3908 = vmatmul.mubr.bf16.gmra.mrb[76].mxu0 %v970_v58  ;;  %5320 = vmatmul.mubr.bf16.gmra.mrb[76].mxu1 %v970_v58 }
 0x473   : > { %3917 = vmatprep.mubr.bf16.mxu0 %v979_v59  ;;  %5329 = vmatprep.mubr.bf16.mxu1 %v979_v59 }
 0x47a   : > { %3918 = vmatmul.mubr.bf16.gmra.mrb[80].mxu0 %v978_v0  ;;  %5330 = vmatmul.mubr.bf16.gmra.mrb[80].mxu1 %v978_v0 }
 0x47b   : > { %3927 = vmatprep.mubr.bf16.mxu0 %v987_v1  ;;  %5339 = vmatprep.mubr.bf16.mxu1 %v987_v1 }
 0x482   : > { %3928 = vmatmul.mubr.bf16.gmra.mrb[84].mxu0 %v986_v6  ;;  %5340 = vmatmul.mubr.bf16.gmra.mrb[84].mxu1 %v986_v6 }
 0x483   : > { %3937 = vmatprep.mubr.bf16.mxu0 %v995_v7  ;;  %5349 = vmatprep.mubr.bf16.mxu1 %v995_v7 }
 0x48a   : > { %3938 = vmatmul.mubr.bf16.gmra.mrb[88].mxu0 %v994_v12  ;;  %5350 = vmatmul.mubr.bf16.gmra.mrb[88].mxu1 %v994_v12  ;;  %v779_v12 = vld [vmem:[%s10642_s25 + $0xef8] sm:$0xff] }
 0x48b   : > { %3947 = vmatprep.mubr.bf16.mxu0 %v1003_v13  ;;  %5359 = vmatprep.mubr.bf16.mxu1 %v1003_v13  ;;  %v1051_v23 = vpack.c.bf16 %v779_v12, %v771_v11  ;;  %v803_v11 = vld [vmem:[%s10642_s25 + $0xfb8] sm:$0xff] }
 0x48c   : > { %v811_v12 = vld [vmem:[%s10642_s25 + $0xff8] sm:$0xff] }
 0x492   : > { %3948 = vmatmul.mubr.bf16.gmra.mrb[92].mxu0 %v1002_v18  ;;  %5360 = vmatmul.mubr.bf16.gmra.mrb[92].mxu1 %v1002_v18 }
 0x493   : > { %3957 = vmatprep.mubr.bf16.mxu0 %v1011_v19  ;;  %5369 = vmatprep.mubr.bf16.mxu1 %v1011_v19  ;;  %v1042_v19 = vpack.c.bf16 %v762_v9, %v754_v8  ;;  %v794_v8 = vld [vmem:[%s10642_s25 + $0xf70] sm:$0xff] }
 0x49a   : > { %3958 = vmatmul.mubr.bf16.gmra.mrb[96].mxu0 %v1010_v24  ;;  %5370 = vmatmul.mubr.bf16.gmra.mrb[96].mxu1 %v1010_v24 }
 0x49b   : > { %3967 = vmatprep.mubr.bf16.mxu0 %v1019_v25  ;;  %5379 = vmatprep.mubr.bf16.mxu1 %v1019_v25 }
 0x4a2   : > { %3968 = vmatmul.mubr.bf16.gmra.mrb[100].mxu0 %v1018_v30  ;;  %5380 = vmatmul.mubr.bf16.gmra.mrb[100].mxu1 %v1018_v30 }
 0x4a3   : > { %3977 = vmatprep.mubr.bf16.mxu0 %v1027_v32  ;;  %5389 = vmatprep.mubr.bf16.mxu1 %v1027_v32 }
 0x4aa   : > { %3978 = vmatmul.mubr.bf16.gmra.mrb[104].mxu0 %v1026_v38  ;;  %5390 = vmatmul.mubr.bf16.gmra.mrb[104].mxu1 %v1026_v38  ;;  %v795_v38 = vld [vmem:[%s10642_s25 + $0xf78] sm:$0xff] }
 0x4ab   : > { %3987 = vmatprep.mubr.bf16.mxu0 %v1035_v42  ;;  %5399 = vmatprep.mubr.bf16.mxu1 %v1035_v42 }
 0x4ad   : > { %v3719_v51 = vpop.f32.mrb[0].mxu0  ;;  %v5131_v52 = vpop.f32.mrb[0].mxu1 }
 0x4ae   : > { %v8006_v54 = vadd.f32 %v5131_v52, %v11155_v44  ;;  %v3721_v55 = vpop.f32.mrb[1].mxu0  ;;  %v5133_v56 = vpop.f32.mrb[1].mxu1  ;;  %v7878_v5 = vadd.f32 %v3719_v51, %v11166_v53  ;;  %v1050_v52 = vpack.c.bf16 %v778_v35, %v770_v34 }
 0x4af   : > { %v8007_v58 = vadd.f32 %v5133_v56, %v11157_v45  ;;  %v3723_v59 = vpop.f32.mrb[2].mxu0  ;;  %v5135_v60 = vpop.f32.mrb[2].mxu1  ;;  %v7879_v10 = vadd.f32 %v3721_v55, %v11172_v63 }
 0x4b0   : > { %v7726_v62 = vmul.f32 -1.442695, %v8006_v54  ;;  %v8008_v0 = vadd.f32 %v5135_v60, %v11155_v44  ;;  %v3725_v1 = vpop.f32.mrb[3].mxu0  ;;  %v5137_v2 = vpop.f32.mrb[3].mxu1  ;;  %v7880_v13 = vadd.f32 %v3723_v59, %v11166_v53 }
 0x4b1   : > { %v7727_v3 = vmul.f32 -1.442695, %v8007_v58  ;;  %v8009_v4 = vadd.f32 %v5137_v2, %v11157_v45  ;;  %v7881_v24 = vadd.f32 %v3725_v1, %v11172_v63  ;;  %v1059_v58 = vpack.c.bf16 %v795_v38, %v787_v37 }
 0x4b2   : > { %9418 = vpow2.f32 %v7726_v62  ;;  %v7728_v6 = vmul.f32 -1.442695, %v8008_v0  ;;  %3988 = vmatmul.mubr.bf16.gmra.mrb[108].mxu0 %v1034_v57  ;;  %5400 = vmatmul.mubr.bf16.gmra.mrb[108].mxu1 %v1034_v57 }
 0x4b3   : > { %9420 = vpow2.f32 %v7727_v3  ;;  %v7729_v7 = vmul.f32 -1.442695, %v8009_v4  ;;  %3997 = vmatprep.mubr.bf16.mxu0 %v1043_v61  ;;  %5409 = vmatprep.mubr.bf16.mxu1 %v1043_v61 }
 0x4b4   : > { %9422 = vpow2.f32 %v7728_v6 }
 0x4b5   : > { %v3729_v14 = vpop.f32.mrb[4].mxu0  ;;  %v5141_v15 = vpop.f32.mrb[4].mxu1  ;;  %9424 = vtanh.f32 %v7878_v5 }
 0x4b6   : > { %v8010_v16 = vadd.f32 %v5141_v15, %v11155_v44  ;;  %v3731_v17 = vpop.f32.mrb[5].mxu0  ;;  %v5143_v18 = vpop.f32.mrb[5].mxu1  ;;  %9426 = vpow2.f32 %v7729_v7  ;;  %v7882_v31 = vadd.f32 %v3729_v14, %v11166_v53  ;;  %v786_v7 = vld [vmem:[%s10642_s25 + $0xf30] sm:$0xff] }
 0x4b7   : > { %v8011_v20 = vadd.f32 %v5143_v18, %v11157_v45  ;;  %v3733_v21 = vpop.f32.mrb[6].mxu0  ;;  %v5145_v22 = vpop.f32.mrb[6].mxu1  ;;  %9428 = vtanh.f32 %v7879_v10  ;;  %v7883_v55 = vadd.f32 %v3731_v17, %v11172_v63 }
 0x4b8   : > { %v7730_v25 = vmul.f32 -1.442695, %v8010_v16  ;;  %v8012_v26 = vadd.f32 %v5145_v22, %v11155_v44  ;;  %v11187_v27 = vpop.f32.mrb[7].mxu0  ;;  %v5147_v28 = vpop.f32.mrb[7].mxu1  ;;  %9430 = vtanh.f32 %v7880_v13  ;;  %v7884_v5 = vadd.f32 %v3733_v21, %v11166_v53  ;;  %v6474_v13 = vld [vmem:[#allocation8] sm:$0x3] }
 0x4b9   : > { %v7731_v29 = vmul.f32 -1.442695, %v8011_v20  ;;  %v8013_v30 = vadd.f32 %v5147_v28, %v11157_v45  ;;  %v7885_v38 = vadd.f32 %v11187_v27, %v11172_v63 }
 0x4ba   : > { %9432 = vpow2.f32 %v7730_v25  ;;  %v7732_v32 = vmul.f32 -1.442695, %v8012_v26  ;;  %3998 = vmatmul.mubr.bf16.gmra.mrb[112].mxu0 %v1042_v19  ;;  %5410 = vmatmul.mubr.bf16.gmra.mrb[112].mxu1 %v1042_v19 }
 0x4bb   : > { %9434 = vpow2.f32 %v7731_v29  ;;  %4007 = vmatprep.mubr.bf16.mxu0 %v1051_v23  ;;  %5419 = vmatprep.mubr.bf16.mxu1 %v1051_v23  ;;  %v7733_v41 = vmul.f32 -1.442695, %v8013_v30  ;;  %v1058_v23 = vpack.c.bf16 %v794_v8, %v786_v7  ;;  %v1067_v29 = vpack.c.bf16 %v811_v12, %v803_v11 }
 0x4bc   : > { %v9419_v36 = vpop.eup %9418  ;;  %9436 = vtanh.f32 %v7881_v24 }
 0x4bd   : > { %v9421_v39 = vpop.eup %9420  ;;  %v5962_v40 = vadd.f32 1.0, %v9419_v36  ;;  %9438 = vpow2.f32 %v7732_v32  ;;  %v11195_v42 = vpop.f32.mrb[8].mxu0  ;;  %v11229_v36 = vrot.slane %v6474_v13, %v1328_v43 }
 0x4be   : > { %v5151_v46 = vpop.f32.mrb[8].mxu1  ;;  %v5963_v47 = vadd.f32 1.0, %v9421_v39  ;;  %9440 = vtanh.f32 %v7882_v31  ;;  %v11198_v50 = vpop.f32.mrb[9].mxu0 }
 0x4bf   : > { %v8014_v49 = vadd.f32 %v5151_v46, %v11155_v44  ;;  %v5153_v51 = vpop.f32.mrb[9].mxu1  ;;  %v9423_v54 = vpop.eup %9422  ;;  %9442 = vrcp.f32 %v5962_v40  ;;  %v11236_v40 = vrot.slane %v6474_v13, %v1332_v48 }
 0x4c0   : > { %v11201_v56 = vpop.f32.mrb[10].mxu0  ;;  %v5155_v57 = vpop.f32.mrb[10].mxu1  ;;  %9444 = vrcp.f32 %v5963_v47  ;;  %v5964_v60 = vadd.f32 1.0, %v9423_v54  ;;  %v8015_v2 = vadd.f32 %v5153_v51, %v11157_v45  ;;  %v7886_v47 = vadd.f32 %v11195_v42, %v11166_v53  ;;  %v802_v51 = vld [vmem:[%s10642_s25 + $0xfb0] sm:$0xff] }
 0x4c1   : > { %v9425_v59 = vpop.eup %9424  ;;  %v11203_v61 = vpop.f32.mrb[11].mxu0  ;;  %9446 = vpow2.f32 %v7733_v41  ;;  %v7734_v1 = vmul.f32 -1.442695, %v8014_v49  ;;  %v8016_v10 = vadd.f32 %v5155_v57, %v11155_v44 }
 0x4c2   : > { %v5157_v62 = vpop.f32.mrb[11].mxu1  ;;  %v9427_v0 = vpop.eup %9426  ;;  %9448 = vrcp.f32 %v5964_v60  ;;  %4008 = vmatmul.mubr.bf16.gmra.mrb[116].mxu0 %v1050_v52  ;;  %5420 = vmatmul.mubr.bf16.gmra.mrb[116].mxu1 %v1050_v52  ;;  %v7735_v16 = vmul.f32 -1.442695, %v8015_v2  ;;  %v810_v52 = vld [vmem:[%s10642_s25 + $0xff0] sm:$0xff] }
 0x4c3   : > { %v9429_v3 = vpop.eup %9428  ;;  %v5965_v4 = vadd.f32 1.0, %v9427_v0  ;;  %9450 = vtanh.f32 %v7883_v55  ;;  %4017 = vmatprep.mubr.bf16.mxu0 %v1059_v58  ;;  %5429 = vmatprep.mubr.bf16.mxu1 %v1059_v58  ;;  %v8017_v25 = vadd.f32 %v5157_v62, %v11157_v45  ;;  %v7736_v32 = vmul.f32 -1.442695, %v8016_v10 }
 0x4c4   : > { %v11207_v6 = vpop.eup %9430 }
 0x4c5   : > { %v9433_v9 = vpop.eup %9432  ;;  %9452 = vrcp.f32 %v5965_v4  ;;  %v11214_v17 = vpop.f32.mrb[12].mxu0  ;;  %v7737_v49 = vmul.f32 -1.442695, %v8017_v25 }
 0x4c6   : > { %v9435_v14 = vpop.eup %9434  ;;  %v5966_v15 = vadd.f32 1.0, %v9433_v9  ;;  %9454 = vpow2.f32 %v7734_v1  ;;  %v5161_v18 = vpop.f32.mrb[12].mxu1 }
 0x4c7   : > { %v11216_v19 = vpop.eup %9436  ;;  %v5967_v20 = vadd.f32 1.0, %v9435_v14  ;;  %9456 = vtanh.f32 %v7884_v5  ;;  %v11218_v21 = vpop.f32.mrb[13].mxu0  ;;  %v8018_v39 = vadd.f32 %v5161_v18, %v11155_v44  ;;  %v7887_v5 = vadd.f32 %v11198_v50, %v11172_v63 }
 0x4c8   : > { %v5163_v22 = vpop.f32.mrb[13].mxu1  ;;  %v9439_v24 = vpop.eup %9438  ;;  %9458 = vrcp.f32 %v5966_v15  ;;  %v7888_v50 = vadd.f32 %v11201_v56, %v11166_v53 }
 0x4c9   : > { %v11221_v26 = vpop.f32.mrb[14].mxu0  ;;  %v5165_v28 = vpop.f32.mrb[14].mxu1  ;;  %9460 = vrcp.f32 %v5967_v20  ;;  %v5968_v31 = vadd.f32 1.0, %v9439_v24  ;;  %v8019_v33 = vadd.f32 %v5163_v22, %v11157_v45  ;;  %v7738_v58 = vmul.f32 -1.442695, %v8018_v39 }
 0x4ca   : > { %v11223_v30 = vpop.eup %9440  ;;  %v11225_v34 = vpop.f32.mrb[15].mxu0  ;;  %9462 = vpow2.f32 %v7735_v16  ;;  %4018 = vmatmul.mubr.bf16.gmra.mrb[120].mxu0 %v1058_v23  ;;  %5430 = vmatmul.mubr.bf16.gmra.mrb[120].mxu1 %v1058_v23  ;;  %v8020_v7 = vadd.f32 %v5165_v28, %v11155_v44 }
 0x4cb   : > { %v5167_v35 = vpop.f32.mrb[15].mxu1  ;;  %v9443_v37 = vpop.eup %9442  ;;  %9464 = vrcp.f32 %v5968_v31  ;;  %4027 = vmatprep.mubr.bf16.mxu0 %v1067_v29  ;;  %5439 = vmatprep.mubr.bf16.mxu1 %v1067_v29  ;;  %v7739_v12 = vmul.f32 -1.442695, %v8019_v33  ;;  %v7889_v31 = vadd.f32 %v11203_v61, %v11172_v63 }
 0x4cc   : > { %v9445_v41 = vpop.eup %9444  ;;  %v6346_v46 = vmul.f32 %v9443_v37, %v9425_v59  ;;  %9466 = vpow2.f32 %v7736_v32  ;;  %v8021_v16 = vadd.f32 %v5167_v35, %v11157_v45  ;;  %v7740_v24 = vmul.f32 -1.442695, %v8020_v7 }
 0x4cd   : > { %v9447_v43 = vpop.eup %9446  ;;  %v6347_v27 = vmul.f32 %v9445_v41, %v9429_v3  ;;  %9468 = vtanh.f32 %v7885_v38  ;;  %v11244_v59 = vpop.f32.mrb[16].mxu0  ;;  %v1066_v3 = vpack.c.bf16 %v810_v52, %v802_v51  ;;  %v7890_v51 = vadd.f32 %v11214_v17, %v11166_v53 }
 0x4ce   : > { %v9449_v54 = vpop.eup %9448  ;;  %v5969_v55 = vadd.f32 1.0, %v9447_v43  ;;  %v6486_v48 = vmul.f32 %v11229_v36, %v6346_v46  ;;  %v5171_v60 = vpop.f32.mrb[16].mxu1  ;;  %v7741_v35 = vmul.f32 -1.442695, %v8021_v16  ;;  %v7891_v17 = vadd.f32 %v11218_v21, %v11172_v63 }
 0x4cf   : > { %v9451_v57 = vpop.eup %9450  ;;  %v6487_v42 = vmul.f32 %v11236_v40, %v6347_v27  ;;  %v6348_v62 = vmul.f32 %v9449_v54, %v11207_v6  ;;  %v11248_v1 = vpop.f32.mrb[17].mxu0 }
 0x4d0   : > { %v9453_v0 = vpop.eup %9452  ;;  %9470 = vrcp.f32 %v5969_v55  ;;  %v5173_v2 = vpop.f32.mrb[17].mxu1 }
 0x4d1   : > { %v9455_v4 = vpop.eup %9454  ;;  %9472 = vpow2.f32 %v7737_v49  ;;  %v11253_v8 = vpop.f32.mrb[18].mxu0  ;;  %v6614_v10 = vadd.f32 %v6487_v42, %v6486_v48  ;;  %v6349_v20 = vmul.f32 %v9453_v0, %v11216_v19  ;;  %v6488_v22 = vmul.f32 %v11229_v36, %v6348_v62 }
 0x4d2   : > { %v11255_v9 = vpop.f32.mrb[18].mxu1  ;;  %v9457_v11 = vpop.eup %9456  ;;  %9474 = vtanh.f32 %v7886_v47  ;;  %v5970_v6 = vadd.f32 1.0, %v9455_v4  ;;  %4028 = vmatmul.mubr.bf16.gmra.mrb[124].mxu0 %v1066_v3  ;;  %5440 = vmatmul.mubr.bf16.gmra.mrb[124].mxu1 %v1066_v3  ;;  %v8022_v19 = vadd.f32 %v5171_v60, %v11155_v44  ;;  %v8023_v33 = vadd.f32 %v5173_v2, %v11157_v45 }
 0x4d3   : > { %v11257_v13 = vpop.f32.mrb[19].mxu0  ;;  %v11259_v14 = vpop.f32.mrb[19].mxu1  ;;  %9476 = vpow2.f32 %v7738_v58  ;;  %6615 = vadd.xlane.f32.xlu0 %v6614_v10  ;;  %v6489_v32 = vmul.f32 %v11236_v40, %v6349_v20  ;;  %v8024_v2 = vadd.f32 %v11255_v9, %v11155_v44  ;;  %v7892_v9 = vadd.f32 %v11221_v26, %v11166_v53 }
 0x4d4   : > { %v9459_v15 = vpop.eup %9458  ;;  %9478 = vrcp.f32 %v5970_v6  ;;  %v7742_v60 = vmul.f32 -1.442695, %v8022_v19 }
 0x4d5   : > { %v9461_v18 = vpop.eup %9460  ;;  %9480 = vtanh.f32 %v7887_v5  ;;  %v6350_v25 = vmul.f32 %v9459_v15, %v11223_v30  ;;  %v11271_v37 = vpop.f32.mrb[20].mxu0  ;;  %v6617_v30 = vadd.f32 %v6489_v32, %v6488_v22 }
 0x4d6   : > { %v9463_v23 = vpop.eup %9462  ;;  %v6351_v28 = vmul.f32 %v9461_v18, %v9451_v57  ;;  %9482 = vpow2.f32 %v7739_v12  ;;  %v11273_v38 = vpop.f32.mrb[20].mxu1  ;;  %v8025_v18 = vadd.f32 %v11259_v14, %v11157_v45 }
 0x4d7   : > { %v9465_v29 = vpop.eup %9464  ;;  %v5971_v56 = vadd.f32 1.0, %v9463_v23  ;;  %9484 = vtanh.f32 %v7888_v50  ;;  %v11275_v46 = vpop.f32.mrb[21].mxu0  ;;  %v6490_v61 = vmul.f32 %v11229_v36, %v6350_v25  ;;  %6618 = vadd.xlane.f32.xlu0 %v6617_v30  ;;  %v7744_v25 = vmul.f32 -1.442695, %v8024_v2 }
 0x4d8   : > { %v6352_v39 = vmul.f32 %v9465_v29, %v9457_v11  ;;  %v9467_v41 = vpop.eup %9466  ;;  %v11277_v43 = vpop.f32.mrb[21].mxu1  ;;  %v6491_v47 = vmul.f32 %v11236_v40, %v6351_v28  ;;  %v7743_v11 = vmul.f32 -1.442695, %v8023_v33  ;;  %v8026_v19 = vadd.f32 %v11273_v38, %v11155_v44 }
 0x4d9   : > { %9486 = vrcp.f32 %v5971_v56  ;;  %v9469_v49 = vpop.eup %9468  ;;  %v5972_v27 = vadd.f32 1.0, %v9467_v41  ;;  %v11283_v52 = vpop.f32.mrb[22].mxu0  ;;  %v7745_v30 = vmul.f32 -1.442695, %v8025_v18 }
 0x4da   : > { %9488 = vpow2.f32 %v7740_v24  ;;  %v11285_v54 = vpop.f32.mrb[22].mxu1  ;;  %v9471_v55 = vpop.eup %9470  ;;  %v6620_v0 = vadd.f32 %v6491_v47, %v6490_v61  ;;  %v6492_v5 = vmul.f32 %v11229_v36, %v6352_v39 }
 0x4db   : > { %9490 = vtanh.f32 %v7889_v31  ;;  %v11288_v48 = vpop.f32.mrb[23].mxu0  ;;  %v11290_v57 = vpop.f32.mrb[23].mxu1  ;;  %v6353_v4 = vmul.f32 %v9471_v55, %v9469_v49  ;;  %v7894_v49 = vadd.f32 %v11244_v59, %v11166_v53 }
 0x4dc   : > { %v9473_v58 = vpop.eup %9472  ;;  %9492 = vrcp.f32 %v5972_v27  ;;  %6621 = vadd.xlane.f32.xlu1 %v6620_v0 }
 0x4dd   : > { %v9475_v42 = vpop.eup %9474  ;;  %v5973_v62 = vadd.f32 1.0, %v9473_v58  ;;  %9494 = vpow2.f32 %v7741_v35  ;;  %v11297_v12 = vpop.f32.mrb[24].mxu0  ;;  %v6493_v15 = vmul.f32 %v11236_v40, %v6353_v4  ;;  %v7893_v35 = vadd.f32 %v11225_v34, %v11172_v63 }
 0x4de   : > { %v9477_v3 = vpop.eup %9476  ;;  %9496 = vtanh.f32 %v7890_v51  ;;  %v11299_v21 = vpop.f32.mrb[24].mxu1  ;;  %v8027_v34 = vadd.f32 %v11277_v43, %v11157_v45  ;;  %v8028_v4 = vadd.f32 %v11285_v54, %v11155_v44  ;;  %v8029_v54 = vadd.f32 %v11290_v57, %v11157_v45 }
 0x4df   : > { %v9479_v7 = vpop.eup %9478  ;;  %9498 = vrcp.f32 %v5973_v62  ;;  %v5974_v10 = vadd.f32 1.0, %v9477_v3  ;;  %v11306_v20 = vpop.f32.mrb[25].mxu0  ;;  %v6623_v28 = vadd.f32 %v6493_v15, %v6492_v5  ;;  %v7897_v57 = vadd.f32 %v11257_v13, %v11172_v63 }
 0x4e0   : > { %v9481_v6 = vpop.eup %9480  ;;  %9500 = vpow2.f32 %v7742_v60  ;;  %v6354_v50 = vmul.f32 %v9479_v7, %v9475_v42  ;;  %v11308_v22 = vpop.f32.mrb[25].mxu1  ;;  %v7746_v60 = vmul.f32 -1.442695, %v8026_v19  ;;  %v7747_v15 = vmul.f32 -1.442695, %v8027_v34 }
 0x4e1   : > { %v9483_v16 = vpop.eup %9482  ;;  %9502 = vtanh.f32 %v7891_v17  ;;  %v11310_v29 = vpop.f32.mrb[26].mxu0  ;;  %6624 = vadd.xlane.f32.xlu1 %v6623_v28  ;;  %v7895_v17 = vadd.f32 %v11248_v1, %v11172_v63 }
 0x4e2   : > { %v9485_v23 = vpop.eup %9484  ;;  %9504 = vrcp.f32 %v5974_v10  ;;  %v5975_v24 = vadd.f32 1.0, %v9483_v16  ;;  %v11312_v56 = vpop.f32.mrb[26].mxu1  ;;  %v6494_v27 = vmul.f32 %v11229_v36, %v6354_v50 }
 0x4e3   : > { %v9487_v31 = vpop.eup %9486  ;;  %9506 = vpow2.f32 %v7743_v11  ;;  %v11314_v32 = vpop.f32.mrb[27].mxu0 }
 0x4e4   : > { %v11316_v26 = vpop.f32.mrb[27].mxu1  ;;  %v9489_v14 = vpop.eup %9488  ;;  %9508 = vrcp.f32 %v5975_v24  ;;  %v6355_v61 = vmul.f32 %v9487_v31, %v9481_v6  ;;  %v7896_v24 = vadd.f32 %v11253_v8, %v11166_v53  ;;  %v7748_v31 = vmul.f32 -1.442695, %v8028_v4 }
 0x4e5   : > { %v9491_v39 = vpop.eup %9490  ;;  %9510 = vtanh.f32 %v7892_v9  ;;  %v5976_v41 = vadd.f32 1.0, %v9489_v14  ;;  %v11328_v42 = vpop.f32.mrb[28].mxu0 }
 0x4e6   : > { %v9493_v47 = vpop.eup %9492  ;;  %9512 = vpow2.f32 %v7744_v25  ;;  %v6495_v38 = vmul.f32 %v11236_v40, %v6355_v61  ;;  %v11330_v62 = vpop.f32.mrb[28].mxu1  ;;  %v8030_v61 = vadd.f32 %v11299_v21, %v11155_v44 }
 0x4e7   : > { %v9495_v51 = vpop.eup %9494  ;;  %9514 = vrcp.f32 %v5976_v41  ;;  %v6356_v55 = vmul.f32 %v9493_v47, %v9485_v23  ;;  %v11334_v3 = vpop.f32.mrb[29].mxu0 }
 0x4e8   : > { %v9497_v33 = vpop.eup %9496  ;;  %9516 = vtanh.f32 %v7893_v35  ;;  %v5977_v58 = vadd.f32 1.0, %v9495_v51  ;;  %v6626_v0 = vadd.f32 %v6495_v38, %v6494_v27  ;;  %v11336_v43 = vpop.f32.mrb[29].mxu1 }
 0x4e9   : > { %v9499_v59 = vpop.eup %9498  ;;  %9518 = vpow2.f32 %v7745_v30  ;;  %v6496_v7 = vmul.f32 %v11229_v36, %v6356_v55  ;;  %v11341_v10 = vpop.f32.mrb[30].mxu0  ;;  %v7749_v30 = vmul.f32 -1.442695, %v8029_v54 }
 0x4ea   : > { %v9501_v2 = vpop.eup %9500  ;;  %9520 = vrcp.f32 %v5977_v58  ;;  %v6357_v5 = vmul.f32 %v9499_v59, %v9491_v39  ;;  %v11343_v11 = vpop.f32.mrb[30].mxu1  ;;  %6627 = vadd.xlane.f32.xlu0 %v6626_v0  ;;  %v7898_v59 = vadd.f32 %v11271_v37, %v11166_v53  ;;  %v7899_v37 = vadd.f32 %v11275_v46, %v11172_v63 }
 0x4eb   : > { %v9503_v6 = vpop.eup %9502  ;;  %9522 = vtanh.f32 %v7894_v49  ;;  %v5978_v1 = vadd.f32 1.0, %v9501_v2  ;;  %v11345_v50 = vpop.f32.mrb[31].mxu0  ;;  %v7900_v46 = vadd.f32 %v11283_v52, %v11166_v53 }
 0x4ec   : > { %v11347_v16 = vpop.f32.mrb[31].mxu1  ;;  %v9505_v9 = vpop.eup %9504  ;;  %9524 = vpow2.f32 %v7746_v60  ;;  %v6497_v18 = vmul.f32 %v11236_v40, %v6357_v5 }
 0x4ed   : > { %v9507_v23 = vpop.eup %9506  ;;  %9526 = vrcp.f32 %v5978_v1  ;;  %v6358_v19 = vmul.f32 %v9505_v9, %v9497_v33  ;;  %v11358_v8 = vpop.f32.mrb[32].mxu0 }
 0x4ee   : > { %v9509_v25 = vpop.eup %9508  ;;  %9528 = vtanh.f32 %v7895_v17  ;;  %v5979_v28 = vadd.f32 1.0, %v9507_v23  ;;  %v6629_v14 = vadd.f32 %v6497_v18, %v6496_v7  ;;  %v11360_v47 = vpop.f32.mrb[32].mxu1  ;;  %v8031_v17 = vadd.f32 %v11308_v22, %v11157_v45 }
 0x4ef   : > { %v9511_v35 = vpop.eup %9510  ;;  %9530 = vpow2.f32 %v7747_v15  ;;  %v6359_v39 = vmul.f32 %v9509_v25, %v9503_v6  ;;  %v6498_v51 = vmul.f32 %v11229_v36, %v6358_v19  ;;  %v11364_v38 = vpop.f32.mrb[33].mxu0  ;;  %v7750_v6 = vmul.f32 -1.442695, %v8030_v61 }
 0x4f0   : > { %v9513_v41 = vpop.eup %9512  ;;  %9532 = vrcp.f32 %v5979_v28  ;;  %6630 = vadd.xlane.f32.xlu1 %v6629_v14  ;;  %v11366_v55 = vpop.f32.mrb[33].mxu1  ;;  %v8032_v22 = vadd.f32 %v11312_v56, %v11155_v44  ;;  %v8033_v56 = vadd.f32 %v11316_v26, %v11157_v45 }
 0x4f1   : > { %v9515_v49 = vpop.eup %9514  ;;  %9534 = vtanh.f32 %v7896_v24  ;;  %v5980_v27 = vadd.f32 1.0, %v9513_v41  ;;  %v6499_v34 = vmul.f32 %v11236_v40, %v6359_v39  ;;  %v11368_v21 = vpop.f32.mrb[34].mxu0  ;;  %v7751_v24 = vmul.f32 -1.442695, %v8031_v17 }
 0x4f2   : > { %v9517_v13 = vpop.eup %9516  ;;  %9536 = vpow2.f32 %v7748_v31  ;;  %v6360_v33 = vmul.f32 %v9515_v49, %v9511_v35  ;;  %v11370_v58 = vpop.f32.mrb[34].mxu1  ;;  %v7752_v49 = vmul.f32 -1.442695, %v8032_v22  ;;  %v8034_v17 = vadd.f32 %v11330_v62, %v11155_v44 }
 0x4f3   : > { %v9519_v60 = vpop.eup %9518  ;;  %9538 = vrcp.f32 %v5980_v27  ;;  %v6632_v0 = vadd.f32 %v6499_v34, %v6498_v51  ;;  %v11376_v2 = vpop.f32.mrb[35].mxu0 }
 0x4f4   : > { %v11378_v4 = vpop.f32.mrb[35].mxu1  ;;  %v9521_v5 = vpop.eup %9520  ;;  %9540 = vtanh.f32 %v7897_v57  ;;  %v5981_v7 = vadd.f32 1.0, %v9519_v60  ;;  %v6500_v9 = vmul.f32 %v11229_v36, %v6360_v33 }
 0x4f5   : > { %v9523_v1 = vpop.eup %9522  ;;  %9542 = vpow2.f32 %v7749_v30  ;;  %6633 = vadd.xlane.f32.xlu0 %v6632_v0  ;;  %v6361_v15 = vmul.f32 %v9521_v5, %v9517_v13  ;;  %v11386_v14 = vpop.f32.mrb[36].mxu0 }
 0x4f6   : > { %v9525_v54 = vpop.eup %9524  ;;  %9544 = vrcp.f32 %v5981_v7  ;;  %v11388_v35 = vpop.f32.mrb[36].mxu1  ;;  %v7753_v7 = vmul.f32 -1.442695, %v8033_v56  ;;  %v8036_v56 = vadd.f32 %v11343_v11, %v11155_v44  ;;  %v7904_v11 = vadd.f32 %v11310_v29, %v11166_v53 }
 0x4f7   : > { %v9527_v18 = vpop.eup %9526  ;;  %9546 = vtanh.f32 %v7898_v59  ;;  %v5982_v23 = vadd.f32 1.0, %v9525_v54  ;;  %v6501_v25 = vmul.f32 %v11236_v40, %v6361_v15  ;;  %v11394_v41 = vpop.f32.mrb[37].mxu0  ;;  %v7901_v59 = vadd.f32 %v11288_v48, %v11172_v63 }
 0x4f8   : > { %v9529_v28 = vpop.eup %9528  ;;  %9548 = vpow2.f32 %v7750_v6  ;;  %v6362_v31 = vmul.f32 %v9527_v18, %v9523_v1  ;;  %v11396_v57 = vpop.f32.mrb[37].mxu1  ;;  %v7902_v54 = vadd.f32 %v11297_v12, %v11166_v53  ;;  %v8035_v48 = vadd.f32 %v11336_v43, %v11157_v45 }
 0x4f9   : > { %v9531_v19 = vpop.eup %9530  ;;  %9550 = vrcp.f32 %v5982_v23  ;;  %v6635_v39 = vadd.f32 %v6501_v25, %v6500_v9  ;;  %v11398_v27 = vpop.f32.mrb[38].mxu0  ;;  %v7754_v18 = vmul.f32 -1.442695, %v8034_v17  ;;  %v8038_v29 = vadd.f32 %v11360_v47, %v11155_v44 }
 0x4fa   : > { %v9533_v30 = vpop.eup %9532  ;;  %9552 = vtanh.f32 %v7899_v37  ;;  %v5983_v61 = vadd.f32 1.0, %v9531_v19  ;;  %v11400_v51 = vpop.f32.mrb[38].mxu1  ;;  %v6502_v13 = vmul.f32 %v11229_v36, %v6362_v31 }
 0x4fb   : > { %v9535_v34 = vpop.eup %9534  ;;  %9554 = vpow2.f32 %v7751_v24  ;;  %6636 = vadd.xlane.f32.xlu1 %v6635_v39  ;;  %v6363_v52 = vmul.f32 %v9533_v30, %v9529_v28  ;;  %v11403_v26 = vpop.f32.mrb[39].mxu0 }
 0x4fc   : > { %v11405_v33 = vpop.f32.mrb[39].mxu1  ;;  %v9537_v60 = vpop.eup %9536  ;;  %9556 = vrcp.f32 %v5983_v61 }
 0x4fd   : > { %v9539_v0 = vpop.eup %9538  ;;  %9558 = vtanh.f32 %v7900_v46  ;;  %v5984_v5 = vadd.f32 1.0, %v9537_v60  ;;  %v6503_v6 = vmul.f32 %v11236_v40, %v6363_v52  ;;  %v11416_v23 = vpop.f32.mrb[40].mxu0  ;;  %v7903_v46 = vadd.f32 %v11306_v20, %v11172_v63 }
 0x4fe   : > { %v9541_v1 = vpop.eup %9540  ;;  %9560 = vpow2.f32 %v7752_v49  ;;  %v6364_v15 = vmul.f32 %v9539_v0, %v9535_v34  ;;  %v11418_v24 = vpop.f32.mrb[40].mxu1  ;;  %v7755_v34 = vmul.f32 -1.442695, %v8035_v48  ;;  %v8037_v0 = vadd.f32 %v11347_v16, %v11157_v45 }
 0x4ff   : > { %v9543_v9 = vpop.eup %9542  ;;  %9562 = vrcp.f32 %v5984_v5  ;;  %v6638_v37 = vadd.f32 %v6503_v6, %v6502_v13  ;;  %v11421_v19 = vpop.f32.mrb[41].mxu0 }
 0x500   : > { %v9545_v22 = vpop.eup %9544  ;;  %9564 = vtanh.f32 %v7901_v59  ;;  %v5985_v62 = vadd.f32 1.0, %v9543_v9  ;;  %v6504_v31 = vmul.f32 %v11229_v36, %v6364_v15  ;;  %v11423_v12 = vpop.f32.mrb[41].mxu1 }
 0x501   : > { %v9547_v25 = vpop.eup %9546  ;;  %9566 = vpow2.f32 %v7753_v7  ;;  %6639 = vadd.xlane.f32.xlu0 %v6638_v37  ;;  %v6365_v28 = vmul.f32 %v9545_v22, %v9541_v1  ;;  %v11429_v39 = vpop.f32.mrb[42].mxu0  ;;  %v7756_v1 = vmul.f32 -1.442695, %v8036_v56  ;;  %v7905_v37 = vadd.f32 %v11314_v32, %v11172_v63 }
 0x502   : > { %v9549_v43 = vpop.eup %9548  ;;  %9568 = vrcp.f32 %v5985_v62  ;;  %v11431_v30 = vpop.f32.mrb[42].mxu1 }
 0x503   : > { %v9551_v61 = vpop.eup %9550  ;;  %9570 = vtanh.f32 %v7902_v54  ;;  %v5986_v49 = vadd.f32 1.0, %v9549_v43  ;;  %v6505_v52 = vmul.f32 %v11236_v40, %v6365_v28  ;;  %v11434_v13 = vpop.f32.mrb[43].mxu0 }
 0x504   : > { %v11436_v60 = vpop.f32.mrb[43].mxu1  ;;  %v9553_v59 = vpop.eup %9552  ;;  %9572 = vpow2.f32 %v7754_v18  ;;  %v6366_v20 = vmul.f32 %v9551_v61, %v9547_v25  ;;  %v7757_v25 = vmul.f32 -1.442695, %v8037_v0  ;;  %v7758_v0 = vmul.f32 -1.442695, %v8038_v29 }
 0x505   : > { %v9555_v17 = vpop.eup %9554  ;;  %9574 = vrcp.f32 %v5986_v49  ;;  %v6641_v5 = vadd.f32 %v6505_v52, %v6504_v31  ;;  %v11447_v16 = vpop.f32.mrb[44].mxu0  ;;  %v7906_v49 = vadd.f32 %v11328_v42, %v11166_v53  ;;  %v7907_v42 = vadd.f32 %v11334_v3, %v11172_v63 }
 0x506   : > { %v9557_v7 = vpop.eup %9556  ;;  %9576 = vtanh.f32 %v7903_v46  ;;  %v5987_v6 = vadd.f32 1.0, %v9555_v17  ;;  %v6506_v54 = vmul.f32 %v11229_v36, %v6366_v20  ;;  %v11449_v22 = vpop.f32.mrb[44].mxu1  ;;  %v7908_v3 = vadd.f32 %v11341_v10, %v11166_v53 }
 0x507   : > { %v9559_v15 = vpop.eup %9558  ;;  %9578 = vpow2.f32 %v7755_v34  ;;  %6642 = vadd.xlane.f32.xlu1 %v6641_v5  ;;  %v6367_v9 = vmul.f32 %v9557_v7, %v9553_v59  ;;  %v11452_v31 = vpop.f32.mrb[45].mxu0  ;;  %v8039_v34 = vadd.f32 %v11366_v55, %v11157_v45  ;;  %v8040_v55 = vadd.f32 %v11370_v58, %v11155_v44 }
 0x508   : > { %v9561_v48 = vpop.eup %9560  ;;  %9580 = vrcp.f32 %v5987_v6  ;;  %v11454_v43 = vpop.f32.mrb[45].mxu1  ;;  %v8041_v58 = vadd.f32 %v11378_v4, %v11157_v45 }
 0x509   : > { %v9563_v62 = vpop.eup %9562  ;;  %9582 = vtanh.f32 %v7904_v11  ;;  %v5988_v18 = vadd.f32 1.0, %v9561_v48  ;;  %v6507_v28 = vmul.f32 %v11236_v40, %v6367_v9  ;;  %v11456_v56 = vpop.f32.mrb[46].mxu0 }
 0x50a   : > { %v9565_v46 = vpop.eup %9564  ;;  %9584 = vpow2.f32 %v7756_v1  ;;  %v6368_v32 = vmul.f32 %v9563_v62, %v9559_v15  ;;  %v11458_v47 = vpop.f32.mrb[46].mxu1 }
 0x50b   : > { %v9567_v61 = vpop.eup %9566  ;;  %9586 = vrcp.f32 %v5988_v18  ;;  %v6644_v52 = vadd.f32 %v6507_v28, %v6506_v54  ;;  %v11464_v59 = vpop.f32.mrb[47].mxu0  ;;  %v7759_v54 = vmul.f32 -1.442695, %v8039_v34  ;;  %v7760_v34 = vmul.f32 -1.442695, %v8040_v55 }
 0x50c   : > { %v11466_v20 = vpop.f32.mrb[47].mxu1  ;;  %v9569_v17 = vpop.eup %9568  ;;  %9588 = vtanh.f32 %v7905_v37  ;;  %v5989_v11 = vadd.f32 1.0, %v9567_v61  ;;  %v6508_v6 = vmul.f32 %v11229_v36, %v6368_v32 }
 0x50d   : > { %v9571_v5 = vpop.eup %9570  ;;  %9590 = vpow2.f32 %v7757_v25  ;;  %6645 = vadd.xlane.f32.xlu0 %v6644_v52  ;;  %v6369_v7 = vmul.f32 %v9569_v17, %v9565_v46  ;;  %v11474_v62 = vpop.f32.mrb[48].mxu0 }
 0x50e   : > { %v9573_v1 = vpop.eup %9572  ;;  %9592 = vrcp.f32 %v5989_v11  ;;  %v11476_v18 = vpop.f32.mrb[48].mxu1 }
 0x50f   : > { %v9575_v15 = vpop.eup %9574  ;;  %9594 = vtanh.f32 %v7906_v49  ;;  %v5990_v9 = vadd.f32 1.0, %v9573_v1  ;;  %v6509_v48 = vmul.f32 %v11236_v40, %v6369_v7  ;;  %v11482_v46 = vpop.f32.mrb[49].mxu0  ;;  %v8042_v1 = vadd.f32 %v11388_v35, %v11155_v44 }
 0x510   : > { %v9577_v37 = vpop.eup %9576  ;;  %9596 = vpow2.f32 %v7758_v0  ;;  %v6370_v29 = vmul.f32 %v9575_v15, %v9571_v5  ;;  %v11484_v32 = vpop.f32.mrb[49].mxu1  ;;  %v7761_v15 = vmul.f32 -1.442695, %v8041_v58 }
 0x511   : > { %v9579_v25 = vpop.eup %9578  ;;  %9598 = vrcp.f32 %v5990_v9  ;;  %v6647_v28 = vadd.f32 %v6509_v48, %v6508_v6  ;;  %v11486_v52 = vpop.f32.mrb[50].mxu0  ;;  %v7909_v6 = vadd.f32 %v11345_v50, %v11172_v63  ;;  %v8043_v50 = vadd.f32 %v11396_v57, %v11157_v45 }
 0x512   : > { %v9581_v61 = vpop.eup %9580  ;;  %9600 = vtanh.f32 %v7907_v42  ;;  %v5991_v49 = vadd.f32 1.0, %v9579_v25  ;;  %v11488_v17 = vpop.f32.mrb[50].mxu1  ;;  %v6510_v0 = vmul.f32 %v11229_v36, %v6370_v29  ;;  %v7910_v29 = vadd.f32 %v11358_v8, %v11166_v53 }
 0x513   : > { %v9583_v11 = vpop.eup %9582  ;;  %9602 = vpow2.f32 %v7759_v54  ;;  %6648 = vadd.xlane.f32.xlu1 %v6647_v28  ;;  %v6371_v10 = vmul.f32 %v9581_v61, %v9577_v37  ;;  %v11491_v4 = vpop.f32.mrb[51].mxu0 }
 0x514   : > { %v11493_v5 = vpop.f32.mrb[51].mxu1  ;;  %v9585_v7 = vpop.eup %9584  ;;  %9604 = vrcp.f32 %v5991_v49 }
 0x515   : > { %v9587_v42 = vpop.eup %9586  ;;  %9606 = vtanh.f32 %v7908_v3  ;;  %v5992_v55 = vadd.f32 1.0, %v9585_v7  ;;  %v6511_v9 = vmul.f32 %v11236_v40, %v6371_v10  ;;  %v7762_v3 = vmul.f32 -1.442695, %v8042_v1  ;;  %v11504_v61 = vpop.f32.mrb[52].mxu0 }
 0x516   : > { %v9589_v54 = vpop.eup %9588  ;;  %9608 = vpow2.f32 %v7760_v34  ;;  %v6372_v48 = vmul.f32 %v9587_v42, %v9583_v11  ;;  %v11506_v58 = vpop.f32.mrb[52].mxu1  ;;  %v8044_v7 = vadd.f32 %v11400_v51, %v11155_v44  ;;  %v7912_v51 = vadd.f32 %v11368_v21, %v11166_v53 }
 0x517   : > { %v9591_v37 = vpop.eup %9590  ;;  %9610 = vrcp.f32 %v5992_v55  ;;  %v6650_v25 = vadd.f32 %v6511_v9, %v6510_v0  ;;  %v11509_v10 = vpop.f32.mrb[53].mxu0  ;;  %v7911_v0 = vadd.f32 %v11364_v38, %v11172_v63  ;;  %v8046_v21 = vadd.f32 %v11418_v24, %v11155_v44 }
 0x518   : > { %v9593_v28 = vpop.eup %9592  ;;  %9612 = vtanh.f32 %v7909_v6  ;;  %v5993_v35 = vadd.f32 1.0, %v9591_v37  ;;  %v6512_v11 = vmul.f32 %v11229_v36, %v6372_v48  ;;  %v11511_v8 = vpop.f32.mrb[53].mxu1 }
 0x519   : > { %v9595_v49 = vpop.eup %9594  ;;  %9614 = vpow2.f32 %v7761_v15  ;;  %6651 = vadd.xlane.f32.xlu0 %v6650_v25  ;;  %v6373_v34 = vmul.f32 %v9593_v28, %v9589_v54  ;;  %v11517_v6 = vpop.f32.mrb[54].mxu0  ;;  %v7763_v15 = vmul.f32 -1.442695, %v8043_v50  ;;  %v8045_v28 = vadd.f32 %v11405_v33, %v11157_v45 }
 0x51a   : > { %v9597_v57 = vpop.eup %9596  ;;  %9616 = vrcp.f32 %v5993_v35  ;;  %v11519_v1 = vpop.f32.mrb[54].mxu1 }
 0x51b   : > { %v9599_v42 = vpop.eup %9598  ;;  %9618 = vtanh.f32 %v7910_v29  ;;  %v5994_v55 = vadd.f32 1.0, %v9597_v57  ;;  %v6513_v9 = vmul.f32 %v11236_v40, %v6373_v34  ;;  %v11522_v54 = vpop.f32.mrb[55].mxu0  ;;  %v7764_v34 = vmul.f32 -1.442695, %v8044_v7 }
 0x51c   : > { %12714 = vst [vmem:[#allocation14_spill] sm:$0xff] %v11522_v54  ;;  %v11524_v48 = vpop.f32.mrb[55].mxu1  ;;  %v9601_v37 = vpop.eup %9600  ;;  %9620 = vpow2.f32 %v7762_v3  ;;  %v6374_v38 = vmul.f32 %v9599_v42, %v9595_v49  ;;  %v7913_v42 = vadd.f32 %v11376_v2, %v11172_v63 }
 0x51d   : > { %v9603_v25 = vpop.eup %9602  ;;  %9622 = vrcp.f32 %v5994_v55  ;;  %v6653_v29 = vadd.f32 %v6513_v9, %v6512_v11  ;;  %v11535_v33 = vpop.f32.mrb[56].mxu0  ;;  %v7765_v55 = vmul.f32 -1.442695, %v8045_v28  ;;  %v8047_v28 = vadd.f32 %v11423_v12, %v11157_v45 }
 0x51e   : > { %v9605_v35 = vpop.eup %9604  ;;  %9624 = vtanh.f32 %v7911_v0  ;;  %v5995_v50 = vadd.f32 1.0, %v9603_v25  ;;  %v6514_v3 = vmul.f32 %v11229_v36, %v6374_v38  ;;  %v11537_v11 = vpop.f32.mrb[56].mxu1  ;;  %v8048_v12 = vadd.f32 %v11431_v30, %v11155_v44 }
 0x51f   : > { %v9607_v57 = vpop.eup %9606  ;;  %9626 = vpow2.f32 %v7763_v15  ;;  %6654 = vadd.xlane.f32.xlu1 %v6653_v29  ;;  %v6375_v54 = vmul.f32 %v9605_v35, %v9601_v37  ;;  %v11540_v9 = vpop.f32.mrb[57].mxu0  ;;  %v8049_v30 = vadd.f32 %v11436_v60, %v11157_v45 }
 0x520   : > { %v9609_v49 = vpop.eup %9608  ;;  %9628 = vrcp.f32 %v5995_v50  ;;  %12715 = vst [vmem:[#allocation15_spill] sm:$0xff] %v11540_v9  ;;  %v11542_v37 = vpop.f32.mrb[57].mxu1 }
 0x521   : > { %v9611_v0 = vpop.eup %9610  ;;  %9630 = vtanh.f32 %v7912_v51  ;;  %v5996_v7 = vadd.f32 1.0, %v9609_v49  ;;  %v6515_v15 = vmul.f32 %v11236_v40, %v6375_v54  ;;  %v11544_v25 = vpop.f32.mrb[58].mxu0  ;;  %v7914_v51 = vadd.f32 %v11386_v14, %v11166_v53 }
 0x522   : > { %v9613_v38 = vpop.eup %9612  ;;  %9632 = vpow2.f32 %v7764_v34  ;;  %v6376_v2 = vmul.f32 %v9611_v0, %v9607_v57  ;;  %12716 = vst [vmem:[#allocation16_spill] sm:$0xff] %v11544_v25  ;;  %v11546_v24 = vpop.f32.mrb[58].mxu1  ;;  %v7766_v57 = vmul.f32 -1.442695, %v8046_v21  ;;  %v7915_v14 = vadd.f32 %v11394_v41, %v11172_v63 }
 0x523   : > { %v9615_v29 = vpop.eup %9614  ;;  %9634 = vrcp.f32 %v5996_v7  ;;  %v6656_v54 = vadd.f32 %v6515_v15, %v6514_v3  ;;  %v11552_v35 = vpop.f32.mrb[59].mxu0  ;;  %v7916_v41 = vadd.f32 %v11398_v27, %v11166_v53 }
 0x524   : > { %v11554_v50 = vpop.f32.mrb[59].mxu1  ;;  %v9617_v49 = vpop.eup %9616  ;;  %9636 = vtanh.f32 %v7913_v42  ;;  %v5997_v34 = vadd.f32 1.0, %v9615_v29  ;;  %v6516_v7 = vmul.f32 %v11229_v36, %v6376_v2  ;;  %v7767_v42 = vmul.f32 -1.442695, %v8047_v28 }
 0x525   : > { %v9619_v0 = vpop.eup %9618  ;;  %9638 = vpow2.f32 %v7765_v55  ;;  %6657 = vadd.xlane.f32.xlu0 %v6656_v54  ;;  %v6377_v25 = vmul.f32 %v9617_v49, %v9613_v38  ;;  %v11562_v38 = vpop.f32.mrb[60].mxu0 }
 0x526   : > { %v9621_v9 = vpop.eup %9620  ;;  %9640 = vrcp.f32 %v5997_v34  ;;  %v11564_v2 = vpop.f32.mrb[60].mxu1  ;;  %v7768_v34 = vmul.f32 -1.442695, %v8048_v12  ;;  %v8050_v12 = vadd.f32 %v11449_v22, %v11155_v44 }
 0x527   : > { %v9623_v3 = vpop.eup %9622  ;;  %9642 = vtanh.f32 %v7914_v51  ;;  %v5998_v15 = vadd.f32 1.0, %v9621_v9  ;;  %v6517_v21 = vmul.f32 %v11236_v40, %v6377_v25  ;;  %v11570_v9 = vpop.f32.mrb[61].mxu0 }
 0x528   : > { %v9625_v29 = vpop.eup %9624  ;;  %9644 = vpow2.f32 %v7766_v57  ;;  %v6378_v55 = vmul.f32 %v9623_v3, %v9619_v0  ;;  %12717 = vst [vmem:[#allocation17_spill] sm:$0xff] %v11570_v9  ;;  %v11572_v28 = vpop.f32.mrb[61].mxu1 }
 0x529   : > { %v9627_v54 = vpop.eup %9626  ;;  %9646 = vrcp.f32 %v5998_v15  ;;  %v6659_v51 = vadd.f32 %v6517_v21, %v6516_v7  ;;  %v11574_v57 = vpop.f32.mrb[62].mxu0 }
 0x52a   : > { %v9629_v25 = vpop.eup %9628  ;;  %9648 = vtanh.f32 %v7915_v14  ;;  %v5999_v49 = vadd.f32 1.0, %v9627_v54  ;;  %12718 = vst [vmem:[#allocation18_spill] sm:$0xff] %v11574_v57  ;;  %v11576_v0 = vpop.f32.mrb[62].mxu1  ;;  %v6518_v15 = vmul.f32 %v11229_v36, %v6378_v55  ;;  %v7917_v14 = vadd.f32 %v11403_v26, %v11172_v63 }
 0x52b   : > { %v9631_v3 = vpop.eup %9630  ;;  %9650 = vpow2.f32 %v7767_v42  ;;  %6660 = vadd.xlane.f32.xlu1 %v6659_v51  ;;  %v6379_v27 = vmul.f32 %v9629_v25, %v9625_v29  ;;  %v11579_v60 = vpop.f32.mrb[63].mxu0  ;;  %v7769_v42 = vmul.f32 -1.442695, %v8049_v30  ;;  %v8051_v26 = vadd.f32 %v11454_v43, %v11157_v45 }
 0x52c   : > { %12719 = vst [vmem:[#allocation19_spill] sm:$0xff] %v11579_v60  ;;  %v11581_v7 = vpop.f32.mrb[63].mxu1  ;;  %v9633_v21 = vpop.eup %9632  ;;  %9652 = vrcp.f32 %v5999_v49  ;;  %v7918_v49 = vadd.f32 %v11416_v23, %v11166_v53 }
 0x52d   : > { %v9635_v54 = vpop.eup %9634  ;;  %9654 = vtanh.f32 %v7916_v41  ;;  %v6000_v57 = vadd.f32 1.0, %v9633_v21  ;;  %v6519_v29 = vmul.f32 %v11236_v40, %v6379_v27  ;;  %v7770_v41 = vmul.f32 -1.442695, %v8050_v12  ;;  %v11592_v21 = vpop.f32.mrb[64].mxu0 }
 0x52e   : > { %v9637_v51 = vpop.eup %9636  ;;  %9656 = vpow2.f32 %v7768_v34  ;;  %v6380_v55 = vmul.f32 %v9635_v54, %v9631_v3  ;;  %v11594_v30 = vpop.f32.mrb[64].mxu1 }
 0x52f   : > { %v9639_v25 = vpop.eup %9638  ;;  %9658 = vrcp.f32 %v6000_v57  ;;  %v6662_v60 = vadd.f32 %v6519_v29, %v6518_v15  ;;  %v11597_v3 = vpop.f32.mrb[65].mxu0  ;;  %v7919_v15 = vadd.f32 %v11421_v19, %v11172_v63 }
 0x530   : > { %v9641_v9 = vpop.eup %9640  ;;  %9660 = vtanh.f32 %v7917_v14  ;;  %v6001_v22 = vadd.f32 1.0, %v9639_v25  ;;  %v6520_v57 = vmul.f32 %v11229_v36, %v6380_v55  ;;  %12720 = vst [vmem:[#allocation20_spill] sm:$0xff] %v11597_v3  ;;  %v11599_v23 = vpop.f32.mrb[65].mxu1  ;;  %v8052_v14 = vadd.f32 %v11458_v47, %v11155_v44 }
 0x531   : > { %v9643_v27 = vpop.eup %9642  ;;  %9662 = vpow2.f32 %v7769_v42  ;;  %6663 = vadd.xlane.f32.xlu0 %v6662_v60  ;;  %v6381_v34 = vmul.f32 %v9641_v9, %v9637_v51  ;;  %v11605_v12 = vpop.f32.mrb[66].mxu0  ;;  %v7771_v42 = vmul.f32 -1.442695, %v8051_v26  ;;  %v7920_v47 = vadd.f32 %v11429_v39, %v11166_v53 }
 0x532   : > { %v9645_v43 = vpop.eup %9644  ;;  %9664 = vrcp.f32 %v6001_v22  ;;  %12721 = vst [vmem:[#allocation21_spill] sm:$0xff] %v11605_v12  ;;  %v11607_v54 = vpop.f32.mrb[66].mxu1  ;;  %v8053_v12 = vadd.f32 %v11466_v20, %v11157_v45  ;;  %v8054_v39 = vadd.f32 %v11476_v18, %v11155_v44 }
 0x533   : > { %v9647_v60 = vpop.eup %9646  ;;  %9666 = vtanh.f32 %v7918_v49  ;;  %v6002_v9 = vadd.f32 1.0, %v9645_v43  ;;  %v6521_v29 = vmul.f32 %v11236_v40, %v6381_v34  ;;  %v11610_v51 = vpop.f32.mrb[67].mxu0  ;;  %v7772_v34 = vmul.f32 -1.442695, %v8052_v14 }
 0x534   : > { %12722 = vst [vmem:[#allocation22_spill] sm:$0xff] %v11610_v51  ;;  %v11612_v55 = vpop.f32.mrb[67].mxu1  ;;  %v9649_v25 = vpop.eup %9648  ;;  %9668 = vpow2.f32 %v7770_v41  ;;  %v6382_v19 = vmul.f32 %v9647_v60, %v9643_v27  ;;  %v7921_v60 = vadd.f32 %v11434_v13, %v11172_v63 }
 0x535   : > { %v9651_v22 = vpop.eup %9650  ;;  %9670 = vrcp.f32 %v6002_v9  ;;  %v6665_v49 = vadd.f32 %v6521_v29, %v6520_v57  ;;  %v11623_v20 = vpop.f32.mrb[68].mxu0  ;;  %v7773_v9 = vmul.f32 -1.442695, %v8053_v12  ;;  %v8055_v12 = vadd.f32 %v11484_v32, %v11157_v45 }
 0x536   : > { %v9653_v43 = vpop.eup %9652  ;;  %9672 = vtanh.f32 %v7919_v15  ;;  %v6003_v26 = vadd.f32 1.0, %v9651_v22  ;;  %v6522_v41 = vmul.f32 %v11229_v36, %v6382_v19  ;;  %v11625_v57 = vpop.f32.mrb[68].mxu1  ;;  %v8056_v32 = vadd.f32 %v11488_v17, %v11155_v44 }
 0x537   : > { %v9655_v3 = vpop.eup %9654  ;;  %9674 = vpow2.f32 %v7771_v42  ;;  %6666 = vadd.xlane.f32.xlu1 %v6665_v49  ;;  %v6383_v51 = vmul.f32 %v9653_v43, %v9649_v25  ;;  %v11628_v29 = vpop.f32.mrb[69].mxu0  ;;  %v8057_v17 = vadd.f32 %v11493_v5, %v11157_v45 }
 0x538   : > { %v9657_v27 = vpop.eup %9656  ;;  %9676 = vrcp.f32 %v6003_v26  ;;  %12723 = vst [vmem:[#allocation23_spill] sm:$0xff] %v11628_v29  ;;  %v11630_v25 = vpop.f32.mrb[69].mxu1 }
 0x539   : > { %v9659_v15 = vpop.eup %9658  ;;  %9678 = vtanh.f32 %v7920_v47  ;;  %v6004_v14 = vadd.f32 1.0, %v9657_v27  ;;  %v6523_v42 = vmul.f32 %v11236_v40, %v6383_v51  ;;  %v11632_v22 = vpop.f32.mrb[70].mxu0  ;;  %v7922_v47 = vadd.f32 %v11447_v16, %v11166_v53 }
 0x53a   : > { %v9661_v19 = vpop.eup %9660  ;;  %9680 = vpow2.f32 %v7772_v34  ;;  %v6384_v13 = vmul.f32 %v9659_v15, %v9655_v3  ;;  %12724 = vst [vmem:[#allocation24_spill] sm:$0xff] %v11632_v22  ;;  %v11634_v18 = vpop.f32.mrb[70].mxu1  ;;  %v7774_v34 = vmul.f32 -1.442695, %v8054_v39  ;;  %v7923_v16 = vadd.f32 %v11452_v31, %v11172_v63 }
 0x53b   : > { %v9663_v49 = vpop.eup %9662  ;;  %9682 = vrcp.f32 %v6004_v14  ;;  %v6668_v51 = vadd.f32 %v6523_v42, %v6522_v41  ;;  %v11640_v43 = vpop.f32.mrb[71].mxu0  ;;  %v7924_v31 = vadd.f32 %v11456_v56, %v11166_v53 }
 0x53c   : > { %v11642_v26 = vpop.f32.mrb[71].mxu1  ;;  %v9665_v27 = vpop.eup %9664  ;;  %9684 = vtanh.f32 %v7921_v60  ;;  %v6005_v3 = vadd.f32 1.0, %v9663_v49  ;;  %v6524_v14 = vmul.f32 %v11229_v36, %v6384_v13  ;;  %v7775_v60 = vmul.f32 -1.442695, %v8055_v12 }
 0x53d   : > { %v9667_v15 = vpop.eup %9666  ;;  %9686 = vpow2.f32 %v7773_v9  ;;  %6669 = vadd.xlane.f32.xlu0 %v6668_v51  ;;  %v6385_v22 = vmul.f32 %v9665_v27, %v9661_v19  ;;  %v11650_v19 = vpop.f32.mrb[72].mxu0 }
 0x53e   : > { %v9669_v29 = vpop.eup %9668  ;;  %9688 = vrcp.f32 %v6005_v3  ;;  %v11652_v13 = vpop.f32.mrb[72].mxu1  ;;  %v7776_v3 = vmul.f32 -1.442695, %v8056_v32  ;;  %v8058_v32 = vadd.f32 %v11506_v58, %v11155_v44 }
 0x53f   : > { %v9671_v41 = vpop.eup %9670  ;;  %9690 = vtanh.f32 %v7922_v47  ;;  %v6006_v42 = vadd.f32 1.0, %v9669_v29  ;;  %v6525_v39 = vmul.f32 %v11236_v40, %v6385_v22  ;;  %v11658_v29 = vpop.f32.mrb[73].mxu0 }
 0x540   : > { %v9673_v49 = vpop.eup %9672  ;;  %9692 = vpow2.f32 %v7774_v34  ;;  %v6386_v9 = vmul.f32 %v9671_v41, %v9667_v15  ;;  %12725 = vst [vmem:[#allocation25_spill] sm:$0xff] %v11658_v29  ;;  %v11660_v12 = vpop.f32.mrb[73].mxu1 }
 0x541   : > { %v9675_v51 = vpop.eup %9674  ;;  %9694 = vrcp.f32 %v6006_v42  ;;  %v6671_v47 = vadd.f32 %v6525_v39, %v6524_v14  ;;  %v11662_v34 = vpop.f32.mrb[74].mxu0 }
 0x542   : > { %v9677_v22 = vpop.eup %9676  ;;  %9696 = vtanh.f32 %v7923_v16  ;;  %v6007_v27 = vadd.f32 1.0, %v9675_v51  ;;  %12726 = vst [vmem:[#allocation26_spill] sm:$0xff] %v11662_v34  ;;  %v11664_v15 = vpop.f32.mrb[74].mxu1  ;;  %v6526_v42 = vmul.f32 %v11229_v36, %v6386_v9  ;;  %v7925_v16 = vadd.f32 %v11464_v59, %v11172_v63 }
 0x543   : > { %v9679_v41 = vpop.eup %9678  ;;  %9698 = vpow2.f32 %v7775_v60  ;;  %6672 = vadd.xlane.f32.xlu1 %v6671_v47  ;;  %v6387_v56 = vmul.f32 %v9677_v22, %v9673_v49  ;;  %v11667_v5 = vpop.f32.mrb[75].mxu0  ;;  %v7777_v60 = vmul.f32 -1.442695, %v8057_v17  ;;  %v8059_v59 = vadd.f32 %v11511_v8, %v11157_v45 }
 0x544   : > { %12727 = vst [vmem:[#allocation27_spill] sm:$0xff] %v11667_v5  ;;  %v11669_v14 = vpop.f32.mrb[75].mxu1  ;;  %v9681_v39 = vpop.eup %9680  ;;  %9700 = vrcp.f32 %v6007_v27  ;;  %v7926_v27 = vadd.f32 %v11474_v62, %v11166_v53 }
 0x545   : > { %v9683_v51 = vpop.eup %9682  ;;  %9702 = vtanh.f32 %v7924_v31  ;;  %v6008_v34 = vadd.f32 1.0, %v9681_v39  ;;  %v6527_v49 = vmul.f32 %v11236_v40, %v6387_v56  ;;  %v7778_v31 = vmul.f32 -1.442695, %v8058_v32  ;;  %v11680_v39 = vpop.f32.mrb[76].mxu0 }
 0x546   : > { %v9685_v47 = vpop.eup %9684  ;;  %9704 = vpow2.f32 %v7776_v3  ;;  %v6388_v9 = vmul.f32 %v9683_v51, %v9679_v41  ;;  %v11682_v17 = vpop.f32.mrb[76].mxu1 }
 0x547   : > { %v9687_v22 = vpop.eup %9686  ;;  %9706 = vrcp.f32 %v6008_v34  ;;  %v6674_v5 = vadd.f32 %v6527_v49, %v6526_v42  ;;  %v11685_v41 = vpop.f32.mrb[77].mxu0  ;;  %v7927_v42 = vadd.f32 %v11482_v46, %v11172_v63 }
 0x548   : > { %v9689_v29 = vpop.eup %9688  ;;  %9708 = vtanh.f32 %v7925_v16  ;;  %v6009_v58 = vadd.f32 1.0, %v9687_v22  ;;  %v6528_v34 = vmul.f32 %v11229_v36, %v6388_v9  ;;  %12728 = vst [vmem:[#allocation28_spill] sm:$0xff] %v11685_v41  ;;  %v11687_v62 = vpop.f32.mrb[77].mxu1  ;;  %v8060_v16 = vadd.f32 %v11519_v1, %v11155_v44 }
 0x549   : > { %v9691_v56 = vpop.eup %9690  ;;  %9710 = vpow2.f32 %v7777_v60  ;;  %6675 = vadd.xlane.f32.xlu0 %v6674_v5  ;;  %v6389_v3 = vmul.f32 %v9689_v29, %v9685_v47  ;;  %v11693_v32 = vpop.f32.mrb[78].mxu0  ;;  %v7779_v60 = vmul.f32 -1.442695, %v8059_v59  ;;  %v7928_v1 = vadd.f32 %v11486_v52, %v11166_v53 }
 0x54a   : > { %v9693_v8 = vpop.eup %9692  ;;  %9712 = vrcp.f32 %v6009_v58  ;;  %12729 = vst [vmem:[#allocation29_spill] sm:$0xff] %v11693_v32  ;;  %v11695_v51 = vpop.f32.mrb[78].mxu1  ;;  %v8061_v32 = vadd.f32 %v11524_v48, %v11157_v45  ;;  %v8062_v52 = vadd.f32 %v11537_v11, %v11155_v44 }
 0x54b   : > { %v9695_v5 = vpop.eup %9694  ;;  %9714 = vtanh.f32 %v7926_v27  ;;  %v6010_v29 = vadd.f32 1.0, %v9693_v8  ;;  %v6529_v49 = vmul.f32 %v11236_v40, %v6389_v3  ;;  %v11698_v47 = vpop.f32.mrb[79].mxu0  ;;  %v7780_v3 = vmul.f32 -1.442695, %v8060_v16 }
 0x54c   : > { %12730 = vst [vmem:[#allocation30_spill] sm:$0xff] %v11698_v47  ;;  %v11700_v9 = vpop.f32.mrb[79].mxu1  ;;  %v9697_v22 = vpop.eup %9696  ;;  %9716 = vpow2.f32 %v7778_v31  ;;  %v6390_v46 = vmul.f32 %v9695_v5, %v9691_v56  ;;  %v7929_v5 = vadd.f32 %v11491_v4, %v11172_v63 }
 0x54d   : > { %v9699_v58 = vpop.eup %9698  ;;  %9718 = vrcp.f32 %v6010_v29  ;;  %v6677_v27 = vadd.f32 %v6529_v49, %v6528_v34  ;;  %v11711_v48 = vpop.f32.mrb[80].mxu0  ;;  %v7781_v29 = vmul.f32 -1.442695, %v8061_v32  ;;  %v8063_v32 = vadd.f32 %v11542_v37, %v11157_v45 }
 0x54e   : > { %v9701_v8 = vpop.eup %9700  ;;  %9720 = vtanh.f32 %v7927_v42  ;;  %v6011_v59 = vadd.f32 1.0, %v9699_v58  ;;  %v6530_v31 = vmul.f32 %v11229_v36, %v6390_v46  ;;  %v11713_v34 = vpop.f32.mrb[80].mxu1  ;;  %v8064_v37 = vadd.f32 %v11546_v24, %v11155_v44 }
 0x54f   : > { %v9703_v41 = vpop.eup %9702  ;;  %9722 = vpow2.f32 %v7779_v60  ;;  %6678 = vadd.xlane.f32.xlu1 %v6677_v27  ;;  %v6391_v47 = vmul.f32 %v9701_v8, %v9697_v22  ;;  %v11716_v49 = vpop.f32.mrb[81].mxu0  ;;  %v8065_v24 = vadd.f32 %v11554_v50, %v11157_v45 }
 0x550   : > { %v9705_v56 = vpop.eup %9704  ;;  %9724 = vrcp.f32 %v6011_v59  ;;  %12731 = vst [vmem:[#allocation31_spill] sm:$0xff] %v11716_v49  ;;  %v11718_v22 = vpop.f32.mrb[81].mxu1 }
 0x551   : > { %v9707_v42 = vpop.eup %9706  ;;  %9726 = vtanh.f32 %v7928_v1  ;;  %v6012_v16 = vadd.f32 1.0, %v9705_v56  ;;  %v6531_v60 = vmul.f32 %v11236_v40, %v6391_v47  ;;  %v11720_v58 = vpop.f32.mrb[82].mxu0  ;;  %v7930_v1 = vadd.f32 %v11504_v61, %v11166_v53 }
 0x552   : > { %v9709_v46 = vpop.eup %9708  ;;  %9728 = vpow2.f32 %v7780_v3  ;;  %v6392_v4 = vmul.f32 %v9707_v42, %v9703_v41  ;;  %12732 = vst [vmem:[#allocation32_spill] sm:$0xff] %v11720_v58  ;;  %v11722_v11 = vpop.f32.mrb[82].mxu1  ;;  %v7782_v3 = vmul.f32 -1.442695, %v8062_v52  ;;  %v7931_v61 = vadd.f32 %v11509_v10, %v11172_v63 }
 0x553   : > { %v9711_v27 = vpop.eup %9710  ;;  %9730 = vrcp.f32 %v6012_v16  ;;  %v6680_v47 = vadd.f32 %v6531_v60, %v6530_v31  ;;  %v11728_v8 = vpop.f32.mrb[83].mxu0  ;;  %v7932_v10 = vadd.f32 %v11517_v6, %v11166_v53 }
 0x554   : > { %v11730_v59 = vpop.f32.mrb[83].mxu1  ;;  %v9713_v56 = vpop.eup %9712  ;;  %9732 = vtanh.f32 %v7929_v5  ;;  %v6013_v41 = vadd.f32 1.0, %v9711_v27  ;;  %v6532_v16 = vmul.f32 %v11229_v36, %v6392_v4  ;;  %v7783_v5 = vmul.f32 -1.442695, %v8063_v32 }
 0x555   : > { %v9715_v42 = vpop.eup %9714  ;;  %9734 = vpow2.f32 %v7781_v29  ;;  %6681 = vadd.xlane.f32.xlu0 %v6680_v47  ;;  %v6393_v58 = vmul.f32 %v9713_v56, %v9709_v46  ;;  %v11738_v46 = vpop.f32.mrb[84].mxu0 }
 0x556   : > { %v9717_v49 = vpop.eup %9716  ;;  %9736 = vrcp.f32 %v6013_v41  ;;  %12733 = vst [vmem:[#allocation33_spill] sm:$0xff] %v11738_v46  ;;  %v11740_v4 = vpop.f32.mrb[84].mxu1  ;;  %v7784_v41 = vmul.f32 -1.442695, %v8064_v37  ;;  %v8066_v37 = vadd.f32 %v11564_v2, %v11155_v44 }
 0x557   : > { %v9719_v31 = vpop.eup %9718  ;;  %9738 = vtanh.f32 %v7930_v1  ;;  %v6014_v60 = vadd.f32 1.0, %v9717_v49  ;;  %v6533_v52 = vmul.f32 %v11236_v40, %v6393_v58  ;;  %v11746_v49 = vpop.f32.mrb[85].mxu0 }
 0x558   : > { %v9721_v27 = vpop.eup %9720  ;;  %9740 = vpow2.f32 %v7782_v3  ;;  %v6394_v29 = vmul.f32 %v9719_v31, %v9715_v42  ;;  %12734 = vst [vmem:[#allocation34_spill] sm:$0xff] %v11746_v49  ;;  %v11748_v32 = vpop.f32.mrb[85].mxu1 }
 0x559   : > { %v9723_v47 = vpop.eup %9722  ;;  %9742 = vrcp.f32 %v6014_v60  ;;  %v6683_v1 = vadd.f32 %v6533_v52, %v6532_v16  ;;  %v11750_v3 = vpop.f32.mrb[86].mxu0 }
 0x55a   : > { %v9725_v58 = vpop.eup %9724  ;;  %9744 = vtanh.f32 %v7931_v61  ;;  %v6015_v56 = vadd.f32 1.0, %v9723_v47  ;;  %12735 = vst [vmem:[#allocation35_spill] sm:$0xff] %v11750_v3  ;;  %v11752_v42 = vpop.f32.mrb[86].mxu1  ;;  %v6534_v60 = vmul.f32 %v11229_v36, %v6394_v29  ;;  %v12737_v61 = vld [vmem:[#allocation14_spill] sm:$0xff] }
 0x55b   : > { %v9727_v31 = vpop.eup %9726  ;;  %9746 = vpow2.f32 %v7783_v5  ;;  %6684 = vadd.xlane.f32.xlu1 %v6683_v1  ;;  %v6395_v6 = vmul.f32 %v9725_v58, %v9721_v27  ;;  %v11755_v50 = vpop.f32.mrb[87].mxu0  ;;  %v7933_v47 = vadd.f32 %v12737_v61, %v11172_v63  ;;  %v7785_v5 = vmul.f32 -1.442695, %v8065_v24 }
 0x55c   : > { %12736 = vst [vmem:[#allocation36_spill] sm:$0xff] %v11755_v50  ;;  %v11757_v16 = vpop.f32.mrb[87].mxu1  ;;  %v9729_v52 = vpop.eup %9728  ;;  %9748 = vrcp.f32 %v6015_v56  ;;  %v8067_v1 = vadd.f32 %v11572_v28, %v11157_v45  ;;  %v7934_v61 = vadd.f32 %v11535_v33, %v11166_v53  ;;  %v11778_v33 = vld [vmem:[#allocation2] ss:$0 sm:$0xff] }
 0x55d   : > { %v9731_v3 = vpop.eup %9730  ;;  %9750 = vtanh.f32 %v7932_v10  ;;  %v6016_v49 = vadd.f32 1.0, %v9729_v52  ;;  %v6535_v27 = vmul.f32 %v11236_v40, %v6395_v6  ;;  %v7786_v52 = vmul.f32 -1.442695, %v8066_v37  ;;  %v11768_v24 = vpop.f32.mrb[88].mxu0 }
 0x55e   : > { %v9733_v29 = vpop.eup %9732  ;;  %9752 = vpow2.f32 %v7784_v41  ;;  %v6396_v58 = vmul.f32 %v9731_v3, %v9727_v31  ;;  %12738 = vst [vmem:[#allocation14_spill] sm:$0xff] %v11768_v24  ;;  %v11770_v46 = vpop.f32.mrb[88].mxu1  ;;  %v7787_v37 = vmul.f32 -1.442695, %v8067_v1 }
 0x55f   : > { %v9735_v56 = vpop.eup %9734  ;;  %9754 = vrcp.f32 %v6016_v49  ;;  %v6686_v50 = vadd.f32 %v6535_v27, %v6534_v60  ;;  %v11774_v49 = vpop.f32.mrb[89].mxu0  ;;  %v12741_v60 = vld [vmem:[#allocation15_spill] sm:$0xff]  ;;  %v8068_v27 = vadd.f32 %v11576_v0, %v11155_v44 }
 0x560   : > { %v9737_v2 = vpop.eup %9736  ;;  %9756 = vtanh.f32 %v7933_v47  ;;  %v6017_v10 = vadd.f32 1.0, %v9735_v56  ;;  %v6536_v3 = vmul.f32 %v11229_v36, %v6396_v58  ;;  %12739 = vst [vmem:[#allocation37_spill] sm:$0xff] %v11774_v49  ;;  %v11776_v31 = vpop.f32.mrb[89].mxu1  ;;  %v7935_v47 = vadd.f32 %v12741_v60, %v11172_v63 }
 0x561   : > { %v9739_v41 = vpop.eup %9738  ;;  %9758 = vpow2.f32 %v7785_v5  ;;  %6687 = vadd.xlane.f32.xlu0 %v6686_v50  ;;  %v6397_v28 = vmul.f32 %v9737_v2, %v9733_v29  ;;  %12740 = vst [vmem:[#allocation38_spill] sm:$0xff] %v11776_v31  ;;  %v6616_v5 = vpop.xlane.xlu0 %6615 }
 0x562   : > { %v9741_v6 = vpop.eup %9740  ;;  %9760 = vrcp.f32 %v6017_v10  ;;  %v11784_v50 = vpop.f32.mrb[90].mxu0  ;;  %v6813_v60 = vadd.f32 %v11778_v33, %v6616_v5 }
 0x563   : > { %12742 = vst [vmem:[#allocation15_spill] sm:$0xff] %v11784_v50  ;;  %v9743_v29 = vpop.eup %9742  ;;  %9762 = vtanh.f32 %v7934_v61  ;;  %v6018_v58 = vadd.f32 1.0, %v9741_v6  ;;  %v6537_v56 = vmul.f32 %v11236_v40, %v6397_v28  ;;  %v11787_v2 = vpop.f32.mrb[90].mxu1  ;;  %v12745_v61 = vld [vmem:[#allocation16_spill] sm:$0xff]  ;;  %v8069_v28 = vadd.f32 %v11581_v7, %v11157_v45 }
 0x564   : > { %12743 = vst [vmem:[#allocation39_spill] sm:$0xff] %v11787_v2  ;;  %v11789_v10 = vpop.f32.mrb[91].mxu0  ;;  %v9745_v49 = vpop.eup %9744  ;;  %9764 = vpow2.f32 %v7786_v52  ;;  %v6398_v1 = vmul.f32 %v9743_v29, %v9739_v41  ;;  %v7936_v6 = vadd.f32 %v12745_v61, %v11166_v53  ;;  %6878 = vst.msk [vmem:[%s11800_s6] sm:$0xff] %vm6877_vm0, %v6813_v60  ;;  %v7937_v7 = vadd.f32 %v11552_v35, %v11172_v63 }
 0x565   : > { %12744 = vst [vmem:[#allocation40_spill] sm:$0xff] %v11789_v10  ;;  %v11792_v0 = vpop.f32.mrb[91].mxu1  ;;  %v9747_v24 = vpop.eup %9746  ;;  %9766 = vrcp.f32 %v6018_v58  ;;  %v6689_v50 = vadd.f32 %v6537_v56, %v6536_v3  ;;  %v7788_v10 = vmul.f32 -1.442695, %v8068_v27  ;;  %v7789_v56 = vmul.f32 -1.442695, %v8069_v28 }
 0x566   : > { %v9749_v2 = vpop.eup %9748  ;;  %9768 = vtanh.f32 %v7935_v47  ;;  %v6019_v31 = vadd.f32 1.0, %v9747_v24  ;;  %v6538_v5 = vmul.f32 %v11229_v36, %v6398_v1  ;;  %v8070_v24 = vadd.f32 %v11594_v30, %v11155_v44  ;;  %v6619_v3 = vpop.xlane.xlu0 %6618 }
 0x567   : > { %v9751_v52 = vpop.eup %9750  ;;  %9770 = vpow2.f32 %v7787_v37  ;;  %6690 = vadd.xlane.f32.xlu1 %v6689_v50  ;;  %v6399_v41 = vmul.f32 %v9749_v2, %v9745_v49  ;;  %v11809_v47 = vpop.f32.mrb[92].mxu0  ;;  %v6814_v2 = vadd.f32 %v11778_v33, %v6619_v3  ;;  %v7938_v61 = vadd.f32 %v11562_v38, %v11166_v53 }
 0x568   : > { %v9753_v29 = vpop.eup %9752  ;;  %9772 = vrcp.f32 %v6019_v31  ;;  %v11812_v49 = vpop.f32.mrb[92].mxu1  ;;  %v7790_v3 = vmul.f32 -1.442695, %v8070_v24  ;;  %v8072_v24 = vadd.f32 %v11607_v54, %v11155_v44 }
 0x569   : > { %v9755_v27 = vpop.eup %9754  ;;  %9774 = vtanh.f32 %v7936_v6  ;;  %v6020_v58 = vadd.f32 1.0, %v9753_v29  ;;  %v6539_v37 = vmul.f32 %v11236_v40, %v6399_v41  ;;  %v11814_v50 = vpop.f32.mrb[93].mxu0  ;;  %v8071_v6 = vadd.f32 %v11599_v23, %v11157_v45  ;;  %6879 = vst.msk [vmem:[%s11800_s6 + $0x8] sm:$0xff] %vm6877_vm0, %v6814_v2 }
 0x56a   : > { %12746 = vst [vmem:[#allocation16_spill] sm:$0xff] %v11814_v50  ;;  %v9757_v31 = vpop.eup %9756  ;;  %9776 = vpow2.f32 %v7788_v10  ;;  %v6400_v35 = vmul.f32 %v9755_v27, %v9751_v52  ;;  %v11817_v30 = vpop.f32.mrb[93].mxu1 }
 0x56b   : > { %v11819_v1 = vpop.f32.mrb[94].mxu0  ;;  %v9759_v60 = vpop.eup %9758  ;;  %9778 = vrcp.f32 %v6020_v58  ;;  %v6692_v28 = vadd.f32 %v6539_v37, %v6538_v5  ;;  %v7791_v50 = vmul.f32 -1.442695, %v8071_v6 }
 0x56c   : > { %12747 = vst [vmem:[#allocation41_spill] sm:$0xff] %v11819_v1  ;;  %v11825_v41 = vpop.f32.mrb[94].mxu1  ;;  %v11827_v10 = vpop.f32.mrb[95].mxu0  ;;  %9780 = vtanh.f32 %v7937_v7  ;;  %v6021_v29 = vadd.f32 1.0, %v9759_v60  ;;  %v6540_v23 = vmul.f32 %v11229_v36, %v6400_v35  ;;  %v12749_v7 = vld [vmem:[#allocation17_spill] sm:$0xff] }
 0x56d   : > { %12748 = vst [vmem:[#allocation42_spill] sm:$0xff] %v11827_v10  ;;  %v9761_v52 = vpop.eup %9760  ;;  %v6622_v27 = vpop.xlane.xlu1 %6621  ;;  %9782 = vpow2.f32 %v7789_v56  ;;  %6693 = vadd.xlane.f32.xlu0 %v6692_v28  ;;  %v7939_v60 = vadd.f32 %v12749_v7, %v11172_v63 }
 0x56e   : > { %v11831_v1 = vpop.f32.mrb[95].mxu1  ;;  %v9763_v58 = vpop.eup %9762  ;;  %v6401_v38 = vmul.f32 %v9761_v52, %v9757_v31  ;;  %v6815_v5 = vadd.f32 %v11778_v33, %v6622_v27  ;;  %9784 = vrcp.f32 %v6021_v29  ;;  %v12751_v27 = vld [vmem:[#allocation18_spill] sm:$0xff] }
 0x56f   : > { %v9765_v37 = vpop.eup %9764  ;;  %9786 = vtanh.f32 %v7938_v61  ;;  %v11842_v28 = vpop.f32.mrb[96].mxu0  ;;  %v7940_v54 = vadd.f32 %v12751_v27, %v11166_v53  ;;  %v8073_v61 = vadd.f32 %v11612_v55, %v11157_v45 }
 0x570   : > { %v9767_v2 = vpop.eup %9766  ;;  %v6022_v10 = vadd.f32 1.0, %v9765_v37  ;;  %v6541_v56 = vmul.f32 %v11236_v40, %v6401_v38  ;;  %6880 = vst.msk [vmem:[%s11800_s6 + $0x10] sm:$0xff] %vm6877_vm0, %v6815_v5  ;;  %9788 = vpow2.f32 %v7790_v3  ;;  %12750 = vst [vmem:[#allocation17_spill] sm:$0xff] %v11842_v28  ;;  %v11844_v52 = vpop.f32.mrb[96].mxu1 }
 0x571   : > { %v9769_v31 = vpop.eup %9768  ;;  %v6402_v35 = vmul.f32 %v9767_v2, %v9763_v58  ;;  %v6625_v37 = vpop.xlane.xlu1 %6624  ;;  %v7792_v58 = vmul.f32 -1.442695, %v8072_v24  ;;  %v12755_v24 = vld [vmem:[#allocation19_spill] sm:$0xff] }
 0x572   : > { %v9771_v29 = vpop.eup %9770  ;;  %9790 = vrcp.f32 %v6022_v10  ;;  %v6695_v6 = vadd.f32 %v6541_v56, %v6540_v23  ;;  %v11850_v38 = vpop.f32.mrb[97].mxu0  ;;  %v6816_v55 = vadd.f32 %v11778_v33, %v6625_v37 }
 0x573   : > { %12752 = vst [vmem:[#allocation18_spill] sm:$0xff] %v11850_v38  ;;  %v9773_v5 = vpop.eup %9772  ;;  %9792 = vtanh.f32 %v7939_v60  ;;  %v6023_v3 = vadd.f32 1.0, %v9771_v29  ;;  %v11852_v7 = vpop.f32.mrb[97].mxu1  ;;  %v6542_v27 = vmul.f32 %v11229_v36, %v6402_v35  ;;  %v7941_v29 = vadd.f32 %v12755_v24, %v11172_v63 }
 0x574   : > { %v11854_v2 = vpop.f32.mrb[98].mxu0  ;;  %v9775_v28 = vpop.eup %9774  ;;  %9794 = vpow2.f32 %v7791_v50  ;;  %6696 = vadd.xlane.f32.xlu1 %v6695_v6  ;;  %v6403_v10 = vmul.f32 %v9773_v5, %v9769_v31  ;;  %v7793_v35 = vmul.f32 -1.442695, %v8073_v61  ;;  %6881 = vst.msk [vmem:[%s11800_s6 + $0x18] sm:$0xff] %vm6877_vm0, %v6816_v55  ;;  %v7942_v24 = vadd.f32 %v11592_v21, %v11166_v53 }
 0x575   : > { %12753 = vst [vmem:[#allocation43_spill] sm:$0xff] %v11854_v2  ;;  %v11858_v23 = vpop.f32.mrb[98].mxu1  ;;  %v11860_v56 = vpop.f32.mrb[99].mxu0  ;;  %9796 = vrcp.f32 %v6023_v3  ;;  %v8074_v2 = vadd.f32 %v11625_v57, %v11155_v44  ;;  %v8075_v57 = vadd.f32 %v11630_v25, %v11157_v45 }
 0x576   : > { %12754 = vst [vmem:[#allocation44_spill] sm:$0xff] %v11860_v56  ;;  %v9777_v60 = vpop.eup %9776  ;;  %v11866_v50 = vpop.f32.mrb[99].mxu1  ;;  %9798 = vtanh.f32 %v7940_v54  ;;  %v6543_v37 = vmul.f32 %v11236_v40, %v6403_v10 }
 0x577   : > { %12756 = vst [vmem:[#allocation19_spill] sm:$0xff] %v11866_v50  ;;  %v9779_v6 = vpop.eup %9778  ;;  %v6024_v31 = vadd.f32 1.0, %v9777_v60  ;;  %9800 = vpow2.f32 %v7792_v58  ;;  %v7794_v61 = vmul.f32 -1.442695, %v8074_v2  ;;  %v6628_v60 = vpop.xlane.xlu0 %6627  ;;  %v12759_v2 = vld [vmem:[#allocation20_spill] sm:$0xff] }
 0x578   : > { %v9781_v5 = vpop.eup %9780  ;;  %v6404_v56 = vmul.f32 %v9779_v6, %v9775_v28  ;;  %v6698_v38 = vadd.f32 %v6543_v37, %v6542_v27  ;;  %v11875_v10 = vpop.f32.mrb[100].mxu0  ;;  %v6817_v21 = vadd.f32 %v11778_v33, %v6628_v60  ;;  %v7795_v37 = vmul.f32 -1.442695, %v8075_v57 }
 0x579   : > { %v9783_v3 = vpop.eup %9782  ;;  %9802 = vrcp.f32 %v6024_v31  ;;  %12757 = vst [vmem:[#allocation45_spill] sm:$0xff] %v11875_v10  ;;  %v11879_v6 = vpop.f32.mrb[100].mxu1  ;;  %v8076_v31 = vadd.f32 %v11634_v18, %v11155_v44  ;;  %v8077_v57 = vadd.f32 %v11642_v26, %v11157_v45 }
 0x57a   : > { %v9785_v50 = vpop.eup %9784  ;;  %9804 = vtanh.f32 %v7941_v29  ;;  %v6025_v54 = vadd.f32 1.0, %v9783_v3  ;;  %6699 = vadd.xlane.f32.xlu0 %v6698_v38  ;;  %v6544_v58 = vmul.f32 %v11229_v36, %v6404_v56  ;;  %v11881_v25 = vpop.f32.mrb[101].mxu0  ;;  %v7943_v29 = vadd.f32 %v12759_v2, %v11172_v63  ;;  %6882 = vst.msk [vmem:[%s11800_s6 + $0x20] sm:$0xff] %vm6877_vm0, %v6817_v21 }
 0x57b   : > { %v9787_v55 = vpop.eup %9786  ;;  %9806 = vpow2.f32 %v7793_v35  ;;  %v6405_v28 = vmul.f32 %v9785_v50, %v9781_v5  ;;  %12758 = vst [vmem:[#allocation46_spill] sm:$0xff] %v11881_v25  ;;  %v11887_v35 = vpop.f32.mrb[101].mxu1 }
 0x57c   : > { %v9789_v27 = vpop.eup %9788  ;;  %9808 = vrcp.f32 %v6025_v54  ;;  %v11889_v38 = vpop.f32.mrb[102].mxu0 }
 0x57d   : > { %12760 = vst [vmem:[#allocation20_spill] sm:$0xff] %v11889_v38  ;;  %v9791_v50 = vpop.eup %9790  ;;  %9810 = vtanh.f32 %v7942_v24  ;;  %v6026_v56 = vadd.f32 1.0, %v9789_v27  ;;  %v6545_v5 = vmul.f32 %v11236_v40, %v6405_v28  ;;  %v11894_v3 = vpop.f32.mrb[102].mxu1  ;;  %v12763_v38 = vld [vmem:[#allocation21_spill] sm:$0xff] }
 0x57e   : > { %v11896_v54 = vpop.f32.mrb[103].mxu0  ;;  %v9793_v60 = vpop.eup %9792  ;;  %9812 = vpow2.f32 %v7794_v61  ;;  %v6406_v2 = vmul.f32 %v9791_v50, %v9787_v55  ;;  %v7944_v24 = vadd.f32 %v12763_v38, %v11166_v53  ;;  %v12764_v38 = vld [vmem:[#allocation22_spill] sm:$0xff] }
 0x57f   : > { %12761 = vst [vmem:[#allocation47_spill] sm:$0xff] %v11896_v54  ;;  %v11898_v18 = vpop.f32.mrb[103].mxu1  ;;  %v9795_v25 = vpop.eup %9794  ;;  %9814 = vrcp.f32 %v6026_v56  ;;  %v6701_v28 = vadd.f32 %v6545_v5, %v6544_v58  ;;  %v7796_v54 = vmul.f32 -1.442695, %v8076_v31  ;;  %v7945_v26 = vadd.f32 %v12764_v38, %v11172_v63 }
 0x580   : > { %12762 = vst [vmem:[#allocation48_spill] sm:$0xff] %v11898_v18  ;;  %v6631_v21 = vpop.xlane.xlu1 %6630  ;;  %v9797_v27 = vpop.eup %9796  ;;  %9816 = vtanh.f32 %v7943_v29  ;;  %v6027_v10 = vadd.f32 1.0, %v9795_v25  ;;  %v6546_v56 = vmul.f32 %v11229_v36, %v6406_v2  ;;  %v8078_v58 = vadd.f32 %v11652_v13, %v11155_v44 }
 0x581   : > { %v6818_v61 = vadd.f32 %v11778_v33, %v6631_v21  ;;  %v9799_v55 = vpop.eup %9798  ;;  %9818 = vpow2.f32 %v7795_v37  ;;  %6702 = vadd.xlane.f32.xlu1 %v6701_v28  ;;  %v6407_v50 = vmul.f32 %v9797_v27, %v9793_v60  ;;  %v11912_v25 = vpop.f32.mrb[104].mxu0  ;;  %v7797_v5 = vmul.f32 -1.442695, %v8077_v57 }
 0x582   : > { %v9801_v18 = vpop.eup %9800  ;;  %9820 = vrcp.f32 %v6027_v10  ;;  %12765 = vst [vmem:[#allocation21_spill] sm:$0xff] %v11912_v25  ;;  %v11914_v29 = vpop.f32.mrb[104].mxu1  ;;  %v7946_v13 = vadd.f32 %v11623_v20, %v11166_v53 }
 0x583   : > { %6883 = vst.msk [vmem:[%s11800_s6 + $0x28] sm:$0xff] %vm6877_vm0, %v6818_v61  ;;  %v9803_v31 = vpop.eup %9802  ;;  %9822 = vtanh.f32 %v7944_v24  ;;  %v6028_v37 = vadd.f32 1.0, %v9801_v18  ;;  %v6547_v60 = vmul.f32 %v11236_v40, %v6407_v50  ;;  %v11917_v2 = vpop.f32.mrb[105].mxu0  ;;  %v8079_v18 = vadd.f32 %v11660_v12, %v11157_v45 }
 0x584   : > { %12766 = vst [vmem:[#allocation22_spill] sm:$0xff] %v11917_v2  ;;  %v11919_v10 = vpop.f32.mrb[105].mxu1  ;;  %v9805_v28 = vpop.eup %9804  ;;  %9824 = vpow2.f32 %v7796_v54  ;;  %v6408_v21 = vmul.f32 %v9803_v31, %v9799_v55  ;;  %v7798_v54 = vmul.f32 -1.442695, %v8078_v58 }
 0x585   : > { %v6634_v27 = vpop.xlane.xlu0 %6633  ;;  %v11923_v61 = vpop.f32.mrb[106].mxu0  ;;  %9826 = vrcp.f32 %v6028_v37  ;;  %v6704_v24 = vadd.f32 %v6547_v60, %v6546_v56  ;;  %v12769_v56 = vld [vmem:[#allocation23_spill] sm:$0xff] }
 0x586   : > { %12767 = vst [vmem:[#allocation49_spill] sm:$0xff] %v11923_v61  ;;  %v9807_v38 = vpop.eup %9806  ;;  %v6819_v57 = vadd.f32 %v11778_v33, %v6634_v27  ;;  %v11928_v50 = vpop.f32.mrb[106].mxu1  ;;  %9828 = vtanh.f32 %v7945_v26  ;;  %v6548_v61 = vmul.f32 %v11229_v36, %v6408_v21  ;;  %v7947_v60 = vadd.f32 %v12769_v56, %v11172_v63 }
 0x587   : > { %v11930_v2 = vpop.f32.mrb[107].mxu0  ;;  %v9809_v25 = vpop.eup %9808  ;;  %v6029_v20 = vadd.f32 1.0, %v9807_v38  ;;  %9830 = vpow2.f32 %v7797_v5  ;;  %6705 = vadd.xlane.f32.xlu0 %v6704_v24  ;;  %v8080_v26 = vadd.f32 %v11664_v15, %v11155_v44  ;;  %v7799_v38 = vmul.f32 -1.442695, %v8079_v18 }
 0x588   : > { %12768 = vst [vmem:[#allocation50_spill] sm:$0xff] %v11930_v2  ;;  %v11932_v55 = vpop.f32.mrb[107].mxu1  ;;  %v9811_v31 = vpop.eup %9810  ;;  %v6409_v37 = vmul.f32 %v9809_v25, %v9805_v28  ;;  %6884 = vst.msk [vmem:[%s11800_s6 + $0x30] sm:$0xff] %vm6877_vm0, %v6819_v57  ;;  %v12770_v25 = vld [vmem:[#allocation24_spill] sm:$0xff]  ;;  %v8081_v15 = vadd.f32 %v11669_v14, %v11157_v45 }
 0x589   : > { %v9813_v12 = vpop.eup %9812  ;;  %9832 = vrcp.f32 %v6029_v20  ;;  %v7948_v28 = vadd.f32 %v12770_v25, %v11166_v53  ;;  %v6637_v57 = vpop.xlane.xlu1 %6636 }
 0x58a   : > { %v9815_v27 = vpop.eup %9814  ;;  %9834 = vtanh.f32 %v7946_v13  ;;  %v6030_v58 = vadd.f32 1.0, %v9813_v12  ;;  %v6549_v5 = vmul.f32 %v11236_v40, %v6409_v37  ;;  %v11944_v20 = vpop.f32.mrb[108].mxu0  ;;  %v6820_v18 = vadd.f32 %v11778_v33, %v6637_v57 }
 0x58b   : > { %v9817_v24 = vpop.eup %9816  ;;  %9836 = vpow2.f32 %v7798_v54  ;;  %v6410_v21 = vmul.f32 %v9815_v27, %v9811_v31  ;;  %12771 = vst [vmem:[#allocation23_spill] sm:$0xff] %v11944_v20  ;;  %v11949_v12 = vpop.f32.mrb[108].mxu1  ;;  %v7800_v31 = vmul.f32 -1.442695, %v8080_v26 }
 0x58c   : > { %v9819_v2 = vpop.eup %9818  ;;  %9838 = vrcp.f32 %v6030_v58  ;;  %v6707_v13 = vadd.f32 %v6549_v5, %v6548_v61  ;;  %v11951_v37 = vpop.f32.mrb[109].mxu0  ;;  %6885 = vst.msk [vmem:[%s11800_s6 + $0x38] sm:$0xff] %vm6877_vm0, %v6820_v18 }
 0x58d   : > { %12772 = vst [vmem:[#allocation24_spill] sm:$0xff] %v11951_v37  ;;  %v9821_v56 = vpop.eup %9820  ;;  %9840 = vtanh.f32 %v7947_v60  ;;  %v6031_v54 = vadd.f32 1.0, %v9819_v2  ;;  %v11953_v27 = vpop.f32.mrb[109].mxu1  ;;  %v6550_v61 = vmul.f32 %v11229_v36, %v6410_v21  ;;  %v7949_v2 = vadd.f32 %v11640_v43, %v11172_v63 }
 0x58e   : > { %v11955_v25 = vpop.f32.mrb[110].mxu0  ;;  %v9823_v58 = vpop.eup %9822  ;;  %9842 = vpow2.f32 %v7799_v38  ;;  %6708 = vadd.xlane.f32.xlu1 %v6707_v13  ;;  %v6411_v14 = vmul.f32 %v9821_v56, %v9817_v24  ;;  %v8082_v60 = vadd.f32 %v11682_v17, %v11155_v44  ;;  %v7801_v21 = vmul.f32 -1.442695, %v8081_v15 }
 0x58f   : > { %12773 = vst [vmem:[#allocation51_spill] sm:$0xff] %v11955_v25  ;;  %v11960_v5 = vpop.f32.mrb[110].mxu1  ;;  %v11962_v57 = vpop.f32.mrb[111].mxu0  ;;  %9844 = vrcp.f32 %v6031_v54  ;;  %v7950_v56 = vadd.f32 %v11650_v19, %v11166_v53  ;;  %v8083_v43 = vadd.f32 %v11687_v62, %v11157_v45 }
 0x590   : > { %12774 = vst [vmem:[#allocation52_spill] sm:$0xff] %v11962_v57  ;;  %v9825_v37 = vpop.eup %9824  ;;  %v11968_v26 = vpop.f32.mrb[111].mxu1  ;;  %9846 = vtanh.f32 %v7948_v28  ;;  %v6551_v13 = vmul.f32 %v11236_v40, %v6411_v14  ;;  %v7802_v14 = vmul.f32 -1.442695, %v8082_v60  ;;  %v8084_v60 = vadd.f32 %v11695_v51, %v11155_v44 }
 0x591   : > { %12775 = vst [vmem:[#allocation53_spill] sm:$0xff] %v11968_v26  ;;  %v9827_v38 = vpop.eup %9826  ;;  %v6032_v24 = vadd.f32 1.0, %v9825_v37  ;;  %9848 = vpow2.f32 %v7800_v31  ;;  %v6640_v57 = vpop.xlane.xlu0 %6639 }
 0x592   : > { %v9829_v18 = vpop.eup %9828  ;;  %v6412_v54 = vmul.f32 %v9827_v38, %v9823_v58  ;;  %v6710_v17 = vadd.f32 %v6551_v13, %v6550_v61  ;;  %v6821_v28 = vadd.f32 %v11778_v33, %v6640_v57  ;;  %v11976_v20 = vpop.f32.mrb[112].mxu0 }
 0x593   : > { %v9831_v25 = vpop.eup %9830  ;;  %9850 = vrcp.f32 %v6032_v24  ;;  %12776 = vst [vmem:[#allocation54_spill] sm:$0xff] %v11976_v20  ;;  %v11978_v26 = vpop.f32.mrb[112].mxu1  ;;  %v7804_v20 = vmul.f32 -1.442695, %v8084_v60 }
 0x594   : > { %v9833_v37 = vpop.eup %9832  ;;  %9852 = vtanh.f32 %v7949_v2  ;;  %v6033_v15 = vadd.f32 1.0, %v9831_v25  ;;  %6711 = vadd.xlane.f32.xlu0 %v6710_v17  ;;  %v6552_v58 = vmul.f32 %v11229_v36, %v6412_v54  ;;  %6886 = vst.msk [vmem:[%s11800_s6 + $0x40] sm:$0xff] %vm6877_vm0, %v6821_v28  ;;  %v11983_v62 = vpop.f32.mrb[113].mxu0  ;;  %v12778_v25 = vld [vmem:[#allocation25_spill] sm:$0xff] }
 0x595   : > { %v9835_v19 = vpop.eup %9834  ;;  %9854 = vpow2.f32 %v7801_v21  ;;  %v6413_v31 = vmul.f32 %v9833_v37, %v9829_v18  ;;  %12777 = vst [vmem:[#allocation55_spill] sm:$0xff] %v11983_v62  ;;  %v11985_v61 = vpop.f32.mrb[113].mxu1  ;;  %v7951_v2 = vadd.f32 %v12778_v25, %v11172_v63  ;;  %v7803_v18 = vmul.f32 -1.442695, %v8083_v43 }
 0x596   : > { %v9837_v57 = vpop.eup %9836  ;;  %9856 = vrcp.f32 %v6033_v15  ;;  %v11991_v38 = vpop.f32.mrb[114].mxu0  ;;  %v12782_v15 = vld [vmem:[#allocation26_spill] sm:$0xff] }
 0x597   : > { %12779 = vst [vmem:[#allocation25_spill] sm:$0xff] %v11991_v38  ;;  %v11993_v24 = vpop.f32.mrb[114].mxu1  ;;  %v9839_v21 = vpop.eup %9838  ;;  %9858 = vtanh.f32 %v7950_v56  ;;  %v6034_v13 = vadd.f32 1.0, %v9837_v57  ;;  %v6553_v54 = vmul.f32 %v11236_v40, %v6413_v31  ;;  %v7952_v25 = vadd.f32 %v12782_v15, %v11166_v53 }
 0x598   : > { %v11996_v17 = vpop.f32.mrb[115].mxu0  ;;  %v11998_v28 = vpop.f32.mrb[115].mxu1  ;;  %9860 = vpow2.f32 %v7802_v14  ;;  %v6414_v51 = vmul.f32 %v9839_v21, %v9835_v19  ;;  %v8085_v56 = vadd.f32 %v11700_v9, %v11157_v45  ;;  %v12783_v21 = vld [vmem:[#allocation27_spill] sm:$0xff] }
 0x599   : > { %12780 = vst [vmem:[#allocation56_spill] sm:$0xff] %v11996_v17  ;;  %12781 = vst [vmem:[#allocation57_spill] sm:$0xff] %v11998_v28  ;;  %v9841_v37 = vpop.eup %9840  ;;  %v6643_v38 = vpop.xlane.xlu1 %6642  ;;  %9862 = vrcp.f32 %v6034_v13  ;;  %v6713_v43 = vadd.f32 %v6553_v54, %v6552_v58  ;;  %v7953_v9 = vadd.f32 %v12783_v21, %v11172_v63  ;;  %v8086_v58 = vadd.f32 %v11713_v34, %v11155_v44 }
 0x59a   : > { %v9843_v62 = vpop.eup %9842  ;;  %v6822_v31 = vadd.f32 %v11778_v33, %v6643_v38  ;;  %9864 = vtanh.f32 %v7951_v2  ;;  %v6554_v14 = vmul.f32 %v11229_v36, %v6414_v51  ;;  %v12012_v38 = vpop.f32.mrb[116].mxu0  ;;  %v7805_v13 = vmul.f32 -1.442695, %v8085_v56 }
 0x59b   : > { %v9845_v57 = vpop.eup %9844  ;;  %v6035_v17 = vadd.f32 1.0, %v9843_v62  ;;  %9866 = vpow2.f32 %v7803_v18  ;;  %6714 = vadd.xlane.f32.xlu1 %v6713_v43  ;;  %v12014_v62 = vpop.f32.mrb[116].mxu1  ;;  %v7954_v51 = vadd.f32 %v11680_v39, %v11166_v53 }
 0x59c   : > { %v9847_v28 = vpop.eup %9846  ;;  %v6415_v15 = vmul.f32 %v9845_v57, %v9841_v37  ;;  %6887 = vst.msk [vmem:[%s11800_s6 + $0x48] sm:$0xff] %vm6877_vm0, %v6822_v31  ;;  %v12017_v54 = vpop.f32.mrb[117].mxu0 }
 0x59d   : > { %v9849_v19 = vpop.eup %9848  ;;  %9868 = vrcp.f32 %v6035_v17  ;;  %12784 = vst [vmem:[#allocation26_spill] sm:$0xff] %v12017_v54  ;;  %v12019_v37 = vpop.f32.mrb[117].mxu1 }
 0x59e   : > { %v9851_v2 = vpop.eup %9850  ;;  %9870 = vtanh.f32 %v7952_v25  ;;  %v6036_v60 = vadd.f32 1.0, %v9849_v19  ;;  %v6555_v18 = vmul.f32 %v11236_v40, %v6415_v15  ;;  %v6646_v43 = vpop.xlane.xlu0 %6645  ;;  %v8087_v25 = vadd.f32 %v11718_v22, %v11157_v45 }
 0x59f   : > { %v9853_v17 = vpop.eup %9852  ;;  %9872 = vpow2.f32 %v7804_v20  ;;  %v6416_v34 = vmul.f32 %v9851_v2, %v9847_v28  ;;  %v12023_v31 = vpop.f32.mrb[118].mxu0  ;;  %v6823_v15 = vadd.f32 %v11778_v33, %v6646_v43  ;;  %v7806_v20 = vmul.f32 -1.442695, %v8086_v58 }
 0x5a0   : > { %12785 = vst [vmem:[#allocation27_spill] sm:$0xff] %v12023_v31  ;;  %v9855_v57 = vpop.eup %9854  ;;  %9874 = vrcp.f32 %v6036_v60  ;;  %v6716_v56 = vadd.f32 %v6555_v18, %v6554_v14  ;;  %v12028_v19 = vpop.f32.mrb[118].mxu1  ;;  %v12787_v14 = vld [vmem:[#allocation28_spill] sm:$0xff] }
 0x5a1   : > { %v12030_v21 = vpop.f32.mrb[119].mxu0  ;;  %v9857_v54 = vpop.eup %9856  ;;  %9876 = vtanh.f32 %v7953_v9  ;;  %v6037_v39 = vadd.f32 1.0, %v9855_v57  ;;  %v6556_v31 = vmul.f32 %v11229_v36, %v6416_v34  ;;  %6888 = vst.msk [vmem:[%s11800_s6 + $0x50] sm:$0xff] %vm6877_vm0, %v6823_v15  ;;  %v7955_v18 = vadd.f32 %v12787_v14, %v11172_v63 }
 0x5a2   : > { %12786 = vst [vmem:[#allocation58_spill] sm:$0xff] %v12030_v21  ;;  %v12032_v28 = vpop.f32.mrb[119].mxu1  ;;  %v9859_v2 = vpop.eup %9858  ;;  %9878 = vpow2.f32 %v7805_v13  ;;  %6717 = vadd.xlane.f32.xlu0 %v6716_v56  ;;  %v6417_v60 = vmul.f32 %v9857_v54, %v9853_v17  ;;  %v8088_v9 = vadd.f32 %v11722_v11, %v11155_v44  ;;  %v7807_v57 = vmul.f32 -1.442695, %v8087_v25  ;;  %v12788_v54 = vld [vmem:[#allocation29_spill] sm:$0xff] }
 0x5a3   : > { %v9861_v22 = vpop.eup %9860  ;;  %9880 = vrcp.f32 %v6037_v39  ;;  %v7956_v17 = vadd.f32 %v12788_v54, %v11166_v53  ;;  %v6649_v15 = vpop.xlane.xlu1 %6648  ;;  %v8089_v11 = vadd.f32 %v11730_v59, %v11157_v45 }
 0x5a4   : > { %v9863_v43 = vpop.eup %9862  ;;  %9882 = vtanh.f32 %v7954_v51  ;;  %v6038_v58 = vadd.f32 1.0, %v9861_v22  ;;  %v6557_v13 = vmul.f32 %v11236_v40, %v6417_v60  ;;  %v12044_v39 = vpop.f32.mrb[120].mxu0  ;;  %v6824_v25 = vadd.f32 %v11778_v33, %v6649_v15 }
 0x5a5   : > { %v9865_v56 = vpop.eup %9864  ;;  %9884 = vpow2.f32 %v7806_v20  ;;  %v6418_v34 = vmul.f32 %v9863_v43, %v9859_v2  ;;  %12789 = vst [vmem:[#allocation28_spill] sm:$0xff] %v12044_v39  ;;  %v12049_v22 = vpop.f32.mrb[120].mxu1  ;;  %v7808_v2 = vmul.f32 -1.442695, %v8088_v9  ;;  %v8090_v9 = vadd.f32 %v11740_v4, %v11155_v44 }
 0x5a6   : > { %v9867_v21 = vpop.eup %9866  ;;  %9886 = vrcp.f32 %v6038_v58  ;;  %v6719_v51 = vadd.f32 %v6557_v13, %v6556_v31  ;;  %v12051_v60 = vpop.f32.mrb[121].mxu0  ;;  %6889 = vst.msk [vmem:[%s11800_s6 + $0x58] sm:$0xff] %vm6877_vm0, %v6824_v25  ;;  %v8091_v4 = vadd.f32 %v11748_v32, %v11157_v45 }
 0x5a7   : > { %12790 = vst [vmem:[#allocation29_spill] sm:$0xff] %v12051_v60  ;;  %v9869_v14 = vpop.eup %9868  ;;  %9888 = vtanh.f32 %v7955_v18  ;;  %v6039_v20 = vadd.f32 1.0, %v9867_v21  ;;  %v12053_v43 = vpop.f32.mrb[121].mxu1  ;;  %v6558_v31 = vmul.f32 %v11229_v36, %v6418_v34  ;;  %v12794_v21 = vld [vmem:[#allocation30_spill] sm:$0xff]  ;;  %v7809_v34 = vmul.f32 -1.442695, %v8089_v11 }
 0x5a8   : > { %v12055_v54 = vpop.f32.mrb[122].mxu0  ;;  %v9871_v58 = vpop.eup %9870  ;;  %9890 = vpow2.f32 %v7807_v57  ;;  %6720 = vadd.xlane.f32.xlu1 %v6719_v51  ;;  %v6419_v59 = vmul.f32 %v9869_v14, %v9865_v56  ;;  %v7957_v18 = vadd.f32 %v12794_v21, %v11172_v63  ;;  %v7958_v14 = vadd.f32 %v11711_v48, %v11166_v53 }
 0x5a9   : > { %12791 = vst [vmem:[#allocation59_spill] sm:$0xff] %v12055_v54  ;;  %v12060_v13 = vpop.f32.mrb[122].mxu1  ;;  %v12062_v15 = vpop.f32.mrb[123].mxu0  ;;  %9892 = vrcp.f32 %v6039_v20 }
 0x5aa   : > { %12792 = vst [vmem:[#allocation60_spill] sm:$0xff] %v12060_v13  ;;  %12793 = vst [vmem:[#allocation61_spill] sm:$0xff] %v12062_v15  ;;  %v9873_v60 = vpop.eup %9872  ;;  %v12068_v54 = vpop.f32.mrb[123].mxu1  ;;  %9894 = vtanh.f32 %v7956_v17  ;;  %v6559_v51 = vmul.f32 %v11236_v40, %v6419_v59  ;;  %v7810_v59 = vmul.f32 -1.442695, %v8090_v9  ;;  %v8092_v9 = vadd.f32 %v11752_v42, %v11155_v44 }
 0x5ab   : > { %12795 = vst [vmem:[#allocation30_spill] sm:$0xff] %v12068_v54  ;;  %v9875_v57 = vpop.eup %9874  ;;  %v6040_v56 = vadd.f32 1.0, %v9873_v60  ;;  %9896 = vpow2.f32 %v7808_v2  ;;  %v6652_v15 = vpop.xlane.xlu0 %6651 }
 0x5ac   : > { %v9877_v25 = vpop.eup %9876  ;;  %v6420_v20 = vmul.f32 %v9875_v57, %v9871_v58  ;;  %v6722_v21 = vadd.f32 %v6559_v51, %v6558_v31  ;;  %v6825_v17 = vadd.f32 %v11778_v33, %v6652_v15  ;;  %v12076_v54 = vpop.f32.mrb[124].mxu0 }
 0x5ad   : > { %v9879_v39 = vpop.eup %9878  ;;  %9898 = vrcp.f32 %v6040_v56  ;;  %12796 = vst [vmem:[#allocation62_spill] sm:$0xff] %v12076_v54  ;;  %v12078_v13 = vpop.f32.mrb[124].mxu1  ;;  %v7812_v54 = vmul.f32 -1.442695, %v8092_v9 }
 0x5ae   : > { %v9881_v60 = vpop.eup %9880  ;;  %9900 = vtanh.f32 %v7957_v18  ;;  %v6041_v11 = vadd.f32 1.0, %v9879_v39  ;;  %6723 = vadd.xlane.f32.xlu0 %v6722_v21  ;;  %v6560_v58 = vmul.f32 %v11229_v36, %v6420_v20  ;;  %6890 = vst.msk [vmem:[%s11800_s6 + $0x60] sm:$0xff] %vm6877_vm0, %v6825_v17  ;;  %v12083_v32 = vpop.f32.mrb[125].mxu0  ;;  %v12798_v39 = vld [vmem:[#allocation31_spill] sm:$0xff] }
 0x5af   : > { %v9883_v48 = vpop.eup %9882  ;;  %9902 = vpow2.f32 %v7809_v34  ;;  %v6421_v2 = vmul.f32 %v9881_v60, %v9877_v25  ;;  %12797 = vst [vmem:[#allocation63_spill] sm:$0xff] %v12083_v32  ;;  %v12085_v31 = vpop.f32.mrb[125].mxu1  ;;  %v7959_v18 = vadd.f32 %v12798_v39, %v11172_v63  ;;  %v7811_v25 = vmul.f32 -1.442695, %v8091_v4 }
 0x5b0   : > { %v9885_v15 = vpop.eup %9884  ;;  %9904 = vrcp.f32 %v6041_v11  ;;  %v12091_v57 = vpop.f32.mrb[126].mxu0  ;;  %v12802_v11 = vld [vmem:[#allocation32_spill] sm:$0xff] }
 0x5b1   : > { %12799 = vst [vmem:[#allocation31_spill] sm:$0xff] %v12091_v57  ;;  %v12093_v56 = vpop.f32.mrb[126].mxu1  ;;  %v9887_v34 = vpop.eup %9886  ;;  %9906 = vtanh.f32 %v7958_v14  ;;  %v6042_v51 = vadd.f32 1.0, %v9885_v15  ;;  %v6561_v20 = vmul.f32 %v11236_v40, %v6421_v2  ;;  %v7960_v39 = vadd.f32 %v12802_v11, %v11166_v53 }
 0x5b2   : > { %v12096_v21 = vpop.f32.mrb[127].mxu0  ;;  %v12098_v17 = vpop.f32.mrb[127].mxu1  ;;  %9908 = vpow2.f32 %v7810_v59  ;;  %v6422_v42 = vmul.f32 %v9887_v34, %v9883_v48  ;;  %v8093_v14 = vadd.f32 %v11757_v16, %v11157_v45  ;;  %v7961_v16 = vadd.f32 %v11728_v8, %v11172_v63  ;;  %v12804_v8 = vld [vmem:[#allocation38_spill] sm:$0xff] }
 0x5b3   : > { %12800 = vst [vmem:[#allocation64_spill] sm:$0xff] %v12096_v21  ;;  %12801 = vst [vmem:[#allocation65_spill] sm:$0xff] %v12098_v17  ;;  %v9889_v60 = vpop.eup %9888  ;;  %v6655_v57 = vpop.xlane.xlu1 %6654  ;;  %9910 = vrcp.f32 %v6042_v51  ;;  %v6725_v4 = vadd.f32 %v6561_v20, %v6560_v58  ;;  %v8094_v58 = vadd.f32 %v11770_v46, %v11155_v44  ;;  %v12803_v51 = vld [vmem:[#allocation33_spill] sm:$0xff] }
 0x5b4   : > { %v9891_v32 = vpop.eup %9890  ;;  %v6826_v2 = vadd.f32 %v11778_v33, %v6655_v57  ;;  %9912 = vtanh.f32 %v7959_v18  ;;  %v6562_v59 = vmul.f32 %v11229_v36, %v6422_v42  ;;  %v7813_v18 = vmul.f32 -1.442695, %v8093_v14 }
 0x5b5   : > { %v9893_v15 = vpop.eup %9892  ;;  %v6043_v21 = vadd.f32 1.0, %v9891_v32  ;;  %9914 = vpow2.f32 %v7811_v25  ;;  %6726 = vadd.xlane.f32.xlu1 %v6725_v4  ;;  %v7962_v25 = vadd.f32 %v12803_v51, %v11166_v53  ;;  %v8095_v42 = vadd.f32 %v12804_v8, %v11157_v45 }
 0x5b6   : > { %v9895_v17 = vpop.eup %9894  ;;  %v6423_v11 = vmul.f32 %v9893_v15, %v9889_v60  ;;  %6891 = vst.msk [vmem:[%s11800_s6 + $0x68] sm:$0xff] %vm6877_vm0, %v6826_v2  ;;  %v7814_v2 = vmul.f32 -1.442695, %v8094_v58 }
 0x5b7   : > { %v9897_v48 = vpop.eup %9896  ;;  %9916 = vrcp.f32 %v6043_v21  ;;  %v6658_v21 = vpop.xlane.xlu0 %6657  ;;  %v7815_v58 = vmul.f32 -1.442695, %v8095_v42 }
 0x5b8   : > { %v9899_v57 = vpop.eup %9898  ;;  %9918 = vtanh.f32 %v7960_v39  ;;  %v6044_v32 = vadd.f32 1.0, %v9897_v48  ;;  %v6563_v9 = vmul.f32 %v11236_v40, %v6423_v11  ;;  %v6827_v39 = vadd.f32 %v11778_v33, %v6658_v21  ;;  %v12805_v48 = vld [vmem:[#allocation34_spill] sm:$0xff] }
 0x5b9   : > { %v9901_v34 = vpop.eup %9900  ;;  %9920 = vpow2.f32 %v7812_v54  ;;  %v6424_v20 = vmul.f32 %v9899_v57, %v9895_v17  ;;  %v7963_v57 = vadd.f32 %v12805_v48, %v11172_v63  ;;  %v12808_v48 = vld [vmem:[#allocation36_spill] sm:$0xff] }
 0x5ba   : > { %v9903_v60 = vpop.eup %9902  ;;  %9922 = vrcp.f32 %v6044_v32  ;;  %v6728_v46 = vadd.f32 %v6563_v9, %v6562_v59  ;;  %6892 = vst.msk [vmem:[%s11800_s6 + $0x70] sm:$0xff] %vm6877_vm0, %v6827_v39  ;;  %v12806_v59 = vld [vmem:[#allocation39_spill] sm:$0xff] }
 0x5bb   : > { %v9905_v4 = vpop.eup %9904  ;;  %9924 = vtanh.f32 %v7961_v16  ;;  %v6045_v14 = vadd.f32 1.0, %v9903_v60  ;;  %v6564_v54 = vmul.f32 %v11229_v36, %v6424_v20  ;;  %v8096_v32 = vadd.f32 %v12806_v59, %v11155_v44  ;;  %v6661_v60 = vpop.xlane.xlu1 %6660 }
 0x5bc   : > { %v9907_v15 = vpop.eup %9906  ;;  %9926 = vpow2.f32 %v7813_v18  ;;  %6729 = vadd.xlane.f32.xlu0 %v6728_v46  ;;  %v6425_v11 = vmul.f32 %v9905_v4, %v9901_v34  ;;  %v12807_v34 = vld [vmem:[#allocation35_spill] sm:$0xff]  ;;  %v8097_v46 = vadd.f32 %v11792_v0, %v11157_v45  ;;  %v7965_v0 = vadd.f32 %v12808_v48, %v11172_v63 }
 0x5bd   : > { %v9909_v17 = vpop.eup %9908  ;;  %9928 = vrcp.f32 %v6045_v14  ;;  %v7964_v20 = vadd.f32 %v12807_v34, %v11166_v53  ;;  %v7816_v14 = vmul.f32 -1.442695, %v8096_v32 }
 0x5be   : > { %v9911_v9 = vpop.eup %9910  ;;  %9930 = vtanh.f32 %v7962_v25  ;;  %v6046_v16 = vadd.f32 1.0, %v9909_v17  ;;  %v6565_v18 = vmul.f32 %v11236_v40, %v6425_v11  ;;  %v6828_v25 = vadd.f32 %v11778_v33, %v6661_v60  ;;  %v12143_v60 = vld [vmem:[#allocation2] ss:$0 sm:$0xff] }
 0x5bf   : > { %v9913_v51 = vpop.eup %9912  ;;  %9932 = vpow2.f32 %v7814_v2  ;;  %v6426_v21 = vmul.f32 %v9911_v9, %v9907_v15  ;;  %v8098_v33 = vadd.f32 %v11812_v49, %v11155_v44  ;;  %v7817_v59 = vmul.f32 -1.442695, %v8097_v46 }
 0x5c0   : > { %v9915_v8 = vpop.eup %9914  ;;  %9934 = vrcp.f32 %v6046_v16  ;;  %v6731_v39 = vadd.f32 %v6565_v18, %v6564_v54  ;;  %6893 = vst.msk [vmem:[%s11800_s6 + $0x78] sm:$0xff] %vm6877_vm0, %v6828_v25  ;;  %v12809_v16 = vld [vmem:[#allocation14_spill] sm:$0xff] }
 0x5c1   : > { %v9917_v4 = vpop.eup %9916  ;;  %9936 = vtanh.f32 %v7963_v57  ;;  %v6047_v42 = vadd.f32 1.0, %v9915_v8  ;;  %v6566_v2 = vmul.f32 %v11229_v36, %v6426_v21  ;;  %v8099_v21 = vadd.f32 %v11817_v30, %v11157_v45  ;;  %v12810_v30 = vld [vmem:[#allocation37_spill] sm:$0xff] }
 0x5c2   : > { %v9919_v11 = vpop.eup %9918  ;;  %9938 = vpow2.f32 %v7815_v58  ;;  %6732 = vadd.xlane.f32.xlu1 %v6731_v39  ;;  %v6427_v17 = vmul.f32 %v9917_v4, %v9913_v51  ;;  %v7966_v58 = vadd.f32 %v12809_v16, %v11166_v53  ;;  %v6664_v51 = vpop.xlane.xlu0 %6663  ;;  %v7818_v39 = vmul.f32 -1.442695, %v8098_v33 }
 0x5c3   : > { %v9921_v15 = vpop.eup %9920  ;;  %9940 = vrcp.f32 %v6047_v42  ;;  %v7819_v48 = vmul.f32 -1.442695, %v8099_v21  ;;  %v8101_v16 = vadd.f32 %v11831_v1, %v11157_v45 }
 0x5c4   : > { %v9923_v54 = vpop.eup %9922  ;;  %9942 = vtanh.f32 %v7964_v20  ;;  %v6048_v57 = vadd.f32 1.0, %v9921_v15  ;;  %v6567_v32 = vmul.f32 %v11236_v40, %v6427_v17  ;;  %v6829_v20 = vadd.f32 %v12143_v60, %v6664_v51 }
 0x5c5   : > { %v9925_v9 = vpop.eup %9924  ;;  %9944 = vpow2.f32 %v7816_v14  ;;  %v6428_v18 = vmul.f32 %v9923_v54, %v9919_v11  ;;  %v7967_v11 = vadd.f32 %v12810_v30, %v11172_v63  ;;  %v8100_v17 = vadd.f32 %v11825_v41, %v11155_v44  ;;  %v12811_v54 = vld [vmem:[#allocation15_spill] sm:$0xff] }
 0x5c6   : > { %v9927_v34 = vpop.eup %9926  ;;  %9946 = vrcp.f32 %v6048_v57  ;;  %v6734_v49 = vadd.f32 %v6567_v32, %v6566_v2  ;;  %6894 = vst.msk [vmem:[%s11800_s6 + $0x80] sm:$0xff] %vm6877_vm0, %v6829_v20  ;;  %v7968_v57 = vadd.f32 %v12811_v54, %v11166_v53  ;;  %v6667_v32 = vpop.xlane.xlu1 %6666 }
 0x5c7   : > { %v9929_v8 = vpop.eup %9928  ;;  %9948 = vtanh.f32 %v7965_v0  ;;  %v6049_v46 = vadd.f32 1.0, %v9927_v34  ;;  %v6568_v42 = vmul.f32 %v11229_v36, %v6428_v18  ;;  %v7820_v34 = vmul.f32 -1.442695, %v8100_v17 }
 0x5c8   : > { %v9931_v25 = vpop.eup %9930  ;;  %9950 = vpow2.f32 %v7817_v59  ;;  %6735 = vadd.xlane.f32.xlu0 %v6734_v49  ;;  %v6429_v4 = vmul.f32 %v9929_v8, %v9925_v9 }
 0x5c9   : > { %v9933_v14 = vpop.eup %9932  ;;  %9952 = vrcp.f32 %v6049_v46  ;;  %v12812_v46 = vld [vmem:[#allocation40_spill] sm:$0xff] }
 0x5ca   : > { %v9935_v2 = vpop.eup %9934  ;;  %9954 = vtanh.f32 %v7966_v58  ;;  %v6050_v15 = vadd.f32 1.0, %v9933_v14  ;;  %v6569_v0 = vmul.f32 %v11236_v40, %v6429_v4  ;;  %v6830_v58 = vadd.f32 %v12143_v60, %v6667_v32 }
 0x5cb   : > { %v9937_v33 = vpop.eup %9936  ;;  %9956 = vpow2.f32 %v7818_v39  ;;  %v6430_v59 = vmul.f32 %v9935_v2, %v9931_v25  ;;  %v7969_v1 = vadd.f32 %v12812_v46, %v11172_v63  ;;  %v8102_v39 = vadd.f32 %v11844_v52, %v11155_v44  ;;  %v6670_v2 = vpop.xlane.xlu0 %6669 }
 0x5cc   : > { %v9939_v9 = vpop.eup %9938  ;;  %9958 = vrcp.f32 %v6050_v15  ;;  %v6737_v41 = vadd.f32 %v6569_v0, %v6568_v42  ;;  %6895 = vst.msk [vmem:[%s11800_s6 + $0x88] sm:$0xff] %vm6877_vm0, %v6830_v58  ;;  %v7821_v42 = vmul.f32 -1.442695, %v8101_v16  ;;  %v6831_v0 = vadd.f32 %v12143_v60, %v6670_v2  ;;  %v12813_v16 = vld [vmem:[#allocation16_spill] sm:$0xff] }
 0x5cd   : > { %v9941_v18 = vpop.eup %9940  ;;  %9960 = vtanh.f32 %v7967_v11  ;;  %v6051_v51 = vadd.f32 1.0, %v9939_v9  ;;  %v6570_v20 = vmul.f32 %v11229_v36, %v6430_v59  ;;  %v7970_v11 = vadd.f32 %v11809_v47, %v11166_v53 }
 0x5ce   : > { %v9943_v21 = vpop.eup %9942  ;;  %9962 = vpow2.f32 %v7819_v48  ;;  %6738 = vadd.xlane.f32.xlu1 %v6737_v41  ;;  %v6431_v49 = vmul.f32 %v9941_v18, %v9937_v33  ;;  %v8103_v48 = vadd.f32 %v11852_v7, %v11157_v45  ;;  %6896 = vst.msk [vmem:[%s11800_s6 + $0x90] sm:$0xff] %vm6877_vm0, %v6831_v0  ;;  %v7971_v7 = vadd.f32 %v12813_v16, %v11172_v63 }
 0x5cf   : > { %v9945_v8 = vpop.eup %9944  ;;  %9964 = vrcp.f32 %v6051_v51  ;;  %v8104_v41 = vadd.f32 %v11858_v23, %v11155_v44  ;;  %v8106_v0 = vadd.f32 %v11879_v6, %v11155_v44 }
 0x5d0   : > { %v9947_v25 = vpop.eup %9946  ;;  %9966 = vtanh.f32 %v7968_v57  ;;  %v6052_v4 = vadd.f32 1.0, %v9945_v8  ;;  %v6571_v14 = vmul.f32 %v11236_v40, %v6431_v49  ;;  %v7822_v57 = vmul.f32 -1.442695, %v8102_v39  ;;  %v12814_v49 = vld [vmem:[#allocation41_spill] sm:$0xff]  ;;  %v6673_v46 = vpop.xlane.xlu1 %6672  ;;  %v12815_v39 = vld [vmem:[#allocation19_spill] sm:$0xff] }
 0x5d1   : > { %v9949_v30 = vpop.eup %9948  ;;  %9968 = vpow2.f32 %v7820_v34  ;;  %v6432_v17 = vmul.f32 %v9947_v25, %v9943_v21  ;;  %v7823_v51 = vmul.f32 -1.442695, %v8103_v48  ;;  %v8105_v25 = vadd.f32 %v12815_v39, %v11157_v45  ;;  %v12816_v48 = vld [vmem:[#allocation42_spill] sm:$0xff] }
 0x5d2   : > { %v9951_v15 = vpop.eup %9950  ;;  %9970 = vrcp.f32 %v6052_v4  ;;  %v6740_v52 = vadd.f32 %v6571_v14, %v6570_v20  ;;  %v7972_v20 = vadd.f32 %v12814_v49, %v11166_v53  ;;  %v6832_v4 = vadd.f32 %v12143_v60, %v6673_v46 }
 0x5d3   : > { %v9953_v33 = vpop.eup %9952  ;;  %9972 = vtanh.f32 %v7969_v1  ;;  %v6053_v54 = vadd.f32 1.0, %v9951_v15  ;;  %v6572_v32 = vmul.f32 %v11229_v36, %v6432_v17  ;;  %v8108_v39 = vadd.f32 %v11894_v3, %v11155_v44 }
 0x5d4   : > { %v9955_v59 = vpop.eup %9954  ;;  %9974 = vpow2.f32 %v7821_v42  ;;  %6741 = vadd.xlane.f32.xlu0 %v6740_v52  ;;  %v6433_v47 = vmul.f32 %v9953_v33, %v9949_v30  ;;  %v7824_v30 = vmul.f32 -1.442695, %v8104_v41  ;;  %6897 = vst.msk [vmem:[%s11800_s6 + $0x98] sm:$0xff] %vm6877_vm0, %v6832_v4  ;;  %v7973_v52 = vadd.f32 %v12816_v48, %v11172_v63  ;;  %v12820_v48 = vld [vmem:[#allocation48_spill] sm:$0xff] }
 0x5d5   : > { %v9957_v9 = vpop.eup %9956  ;;  %9976 = vrcp.f32 %v6053_v54 }
 0x5d6   : > { %v9959_v58 = vpop.eup %9958  ;;  %9978 = vtanh.f32 %v7970_v11  ;;  %v6054_v18 = vadd.f32 1.0, %v9957_v9  ;;  %v6573_v34 = vmul.f32 %v11236_v40, %v6433_v47 }
 0x5d7   : > { %v9961_v21 = vpop.eup %9960  ;;  %9980 = vpow2.f32 %v7822_v57  ;;  %v6434_v8 = vmul.f32 %v9959_v58, %v9955_v59  ;;  %v7825_v57 = vmul.f32 -1.442695, %v8105_v25  ;;  %v8107_v58 = vadd.f32 %v11887_v35, %v11157_v45 }
 0x5d8   : > { %v9963_v1 = vpop.eup %9962  ;;  %9982 = vrcp.f32 %v6054_v18  ;;  %v6743_v23 = vadd.f32 %v6573_v34, %v6572_v32  ;;  %v12817_v32 = vld [vmem:[#allocation17_spill] sm:$0xff] }
 0x5d9   : > { %v9965_v42 = vpop.eup %9964  ;;  %9984 = vtanh.f32 %v7971_v7  ;;  %v6055_v14 = vadd.f32 1.0, %v9963_v1  ;;  %v6574_v2 = vmul.f32 %v11229_v36, %v6434_v8  ;;  %v7974_v9 = vadd.f32 %v12817_v32, %v11166_v53  ;;  %v6676_v7 = vpop.xlane.xlu0 %6675  ;;  %v12818_v1 = vld [vmem:[#allocation18_spill] sm:$0xff] }
 0x5da   : > { %v9967_v11 = vpop.eup %9966  ;;  %9986 = vpow2.f32 %v7823_v51  ;;  %6744 = vadd.xlane.f32.xlu1 %v6743_v23  ;;  %v6435_v17 = vmul.f32 %v9965_v42, %v9961_v21  ;;  %v6833_v18 = vadd.f32 %v12143_v60, %v6676_v7  ;;  %v7826_v21 = vmul.f32 -1.442695, %v8106_v0 }
 0x5db   : > { %v9969_v15 = vpop.eup %9968  ;;  %9988 = vrcp.f32 %v6055_v14  ;;  %v7975_v35 = vadd.f32 %v12818_v1, %v11172_v63  ;;  %v7827_v4 = vmul.f32 -1.442695, %v8107_v58  ;;  %v8111_v1 = vadd.f32 %v11919_v10, %v11157_v45 }
 0x5dc   : > { %v9971_v33 = vpop.eup %9970  ;;  %9990 = vtanh.f32 %v7972_v20  ;;  %v6056_v54 = vadd.f32 1.0, %v9969_v15  ;;  %v6575_v59 = vmul.f32 %v11236_v40, %v6435_v17  ;;  %6898 = vst.msk [vmem:[%s11800_s6 + $0xa0] sm:$0xff] %vm6877_vm0, %v6833_v18 }
 0x5dd   : > { %v9973_v47 = vpop.eup %9972  ;;  %9992 = vpow2.f32 %v7824_v30  ;;  %v6436_v16 = vmul.f32 %v9971_v33, %v9967_v11  ;;  %v12819_v30 = vld [vmem:[#allocation43_spill] sm:$0xff] }
 0x5de   : > { %v9975_v41 = vpop.eup %9974  ;;  %9994 = vrcp.f32 %v6056_v54  ;;  %v6746_v6 = vadd.f32 %v6575_v59, %v6574_v2  ;;  %v7976_v11 = vadd.f32 %v12819_v30, %v11166_v53  ;;  %v6679_v2 = vpop.xlane.xlu1 %6678 }
 0x5df   : > { %v9977_v51 = vpop.eup %9976  ;;  %9996 = vtanh.f32 %v7973_v52  ;;  %v6057_v34 = vadd.f32 1.0, %v9975_v41  ;;  %v6576_v8 = vmul.f32 %v11229_v36, %v6436_v16  ;;  %v8109_v52 = vadd.f32 %v12820_v48, %v11157_v45  ;;  %v12821_v16 = vld [vmem:[#allocation44_spill] sm:$0xff] }
 0x5e0   : > { %v9979_v49 = vpop.eup %9978  ;;  %9998 = vpow2.f32 %v7825_v57  ;;  %6747 = vadd.xlane.f32.xlu0 %v6746_v6  ;;  %v6437_v20 = vmul.f32 %v9977_v51, %v9973_v47  ;;  %v6834_v0 = vadd.f32 %v12143_v60, %v6679_v2  ;;  %v7828_v57 = vmul.f32 -1.442695, %v8108_v39 }
 0x5e1   : > { %v9981_v46 = vpop.eup %9980  ;;  %10000 = vrcp.f32 %v6057_v34  ;;  %v7977_v7 = vadd.f32 %v12821_v16, %v11172_v63  ;;  %v8110_v41 = vadd.f32 %v11914_v29, %v11155_v44  ;;  %v7829_v18 = vmul.f32 -1.442695, %v8109_v52 }
 0x5e2   : > { %v9983_v25 = vpop.eup %9982  ;;  %10002 = vtanh.f32 %v7974_v9  ;;  %v6058_v23 = vadd.f32 1.0, %v9981_v46  ;;  %v6577_v42 = vmul.f32 %v11236_v40, %v6437_v20  ;;  %6899 = vst.msk [vmem:[%s11800_s6 + $0xa8] sm:$0xff] %vm6877_vm0, %v6834_v0  ;;  %v7831_v48 = vmul.f32 -1.442695, %v8111_v1  ;;  %v12824_v0 = vld [vmem:[#allocation20_spill] sm:$0xff]  ;;  %v12826_v1 = vld [vmem:[#allocation21_spill] sm:$0xff] }
 0x5e3   : > { %v9985_v14 = vpop.eup %9984  ;;  %10004 = vpow2.f32 %v7826_v21  ;;  %v6438_v17 = vmul.f32 %v9983_v25, %v9979_v49  ;;  %v12822_v21 = vld [vmem:[#allocation45_spill] sm:$0xff] }
 0x5e4   : > { %v9987_v15 = vpop.eup %9986  ;;  %10006 = vrcp.f32 %v6058_v23  ;;  %v6749_v3 = vadd.f32 %v6577_v42, %v6576_v8  ;;  %v7978_v49 = vadd.f32 %v12822_v21, %v11166_v53  ;;  %v6682_v8 = vpop.xlane.xlu0 %6681  ;;  %v7830_v23 = vmul.f32 -1.442695, %v8110_v41 }
 0x5e5   : > { %v9989_v33 = vpop.eup %9988  ;;  %10008 = vtanh.f32 %v7975_v35  ;;  %v6059_v54 = vadd.f32 1.0, %v9987_v15  ;;  %v6578_v32 = vmul.f32 %v11229_v36, %v6438_v17  ;;  %v6835_v35 = vadd.f32 %v12143_v60, %v6682_v8 }
 0x5e6   : > { %v9991_v59 = vpop.eup %9990  ;;  %10010 = vpow2.f32 %v7827_v4  ;;  %6750 = vadd.xlane.f32.xlu1 %v6749_v3  ;;  %v6439_v47 = vmul.f32 %v9989_v33, %v9985_v14  ;;  %v8112_v17 = vadd.f32 %v11928_v50, %v11155_v44  ;;  %v7980_v33 = vadd.f32 %v12824_v0, %v11166_v53 }
 0x5e7   : > { %v9993_v9 = vpop.eup %9992  ;;  %10012 = vrcp.f32 %v6059_v54  ;;  %6900 = vst.msk [vmem:[%s11800_s6 + $0xb0] sm:$0xff] %vm6877_vm0, %v6835_v35 }
 0x5e8   : > { %v9995_v58 = vpop.eup %9994  ;;  %10014 = vtanh.f32 %v7976_v11  ;;  %v6060_v6 = vadd.f32 1.0, %v9993_v9  ;;  %v6579_v51 = vmul.f32 %v11236_v40, %v6439_v47  ;;  %v12823_v11 = vld [vmem:[#allocation46_spill] sm:$0xff]  ;;  %v8113_v47 = vadd.f32 %v11932_v55, %v11157_v45 }
 0x5e9   : > { %v9997_v34 = vpop.eup %9996  ;;  %10016 = vpow2.f32 %v7828_v57  ;;  %v6440_v20 = vmul.f32 %v9995_v58, %v9991_v59  ;;  %v7979_v10 = vadd.f32 %v12823_v11, %v11172_v63  ;;  %v6685_v57 = vpop.xlane.xlu1 %6684 }
 0x5ea   : > { %v9999_v46 = vpop.eup %9998  ;;  %10018 = vrcp.f32 %v6060_v6  ;;  %v6752_v29 = vadd.f32 %v6579_v51, %v6578_v32  ;;  %v6836_v32 = vadd.f32 %v12143_v60, %v6685_v57  ;;  %v12825_v51 = vld [vmem:[#allocation47_spill] sm:$0xff]  ;;  %v12828_v57 = vld [vmem:[#allocation49_spill] sm:$0xff] }
 0x5eb   : > { %v10001_v39 = vpop.eup %10000  ;;  %10020 = vtanh.f32 %v7977_v7  ;;  %v6061_v25 = vadd.f32 1.0, %v9999_v46  ;;  %v6580_v14 = vmul.f32 %v11229_v36, %v6440_v20  ;;  %v7832_v7 = vmul.f32 -1.442695, %v8112_v17 }
 0x5ec   : > { %v10003_v4 = vpop.eup %10002  ;;  %10022 = vpow2.f32 %v7829_v18  ;;  %6753 = vadd.xlane.f32.xlu0 %v6752_v29  ;;  %v6441_v42 = vmul.f32 %v10001_v39, %v9997_v34  ;;  %6901 = vst.msk [vmem:[%s11800_s6 + $0xb8] sm:$0xff] %vm6877_vm0, %v6836_v32  ;;  %v7981_v55 = vadd.f32 %v12825_v51, %v11172_v63  ;;  %v8114_v34 = vadd.f32 %v11949_v12, %v11155_v44 }
 0x5ed   : > { %v10005_v30 = vpop.eup %10004  ;;  %10024 = vrcp.f32 %v6061_v25  ;;  %v7833_v20 = vmul.f32 -1.442695, %v8113_v47  ;;  %v7982_v29 = vadd.f32 %v12826_v1, %v11166_v53 }
 0x5ee   : > { %v10007_v2 = vpop.eup %10006  ;;  %10026 = vtanh.f32 %v7978_v49  ;;  %v6062_v15 = vadd.f32 1.0, %v10005_v30  ;;  %v6581_v52 = vmul.f32 %v11236_v40, %v6441_v42  ;;  %v6688_v39 = vpop.xlane.xlu0 %6687  ;;  %v7834_v30 = vmul.f32 -1.442695, %v8114_v34 }
 0x5ef   : > { %v10009_v3 = vpop.eup %10008  ;;  %10028 = vpow2.f32 %v7830_v23  ;;  %v6442_v54 = vmul.f32 %v10007_v2, %v10003_v4  ;;  %v8115_v23 = vadd.f32 %v11953_v27, %v11157_v45  ;;  %v6837_v4 = vadd.f32 %v12143_v60, %v6688_v39  ;;  %v12831_v39 = vld [vmem:[#allocation23_spill] sm:$0xff] }
 0x5f0   : > { %v10011_v59 = vpop.eup %10010  ;;  %10030 = vrcp.f32 %v6062_v15  ;;  %v6755_v50 = vadd.f32 %v6581_v52, %v6580_v14  ;;  %v12827_v15 = vld [vmem:[#allocation22_spill] sm:$0xff] }
 0x5f1   : > { %v10013_v9 = vpop.eup %10012  ;;  %10032 = vtanh.f32 %v7979_v10  ;;  %v6063_v16 = vadd.f32 1.0, %v10011_v59  ;;  %v6582_v6 = vmul.f32 %v11229_v36, %v6442_v54  ;;  %6902 = vst.msk [vmem:[%s11800_s6 + $0xc0] sm:$0xff] %vm6877_vm0, %v6837_v4  ;;  %v7983_v27 = vadd.f32 %v12827_v15, %v11172_v63 }
 0x5f2   : > { %v10015_v41 = vpop.eup %10014  ;;  %10034 = vpow2.f32 %v7831_v48  ;;  %6756 = vadd.xlane.f32.xlu1 %v6755_v50  ;;  %v6443_v58 = vmul.f32 %v10013_v9, %v10009_v3  ;;  %v8116_v48 = vadd.f32 %v11960_v5, %v11155_v44  ;;  %v7835_v0 = vmul.f32 -1.442695, %v8115_v23  ;;  %v12829_v9 = vld [vmem:[#allocation53_spill] sm:$0xff] }
 0x5f3   : > { %v10017_v18 = vpop.eup %10016  ;;  %10036 = vrcp.f32 %v6063_v16  ;;  %v7984_v59 = vadd.f32 %v12828_v57, %v11166_v53  ;;  %v8117_v16 = vadd.f32 %v12829_v9, %v11157_v45 }
 0x5f4   : > { %v10019_v21 = vpop.eup %10018  ;;  %10038 = vtanh.f32 %v7980_v33  ;;  %v6064_v49 = vadd.f32 1.0, %v10017_v18  ;;  %v6583_v8 = vmul.f32 %v11236_v40, %v6443_v58  ;;  %v6691_v50 = vpop.xlane.xlu1 %6690 }
 0x5f5   : > { %v10021_v46 = vpop.eup %10020  ;;  %10040 = vpow2.f32 %v7832_v7  ;;  %v6444_v35 = vmul.f32 %v10019_v21, %v10015_v41  ;;  %v6838_v7 = vadd.f32 %v12143_v60, %v6691_v50  ;;  %v12830_v21 = vld [vmem:[#allocation50_spill] sm:$0xff]  ;;  %v7837_v1 = vmul.f32 -1.442695, %v8117_v16  ;;  %v12834_v16 = vld [vmem:[#allocation57_spill] sm:$0xff] }
 0x5f6   : > { %v10023_v25 = vpop.eup %10022  ;;  %10042 = vrcp.f32 %v6064_v49  ;;  %v6758_v12 = vadd.f32 %v6583_v8, %v6582_v6  ;;  %v7836_v6 = vmul.f32 -1.442695, %v8116_v48  ;;  %v7985_v49 = vadd.f32 %v12830_v21, %v11172_v63  ;;  %v12832_v48 = vld [vmem:[#allocation24_spill] sm:$0xff] }
 0x5f7   : > { %v10025_v42 = vpop.eup %10024  ;;  %10044 = vtanh.f32 %v7981_v55  ;;  %v6065_v14 = vadd.f32 1.0, %v10023_v25  ;;  %v6584_v17 = vmul.f32 %v11229_v36, %v6444_v35  ;;  %6903 = vst.msk [vmem:[%s11800_s6 + $0xc8] sm:$0xff] %vm6877_vm0, %v6838_v7  ;;  %v7986_v25 = vadd.f32 %v12831_v39, %v11166_v53  ;;  %v12835_v21 = vld [vmem:[#allocation52_spill] sm:$0xff]  ;;  %v12836_v39 = vld [vmem:[#allocation54_spill] sm:$0xff] }
 0x5f8   : > { %v10027_v11 = vpop.eup %10026  ;;  %10046 = vpow2.f32 %v7833_v20  ;;  %6759 = vadd.xlane.f32.xlu0 %v6758_v12  ;;  %v6445_v10 = vmul.f32 %v10025_v42, %v10021_v46  ;;  %v8118_v20 = vadd.f32 %v11978_v26, %v11155_v44  ;;  %v8119_v42 = vadd.f32 %v11985_v61, %v11157_v45 }
 0x5f9   : > { %v10029_v2 = vpop.eup %10028  ;;  %10048 = vrcp.f32 %v6065_v14  ;;  %v7987_v61 = vadd.f32 %v12832_v48, %v11172_v63  ;;  %v8124_v48 = vadd.f32 %v12028_v19, %v11155_v44 }
 0x5fa   : > { %v10031_v52 = vpop.eup %10030  ;;  %10050 = vtanh.f32 %v7982_v29  ;;  %v6066_v3 = vadd.f32 1.0, %v10029_v2  ;;  %v6585_v33 = vmul.f32 %v11236_v40, %v6445_v10  ;;  %v6694_v12 = vpop.xlane.xlu0 %6693  ;;  %v7838_v10 = vmul.f32 -1.442695, %v8118_v20 }
 0x5fb   : > { %v10033_v54 = vpop.eup %10032  ;;  %10052 = vpow2.f32 %v7834_v30  ;;  %v6446_v47 = vmul.f32 %v10031_v52, %v10027_v11  ;;  %v6839_v14 = vadd.f32 %v12143_v60, %v6694_v12  ;;  %v8120_v52 = vadd.f32 %v11993_v24, %v11155_v44 }
 0x5fc   : > { %v10035_v32 = vpop.eup %10034  ;;  %10054 = vrcp.f32 %v6066_v3  ;;  %v6761_v5 = vadd.f32 %v6585_v33, %v6584_v17  ;;  %v7839_v33 = vmul.f32 -1.442695, %v8119_v42  ;;  %v8122_v20 = vadd.f32 %v12014_v62, %v11155_v44 }
 0x5fd   : > { %v10037_v41 = vpop.eup %10036  ;;  %10056 = vtanh.f32 %v7983_v27  ;;  %v6067_v58 = vadd.f32 1.0, %v10035_v32  ;;  %v6586_v55 = vmul.f32 %v11229_v36, %v6446_v47  ;;  %6904 = vst.msk [vmem:[%s11800_s6 + $0xd0] sm:$0xff] %vm6877_vm0, %v6839_v14  ;;  %v8123_v42 = vadd.f32 %v12019_v37, %v11157_v45 }
 0x5fe   : > { %v10039_v18 = vpop.eup %10038  ;;  %10058 = vpow2.f32 %v7835_v0  ;;  %6762 = vadd.xlane.f32.xlu1 %v6761_v5  ;;  %v6447_v51 = vmul.f32 %v10037_v41, %v10033_v54  ;;  %v8121_v5 = vadd.f32 %v12834_v16, %v11157_v45 }
 0x5ff   : > { %v10041_v34 = vpop.eup %10040  ;;  %10060 = vrcp.f32 %v6067_v58 }
 0x600   : > { %v10043_v8 = vpop.eup %10042  ;;  %10062 = vtanh.f32 %v7984_v59  ;;  %v6068_v46 = vadd.f32 1.0, %v10041_v34  ;;  %v6587_v29 = vmul.f32 %v11236_v40, %v6447_v51  ;;  %v12833_v59 = vld [vmem:[#allocation51_spill] sm:$0xff] }
 0x601   : > { %v10045_v35 = vpop.eup %10044  ;;  %10064 = vpow2.f32 %v7836_v6  ;;  %v6448_v23 = vmul.f32 %v10043_v8, %v10039_v18  ;;  %v7988_v47 = vadd.f32 %v12833_v59, %v11166_v53  ;;  %v6697_v32 = vpop.xlane.xlu1 %6696  ;;  %v7840_v6 = vmul.f32 -1.442695, %v8120_v52 }
 0x602   : > { %v10047_v4 = vpop.eup %10046  ;;  %10066 = vrcp.f32 %v6068_v46  ;;  %v6764_v26 = vadd.f32 %v6587_v29, %v6586_v55  ;;  %v6840_v7 = vadd.f32 %v12143_v60, %v6697_v32  ;;  %v8125_v32 = vadd.f32 %v12032_v28, %v11157_v45 }
 0x603   : > { %v10049_v30 = vpop.eup %10048  ;;  %10068 = vtanh.f32 %v7985_v49  ;;  %v6069_v11 = vadd.f32 1.0, %v10047_v4  ;;  %v6588_v15 = vmul.f32 %v11229_v36, %v6448_v23  ;;  %v7989_v49 = vadd.f32 %v12835_v21, %v11172_v63 }
 0x604   : > { %v10051_v17 = vpop.eup %10050  ;;  %10070 = vpow2.f32 %v7837_v1  ;;  %6765 = vadd.xlane.f32.xlu0 %v6764_v26  ;;  %v6449_v2 = vmul.f32 %v10049_v30, %v10045_v35  ;;  %6905 = vst.msk [vmem:[%s11800_s6 + $0xd8] sm:$0xff] %vm6877_vm0, %v6840_v7  ;;  %v7841_v1 = vmul.f32 -1.442695, %v8121_v5  ;;  %v7845_v21 = vmul.f32 -1.442695, %v8125_v32 }
 0x605   : > { %v10053_v27 = vpop.eup %10052  ;;  %10072 = vrcp.f32 %v6069_v11  ;;  %v7842_v11 = vmul.f32 -1.442695, %v8122_v20 }
 0x606   : > { %v10055_v3 = vpop.eup %10054  ;;  %10074 = vtanh.f32 %v7986_v25  ;;  %v6070_v0 = vadd.f32 1.0, %v10053_v27  ;;  %v6589_v54 = vmul.f32 %v11236_v40, %v6449_v2  ;;  %v7990_v25 = vadd.f32 %v12836_v39, %v11166_v53  ;;  %v12837_v27 = vld [vmem:[#allocation55_spill] sm:$0xff] }
 0x607   : > { %v10057_v57 = vpop.eup %10056  ;;  %10076 = vpow2.f32 %v7838_v10  ;;  %v6450_v50 = vmul.f32 %v10055_v3, %v10051_v17  ;;  %v6700_v12 = vpop.xlane.xlu0 %6699  ;;  %v7991_v37 = vadd.f32 %v12837_v27, %v11172_v63  ;;  %v7843_v3 = vmul.f32 -1.442695, %v8123_v42  ;;  %v12842_v27 = vld [vmem:[#allocation27_spill] sm:$0xff] }
 0x608   : > { %v10059_v9 = vpop.eup %10058  ;;  %10078 = vrcp.f32 %v6070_v0  ;;  %v6767_v24 = vadd.f32 %v6589_v54, %v6588_v15  ;;  %v6841_v26 = vadd.f32 %v12143_v60, %v6700_v12  ;;  %v12838_v54 = vld [vmem:[#allocation25_spill] sm:$0xff] }
 0x609   : > { %v10061_v41 = vpop.eup %10060  ;;  %10080 = vtanh.f32 %v7987_v61  ;;  %v6071_v58 = vadd.f32 1.0, %v10059_v9  ;;  %v6590_v55 = vmul.f32 %v11229_v36, %v6450_v50 }
 0x60a   : > { %v10063_v18 = vpop.eup %10062  ;;  %10082 = vpow2.f32 %v7839_v33  ;;  %6768 = vadd.xlane.f32.xlu1 %v6767_v24  ;;  %v6451_v51 = vmul.f32 %v10061_v41, %v10057_v57  ;;  %6906 = vst.msk [vmem:[%s11800_s6 + $0xe0] sm:$0xff] %vm6877_vm0, %v6841_v26  ;;  %v7992_v57 = vadd.f32 %v12838_v54, %v11166_v53  ;;  %v7844_v24 = vmul.f32 -1.442695, %v8124_v48  ;;  %v12840_v26 = vld [vmem:[#allocation26_spill] sm:$0xff] }
 0x60b   : > { %v10065_v34 = vpop.eup %10064  ;;  %10084 = vrcp.f32 %v6071_v58 }
 0x60c   : > { %v10067_v8 = vpop.eup %10066  ;;  %10086 = vtanh.f32 %v7988_v47  ;;  %v6072_v46 = vadd.f32 1.0, %v10065_v34  ;;  %v6591_v29 = vmul.f32 %v11236_v40, %v6451_v51  ;;  %v8126_v51 = vadd.f32 %v12049_v22, %v11155_v44 }
 0x60d   : > { %v10069_v35 = vpop.eup %10068  ;;  %10088 = vpow2.f32 %v7840_v6  ;;  %v6452_v23 = vmul.f32 %v10067_v8, %v10063_v18  ;;  %v12839_v18 = vld [vmem:[#allocation56_spill] sm:$0xff]  ;;  %v7994_v8 = vadd.f32 %v12012_v38, %v11166_v53 }
 0x60e   : > { %v10071_v4 = vpop.eup %10070  ;;  %10090 = vrcp.f32 %v6072_v46  ;;  %v6770_v62 = vadd.f32 %v6591_v29, %v6590_v55  ;;  %v6703_v47 = vpop.xlane.xlu1 %6702  ;;  %v7993_v28 = vadd.f32 %v12839_v18, %v11172_v63  ;;  %v7846_v12 = vmul.f32 -1.442695, %v8126_v51 }
 0x60f   : > { %v10073_v14 = vpop.eup %10072  ;;  %10092 = vtanh.f32 %v7989_v49  ;;  %v6073_v30 = vadd.f32 1.0, %v10071_v4  ;;  %v6592_v2 = vmul.f32 %v11229_v36, %v6452_v23  ;;  %v6842_v9 = vadd.f32 %v12143_v60, %v6703_v47 }
 0x610   : > { %v10075_v10 = vpop.eup %10074  ;;  %10094 = vpow2.f32 %v7841_v1  ;;  %6771 = vadd.xlane.f32.xlu0 %v6770_v62  ;;  %v6453_v17 = vmul.f32 %v10073_v14, %v10069_v35  ;;  %v8127_v35 = vadd.f32 %v12053_v43, %v11157_v45  ;;  %v7995_v43 = vadd.f32 %v12840_v26, %v11172_v63  ;;  %v12841_v14 = vld [vmem:[#allocation60_spill] sm:$0xff]  ;;  %v12847_v26 = vld [vmem:[#allocation59_spill] sm:$0xff] }
 0x611   : > { %v10077_v15 = vpop.eup %10076  ;;  %10096 = vrcp.f32 %v6073_v30  ;;  %6907 = vst.msk [vmem:[%s11800_s6 + $0xe8] sm:$0xff] %vm6877_vm0, %v6842_v9  ;;  %v8128_v30 = vadd.f32 %v12841_v14, %v11155_v44 }
 0x612   : > { %v10079_v61 = vpop.eup %10078  ;;  %10098 = vtanh.f32 %v7990_v25  ;;  %v6074_v52 = vadd.f32 1.0, %v10077_v15  ;;  %v6593_v0 = vmul.f32 %v11236_v40, %v6453_v17  ;;  %v7847_v17 = vmul.f32 -1.442695, %v8127_v35 }
 0x613   : > { %v10081_v33 = vpop.eup %10080  ;;  %10100 = vpow2.f32 %v7842_v11  ;;  %v6454_v59 = vmul.f32 %v10079_v61, %v10075_v10  ;;  %v7848_v47 = vmul.f32 -1.442695, %v8128_v30 }
 0x614   : > { %v10083_v50 = vpop.eup %10082  ;;  %10102 = vrcp.f32 %v6074_v52  ;;  %v6773_v19 = vadd.f32 %v6593_v0, %v6592_v2  ;;  %v6706_v1 = vpop.xlane.xlu0 %6705 }
 0x615   : > { %v10085_v16 = vpop.eup %10084  ;;  %10104 = vtanh.f32 %v7991_v37  ;;  %v6075_v5 = vadd.f32 1.0, %v10083_v50  ;;  %v6594_v58 = vmul.f32 %v11229_v36, %v6454_v59  ;;  %v6843_v39 = vadd.f32 %v12143_v60, %v6706_v1 }
 0x616   : > { %v10087_v7 = vpop.eup %10086  ;;  %10106 = vpow2.f32 %v7843_v3  ;;  %6774 = vadd.xlane.f32.xlu1 %v6773_v19  ;;  %v6455_v41 = vmul.f32 %v10085_v16, %v10081_v33  ;;  %v7996_v37 = vadd.f32 %v12842_v27, %v11166_v53  ;;  %v12843_v3 = vld [vmem:[#allocation30_spill] sm:$0xff] }
 0x617   : > { %v10089_v6 = vpop.eup %10088  ;;  %10108 = vrcp.f32 %v6075_v5  ;;  %6908 = vst.msk [vmem:[%s11800_s6 + $0xf0] sm:$0xff] %vm6877_vm0, %v6843_v39  ;;  %v8129_v0 = vadd.f32 %v12843_v3, %v11157_v45  ;;  %v12844_v16 = vld [vmem:[#allocation58_spill] sm:$0xff]  ;;  %v12849_v3 = vld [vmem:[#allocation61_spill] sm:$0xff] }
 0x618   : > { %v10091_v55 = vpop.eup %10090  ;;  %10110 = vtanh.f32 %v7992_v57  ;;  %v6076_v34 = vadd.f32 1.0, %v10089_v6  ;;  %v6595_v49 = vmul.f32 %v11236_v40, %v6455_v41  ;;  %v7997_v5 = vadd.f32 %v12844_v16, %v11172_v63 }
 0x619   : > { %v10093_v20 = vpop.eup %10092  ;;  %10112 = vpow2.f32 %v7844_v24  ;;  %v6456_v46 = vmul.f32 %v10091_v55, %v10087_v7  ;;  %v8130_v24 = vadd.f32 %v12078_v13, %v11155_v44 }
 0x61a   : > { %v10095_v29 = vpop.eup %10094  ;;  %10114 = vrcp.f32 %v6076_v34  ;;  %v6776_v22 = vadd.f32 %v6595_v49, %v6594_v58  ;;  %v7849_v58 = vmul.f32 -1.442695, %v8129_v0  ;;  %v8131_v49 = vadd.f32 %v12085_v31, %v11157_v45 }
 0x61b   : > { %v10097_v25 = vpop.eup %10096  ;;  %10116 = vtanh.f32 %v7993_v28  ;;  %v6077_v23 = vadd.f32 1.0, %v10095_v29  ;;  %v6596_v42 = vmul.f32 %v11229_v36, %v6456_v46  ;;  %v6709_v61 = vpop.xlane.xlu1 %6708  ;;  %v12845_v28 = vld [vmem:[#allocation28_spill] sm:$0xff]  ;;  %v7850_v1 = vmul.f32 -1.442695, %v8130_v24  ;;  %v12850_v24 = vld [vmem:[#allocation62_spill] sm:$0xff] }
 0x61c   : > { %v10099_v4 = vpop.eup %10098  ;;  %10118 = vpow2.f32 %v7845_v21  ;;  %6777 = vadd.xlane.f32.xlu0 %v6776_v22  ;;  %v6457_v38 = vmul.f32 %v10097_v25, %v10093_v20  ;;  %v6844_v54 = vadd.f32 %v12143_v60, %v6709_v61  ;;  %v7998_v51 = vadd.f32 %v12845_v28, %v11166_v53  ;;  %v12846_v25 = vld [vmem:[#allocation29_spill] sm:$0xff] }
 0x61d   : > { %v10101_v62 = vpop.eup %10100  ;;  %10120 = vrcp.f32 %v6077_v23  ;;  %v7999_v31 = vadd.f32 %v12846_v25, %v11172_v63  ;;  %v8132_v23 = vadd.f32 %v12093_v56, %v11155_v44 }
 0x61e   : > { %v10103_v11 = vpop.eup %10102  ;;  %10122 = vtanh.f32 %v7994_v8  ;;  %v6078_v10 = vadd.f32 1.0, %v10101_v62  ;;  %v6597_v2 = vmul.f32 %v11236_v40, %v6457_v38  ;;  %6909 = vst.msk [vmem:[%s11800_s6 + $0xf8] sm:$0xff] %vm6877_vm0, %v6844_v54  ;;  %v7851_v38 = vmul.f32 -1.442695, %v8131_v49 }
 0x61f   : > { %v10105_v15 = vpop.eup %10104  ;;  %10124 = vpow2.f32 %v7846_v12  ;;  %v6458_v48 = vmul.f32 %v10103_v11, %v10099_v4  ;;  %v7852_v27 = vmul.f32 -1.442695, %v8132_v23 }
 0x620   : > { %v10107_v52 = vpop.eup %10106  ;;  %10126 = vrcp.f32 %v6078_v10  ;;  %v6779_v33 = vadd.f32 %v6597_v2, %v6596_v42  ;;  %v12848_v10 = vld [vmem:[#allocation65_spill] sm:$0xff] }
 0x621   : > { %v10109_v57 = vpop.eup %10108  ;;  %10128 = vtanh.f32 %v7995_v43  ;;  %v6079_v59 = vadd.f32 1.0, %v10107_v52  ;;  %v6598_v19 = vmul.f32 %v11229_v36, %v6458_v48  ;;  %v6712_v34 = vpop.xlane.xlu0 %6711  ;;  %v8000_v43 = vadd.f32 %v12847_v26, %v11166_v53 }
 0x622   : > { %v10111_v50 = vpop.eup %10110  ;;  %10130 = vpow2.f32 %v7847_v17  ;;  %6780 = vadd.xlane.f32.xlu1 %v6779_v33  ;;  %v6459_v32 = vmul.f32 %v10109_v57, %v10105_v15  ;;  %v6845_v20 = vadd.f32 %v12143_v60, %v6712_v34  ;;  %v8133_v17 = vadd.f32 %v12848_v10, %v11157_v45 }
 0x623   : > { %v10113_v9 = vpop.eup %10112  ;;  %10132 = vrcp.f32 %v6079_v59  ;;  %v8001_v45 = vadd.f32 %v12849_v3, %v11172_v63 }
 0x624   : > { %v10115_v7 = vpop.eup %10114  ;;  %10134 = vtanh.f32 %v7996_v37  ;;  %v6080_v41 = vadd.f32 1.0, %v10113_v9  ;;  %v6599_v6 = vmul.f32 %v11236_v40, %v6459_v32  ;;  %6910 = vst.msk [vmem:[%s11800_s6 + $0x100] sm:$0xff] %vm6877_vm0, %v6845_v20  ;;  %v7853_v33 = vmul.f32 -1.442695, %v8133_v17 }
 0x625   : > { %v10117_v18 = vpop.eup %10116  ;;  %10136 = vpow2.f32 %v7848_v47  ;;  %v6460_v55 = vmul.f32 %v10115_v7, %v10111_v50  ;;  %v8002_v7 = vadd.f32 %v12850_v24, %v11166_v53 }
 0x626   : > { %v10119_v21 = vpop.eup %10118  ;;  %10138 = vrcp.f32 %v6080_v41  ;;  %v6782_v13 = vadd.f32 %v6599_v6, %v6598_v19  ;;  %v12373_v19 = vld [vmem:[#allocation2] ss:$0 sm:$0xff] }
 0x627   : > { %v10121_v8 = vpop.eup %10120  ;;  %10140 = vtanh.f32 %v7997_v5  ;;  %v6081_v46 = vadd.f32 1.0, %v10119_v21  ;;  %v6600_v22 = vmul.f32 %v11229_v36, %v6460_v55  ;;  %v12851_v55 = vld [vmem:[#allocation63_spill] sm:$0xff] }
 0x628   : > { %v10123_v29 = vpop.eup %10122  ;;  %10142 = vpow2.f32 %v7849_v58  ;;  %6783 = vadd.xlane.f32.xlu0 %v6782_v13  ;;  %v6461_v35 = vmul.f32 %v10121_v8, %v10117_v18  ;;  %v6715_v30 = vpop.xlane.xlu1 %6714  ;;  %v8003_v34 = vadd.f32 %v12851_v55, %v11172_v63 }
 0x629   : > { %v10125_v39 = vpop.eup %10124  ;;  %10144 = vrcp.f32 %v6081_v46  ;;  %v6846_v56 = vadd.f32 %v12143_v60, %v6715_v30 }
 0x62a   : > { %v10127_v12 = vpop.eup %10126  ;;  %10146 = vtanh.f32 %v7998_v51  ;;  %v6082_v4 = vadd.f32 1.0, %v10125_v39  ;;  %v6601_v42 = vmul.f32 %v11236_v40, %v6461_v35 }
 0x62b   : > { %v10129_v62 = vpop.eup %10128  ;;  %10148 = vpow2.f32 %v7850_v1  ;;  %v6462_v14 = vmul.f32 %v10127_v12, %v10123_v29  ;;  %6911 = vst.msk [vmem:[%s11800_s6 + $0x108] sm:$0xff] %vm6877_vm0, %v6846_v56 }
 0x62c   : > { %v10131_v11 = vpop.eup %10130  ;;  %10150 = vrcp.f32 %v6082_v4  ;;  %v6785_v44 = vadd.f32 %v6601_v42, %v6600_v22  ;;  %v12852_v22 = vld [vmem:[#allocation31_spill] sm:$0xff]  ;;  %v12853_v42 = vld [vmem:[#allocation64_spill] sm:$0xff] }
 0x62d   : > { %v10133_v2 = vpop.eup %10132  ;;  %10152 = vtanh.f32 %v7999_v31  ;;  %v6083_v15 = vadd.f32 1.0, %v10131_v11  ;;  %v6602_v61 = vmul.f32 %v11229_v36, %v6462_v14  ;;  %v8004_v39 = vadd.f32 %v12852_v22, %v11166_v53 }
 0x62e   : > { %v10135_v37 = vpop.eup %10134  ;;  %10154 = vpow2.f32 %v7851_v38  ;;  %6786 = vadd.xlane.f32.xlu1 %v6785_v44  ;;  %v6463_v48 = vmul.f32 %v10133_v2, %v10129_v62  ;;  %v8005_v62 = vadd.f32 %v12853_v42, %v11172_v63 }
 0x62f   : > { %v10137_v52 = vpop.eup %10136  ;;  %10156 = vrcp.f32 %v6083_v15  ;;  %v6718_v47 = vpop.xlane.xlu0 %6717 }
 0x630   : > { %v10139_v0 = vpop.eup %10138  ;;  %10158 = vtanh.f32 %v8000_v43  ;;  %v6084_v60 = vadd.f32 1.0, %v10137_v52  ;;  %v6603_v54 = vmul.f32 %v11236_v40, %v6463_v48  ;;  %v6847_v9 = vadd.f32 %v12373_v19, %v6718_v47 }
 0x631   : > { %v10141_v57 = vpop.eup %10140  ;;  %10160 = vpow2.f32 %v7852_v27  ;;  %v6464_v59 = vmul.f32 %v10139_v0, %v10135_v37 }
 0x632   : > { %v10143_v50 = vpop.eup %10142  ;;  %10162 = vrcp.f32 %v6084_v60  ;;  %v6788_v32 = vadd.f32 %v6603_v54, %v6602_v61  ;;  %6912 = vst.msk [vmem:[%s11800_s6 + $0x110] sm:$0xff] %vm6877_vm0, %v6847_v9 }
 0x633   : > { %v10145_v16 = vpop.eup %10144  ;;  %10164 = vtanh.f32 %v8001_v45  ;;  %v6085_v5 = vadd.f32 1.0, %v10143_v50  ;;  %v6604_v6 = vmul.f32 %v11229_v36, %v6464_v59 }
 0x634   : > { %v10147_v41 = vpop.eup %10146  ;;  %10166 = vpow2.f32 %v7853_v33  ;;  %6789 = vadd.xlane.f32.xlu0 %v6788_v32  ;;  %v6465_v58 = vmul.f32 %v10145_v16, %v10141_v57 }
 0x635   : > { %v10149_v18 = vpop.eup %10148  ;;  %10168 = vrcp.f32 %v6085_v5  ;;  %v6721_v20 = vpop.xlane.xlu1 %6720 }
 0x636   : > { %v10151_v28 = vpop.eup %10150  ;;  %v6086_v51 = vadd.f32 1.0, %v10149_v18  ;;  %v6605_v21 = vmul.f32 %v11236_v40, %v6465_v58  ;;  %10170 = vtanh.f32 %v8002_v7  ;;  %v6848_v1 = vadd.f32 %v12373_v19, %v6721_v20 }
 0x637   : > { %v10153_v49 = vpop.eup %10152  ;;  %v6466_v13 = vmul.f32 %v10151_v28, %v10147_v41 }
 0x638   : > { %v10155_v8 = vpop.eup %10154  ;;  %10172 = vrcp.f32 %v6086_v51  ;;  %v6791_v46 = vadd.f32 %v6605_v21, %v6604_v6  ;;  %6913 = vst.msk [vmem:[%s11800_s6 + $0x118] sm:$0xff] %vm6877_vm0, %v6848_v1 }
 0x639   : > { %v10157_v29 = vpop.eup %10156  ;;  %v6087_v35 = vadd.f32 1.0, %v10155_v8  ;;  %10174 = vtanh.f32 %v8003_v34  ;;  %v6606_v23 = vmul.f32 %v11229_v36, %v6466_v13 }
 0x63a   : > { %v10159_v25 = vpop.eup %10158  ;;  %6792 = vadd.xlane.f32.xlu1 %v6791_v46  ;;  %v6467_v31 = vmul.f32 %v10157_v29, %v10153_v49 }
 0x63b   : > { %v10161_v12 = vpop.eup %10160  ;;  %10176 = vrcp.f32 %v6087_v35  ;;  %v6724_v14 = vpop.xlane.xlu0 %6723 }
 0x63c   : > { %v10163_v4 = vpop.eup %10162  ;;  %v6088_v38 = vadd.f32 1.0, %v10161_v12  ;;  %v6607_v26 = vmul.f32 %v11236_v40, %v6467_v31  ;;  %10178 = vtanh.f32 %v8004_v39  ;;  %v6849_v10 = vadd.f32 %v12373_v19, %v6724_v14 }
 0x63d   : > { %v10165_v43 = vpop.eup %10164  ;;  %v6468_v53 = vmul.f32 %v10163_v4, %v10159_v25 }
 0x63e   : > { %v10167_v30 = vpop.eup %10166  ;;  %10180 = vrcp.f32 %v6088_v38  ;;  %v6794_v11 = vadd.f32 %v6607_v26, %v6606_v23  ;;  %6914 = vst.msk [vmem:[%s11800_s6 + $0x120] sm:$0xff] %vm6877_vm0, %v6849_v10 }
 0x63f   : > { %v10169_v17 = vpop.eup %10168  ;;  %v6089_v44 = vadd.f32 1.0, %v10167_v30  ;;  %10182 = vtanh.f32 %v8005_v62  ;;  %v6608_v63 = vmul.f32 %v11229_v36, %v6468_v53 }
 0x640   : > { %6795 = vadd.xlane.f32.xlu0 %v6794_v11  ;;  %v6469_v56 = vmul.f32 %v10169_v17, %v10165_v43  ;;  %v10171_v2 = vpop.eup %10170 }
 0x641   : > { %10184 = vrcp.f32 %v6089_v44 }
 0x642   : > { %v10173_v15 = vpop.eup %10172  ;;  %v6609_v27 = vmul.f32 %v11236_v40, %v6469_v56  ;;  %v6727_v48 = vpop.xlane.xlu1 %6726 }
 0x643   : > { %v6470_v37 = vmul.f32 %v10173_v15, %v10171_v2  ;;  %v10175_v61 = vpop.eup %10174  ;;  %v6850_v3 = vadd.f32 %v12373_v19, %v6727_v48 }
 0x644   : > { %v6797_v52 = vadd.f32 %v6609_v27, %v6608_v63 }
 0x645   : > { %v10177_v45 = vpop.eup %10176  ;;  %v6610_v60 = vmul.f32 %v11229_v36, %v6470_v37  ;;  %6915 = vst.msk [vmem:[%s11800_s6 + $0x128] sm:$0xff] %vm6877_vm0, %v6850_v3 }
 0x646   : > { %6798 = vadd.xlane.f32.xlu1 %v6797_v52  ;;  %v6471_v0 = vmul.f32 %v10177_v45, %v10175_v61  ;;  %v10179_v33 = vpop.eup %10178 }
 0x648   : > { %v10181_v54 = vpop.eup %10180  ;;  %v6611_v57 = vmul.f32 %v11236_v40, %v6471_v0 }
 0x649   : > { %v6472_v59 = vmul.f32 %v10181_v54, %v10179_v33  ;;  %v6730_v47 = vpop.xlane.xlu0 %6729  ;;  %v10183_v50 = vpop.eup %10182 }
 0x64a   : > { %v6800_v32 = vadd.f32 %v6611_v57, %v6610_v60  ;;  %v6851_v9 = vadd.f32 %v12373_v19, %v6730_v47 }
 0x64b   : > { %v10185_v16 = vpop.eup %10184  ;;  %v6612_v24 = vmul.f32 %v11229_v36, %v6472_v59 }
 0x64c   : > { %6801 = vadd.xlane.f32.xlu0 %v6800_v32  ;;  %v6473_v5 = vmul.f32 %v10185_v16, %v10183_v50  ;;  %6916 = vst.msk [vmem:[%s11800_s6 + $0x130] sm:$0xff] %vm6877_vm0, %v6851_v9 }
 0x64e   : > { %v6613_v7 = vmul.f32 %v11236_v40, %v6473_v5 }
 0x64f   : > { %v6733_v41 = vpop.xlane.xlu1 %6732 }
 0x650   : > { %v6803_v58 = vadd.f32 %v6613_v7, %v6612_v24  ;;  %v6852_v6 = vadd.f32 %v12373_v19, %v6733_v41 }
 0x652   : > { %6804 = vadd.xlane.f32.xlu1 %v6803_v58  ;;  %6917 = vst.msk [vmem:[%s11800_s6 + $0x138] sm:$0xff] %vm6877_vm0, %v6852_v6 }
 0x655   : > { %v6736_v18 = vpop.xlane.xlu0 %6735 }
 0x656   : > { %v6853_v28 = vadd.f32 %v12373_v19, %v6736_v18 }
 0x658   : > { %6918 = vst.msk [vmem:[%s11800_s6 + $0x140] sm:$0xff] %vm6877_vm0, %v6853_v28 }
 0x65b   : > { %v6739_v36 = vpop.xlane.xlu1 %6738 }
 0x65c   : > { %v6854_v51 = vadd.f32 %v12373_v19, %v6739_v36 }
 0x65e   : > { %6919 = vst.msk [vmem:[%s11800_s6 + $0x148] sm:$0xff] %vm6877_vm0, %v6854_v51 }
 0x661   : > { %v6742_v40 = vpop.xlane.xlu0 %6741 }
 0x662   : > { %v6855_v55 = vadd.f32 %v12373_v19, %v6742_v40 }
 0x664   : > { %6920 = vst.msk [vmem:[%s11800_s6 + $0x150] sm:$0xff] %vm6877_vm0, %v6855_v55 }
 0x667   : > { %v6745_v34 = vpop.xlane.xlu1 %6744 }
 0x668   : > { %v6856_v21 = vadd.f32 %v12373_v19, %v6745_v34 }
 0x66a   : > { %6921 = vst.msk [vmem:[%s11800_s6 + $0x158] sm:$0xff] %vm6877_vm0, %v6856_v21 }
 0x66d   : > { %v6748_v49 = vpop.xlane.xlu0 %6747 }
 0x66e   : > { %v6857_v13 = vadd.f32 %v12373_v19, %v6748_v49 }
 0x670   : > { %6922 = vst.msk [vmem:[%s11800_s6 + $0x160] sm:$0xff] %vm6877_vm0, %v6857_v13 }
 0x673   : > { %v6751_v20 = vpop.xlane.xlu1 %6750 }
 0x674   : > { %v6858_v8 = vadd.f32 %v12373_v19, %v6751_v20 }
 0x676   : > { %6923 = vst.msk [vmem:[%s11800_s6 + $0x168] sm:$0xff] %vm6877_vm0, %v6858_v8 }
 0x679   : > { %v6754_v46 = vpop.xlane.xlu0 %6753 }
 0x67a   : > { %v6859_v1 = vadd.f32 %v12373_v19, %v6754_v46 }
 0x67c   : > { %6924 = vst.msk [vmem:[%s11800_s6 + $0x170] sm:$0xff] %vm6877_vm0, %v6859_v1 }
 0x67f   : > { %v6757_v29 = vpop.xlane.xlu1 %6756 }
 0x680   : > { %v6860_v35 = vadd.f32 %v12373_v19, %v6757_v29 }
 0x682   : > { %6925 = vst.msk [vmem:[%s11800_s6 + $0x178] sm:$0xff] %vm6877_vm0, %v6860_v35 }
 0x685   : > { %v6760_v22 = vpop.xlane.xlu0 %6759 }
 0x686   : > { %v6861_v39 = vadd.f32 %v12373_v19, %v6760_v22 }
 0x688   : > { %6926 = vst.msk [vmem:[%s11800_s6 + $0x180] sm:$0xff] %vm6877_vm0, %v6861_v39 }
 0x68b   : > { %v6763_v25 = vpop.xlane.xlu1 %6762 }
 0x68c   : > { %v6862_v31 = vadd.f32 %v12373_v19, %v6763_v25 }
 0x68e   : > { %6927 = vst.msk [vmem:[%s11800_s6 + $0x188] sm:$0xff] %vm6877_vm0, %v6862_v31 }
 0x691   : > { %v6766_v23 = vpop.xlane.xlu0 %6765 }
 0x692   : > { %v6863_v12 = vadd.f32 %v12373_v19, %v6766_v23 }
 0x694   : > { %6928 = vst.msk [vmem:[%s11800_s6 + $0x190] sm:$0xff] %vm6877_vm0, %v6863_v12 }
 0x697   : > { %v6769_v4 = vpop.xlane.xlu1 %6768 }
 0x698   : > { %v6864_v38 = vadd.f32 %v12373_v19, %v6769_v4 }
 0x69a   : > { %6929 = vst.msk [vmem:[%s11800_s6 + $0x198] sm:$0xff] %vm6877_vm0, %v6864_v38 }
 0x69d   : > { %v6772_v42 = vpop.xlane.xlu0 %6771 }
 0x69e   : > { %v6865_v62 = vadd.f32 %v12373_v19, %v6772_v42 }
 0x6a0   : > { %6930 = vst.msk [vmem:[%s11800_s6 + $0x1a0] sm:$0xff] %vm6877_vm0, %v6865_v62 }
 0x6a3   : > { %v6775_v26 = vpop.xlane.xlu1 %6774 }
 0x6a4   : > { %v6866_v43 = vadd.f32 %v12373_v19, %v6775_v26 }
 0x6a6   : > { %6931 = vst.msk [vmem:[%s11800_s6 + $0x1a8] sm:$0xff] %vm6877_vm0, %v6866_v43 }
 0x6a9   : > { %v6778_v53 = vpop.xlane.xlu0 %6777 }
 0x6aa   : > { %v6867_v14 = vadd.f32 %v12373_v19, %v6778_v53 }
 0x6ac   : > { %6932 = vst.msk [vmem:[%s11800_s6 + $0x1b0] sm:$0xff] %vm6877_vm0, %v6867_v14 }
 0x6af   : > { %v6781_v30 = vpop.xlane.xlu1 %6780 }
 0x6b0   : > { %v6868_v11 = vadd.f32 %v12373_v19, %v6781_v30 }
 0x6b2   : > { %6933 = vst.msk [vmem:[%s11800_s6 + $0x1b8] sm:$0xff] %vm6877_vm0, %v6868_v11 }
 0x6b5   : > { %v6784_v10 = vpop.xlane.xlu0 %6783 }
 0x6b6   : > { %v6869_v17 = vadd.f32 %v12373_v19, %v6784_v10 }
 0x6b8   : > { %6934 = vst.msk [vmem:[%s11800_s6 + $0x1c0] sm:$0xff] %vm6877_vm0, %v6869_v17 }
 0x6bb   : > { %v6787_v44 = vpop.xlane.xlu1 %6786 }
 0x6bc   : > { %v6870_v56 = vadd.f32 %v12373_v19, %v6787_v44 }
 0x6be   : > { %6935 = vst.msk [vmem:[%s11800_s6 + $0x1c8] sm:$0xff] %vm6877_vm0, %v6870_v56 }
 0x6c1   : > { %v6790_v63 = vpop.xlane.xlu0 %6789 }
 0x6c2   : > { %v6871_v2 = vadd.f32 %v12373_v19, %v6790_v63 }
 0x6c4   : > { %6936 = vst.msk [vmem:[%s11800_s6 + $0x1d0] sm:$0xff] %vm6877_vm0, %v6871_v2 }
 0x6c7   : > { %v6793_v15 = vpop.xlane.xlu1 %6792 }
 0x6c8   : > { %v6872_v27 = vadd.f32 %v12373_v19, %v6793_v15 }
 0x6ca   : > { %6937 = vst.msk [vmem:[%s11800_s6 + $0x1d8] sm:$0xff] %vm6877_vm0, %v6872_v27 }
 0x6cd   : > { %v6796_v37 = vpop.xlane.xlu0 %6795 }
 0x6ce   : > { %v6873_v48 = vadd.f32 %v12373_v19, %v6796_v37 }
 0x6d0   : > { %6938 = vst.msk [vmem:[%s11800_s6 + $0x1e0] sm:$0xff] %vm6877_vm0, %v6873_v48 }
 0x6d3   : > { %v6799_v61 = vpop.xlane.xlu1 %6798 }
 0x6d4   : > { %v6874_v52 = vadd.f32 %v12373_v19, %v6799_v61 }
 0x6d6   : > { %6939 = vst.msk [vmem:[%s11800_s6 + $0x1e8] sm:$0xff] %vm6877_vm0, %v6874_v52 }
 0x6d9   : > { %v6802_v3 = vpop.xlane.xlu0 %6801 }
 0x6da   : > { %v6875_v45 = vadd.f32 %v12373_v19, %v6802_v3 }
 0x6dc   : > { %6940 = vst.msk [vmem:[%s11800_s6 + $0x1f0] sm:$0xff] %vm6877_vm0, %v6875_v45  ;;  %6948 = sbr.rel (!%p12854_p8) target bundleno = 1835 (0x72b), region = 60 }
 0x6df   : > { %v6805_v0 = vpop.xlane.xlu1 %6804 }
 0x6e0   : > { %v6876_v60 = vadd.f32 %v12373_v19, %v6805_v0 }
 0x6e2   : > { %6941 = vst.msk [vmem:[%s11800_s6 + $0x1f8] sm:$0xff] %vm6877_vm0, %v6876_v60 }
 0x6e3   : > { %s12867_s17 = smov (!%p6951_p5, %s6950_s17), 64 }
 0x6e4   : > { %s7857_s26 = sshll.u32 %s12867_s17, 7 }
 0x6e5   : > { %p7860_p10 = scmp.eq.s32.totalorder %s7857_s26, 0 }
 0x6e6   : > { %s12496_s30 = sshrl.u32 (!%p7860_p10), %s12867_s17, 6 }
 0x6e7   : > { %6959 = sbr.rel (%p7860_p10) target bundleno = 1835 (0x72b), region = 64  ;;  %p7861_p3 = scmp.le.s32.totalorder (!%p7860_p10), %s12496_s30, 0 }
 0x6ee   : > { %7375 = sbr.rel (%p7861_p3) target bundleno = 1814 (0x716), region = 146  ;;  %s12855_s4 = smov (!%p7861_p3), %s12490_s23 }
 0x6ef   : > { %s12856_s19 = smov (!%p7861_p3), %s11800_s6  ;;  %s12505_s8 = smov (!%p7861_p3), 0  }
 0x6f0   : > { %s12507_s7 = smov (!%p7861_p3), 0  }
 0x6f5 LB: >> { %v7147_v19 = vld [vmem:[%s10382_s19] sm:$0xff]  ;;  %v7149_v33 = vld [vmem:[%s10382_s19 + $0x8] sm:$0xff]  ;;  %v7151_v54 = vld [vmem:[%s10382_s19 + $0x10] sm:$0xff]  ;;  %s7275_s10 = sadd.s32 1, %s10386_s8  ;;  %s7141_s7 = sadd.s32 1, %s10390_s7   ;;  %s10390_s7 = sphi %s12507_s7, %s7141_s7   ;;  %s10386_s8 = sphi %s12505_s8, %s12859_s8   ;;  %s10382_s19 = sphi %s12856_s19, %s12858_s19   ;;  %s10378_s4 = sphi %s12855_s4, %s12857_s4  }
 0x6f6   : >> { %7148 = vst [vmem:[%s10378_s4] sm:$0xff] %v7147_v19  ;;  %7150 = vst [vmem:[%s10378_s4 + $0x8] sm:$0xff] %v7149_v33  ;;  %v7153_v57 = vld [vmem:[%s10382_s19 + $0x18] sm:$0xff]  ;;  %v7155_v59 = vld [vmem:[%s10382_s19 + $0x20] sm:$0xff]  ;;  %p7276_p11 = scmp.ge.s32.totalorder %s7275_s10, %s12496_s30  ;;  %p7140_p13 = scmp.ge.s32.totalorder %s7141_s7, %s12496_s30 }
 0x6f7   : >> { %7152 = vst [vmem:[%s10378_s4 + $0x10] sm:$0xff] %v7151_v54  ;;  %v7157_v47 = vld [vmem:[%s10382_s19 + $0x28] sm:$0xff]  ;;  %7154 = vst [vmem:[%s10378_s4 + $0x18] sm:$0xff] %v7153_v57  ;;  %v7159_v50 = vld [vmem:[%s10382_s19 + $0x30] sm:$0xff] }
 0x6f8   : >> { %7156 = vst [vmem:[%s10378_s4 + $0x20] sm:$0xff] %v7155_v59  ;;  %7158 = vst [vmem:[%s10378_s4 + $0x28] sm:$0xff] %v7157_v47  ;;  %v7161_v32 = vld [vmem:[%s10382_s19 + $0x38] sm:$0xff]  ;;  %v7163_v9 = vld [vmem:[%s10382_s19 + $0x40] sm:$0xff]  ;;  %s12869_s10 = smov (%p7276_p11, %s7275_s10), 0 }
 0x6f9   : >> { %7160 = vst [vmem:[%s10378_s4 + $0x30] sm:$0xff] %v7159_v50  ;;  %7162 = vst [vmem:[%s10378_s4 + $0x38] sm:$0xff] %v7161_v32  ;;  %v7165_v16 = vld [vmem:[%s10382_s19 + $0x48] sm:$0xff]  ;;  %v7167_v5 = vld [vmem:[%s10382_s19 + $0x50] sm:$0xff]  ;;  %s7862_s9 = sshll.u32 %s12869_s10, 9  ;;  %s12859_s8 = smov %s12869_s10 }
 0x6fa   : >> { %7164 = vst [vmem:[%s10378_s4 + $0x40] sm:$0xff] %v7163_v9  ;;  %v7169_v24 = vld [vmem:[%s10382_s19 + $0x58] sm:$0xff]  ;;  %7166 = vst [vmem:[%s10378_s4 + $0x48] sm:$0xff] %v7165_v16  ;;  %v7171_v7 = vld [vmem:[%s10382_s19 + $0x60] sm:$0xff]  ;;  %s12563_s13 = scalar_lea.vmem %s11800_s6, %s7862_s9 [#allocation10]   ;;  %s12566_s28 = scalar_lea.vmem %s12490_s23, %s7862_s9  }
 0x6fb   : >> { %7168 = vst [vmem:[%s10378_s4 + $0x50] sm:$0xff] %v7167_v5  ;;  %7170 = vst [vmem:[%s10378_s4 + $0x58] sm:$0xff] %v7169_v24  ;;  %v7173_v41 = vld [vmem:[%s10382_s19 + $0x68] sm:$0xff]  ;;  %v7175_v58 = vld [vmem:[%s10382_s19 + $0x70] sm:$0xff] }
 0x6fc   : >> { %7172 = vst [vmem:[%s10378_s4 + $0x60] sm:$0xff] %v7171_v7  ;;  %7174 = vst [vmem:[%s10378_s4 + $0x68] sm:$0xff] %v7173_v41  ;;  %v7177_v6 = vld [vmem:[%s10382_s19 + $0x78] sm:$0xff]  ;;  %v7179_v18 = vld [vmem:[%s10382_s19 + $0x80] sm:$0xff] }
 0x6fd   : >> { %7176 = vst [vmem:[%s10378_s4 + $0x70] sm:$0xff] %v7175_v58  ;;  %v7181_v28 = vld [vmem:[%s10382_s19 + $0x88] sm:$0xff]  ;;  %7178 = vst [vmem:[%s10378_s4 + $0x78] sm:$0xff] %v7177_v6  ;;  %v7183_v36 = vld [vmem:[%s10382_s19 + $0x90] sm:$0xff] }
 0x6fe   : >> { %7180 = vst [vmem:[%s10378_s4 + $0x80] sm:$0xff] %v7179_v18  ;;  %7182 = vst [vmem:[%s10378_s4 + $0x88] sm:$0xff] %v7181_v28  ;;  %v7185_v51 = vld [vmem:[%s10382_s19 + $0x98] sm:$0xff]  ;;  %v7187_v40 = vld [vmem:[%s10382_s19 + $0xa0] sm:$0xff] }
 0x6ff   : >> { %7184 = vst [vmem:[%s10378_s4 + $0x90] sm:$0xff] %v7183_v36  ;;  %7186 = vst [vmem:[%s10378_s4 + $0x98] sm:$0xff] %v7185_v51  ;;  %v7189_v55 = vld [vmem:[%s10382_s19 + $0xa8] sm:$0xff]  ;;  %v7191_v34 = vld [vmem:[%s10382_s19 + $0xb0] sm:$0xff] }
 0x700   : >> { %7188 = vst [vmem:[%s10378_s4 + $0xa0] sm:$0xff] %v7187_v40  ;;  %v7193_v21 = vld [vmem:[%s10382_s19 + $0xb8] sm:$0xff]  ;;  %7190 = vst [vmem:[%s10378_s4 + $0xa8] sm:$0xff] %v7189_v55  ;;  %v7195_v49 = vld [vmem:[%s10382_s19 + $0xc0] sm:$0xff] }
 0x701   : >> { %7192 = vst [vmem:[%s10378_s4 + $0xb0] sm:$0xff] %v7191_v34  ;;  %7194 = vst [vmem:[%s10378_s4 + $0xb8] sm:$0xff] %v7193_v21  ;;  %v7197_v13 = vld [vmem:[%s10382_s19 + $0xc8] sm:$0xff]  ;;  %v7199_v20 = vld [vmem:[%s10382_s19 + $0xd0] sm:$0xff] }
 0x702   : >> { %7196 = vst [vmem:[%s10378_s4 + $0xc0] sm:$0xff] %v7195_v49  ;;  %7198 = vst [vmem:[%s10378_s4 + $0xc8] sm:$0xff] %v7197_v13  ;;  %v7201_v8 = vld [vmem:[%s10382_s19 + $0xd8] sm:$0xff]  ;;  %v7203_v46 = vld [vmem:[%s10382_s19 + $0xe0] sm:$0xff] }
 0x703   : >> { %7200 = vst [vmem:[%s10378_s4 + $0xd0] sm:$0xff] %v7199_v20  ;;  %v7205_v1 = vld [vmem:[%s10382_s19 + $0xe8] sm:$0xff]  ;;  %7202 = vst [vmem:[%s10378_s4 + $0xd8] sm:$0xff] %v7201_v8  ;;  %v7207_v29 = vld [vmem:[%s10382_s19 + $0xf0] sm:$0xff] }
 0x704   : >> { %7204 = vst [vmem:[%s10378_s4 + $0xe0] sm:$0xff] %v7203_v46  ;;  %7206 = vst [vmem:[%s10378_s4 + $0xe8] sm:$0xff] %v7205_v1  ;;  %v7209_v35 = vld [vmem:[%s10382_s19 + $0xf8] sm:$0xff]  ;;  %v7211_v22 = vld [vmem:[%s10382_s19 + $0x100] sm:$0xff] }
 0x705   : >> { %7208 = vst [vmem:[%s10378_s4 + $0xf0] sm:$0xff] %v7207_v29  ;;  %7210 = vst [vmem:[%s10378_s4 + $0xf8] sm:$0xff] %v7209_v35  ;;  %v7213_v39 = vld [vmem:[%s10382_s19 + $0x108] sm:$0xff]  ;;  %v7215_v25 = vld [vmem:[%s10382_s19 + $0x110] sm:$0xff] }
 0x706   : >> { %7212 = vst [vmem:[%s10378_s4 + $0x100] sm:$0xff] %v7211_v22  ;;  %v7217_v31 = vld [vmem:[%s10382_s19 + $0x118] sm:$0xff]  ;;  %7214 = vst [vmem:[%s10378_s4 + $0x108] sm:$0xff] %v7213_v39  ;;  %v7219_v23 = vld [vmem:[%s10382_s19 + $0x120] sm:$0xff] }
 0x707   : >> { %7216 = vst [vmem:[%s10378_s4 + $0x110] sm:$0xff] %v7215_v25  ;;  %7218 = vst [vmem:[%s10378_s4 + $0x118] sm:$0xff] %v7217_v31  ;;  %v7221_v12 = vld [vmem:[%s10382_s19 + $0x128] sm:$0xff]  ;;  %v7223_v4 = vld [vmem:[%s10382_s19 + $0x130] sm:$0xff] }
 0x708   : >> { %7220 = vst [vmem:[%s10378_s4 + $0x120] sm:$0xff] %v7219_v23  ;;  %7222 = vst [vmem:[%s10378_s4 + $0x128] sm:$0xff] %v7221_v12  ;;  %v7225_v38 = vld [vmem:[%s10382_s19 + $0x138] sm:$0xff]  ;;  %v7227_v42 = vld [vmem:[%s10382_s19 + $0x140] sm:$0xff] }
 0x709   : >> { %7224 = vst [vmem:[%s10378_s4 + $0x130] sm:$0xff] %v7223_v4  ;;  %v7229_v62 = vld [vmem:[%s10382_s19 + $0x148] sm:$0xff]  ;;  %7226 = vst [vmem:[%s10378_s4 + $0x138] sm:$0xff] %v7225_v38  ;;  %v7231_v26 = vld [vmem:[%s10382_s19 + $0x150] sm:$0xff] }
 0x70a   : >> { %7228 = vst [vmem:[%s10378_s4 + $0x140] sm:$0xff] %v7227_v42  ;;  %7230 = vst [vmem:[%s10378_s4 + $0x148] sm:$0xff] %v7229_v62  ;;  %v7233_v43 = vld [vmem:[%s10382_s19 + $0x158] sm:$0xff]  ;;  %v7235_v53 = vld [vmem:[%s10382_s19 + $0x160] sm:$0xff] }
 0x70b   : >> { %7232 = vst [vmem:[%s10378_s4 + $0x150] sm:$0xff] %v7231_v26  ;;  %7234 = vst [vmem:[%s10378_s4 + $0x158] sm:$0xff] %v7233_v43  ;;  %v7237_v14 = vld [vmem:[%s10382_s19 + $0x168] sm:$0xff]  ;;  %v7239_v30 = vld [vmem:[%s10382_s19 + $0x170] sm:$0xff] }
 0x70c   : >> { %7236 = vst [vmem:[%s10378_s4 + $0x160] sm:$0xff] %v7235_v53  ;;  %v7241_v11 = vld [vmem:[%s10382_s19 + $0x178] sm:$0xff]  ;;  %7238 = vst [vmem:[%s10378_s4 + $0x168] sm:$0xff] %v7237_v14  ;;  %v7243_v10 = vld [vmem:[%s10382_s19 + $0x180] sm:$0xff] }
 0x70d   : >> { %7240 = vst [vmem:[%s10378_s4 + $0x170] sm:$0xff] %v7239_v30  ;;  %7242 = vst [vmem:[%s10378_s4 + $0x178] sm:$0xff] %v7241_v11  ;;  %v7245_v17 = vld [vmem:[%s10382_s19 + $0x188] sm:$0xff]  ;;  %v7247_v44 = vld [vmem:[%s10382_s19 + $0x190] sm:$0xff] }
 0x70e   : >> { %7244 = vst [vmem:[%s10378_s4 + $0x180] sm:$0xff] %v7243_v10  ;;  %7246 = vst [vmem:[%s10378_s4 + $0x188] sm:$0xff] %v7245_v17  ;;  %v7249_v56 = vld [vmem:[%s10382_s19 + $0x198] sm:$0xff]  ;;  %v7251_v63 = vld [vmem:[%s10382_s19 + $0x1a0] sm:$0xff] }
 0x70f   : >> { %7248 = vst [vmem:[%s10378_s4 + $0x190] sm:$0xff] %v7247_v44  ;;  %v7253_v2 = vld [vmem:[%s10382_s19 + $0x1a8] sm:$0xff]  ;;  %7250 = vst [vmem:[%s10378_s4 + $0x198] sm:$0xff] %v7249_v56  ;;  %v7255_v15 = vld [vmem:[%s10382_s19 + $0x1b0] sm:$0xff]  ;;  %7143 = sbr.rel (!%p7140_p13) target bundleno = 1781 (0x6f5), region = 152 }
 0x710   : >> { %7252 = vst [vmem:[%s10378_s4 + $0x1a0] sm:$0xff] %v7251_v63  ;;  %7254 = vst [vmem:[%s10378_s4 + $0x1a8] sm:$0xff] %v7253_v2  ;;  %v7257_v27 = vld [vmem:[%s10382_s19 + $0x1b8] sm:$0xff]  ;;  %v7259_v37 = vld [vmem:[%s10382_s19 + $0x1c0] sm:$0xff] }
 0x711   : >> { %7256 = vst [vmem:[%s10378_s4 + $0x1b0] sm:$0xff] %v7255_v15  ;;  %7258 = vst [vmem:[%s10378_s4 + $0x1b8] sm:$0xff] %v7257_v27  ;;  %v7261_v48 = vld [vmem:[%s10382_s19 + $0x1c8] sm:$0xff]  ;;  %v7263_v61 = vld [vmem:[%s10382_s19 + $0x1d0] sm:$0xff] }
 0x712   : >> { %7260 = vst [vmem:[%s10378_s4 + $0x1c0] sm:$0xff] %v7259_v37  ;;  %v7265_v52 = vld [vmem:[%s10382_s19 + $0x1d8] sm:$0xff]  ;;  %7262 = vst [vmem:[%s10378_s4 + $0x1c8] sm:$0xff] %v7261_v48  ;;  %v7267_v3 = vld [vmem:[%s10382_s19 + $0x1e0] sm:$0xff] }
 0x713   : >> { %7264 = vst [vmem:[%s10378_s4 + $0x1d0] sm:$0xff] %v7263_v61  ;;  %7266 = vst [vmem:[%s10378_s4 + $0x1d8] sm:$0xff] %v7265_v52  ;;  %v7269_v45 = vld [vmem:[%s10382_s19 + $0x1e8] sm:$0xff]  ;;  %v7271_v0 = vld [vmem:[%s10382_s19 + $0x1f0] sm:$0xff] }
 0x714   : >> { %7268 = vst [vmem:[%s10378_s4 + $0x1e0] sm:$0xff] %v7267_v3  ;;  %7270 = vst [vmem:[%s10378_s4 + $0x1e8] sm:$0xff] %v7269_v45  ;;  %v7273_v60 = vld [vmem:[%s10382_s19 + $0x1f8] sm:$0xff]  ;;  %s12858_s19 = smov %s12563_s13 }
 0x715   : >> { %7272 = vst [vmem:[%s10378_s4 + $0x1f0] sm:$0xff] %v7271_v0  ;;  %7274 = vst [vmem:[%s10378_s4 + $0x1f8] sm:$0xff] %v7273_v60  ;;  %s12857_s4 = smov %s12566_s28 }
 0x716 PF: > { %s12671_s15 = sand.u32 63, %s12867_s17   ;;  %s7876_s16 = sshll.u32 %s12496_s30, 9 }
 0x717   : > { %s7286_s20 = scalar_lea.vmem %s11800_s6, %s7876_s16 [#allocation10]   ;;  %s7288_s25 = scalar_lea.vmem %s12490_s23, %s7876_s16  }
 0x718   : > { %p7867_p1 = scmp.le.s32.totalorder %s12671_s15, 0 }
 0x719   : > { %s10392_s29 = smov (!%p7867_p1), %s7288_s25   ;;  %s10396_s12 = smov (!%p7867_p1), %s7286_s20  }
 0x71a   : > { %7389 = sbr.rel (%p7867_p1) target bundleno = 1835 (0x72b), region = 157  ;;  %s10400_s14 = smov (!%p7867_p1), 0  }
 0x71b   : > { %s10404_s18 = smov (!%p7867_p1), 0  }
 0x721 LB: >> { %v7298_v19 = vld [vmem:[%s10398_s12] sm:$0xff]  ;;  %s7300_s17 = sadd.s32 1, %s10402_s14  ;;  %s7292_s18 = sadd.s32 1, %s10406_s18   ;;  %s10406_s18 = sphi %s10404_s18, %s7292_s18   ;;  %s10402_s14 = sphi %s10400_s14, %s10401_s14   ;;  %s10398_s12 = sphi %s10396_s12, %s7305_s12   ;;  %s10394_s29 = sphi %s10392_s29, %s7306_s29  }
 0x722   : >> { %7299 = vst [vmem:[%s10394_s29] sm:$0xff] %v7298_v19  ;;  %p7301_p7 = scmp.ge.s32.totalorder %s7300_s17, %s12671_s15  ;;  %p7291_p6 = scmp.ge.s32.totalorder %s7292_s18, %s12671_s15 }
 0x724   : >> { %s12871_s17 = smov (%p7301_p7, %s7300_s17), 0  ;;  %7294 = sbr.rel (!%p7291_p6) target bundleno = 1825 (0x721), region = 163 }
 0x725   : >> { %s7868_s6 = sshll.u32 %s12871_s17, 3  ;;  %s10401_s14 = smov %s12871_s17  }
 0x726   : >> { %s7305_s12 = scalar_lea.vmem %s7286_s20, %s7868_s6 [#allocation10]   ;;  %s7306_s29 = scalar_lea.vmem %s7288_s25, %s7868_s6  }
 0x72b PF: > { %p19_p9 = scmp.ge.s32.totalorder %s10471_s24, 4   ;;  %s12860_s20 = smov %s10366_s21 }
 0x72c   : > { %s12861_s21 = smov %s10370_s22  ;;  %s12862_s22 = smov %s10481_s27 }
 0x72d   : > { %s12863_s23 = smov %s10471_s24  ;;  %21 = sbr.rel (!%p19_p9) target bundleno = 8 (0x8), region = 174 }
 0x734   :  { %7322 = vsyncpa [#allocation4], 1 }
 0x735   :  { %7324 = vsyncpa [#allocation4 + $0x1], 1 }
 0x736   :  { %7325 = vsyncpa [#allocation6], 1 }
 0x737   :  { %7326 = vsyncpa [#allocation9], 1 }

</bundles_post_ra>
